<compile_context>
chip_gen: v7x
topology: tpu7x:2x2x1
jax: 0.10.0
libtpu: 0.0.40
codegen_flags: <defaults>
</compile_context>

<pallas_src>
import jax
import jax.numpy as jnp
from jax import lax
from jax.experimental import pallas as pl
from jax.experimental.pallas import tpu as pltpu

NUM_ACTIONS = 6
IN_CHANNELS = 4
BATCH = 2
SPATIAL = 84            # required: conv stack 84x84 -> 7x7x64 = 3136 features
FEATS = 7 * 7 * 64      # 3136
HIDDEN = 512
FC1_N = 2 * HIDDEN      # fused adv|val hidden width = 1024
HEAD_N = NUM_ACTIONS + 1  # fused adv|val head width   = 7
FC1_TN = 256            # fc1 weight column tile streamed per grid step


# ---------------------------------------------------------------------------
# Pallas kernels
# ---------------------------------------------------------------------------
def _mm_bias_relu_kernel(x_ref, w_ref, b_ref, o_ref):
    acc = jnp.dot(x_ref[...], w_ref[...], preferred_element_type=jnp.float32)
    o_ref[...] = jnp.maximum(acc + b_ref[...], 0.0)


def matmul_bias_relu(x, w, b):
    """x: (M, K) f32, w: (K, N) f32, b: (N,) f32 -> relu(x @ w + b)."""
    M, K = x.shape
    N = w.shape[1]
    return pl.pallas_call(
        _mm_bias_relu_kernel,
        out_shape=jax.ShapeDtypeStruct((M, N), jnp.float32),
        grid=(1,),
        in_specs=[
            pl.BlockSpec((M, K), lambda i: (0, 0)),
            pl.BlockSpec((K, N), lambda i: (0, 0)),
            pl.BlockSpec((1, N), lambda i: (0, 0)),
        ],
        out_specs=pl.BlockSpec((M, N), lambda i: (0, 0)),
        compiler_params=pltpu.CompilerParams(
            dimension_semantics=("arbitrary",)),
    )(x, w, b.reshape(1, N))


def _fc_head_kernel(x_ref, w1_ref, b1_ref, w2_ref, b2_ref, o_ref, acc_ref):
    """Fused FC head: one hidden-column tile per grid step.

    x_ref : (B, 3136)   resident features
    w1_ref: (3136, TN)  streamed fc1 (adv|val concatenated) weight columns
    b1_ref: (1, TN)     fc1 bias slice
    w2_ref: (TN, A+1)   block-structured fc2 rows for this hidden tile
    b2_ref: (1, A+1)    [fc2_adv_b | fc2_val_b]
    acc   : (B, A+1)    running adv|val accumulator (VMEM scratch)
    """
    n = pl.program_id(0)

    @pl.when(n == 0)
    def _():
        acc_ref[...] = jnp.zeros_like(acc_ref)

    h = jnp.dot(x_ref[...], w1_ref[...], preferred_element_type=jnp.float32)
    h = jnp.maximum(h + b1_ref[...], 0.0)                        # (B, TN)
    acc_ref[...] += jnp.dot(h, w2_ref[...],
                            preferred_element_type=jnp.float32)  # (B, A+1)

    @pl.when(n == pl.num_programs(0) - 1)
    def _():
        a = o_ref.shape[1]
        av = acc_ref[...] + b2_ref[...]
        adv = av[:, :a]
        val = av[:, a:a + 1]
        # val (B,1) broadcasts over actions == torch .expand(B, num_actions)
        o_ref[...] = val + adv - jnp.mean(adv, axis=1, keepdims=True)


def fc_dueling_head(x, w1, b1, w2, b2, num_actions):
    B, K = x.shape
    N = w1.shape[1]
    assert N % FC1_TN == 0
    nt = N // FC1_TN
    return pl.pallas_call(
        _fc_head_kernel,
        out_shape=jax.ShapeDtypeStruct((B, num_actions), jnp.float32),
        grid=(nt,),
        in_specs=[
            pl.BlockSpec((B, K), lambda n: (0, 0)),            # x (resident)
            pl.BlockSpec((K, FC1_TN), lambda n: (0, n)),       # fc1 W (streamed)
            pl.BlockSpec((1, FC1_TN), lambda n: (0, n)),       # fc1 b slice
            pl.BlockSpec((FC1_TN, HEAD_N), lambda n: (n, 0)),  # fc2 W rows
            pl.BlockSpec((1, HEAD_N), lambda n: (0, 0)),       # fc2 b (resident)
        ],
        out_specs=pl.BlockSpec((B, num_actions), lambda n: (0, 0)),
        scratch_shapes=[pltpu.VMEM((B, HEAD_N), jnp.float32)],
        compiler_params=pltpu.CompilerParams(
            dimension_semantics=("arbitrary",)),  # reduction over hidden tiles
    )(x, w1, b1.reshape(1, N), w2, b2.reshape(1, HEAD_N))


# ---------------------------------------------------------------------------
# Glue: im2col patch extraction (slices/reshape only), NHWC, (kh, kw, C) order
# ---------------------------------------------------------------------------
def im2col_nhwc(x, k, stride):
    B, H, W, C = x.shape
    oh = (H - k) // stride + 1
    ow = (W - k) // stride + 1
    cols = []
    for dh in range(k):
        for dw in range(k):
            sl = lax.slice(
                x,
                (0, dh, dw, 0),
                (B, dh + (oh - 1) * stride + 1, dw + (ow - 1) * stride + 1, C),
                (1, stride, stride, 1),
            )  # (B, oh, ow, C)
            cols.append(sl)
    patches = jnp.stack(cols, axis=3)           # (B, oh, ow, kh*kw, C)
    # No transpose of the big patch tensor: flatten in (kh, kw, C) minor order;
    # the (small) conv weights were permuted to match in prepare_params().
    return patches.reshape(B * oh * ow, k * k * C), oh, ow


def conv_relu(x_nhwc, w2d, b, k, stride, out_c):
    B = x_nhwc.shape[0]
    patches, oh, ow = im2col_nhwc(x_nhwc, k, stride)
    y = matmul_bias_relu(patches, w2d, b)
    return y.reshape(B, oh, ow, out_c)


# ---------------------------------------------------------------------------
# One-time weight preparation (fusion / re-layout, done outside the forward)
# ---------------------------------------------------------------------------
def prepare_params(p, num_actions=NUM_ACTIONS):
    def conv_w(w):  # (out_c, in_c, kh, kw) -> (kh*kw*in_c, out_c)
        out_c = w.shape[0]
        return jnp.transpose(w, (2, 3, 1, 0)).reshape(-1, out_c)

    # fc1_adv | fc1_val fused along the output dimension.
    fc1_w = jnp.concatenate([p["fc1_adv_w"].T, p["fc1_val_w"].T], axis=1)
    fc1_b = jnp.concatenate([p["fc1_adv_b"], p["fc1_val_b"]])
    # Block-structured fc2: rows 0..511 (adv hidden) feed the action columns,
    # rows 512..1023 (val hidden) feed the value column; other entries zero.
    fc2_w = jnp.zeros((FC1_N, HEAD_N), jnp.float32)
    fc2_w = fc2_w.at[:HIDDEN, :num_actions].set(p["fc2_adv_w"].T)
    fc2_w = fc2_w.at[HIDDEN:, num_actions:].set(p["fc2_val_w"].T)
    fc2_b = jnp.concatenate([p["fc2_adv_b"], p["fc2_val_b"]])

    return {
        "conv1_w": conv_w(p["conv1_w"]), "conv1_b": p["conv1_b"],
        "conv2_w": conv_w(p["conv2_w"]), "conv2_b": p["conv2_b"],
        "conv3_w": conv_w(p["conv3_w"]), "conv3_b": p["conv3_b"],
        "fc1_w": fc1_w, "fc1_b": fc1_b,
        "fc2_w": fc2_w, "fc2_b": fc2_b,
    }


# ---------------------------------------------------------------------------
# Forward pass (mirrors Dueling_DQN.forward)
# ---------------------------------------------------------------------------
def dueling_dqn_forward(x_nchw, fp):
    x = jnp.transpose(x_nchw, (0, 2, 3, 1))                       # NCHW -> NHWC
    x = conv_relu(x, fp["conv1_w"], fp["conv1_b"], 8, 4, 32)      # (B,20,20,32)
    x = conv_relu(x, fp["conv2_w"], fp["conv2_b"], 4, 2, 64)      # (B, 9, 9,64)
    x = conv_relu(x, fp["conv3_w"], fp["conv3_b"], 3, 1, 64)      # (B, 7, 7,64)
    B = x.shape[0]
    # torch x.view(B, -1) on NCHW flattens in (C, H, W) order.
    x = jnp.transpose(x, (0, 3, 1, 2)).reshape(B, FEATS)          # (B, 3136)
    return fc_dueling_head(x, fp["fc1_w"], fp["fc1_b"],
                           fp["fc2_w"], fp["fc2_b"], NUM_ACTIONS)


# ---------------------------------------------------------------------------
# Deterministic parameter init (synthetic weights, torch module shapes)
# ---------------------------------------------------------------------------
def init_params(key, in_channels=IN_CHANNELS, num_actions=NUM_ACTIONS):
    ks = jax.random.split(key, 14)

    def w(k, shape, scale=0.05):
        return (scale * jax.random.normal(k, shape)).astype(jnp.float32)

    return {
        "conv1_w": w(ks[0], (32, in_channels, 8, 8)),
        "conv1_b": w(ks[1], (32,)),
        "conv2_w": w(ks[2], (64, 32, 4, 4)),
        "conv2_b": w(ks[3], (64,)),
        "conv3_w": w(ks[4], (64, 64, 3, 3)),
        "conv3_b": w(ks[5], (64,)),
        "fc1_adv_w": w(ks[6], (512, FEATS), 0.02),
        "fc1_adv_b": w(ks[7], (512,)),
        "fc1_val_w": w(ks[8], (512, FEATS), 0.02),
        "fc1_val_b": w(ks[9], (512,)),
        "fc2_adv_w": w(ks[10], (num_actions, 512)),
        "fc2_adv_b": w(ks[11], (num_actions,)),
        "fc2_val_w": w(ks[12], (1, 512)),
        "fc2_val_b": w(ks[13], (1,)),
    }


if __name__ == "__main__":
    key = jax.random.PRNGKey(0)
    k_x, k_p = jax.random.split(key)
    # Spatial size must be 84x84 so the conv stack produces the 7*7*64 features
    # required by fc1 (as implied by the module definition).
    x = jax.random.normal(k_x, (BATCH, IN_CHANNELS, SPATIAL, SPATIAL), jnp.float32)
    params = init_params(k_p)
    fused = jax.tree_util.tree_map(
        jax.block_until_ready, prepare_params(params))  # one-time re-layout

    fwd = jax.jit(dueling_dqn_forward)
    q = fwd(x, fused)
    jax.block_until_ready(q)

    assert q.shape == (BATCH, NUM_ACTIONS), q.shape
    assert q.dtype == jnp.float32
    assert bool(jnp.all(jnp.isfinite(q)))
    print("KERNEL_OK")
</pallas_src>

<mosaic_0001>
module attributes {stable_mosaic.version = 11 : i64} {
  func.func @_mm_bias_relu_kernel(%arg0: i32, %arg1: memref<800x256xf32, #tpu.memory_space<vmem>>, %arg2: memref<256x32xf32, #tpu.memory_space<vmem>>, %arg3: memref<1x32xf32, #tpu.memory_space<vmem>>, %arg4: memref<800x32xf32, #tpu.memory_space<vmem>>) attributes {dimension_semantics = [#tpu.dimension_semantics<arbitrary>], iteration_bounds = array<i64: 1>, scalar_prefetch = 0 : i64, scratch_operands = 0 : i64, tpu.core_type = #tpu.core_type<tc>, window_params = [{pipeline_mode = #tpu.pipeline_mode<synchronous>, transform_indices = @transform_0, window_bounds = array<i64: 800, 256>}, {pipeline_mode = #tpu.pipeline_mode<synchronous>, transform_indices = @transform_1, window_bounds = array<i64: 256, 32>}, {pipeline_mode = #tpu.pipeline_mode<synchronous>, transform_indices = @transform_2, window_bounds = array<i64: 1, 32>}, {pipeline_mode = #tpu.pipeline_mode<synchronous>, transform_indices = @transform_3, window_bounds = array<i64: 800, 32>}]} {
    %c0 = arith.constant 0 : index
    %c0_0 = arith.constant 0 : index
    %0 = vector.load %arg1[%c0, %c0_0] : memref<800x256xf32, #tpu.memory_space<vmem>>, vector<800x256xf32>
    %c0_1 = arith.constant 0 : index
    %c0_2 = arith.constant 0 : index
    %1 = vector.load %arg2[%c0_1, %c0_2] : memref<256x32xf32, #tpu.memory_space<vmem>>, vector<256x32xf32>
    %cst = arith.constant dense<0.000000e+00> : vector<800x32xf32>
    %2 = tpu.matmul %0, %1, %cst {dimension_numbers = #tpu.dot_dimension_numbers<[1], [0], [0], [1], [0, 0, 1, 1], [], []>} : vector<800x256xf32>, vector<256x32xf32>, vector<800x32xf32> -> vector<800x32xf32>
    %c0_3 = arith.constant 0 : index
    %c0_4 = arith.constant 0 : index
    %3 = vector.load %arg3[%c0_3, %c0_4] : memref<1x32xf32, #tpu.memory_space<vmem>>, vector<1x32xf32>
    %4 = vector.broadcast %3 : vector<1x32xf32> to vector<800x32xf32>
    %5 = arith.addf %2, %4 : vector<800x32xf32>
    %cst_5 = arith.constant 0.000000e+00 : f32
    %6 = vector.broadcast %cst_5 : f32 to vector<800x32xf32>
    %7 = arith.maximumf %5, %6 : vector<800x32xf32>
    %c0_6 = arith.constant 0 : index
    %c0_7 = arith.constant 0 : index
    %8 = vector.load %arg4[%c0_6, %c0_7] : memref<800x32xf32, #tpu.memory_space<vmem>>, vector<800x32xf32>
    tpu.vector_store %arg4[%c0_6, %c0_7], %7 {strides = array<i32>} : memref<800x32xf32, #tpu.memory_space<vmem>>, vector<800x32xf32>,
    return
  }
  func.func @transform_0(%arg0: i32) -> (i32, i32) {
    %c0_i32 = arith.constant 0 : i32
    %c0_i32_0 = arith.constant 0 : i32
    %c0_i32_1 = arith.constant 0 : i32
    return %c0_i32, %c0_i32_0 : i32, i32
  }
  func.func @transform_1(%arg0: i32) -> (i32, i32) {
    %c0_i32 = arith.constant 0 : i32
    %c0_i32_0 = arith.constant 0 : i32
    %c0_i32_1 = arith.constant 0 : i32
    return %c0_i32, %c0_i32_0 : i32, i32
  }
  func.func @transform_2(%arg0: i32) -> (i32, i32) {
    %c0_i32 = arith.constant 0 : i32
    %c0_i32_0 = arith.constant 0 : i32
    %c0_i32_1 = arith.constant 0 : i32
    return %c0_i32, %c0_i32_0 : i32, i32
  }
  func.func @transform_3(%arg0: i32) -> (i32, i32) {
    %c0_i32 = arith.constant 0 : i32
    %c0_i32_0 = arith.constant 0 : i32
    %c0_i32_1 = arith.constant 0 : i32
    return %c0_i32, %c0_i32_0 : i32, i32
  }
}

module attributes {stable_mosaic.version = 11 : i64} {
  func.func @_mm_bias_relu_kernel(%arg0: i32, %arg1: memref<162x512xf32, #tpu.memory_space<vmem>>, %arg2: memref<512x64xf32, #tpu.memory_space<vmem>>, %arg3: memref<1x64xf32, #tpu.memory_space<vmem>>, %arg4: memref<162x64xf32, #tpu.memory_space<vmem>>) attributes {dimension_semantics = [#tpu.dimension_semantics<arbitrary>], iteration_bounds = array<i64: 1>, scalar_prefetch = 0 : i64, scratch_operands = 0 : i64, tpu.core_type = #tpu.core_type<tc>, window_params = [{pipeline_mode = #tpu.pipeline_mode<synchronous>, transform_indices = @transform_0, window_bounds = array<i64: 162, 512>}, {pipeline_mode = #tpu.pipeline_mode<synchronous>, transform_indices = @transform_1, window_bounds = array<i64: 512, 64>}, {pipeline_mode = #tpu.pipeline_mode<synchronous>, transform_indices = @transform_2, window_bounds = array<i64: 1, 64>}, {pipeline_mode = #tpu.pipeline_mode<synchronous>, transform_indices = @transform_3, window_bounds = array<i64: 162, 64>}]} {
    %c0 = arith.constant 0 : index
    %c0_0 = arith.constant 0 : index
    %0 = vector.load %arg1[%c0, %c0_0] : memref<162x512xf32, #tpu.memory_space<vmem>>, vector<162x512xf32>
    %c0_1 = arith.constant 0 : index
    %c0_2 = arith.constant 0 : index
    %1 = vector.load %arg2[%c0_1, %c0_2] : memref<512x64xf32, #tpu.memory_space<vmem>>, vector<512x64xf32>
    %cst = arith.constant dense<0.000000e+00> : vector<162x64xf32>
    %2 = tpu.matmul %0, %1, %cst {dimension_numbers = #tpu.dot_dimension_numbers<[1], [0], [0], [1], [0, 0, 1, 1], [], []>} : vector<162x512xf32>, vector<512x64xf32>, vector<162x64xf32> -> vector<162x64xf32>
    %c0_3 = arith.constant 0 : index
    %c0_4 = arith.constant 0 : index
    %3 = vector.load %arg3[%c0_3, %c0_4] : memref<1x64xf32, #tpu.memory_space<vmem>>, vector<1x64xf32>
    %4 = vector.broadcast %3 : vector<1x64xf32> to vector<162x64xf32>
    %5 = arith.addf %2, %4 : vector<162x64xf32>
    %cst_5 = arith.constant 0.000000e+00 : f32
    %6 = vector.broadcast %cst_5 : f32 to vector<162x64xf32>
    %7 = arith.maximumf %5, %6 : vector<162x64xf32>
    %c0_6 = arith.constant 0 : index
    %c0_7 = arith.constant 0 : index
    %8 = vector.load %arg4[%c0_6, %c0_7] : memref<162x64xf32, #tpu.memory_space<vmem>>, vector<162x64xf32>
    tpu.vector_store %arg4[%c0_6, %c0_7], %7 {strides = array<i32>} : memref<162x64xf32, #tpu.memory_space<vmem>>, vector<162x64xf32>,
    return
  }
  func.func @transform_0(%arg0: i32) -> (i32, i32) {
    %c0_i32 = arith.constant 0 : i32
    %c0_i32_0 = arith.constant 0 : i32
    %c0_i32_1 = arith.constant 0 : i32
    return %c0_i32, %c0_i32_0 : i32, i32
  }
  func.func @transform_1(%arg0: i32) -> (i32, i32) {
    %c0_i32 = arith.constant 0 : i32
    %c0_i32_0 = arith.constant 0 : i32
    %c0_i32_1 = arith.constant 0 : i32
    return %c0_i32, %c0_i32_0 : i32, i32
  }
  func.func @transform_2(%arg0: i32) -> (i32, i32) {
    %c0_i32 = arith.constant 0 : i32
    %c0_i32_0 = arith.constant 0 : i32
    %c0_i32_1 = arith.constant 0 : i32
    return %c0_i32, %c0_i32_0 : i32, i32
  }
  func.func @transform_3(%arg0: i32) -> (i32, i32) {
    %c0_i32 = arith.constant 0 : i32
    %c0_i32_0 = arith.constant 0 : i32
    %c0_i32_1 = arith.constant 0 : i32
    return %c0_i32, %c0_i32_0 : i32, i32
  }
}

module attributes {stable_mosaic.version = 11 : i64} {
  func.func @_mm_bias_relu_kernel(%arg0: i32, %arg1: memref<98x576xf32, #tpu.memory_space<vmem>>, %arg2: memref<576x64xf32, #tpu.memory_space<vmem>>, %arg3: memref<1x64xf32, #tpu.memory_space<vmem>>, %arg4: memref<98x64xf32, #tpu.memory_space<vmem>>) attributes {dimension_semantics = [#tpu.dimension_semantics<arbitrary>], iteration_bounds = array<i64: 1>, scalar_prefetch = 0 : i64, scratch_operands = 0 : i64, tpu.core_type = #tpu.core_type<tc>, window_params = [{pipeline_mode = #tpu.pipeline_mode<synchronous>, transform_indices = @transform_0, window_bounds = array<i64: 98, 576>}, {pipeline_mode = #tpu.pipeline_mode<synchronous>, transform_indices = @transform_1, window_bounds = array<i64: 576, 64>}, {pipeline_mode = #tpu.pipeline_mode<synchronous>, transform_indices = @transform_2, window_bounds = array<i64: 1, 64>}, {pipeline_mode = #tpu.pipeline_mode<synchronous>, transform_indices = @transform_3, window_bounds = array<i64: 98, 64>}]} {
    %c0 = arith.constant 0 : index
    %c0_0 = arith.constant 0 : index
    %0 = vector.load %arg1[%c0, %c0_0] : memref<98x576xf32, #tpu.memory_space<vmem>>, vector<98x576xf32>
    %c0_1 = arith.constant 0 : index
    %c0_2 = arith.constant 0 : index
    %1 = vector.load %arg2[%c0_1, %c0_2] : memref<576x64xf32, #tpu.memory_space<vmem>>, vector<576x64xf32>
    %cst = arith.constant dense<0.000000e+00> : vector<98x64xf32>
    %2 = tpu.matmul %0, %1, %cst {dimension_numbers = #tpu.dot_dimension_numbers<[1], [0], [0], [1], [0, 0, 1, 1], [], []>} : vector<98x576xf32>, vector<576x64xf32>, vector<98x64xf32> -> vector<98x64xf32>
    %c0_3 = arith.constant 0 : index
    %c0_4 = arith.constant 0 : index
    %3 = vector.load %arg3[%c0_3, %c0_4] : memref<1x64xf32, #tpu.memory_space<vmem>>, vector<1x64xf32>
    %4 = vector.broadcast %3 : vector<1x64xf32> to vector<98x64xf32>
    %5 = arith.addf %2, %4 : vector<98x64xf32>
    %cst_5 = arith.constant 0.000000e+00 : f32
    %6 = vector.broadcast %cst_5 : f32 to vector<98x64xf32>
    %7 = arith.maximumf %5, %6 : vector<98x64xf32>
    %c0_6 = arith.constant 0 : index
    %c0_7 = arith.constant 0 : index
    %8 = vector.load %arg4[%c0_6, %c0_7] : memref<98x64xf32, #tpu.memory_space<vmem>>, vector<98x64xf32>
    tpu.vector_store %arg4[%c0_6, %c0_7], %7 {strides = array<i32>} : memref<98x64xf32, #tpu.memory_space<vmem>>, vector<98x64xf32>,
    return
  }
  func.func @transform_0(%arg0: i32) -> (i32, i32) {
    %c0_i32 = arith.constant 0 : i32
    %c0_i32_0 = arith.constant 0 : i32
    %c0_i32_1 = arith.constant 0 : i32
    return %c0_i32, %c0_i32_0 : i32, i32
  }
  func.func @transform_1(%arg0: i32) -> (i32, i32) {
    %c0_i32 = arith.constant 0 : i32
    %c0_i32_0 = arith.constant 0 : i32
    %c0_i32_1 = arith.constant 0 : i32
    return %c0_i32, %c0_i32_0 : i32, i32
  }
  func.func @transform_2(%arg0: i32) -> (i32, i32) {
    %c0_i32 = arith.constant 0 : i32
    %c0_i32_0 = arith.constant 0 : i32
    %c0_i32_1 = arith.constant 0 : i32
    return %c0_i32, %c0_i32_0 : i32, i32
  }
  func.func @transform_3(%arg0: i32) -> (i32, i32) {
    %c0_i32 = arith.constant 0 : i32
    %c0_i32_0 = arith.constant 0 : i32
    %c0_i32_1 = arith.constant 0 : i32
    return %c0_i32, %c0_i32_0 : i32, i32
  }
}

module attributes {stable_mosaic.version = 11 : i64} {
  func.func @_fc_head_kernel(%arg0: i32, %arg1: memref<2x3136xf32, #tpu.memory_space<vmem>>, %arg2: memref<3136x256xf32, #tpu.memory_space<vmem>>, %arg3: memref<1x256xf32, #tpu.memory_space<vmem>>, %arg4: memref<256x7xf32, #tpu.memory_space<vmem>>, %arg5: memref<1x7xf32, #tpu.memory_space<vmem>>, %arg6: memref<2x6xf32, #tpu.memory_space<vmem>>, %arg7: memref<2x7xf32, #tpu.memory_space<vmem>>) attributes {dimension_semantics = [#tpu.dimension_semantics<arbitrary>], iteration_bounds = array<i64: 4>, scalar_prefetch = 0 : i64, scratch_operands = 1 : i64, tpu.core_type = #tpu.core_type<tc>, window_params = [{pipeline_mode = #tpu.pipeline_mode<synchronous>, transform_indices = @transform_0, window_bounds = array<i64: 2, 3136>}, {transform_indices = @transform_1, window_bounds = array<i64: 3136, 256>}, {transform_indices = @transform_2, window_bounds = array<i64: 1, 256>}, {transform_indices = @transform_3, window_bounds = array<i64: 256, 7>}, {pipeline_mode = #tpu.pipeline_mode<synchronous>, transform_indices = @transform_4, window_bounds = array<i64: 1, 7>}, {pipeline_mode = #tpu.pipeline_mode<synchronous>, transform_indices = @transform_5, window_bounds = array<i64: 2, 6>}]} {
    %c0_i32 = arith.constant 0 : i32
    %0 = arith.cmpi eq, %arg0, %c0_i32 : i32
    %1 = arith.extui %0 : i1 to i32
    %c0_i32_0 = arith.constant 0 : i32
    %2 = arith.cmpi ne, %1, %c0_i32_0 : i32
    scf.if %2 {
      %cst_15 = arith.constant 0.000000e+00 : f32
      %19 = vector.broadcast %cst_15 : f32 to vector<2x7xf32>
      %c0_16 = arith.constant 0 : index
      %c0_17 = arith.constant 0 : index
      %20 = vector.load %arg7[%c0_16, %c0_17] : memref<2x7xf32, #tpu.memory_space<vmem>>, vector<2x7xf32>
      tpu.vector_store %arg7[%c0_16, %c0_17], %19 {strides = array<i32>} : memref<2x7xf32, #tpu.memory_space<vmem>>, vector<2x7xf32>,
    } else {
    }
    %c0 = arith.constant 0 : index
    %c0_1 = arith.constant 0 : index
    %3 = vector.load %arg1[%c0, %c0_1] : memref<2x3136xf32, #tpu.memory_space<vmem>>, vector<2x3136xf32>
    %c0_2 = arith.constant 0 : index
    %c0_3 = arith.constant 0 : index
    %4 = vector.load %arg2[%c0_2, %c0_3] : memref<3136x256xf32, #tpu.memory_space<vmem>>, vector<3136x256xf32>
    %cst = arith.constant dense<0.000000e+00> : vector<2x256xf32>
    %5 = tpu.matmul %3, %4, %cst {dimension_numbers = #tpu.dot_dimension_numbers<[1], [0], [0], [1], [0, 0, 1, 1], [], []>} : vector<2x3136xf32>, vector<3136x256xf32>, vector<2x256xf32> -> vector<2x256xf32>
    %c0_4 = arith.constant 0 : index
    %c0_5 = arith.constant 0 : index
    %6 = vector.load %arg3[%c0_4, %c0_5] : memref<1x256xf32, #tpu.memory_space<vmem>>, vector<1x256xf32>
    %7 = vector.broadcast %6 : vector<1x256xf32> to vector<2x256xf32>
    %8 = arith.addf %5, %7 : vector<2x256xf32>
    %cst_6 = arith.constant 0.000000e+00 : f32
    %9 = vector.broadcast %cst_6 : f32 to vector<2x256xf32>
    %10 = arith.maximumf %8, %9 : vector<2x256xf32>
    %c0_7 = arith.constant 0 : index
    %c0_8 = arith.constant 0 : index
    %11 = vector.load %arg7[%c0_7, %c0_8] : memref<2x7xf32, #tpu.memory_space<vmem>>, vector<2x7xf32>
    %c0_9 = arith.constant 0 : index
    %c0_10 = arith.constant 0 : index
    %12 = vector.load %arg4[%c0_9, %c0_10] : memref<256x7xf32, #tpu.memory_space<vmem>>, vector<256x7xf32>
    %cst_11 = arith.constant dense<0.000000e+00> : vector<2x7xf32>
    %13 = tpu.matmul %10, %12, %cst_11 {dimension_numbers = #tpu.dot_dimension_numbers<[1], [0], [0], [1], [0, 0, 1, 1], [], []>} : vector<2x256xf32>, vector<256x7xf32>, vector<2x7xf32> -> vector<2x7xf32>
    %14 = arith.addf %11, %13 : vector<2x7xf32>
    %c0_12 = arith.constant 0 : index
    %c0_13 = arith.constant 0 : index
    %15 = vector.load %arg7[%c0_12, %c0_13] : memref<2x7xf32, #tpu.memory_space<vmem>>, vector<2x7xf32>
    tpu.vector_store %arg7[%c0_12, %c0_13], %14 {strides = array<i32>} : memref<2x7xf32, #tpu.memory_space<vmem>>, vector<2x7xf32>,
    %c3_i32 = arith.constant 3 : i32
    %16 = arith.cmpi eq, %arg0, %c3_i32 : i32
    %17 = arith.extui %16 : i1 to i32
    %c0_i32_14 = arith.constant 0 : i32
    %18 = arith.cmpi ne, %17, %c0_i32_14 : i32
    scf.if %18 {
      %c0_15 = arith.constant 0 : index
      %c0_16 = arith.constant 0 : index
      %19 = vector.load %arg7[%c0_15, %c0_16] : memref<2x7xf32, #tpu.memory_space<vmem>>, vector<2x7xf32>
      %c0_17 = arith.constant 0 : index
      %c0_18 = arith.constant 0 : index
      %20 = vector.load %arg5[%c0_17, %c0_18] : memref<1x7xf32, #tpu.memory_space<vmem>>, vector<1x7xf32>
      %21 = vector.broadcast %20 : vector<1x7xf32> to vector<2x7xf32>
      %22 = arith.addf %19, %21 : vector<2x7xf32>
      %23 = vector.extract_strided_slice %22 {offsets = [0, 0], sizes = [2, 6], strides = [1, 1]} : vector<2x7xf32> to vector<2x6xf32>
      %24 = vector.extract_strided_slice %22 {offsets = [0, 6], sizes = [2, 1], strides = [1, 1]} : vector<2x7xf32> to vector<2x1xf32>
      %25 = vector.broadcast %24 : vector<2x1xf32> to vector<2x6xf32>
      %26 = arith.addf %25, %23 : vector<2x6xf32>
      %cst_19 = arith.constant dense<0.000000e+00> : vector<2xf32>
      %27 = vector.multi_reduction <add>, %23, %cst_19 [1] : vector<2x6xf32> to vector<2xf32>
      %28 = vector.shape_cast %27 : vector<2xf32> to vector<2x1xf32>
      %cst_20 = arith.constant 6.000000e+00 : f32
      %29 = vector.broadcast %cst_20 : f32 to vector<2x1xf32>
      %30 = arith.divf %28, %29 : vector<2x1xf32>
      %31 = vector.broadcast %30 : vector<2x1xf32> to vector<2x6xf32>
      %32 = arith.subf %26, %31 : vector<2x6xf32>
      %c0_21 = arith.constant 0 : index
      %c0_22 = arith.constant 0 : index
      %33 = vector.load %arg6[%c0_21, %c0_22] : memref<2x6xf32, #tpu.memory_space<vmem>>, vector<2x6xf32>
      tpu.vector_store %arg6[%c0_21, %c0_22], %32 {strides = array<i32>} : memref<2x6xf32, #tpu.memory_space<vmem>>, vector<2x6xf32>,
    } else {
    }
    return
  }
  func.func @transform_0(%arg0: i32) -> (i32, i32) {
    %c0_i32 = arith.constant 0 : i32
    %c0_i32_0 = arith.constant 0 : i32
    %c0_i32_1 = arith.constant 0 : i32
    return %c0_i32, %c0_i32_0 : i32, i32
  }
  func.func @transform_1(%arg0: i32) -> (i32, i32) {
    %c0_i32 = arith.constant 0 : i32
    %c0_i32_0 = arith.constant 0 : i32
    return %c0_i32, %arg0 : i32, i32
  }
  func.func @transform_2(%arg0: i32) -> (i32, i32) {
    %c0_i32 = arith.constant 0 : i32
    %c0_i32_0 = arith.constant 0 : i32
    return %c0_i32, %arg0 : i32, i32
  }
  func.func @transform_3(%arg0: i32) -> (i32, i32) {
    %c0_i32 = arith.constant 0 : i32
    %c0_i32_0 = arith.constant 0 : i32
    return %arg0, %c0_i32 : i32, i32
  }
  func.func @transform_4(%arg0: i32) -> (i32, i32) {
    %c0_i32 = arith.constant 0 : i32
    %c0_i32_0 = arith.constant 0 : i32
    %c0_i32_1 = arith.constant 0 : i32
    return %c0_i32, %c0_i32_0 : i32, i32
  }
  func.func @transform_5(%arg0: i32) -> (i32, i32) {
    %c0_i32 = arith.constant 0 : i32
    %c0_i32_0 = arith.constant 0 : i32
    %c0_i32_1 = arith.constant 0 : i32
    return %c0_i32, %c0_i32_0 : i32, i32
  }
}

</mosaic_0001>

<bundles_post_ra>
// kernel: dueling_dqn_forward.4
= control target key start
LH: loop header
LB: loop body
LE: loop exit
PB: predicated region body
PF: predicated region fallthrough
CT: control target
= control target key end

     0   :  { %v1105_v0 = vmov 0.0|0.0   ;;  %vm918_vm0 = vcmask 261120   ;;  %s2359_s1 = inlined_call_operand.vmem [shape: f32[256,32], index: 1, kind: input, shape index: {}]   ;;  %s2360_s0 = inlined_call_operand.vmem [shape: f32[800,256], index: 0, kind: input, shape index: {}]   ;;  %s2361_s2 = inlined_call_operand.vmem [shape: f32[1,32], index: 2, kind: input, shape index: {}]   ;;  %s2362_s3 = inlined_call_operand.vmem [shape: f32[800,32], index: 3, kind: output, shape index: {}]  }
   0x1   :  { %1024 = vmatprep.subr.bf16.mxu0 %v1105_v0  ;;  %1072 = vmatprep.subr.bf16.mxu1 %v1105_v0  ;;  %v214_v1 = vld [vmem:[%s2359_s1] sm:$0xff]  ;;  %v215_v2 = vld [vmem:[%s2359_s1 + $0x8] sm:$0xff]  ;;  %v216_v3 = vld [vmem:[%s2359_s1 + $0x10] sm:$0xff] }
   0x2   :  { %v1025_v4 = vpack.c.bf16 %v215_v2, %v214_v1  ;;  %v217_v5 = vld [vmem:[%s2359_s1 + $0x18] sm:$0xff]  ;;  %v218_v7 = vld [vmem:[%s2359_s1 + $0x20] sm:$0xff]  ;;  %v219_v8 = vld [vmem:[%s2359_s1 + $0x28] sm:$0xff] }
   0x3   :  { %v1028_v6 = vpack.c.bf16 %v217_v5, %v216_v3  ;;  %v1031_v9 = vpack.c.bf16 %v219_v8, %v218_v7  ;;  %v220_v10 = vld [vmem:[%s2359_s1 + $0x30] sm:$0xff]  ;;  %v221_v11 = vld [vmem:[%s2359_s1 + $0x38] sm:$0xff]  ;;  %v15_v12 = vld [vmem:[%s2360_s0 + $0x8] sm:$0xff] }
   0x4   :  { %1026 = vmatpush1.bf16.msra.mxu0 %v1025_v4  ;;  %1088 = vmatpush1.bf16.msra.mxu1 %v1025_v4  ;;  %v1034_v13 = vpack.c.bf16 %v221_v11, %v220_v10  ;;  %v115_v14 = vld [vmem:[%s2360_s0 + $0x328] sm:$0xff]  ;;  %v222_v15 = vld [vmem:[%s2359_s1 + $0x40] sm:$0xff]  ;;  %v224_v18 = vld [vmem:[%s2359_s1 + $0x50] sm:$0xff] }
   0x5   :  { %1027 = vmatprep.subr.bf16.mxu0 %v1105_v0  ;;  %1073 = vmatprep.subr.bf16.mxu1 %v1105_v0  ;;  %v223_v16 = vld [vmem:[%s2359_s1 + $0x48] sm:$0xff]  ;;  %v225_v19 = vld [vmem:[%s2359_s1 + $0x58] sm:$0xff]  ;;  %v226_v21 = vld [vmem:[%s2359_s1 + $0x60] sm:$0xff] }
   0x6   :  { %317 = vmatprep.mubr.f32.mxu0 %v15_v12  ;;  %567 = vmatprep.mubr.f32.mxu1 %v115_v14  ;;  %v1037_v17 = vpack.c.bf16 %v223_v16, %v222_v15  ;;  %v1040_v20 = vpack.c.bf16 %v225_v19, %v224_v18  ;;  %v227_v22 = vld [vmem:[%s2359_s1 + $0x68] sm:$0xff]  ;;  %v228_v24 = vld [vmem:[%s2359_s1 + $0x70] sm:$0xff]  ;;  %v229_v25 = vld [vmem:[%s2359_s1 + $0x78] sm:$0xff] }
   0x7   :  { %v1043_v23 = vpack.c.bf16 %v227_v22, %v226_v21  ;;  %v1046_v26 = vpack.c.bf16 %v229_v25, %v228_v24  ;;  %v230_v27 = vld [vmem:[%s2359_s1 + $0x80] sm:$0xff]  ;;  %v231_v28 = vld [vmem:[%s2359_s1 + $0x88] sm:$0xff]  ;;  %v232_v30 = vld [vmem:[%s2359_s1 + $0x90] sm:$0xff] }
   0x8   :  { %1029 = vmatpush1.bf16.msra.mxu0 %v1028_v6  ;;  %1089 = vmatpush1.bf16.msra.mxu1 %v1028_v6  ;;  %v1049_v29 = vpack.c.bf16 %v231_v28, %v230_v27  ;;  %v233_v31 = vld [vmem:[%s2359_s1 + $0x98] sm:$0xff]  ;;  %v234_v33 = vld [vmem:[%s2359_s1 + $0xa0] sm:$0xff]  ;;  %v235_v34 = vld [vmem:[%s2359_s1 + $0xa8] sm:$0xff] }
   0x9   :  { %1030 = vmatprep.subr.bf16.mxu0 %v1105_v0  ;;  %1074 = vmatprep.subr.bf16.mxu1 %v1105_v0  ;;  %v1052_v32 = vpack.c.bf16 %v233_v31, %v232_v30  ;;  %v1055_v35 = vpack.c.bf16 %v235_v34, %v234_v33  ;;  %v236_v36 = vld [vmem:[%s2359_s1 + $0xb0] sm:$0xff]  ;;  %v237_v37 = vld [vmem:[%s2359_s1 + $0xb8] sm:$0xff]  ;;  %v238_v39 = vld [vmem:[%s2359_s1 + $0xc0] sm:$0xff] }
   0xa   :  { %v1058_v38 = vpack.c.bf16 %v237_v37, %v236_v36  ;;  %v239_v40 = vld [vmem:[%s2359_s1 + $0xc8] sm:$0xff]  ;;  %v240_v42 = vld [vmem:[%s2359_s1 + $0xd0] sm:$0xff]  ;;  %v241_v43 = vld [vmem:[%s2359_s1 + $0xd8] sm:$0xff] }
   0xb   :  { %v1061_v41 = vpack.c.bf16 %v239_v40, %v238_v39  ;;  %v1064_v44 = vpack.c.bf16 %v241_v43, %v240_v42  ;;  %v242_v45 = vld [vmem:[%s2359_s1 + $0xe0] sm:$0xff]  ;;  %v243_v46 = vld [vmem:[%s2359_s1 + $0xe8] sm:$0xff]  ;;  %v244_v48 = vld [vmem:[%s2359_s1 + $0xf0] sm:$0xff] }
   0xc   :  { %1032 = vmatpush1.bf16.msra.mxu0 %v1031_v9  ;;  %1090 = vmatpush1.bf16.msra.mxu1 %v1031_v9  ;;  %v1067_v47 = vpack.c.bf16 %v243_v46, %v242_v45  ;;  %v245_v49 = vld [vmem:[%s2359_s1 + $0xf8] sm:$0xff]  ;;  %v14_v51 = vld [vmem:[%s2360_s0] sm:$0xff]  ;;  %v16_v55 = vld [vmem:[%s2360_s0 + $0x10] sm:$0xff] }
   0xd   :  { %1033 = vmatprep.subr.bf16.mxu0 %v1105_v0  ;;  %1075 = vmatprep.subr.bf16.mxu1 %v1105_v0  ;;  %v1070_v50 = vpack.c.bf16 %v245_v49, %v244_v48  ;;  %v114_v52 = vld [vmem:[%s2360_s0 + $0x320] sm:$0xff]  ;;  %v17_v53 = vld [vmem:[%s2360_s0 + $0x18] sm:$0xff]  ;;  %v116_v56 = vld [vmem:[%s2360_s0 + $0x330] sm:$0xff] }
   0xe   :  { %v117_v54 = vld [vmem:[%s2360_s0 + $0x338] sm:$0xff]  ;;  %v19_v57 = vld [vmem:[%s2360_s0 + $0x28] sm:$0xff]  ;;  %v18_v59 = vld [vmem:[%s2360_s0 + $0x20] sm:$0xff] }
   0xf   :  { %v119_v58 = vld [vmem:[%s2360_s0 + $0x348] sm:$0xff]  ;;  %v118_v60 = vld [vmem:[%s2360_s0 + $0x340] sm:$0xff]  ;;  %v21_v61 = vld [vmem:[%s2360_s0 + $0x38] sm:$0xff] }
  0x10   :  { %1035 = vmatpush1.bf16.msra.mxu0 %v1034_v13  ;;  %1091 = vmatpush1.bf16.msra.mxu1 %v1034_v13  ;;  %v121_v62 = vld [vmem:[%s2360_s0 + $0x358] sm:$0xff]  ;;  %v20_v63 = vld [vmem:[%s2360_s0 + $0x30] sm:$0xff]  ;;  %v23_v1 = vld [vmem:[%s2360_s0 + $0x48] sm:$0xff] }
  0x11   :  { %1036 = vmatprep.subr.bf16.mxu0 %v1105_v0  ;;  %1076 = vmatprep.subr.bf16.mxu1 %v1105_v0  ;;  %v123_v2 = vld [vmem:[%s2360_s0 + $0x368] sm:$0xff]  ;;  %v22_v3 = vld [vmem:[%s2360_s0 + $0x40] sm:$0xff]  ;;  %v25_v5 = vld [vmem:[%s2360_s0 + $0x58] sm:$0xff] }
  0x12   :  { %v122_v4 = vld [vmem:[%s2360_s0 + $0x360] sm:$0xff]  ;;  %v125_v6 = vld [vmem:[%s2360_s0 + $0x378] sm:$0xff]  ;;  %v24_v7 = vld [vmem:[%s2360_s0 + $0x50] sm:$0xff] }
  0x13   :  { %v124_v8 = vld [vmem:[%s2360_s0 + $0x370] sm:$0xff]  ;;  %v27_v9 = vld [vmem:[%s2360_s0 + $0x68] sm:$0xff]  ;;  %v26_v11 = vld [vmem:[%s2360_s0 + $0x60] sm:$0xff] }
  0x14   :  { %1038 = vmatpush1.bf16.msra.mxu0 %v1037_v17  ;;  %1092 = vmatpush1.bf16.msra.mxu1 %v1037_v17  ;;  %v127_v10 = vld [vmem:[%s2360_s0 + $0x388] sm:$0xff]  ;;  %v126_v12 = vld [vmem:[%s2360_s0 + $0x380] sm:$0xff]  ;;  %v29_v13 = vld [vmem:[%s2360_s0 + $0x78] sm:$0xff] }
  0x15   :  { %1039 = vmatprep.subr.bf16.mxu0 %v1105_v0  ;;  %1077 = vmatprep.subr.bf16.mxu1 %v1105_v0  ;;  %v129_v14 = vld [vmem:[%s2360_s0 + $0x398] sm:$0xff]  ;;  %v28_v15 = vld [vmem:[%s2360_s0 + $0x70] sm:$0xff]  ;;  %v31_v17 = vld [vmem:[%s2360_s0 + $0x88] sm:$0xff] }
  0x16   :  { %v128_v16 = vld [vmem:[%s2360_s0 + $0x390] sm:$0xff]  ;;  %v131_v18 = vld [vmem:[%s2360_s0 + $0x3a8] sm:$0xff]  ;;  %v30_v19 = vld [vmem:[%s2360_s0 + $0x80] sm:$0xff] }
  0x17   :  { %v33_v21 = vld [vmem:[%s2360_s0 + $0x98] sm:$0xff]  ;;  %v132_v24 = vld [vmem:[%s2360_s0 + $0x3b0] sm:$0xff]  ;;  %v35_v25 = vld [vmem:[%s2360_s0 + $0xa8] sm:$0xff] }
  0x18   :  { %1041 = vmatpush1.bf16.msra.mxu0 %v1040_v20  ;;  %1093 = vmatpush1.bf16.msra.mxu1 %v1040_v20  ;;  %v130_v20 = vld [vmem:[%s2360_s0 + $0x3a0] sm:$0xff]  ;;  %v133_v22 = vld [vmem:[%s2360_s0 + $0x3b8] sm:$0xff]  ;;  %v36_v31 = vld [vmem:[%s2360_s0 + $0xb0] sm:$0xff] }
  0x19   :  { %1042 = vmatprep.subr.bf16.mxu0 %v1105_v0  ;;  %1078 = vmatprep.subr.bf16.mxu1 %v1105_v0  ;;  %v34_v27 = vld [vmem:[%s2360_s0 + $0xa0] sm:$0xff]  ;;  %v137_v30 = vld [vmem:[%s2360_s0 + $0x3d8] sm:$0xff]  ;;  %v39_v33 = vld [vmem:[%s2360_s0 + $0xc8] sm:$0xff] }
  0x1a   :  { %v134_v28 = vld [vmem:[%s2360_s0 + $0x3c0] sm:$0xff]  ;;  %v139_v34 = vld [vmem:[%s2360_s0 + $0x3e8] sm:$0xff]  ;;  %v41_v37 = vld [vmem:[%s2360_s0 + $0xd8] sm:$0xff] }
  0x1b   :  { %v138_v36 = vld [vmem:[%s2360_s0 + $0x3e0] sm:$0xff]  ;;  %v40_v39 = vld [vmem:[%s2360_s0 + $0xd0] sm:$0xff]  ;;  %v143_v42 = vld [vmem:[%s2360_s0 + $0x408] sm:$0xff] }
  0x1c   :  { %1044 = vmatpush1.bf16.msra.mxu0 %v1043_v23  ;;  %1094 = vmatpush1.bf16.msra.mxu1 %v1043_v23  ;;  %v32_v23 = vld [vmem:[%s2360_s0 + $0x90] sm:$0xff]  ;;  %v42_v43 = vld [vmem:[%s2360_s0 + $0xe0] sm:$0xff]  ;;  %v45_v45 = vld [vmem:[%s2360_s0 + $0xf8] sm:$0xff] }
  0x1d   :  { %1045 = vmatprep.subr.bf16.mxu0 %v1105_v0  ;;  %1079 = vmatprep.subr.bf16.mxu1 %v1105_v0  ;;  %v140_v40 = vld [vmem:[%s2360_s0 + $0x3f0] sm:$0xff]  ;;  %v145_v46 = vld [vmem:[%s2360_s0 + $0x418] sm:$0xff]  ;;  %v47_v49 = vld [vmem:[%s2360_s0 + $0x108] sm:$0xff] }
  0x1e   :  { %v144_v48 = vld [vmem:[%s2360_s0 + $0x410] sm:$0xff] }
  0x20   :  { %1047 = vmatpush1.bf16.msra.mxu0 %v1046_v26  ;;  %1095 = vmatpush1.bf16.msra.mxu1 %v1046_v26  ;;  %v135_v26 = vld [vmem:[%s2360_s0 + $0x3c8] sm:$0xff] }
  0x21   :  { %1048 = vmatprep.subr.bf16.mxu0 %v1105_v0  ;;  %1080 = vmatprep.subr.bf16.mxu1 %v1105_v0 }
  0x24   :  { %1050 = vmatpush1.bf16.msra.mxu0 %v1049_v29  ;;  %1096 = vmatpush1.bf16.msra.mxu1 %v1049_v29  ;;  %v37_v29 = vld [vmem:[%s2360_s0 + $0xb8] sm:$0xff] }
  0x25   :  { %1051 = vmatprep.subr.bf16.mxu0 %v1105_v0  ;;  %1081 = vmatprep.subr.bf16.mxu1 %v1105_v0 }
  0x28   :  { %1053 = vmatpush1.bf16.msra.mxu0 %v1052_v32  ;;  %1097 = vmatpush1.bf16.msra.mxu1 %v1052_v32  ;;  %v136_v32 = vld [vmem:[%s2360_s0 + $0x3d0] sm:$0xff] }
  0x29   :  { %1054 = vmatprep.subr.bf16.mxu0 %v1105_v0  ;;  %1082 = vmatprep.subr.bf16.mxu1 %v1105_v0 }
  0x2c   :  { %1056 = vmatpush1.bf16.msra.mxu0 %v1055_v35  ;;  %1098 = vmatpush1.bf16.msra.mxu1 %v1055_v35  ;;  %v38_v35 = vld [vmem:[%s2360_s0 + $0xc0] sm:$0xff] }
  0x2d   :  { %1057 = vmatprep.subr.bf16.mxu0 %v1105_v0  ;;  %1083 = vmatprep.subr.bf16.mxu1 %v1105_v0 }
  0x30   :  { %1059 = vmatpush1.bf16.msra.mxu0 %v1058_v38  ;;  %1099 = vmatpush1.bf16.msra.mxu1 %v1058_v38  ;;  %v141_v38 = vld [vmem:[%s2360_s0 + $0x3f8] sm:$0xff] }
  0x31   :  { %1060 = vmatprep.subr.bf16.mxu0 %v1105_v0  ;;  %1084 = vmatprep.subr.bf16.mxu1 %v1105_v0 }
  0x34   :  { %1062 = vmatpush1.bf16.msra.mxu0 %v1061_v41  ;;  %1100 = vmatpush1.bf16.msra.mxu1 %v1061_v41  ;;  %v43_v41 = vld [vmem:[%s2360_s0 + $0xe8] sm:$0xff] }
  0x35   :  { %1063 = vmatprep.subr.bf16.mxu0 %v1105_v0  ;;  %1085 = vmatprep.subr.bf16.mxu1 %v1105_v0 }
  0x38   :  { %1065 = vmatpush1.bf16.msra.mxu0 %v1064_v44  ;;  %1101 = vmatpush1.bf16.msra.mxu1 %v1064_v44  ;;  %v142_v44 = vld [vmem:[%s2360_s0 + $0x400] sm:$0xff] }
  0x39   :  { %1066 = vmatprep.subr.bf16.mxu0 %v1105_v0  ;;  %1086 = vmatprep.subr.bf16.mxu1 %v1105_v0 }
  0x3c   :  { %1068 = vmatpush1.bf16.msra.mxu0 %v1067_v47  ;;  %1102 = vmatpush1.bf16.msra.mxu1 %v1067_v47  ;;  %v44_v47 = vld [vmem:[%s2360_s0 + $0xf0] sm:$0xff] }
  0x3d   :  { %1069 = vmatprep.subr.bf16.mxu0 %v1105_v0  ;;  %1087 = vmatprep.subr.bf16.mxu1 %v1105_v0  ;;  %v120_v0 = vld [vmem:[%s2360_s0 + $0x350] sm:$0xff] }
  0x40   :  { %1071 = vmatpush1.bf16.msra.mxu0 %v1070_v50  ;;  %1103 = vmatpush1.bf16.msra.mxu1 %v1070_v50  ;;  %v147_v50 = vld [vmem:[%s2360_s0 + $0x428] sm:$0xff] }
  0x43   :  { %318 = vmatmul.mubr.f32.vlgmr.msra.gmra.mrb[0].mxu0 %v14_v51  ;;  %568 = vmatmul.mubr.f32.vlgmr.msra.gmra.mrb[0].mxu1 %v114_v52  ;;  %v46_v51 = vld [vmem:[%s2360_s0 + $0x100] sm:$0xff] }
  0x44   :  { %322 = vmatprep.mubr.f32.mxu0 %v17_v53  ;;  %572 = vmatprep.mubr.f32.mxu1 %v117_v54  ;;  %v146_v52 = vld [vmem:[%s2360_s0 + $0x420] sm:$0xff]  ;;  %v49_v53 = vld [vmem:[%s2360_s0 + $0x118] sm:$0xff] }
  0x45   :  { %v149_v54 = vld [vmem:[%s2360_s0 + $0x438] sm:$0xff] }
  0x47   :  { %323 = vmatmul.mubr.f32.gmra.mrb[2].mxu0 %v16_v55  ;;  %573 = vmatmul.mubr.f32.gmra.mrb[2].mxu1 %v116_v56  ;;  %v48_v55 = vld [vmem:[%s2360_s0 + $0x110] sm:$0xff] }
  0x48   :  { %327 = vmatprep.mubr.f32.mxu0 %v19_v57  ;;  %577 = vmatprep.mubr.f32.mxu1 %v119_v58  ;;  %v148_v56 = vld [vmem:[%s2360_s0 + $0x430] sm:$0xff]  ;;  %v51_v57 = vld [vmem:[%s2360_s0 + $0x128] sm:$0xff] }
  0x49   :  { %v151_v58 = vld [vmem:[%s2360_s0 + $0x448] sm:$0xff] }
  0x4b   :  { %328 = vmatmul.mubr.f32.gmra.mrb[4].mxu0 %v18_v59  ;;  %578 = vmatmul.mubr.f32.gmra.mrb[4].mxu1 %v118_v60  ;;  %v50_v59 = vld [vmem:[%s2360_s0 + $0x120] sm:$0xff] }
  0x4c   :  { %332 = vmatprep.mubr.f32.mxu0 %v21_v61  ;;  %582 = vmatprep.mubr.f32.mxu1 %v121_v62  ;;  %v150_v60 = vld [vmem:[%s2360_s0 + $0x440] sm:$0xff]  ;;  %v53_v61 = vld [vmem:[%s2360_s0 + $0x138] sm:$0xff] }
  0x4d   :  { %v153_v62 = vld [vmem:[%s2360_s0 + $0x458] sm:$0xff] }
  0x4f   :  { %333 = vmatmul.mubr.f32.gmra.mrb[6].mxu0 %v20_v63  ;;  %583 = vmatmul.mubr.f32.gmra.mrb[6].mxu1 %v120_v0  ;;  %v52_v63 = vld [vmem:[%s2360_s0 + $0x130] sm:$0xff] }
  0x50   :  { %337 = vmatprep.mubr.f32.mxu0 %v23_v1  ;;  %587 = vmatprep.mubr.f32.mxu1 %v123_v2  ;;  %v152_v0 = vld [vmem:[%s2360_s0 + $0x450] sm:$0xff]  ;;  %v55_v1 = vld [vmem:[%s2360_s0 + $0x148] sm:$0xff] }
  0x51   :  { %v155_v2 = vld [vmem:[%s2360_s0 + $0x468] sm:$0xff] }
  0x53   :  { %338 = vmatmul.mubr.f32.gmra.mrb[8].mxu0 %v22_v3  ;;  %588 = vmatmul.mubr.f32.gmra.mrb[8].mxu1 %v122_v4  ;;  %v54_v3 = vld [vmem:[%s2360_s0 + $0x140] sm:$0xff] }
  0x54   :  { %342 = vmatprep.mubr.f32.mxu0 %v25_v5  ;;  %592 = vmatprep.mubr.f32.mxu1 %v125_v6  ;;  %v154_v4 = vld [vmem:[%s2360_s0 + $0x460] sm:$0xff]  ;;  %v57_v5 = vld [vmem:[%s2360_s0 + $0x158] sm:$0xff] }
  0x55   :  { %v157_v6 = vld [vmem:[%s2360_s0 + $0x478] sm:$0xff] }
  0x57   :  { %343 = vmatmul.mubr.f32.gmra.mrb[10].mxu0 %v24_v7  ;;  %593 = vmatmul.mubr.f32.gmra.mrb[10].mxu1 %v124_v8  ;;  %v56_v7 = vld [vmem:[%s2360_s0 + $0x150] sm:$0xff] }
  0x58   :  { %347 = vmatprep.mubr.f32.mxu0 %v27_v9  ;;  %597 = vmatprep.mubr.f32.mxu1 %v127_v10  ;;  %v156_v8 = vld [vmem:[%s2360_s0 + $0x470] sm:$0xff]  ;;  %v59_v9 = vld [vmem:[%s2360_s0 + $0x168] sm:$0xff] }
  0x59   :  { %v159_v10 = vld [vmem:[%s2360_s0 + $0x488] sm:$0xff] }
  0x5b   :  { %348 = vmatmul.mubr.f32.gmra.mrb[12].mxu0 %v26_v11  ;;  %598 = vmatmul.mubr.f32.gmra.mrb[12].mxu1 %v126_v12  ;;  %v58_v11 = vld [vmem:[%s2360_s0 + $0x160] sm:$0xff] }
  0x5c   :  { %352 = vmatprep.mubr.f32.mxu0 %v29_v13  ;;  %602 = vmatprep.mubr.f32.mxu1 %v129_v14  ;;  %v158_v12 = vld [vmem:[%s2360_s0 + $0x480] sm:$0xff]  ;;  %v61_v13 = vld [vmem:[%s2360_s0 + $0x178] sm:$0xff] }
  0x5d   :  { %v161_v14 = vld [vmem:[%s2360_s0 + $0x498] sm:$0xff] }
  0x5f   :  { %353 = vmatmul.mubr.f32.gmra.mrb[14].mxu0 %v28_v15  ;;  %603 = vmatmul.mubr.f32.gmra.mrb[14].mxu1 %v128_v16  ;;  %v60_v15 = vld [vmem:[%s2360_s0 + $0x170] sm:$0xff] }
  0x60   :  { %357 = vmatprep.mubr.f32.mxu0 %v31_v17  ;;  %607 = vmatprep.mubr.f32.mxu1 %v131_v18  ;;  %v160_v16 = vld [vmem:[%s2360_s0 + $0x490] sm:$0xff]  ;;  %v63_v17 = vld [vmem:[%s2360_s0 + $0x188] sm:$0xff] }
  0x61   :  { %v163_v18 = vld [vmem:[%s2360_s0 + $0x4a8] sm:$0xff] }
  0x63   :  { %358 = vmatmul.mubr.f32.gmra.mrb[16].mxu0 %v30_v19  ;;  %608 = vmatmul.mubr.f32.gmra.mrb[16].mxu1 %v130_v20  ;;  %v62_v19 = vld [vmem:[%s2360_s0 + $0x180] sm:$0xff] }
  0x64   :  { %362 = vmatprep.mubr.f32.mxu0 %v33_v21  ;;  %612 = vmatprep.mubr.f32.mxu1 %v133_v22  ;;  %v162_v20 = vld [vmem:[%s2360_s0 + $0x4a0] sm:$0xff]  ;;  %v65_v21 = vld [vmem:[%s2360_s0 + $0x198] sm:$0xff] }
  0x65   :  { %v165_v22 = vld [vmem:[%s2360_s0 + $0x4b8] sm:$0xff] }
  0x67   :  { %363 = vmatmul.mubr.f32.gmra.mrb[18].mxu0 %v32_v23  ;;  %613 = vmatmul.mubr.f32.gmra.mrb[18].mxu1 %v132_v24  ;;  %v64_v23 = vld [vmem:[%s2360_s0 + $0x190] sm:$0xff] }
  0x68   :  { %367 = vmatprep.mubr.f32.mxu0 %v35_v25  ;;  %617 = vmatprep.mubr.f32.mxu1 %v135_v26  ;;  %v164_v24 = vld [vmem:[%s2360_s0 + $0x4b0] sm:$0xff]  ;;  %v67_v25 = vld [vmem:[%s2360_s0 + $0x1a8] sm:$0xff] }
  0x69   :  { %v167_v26 = vld [vmem:[%s2360_s0 + $0x4c8] sm:$0xff] }
  0x6b   :  { %368 = vmatmul.mubr.f32.gmra.mrb[20].mxu0 %v34_v27  ;;  %618 = vmatmul.mubr.f32.gmra.mrb[20].mxu1 %v134_v28  ;;  %v66_v27 = vld [vmem:[%s2360_s0 + $0x1a0] sm:$0xff] }
  0x6c   :  { %372 = vmatprep.mubr.f32.mxu0 %v37_v29  ;;  %622 = vmatprep.mubr.f32.mxu1 %v137_v30  ;;  %v166_v28 = vld [vmem:[%s2360_s0 + $0x4c0] sm:$0xff]  ;;  %v69_v29 = vld [vmem:[%s2360_s0 + $0x1b8] sm:$0xff] }
  0x6d   :  { %v169_v30 = vld [vmem:[%s2360_s0 + $0x4d8] sm:$0xff] }
  0x6f   :  { %373 = vmatmul.mubr.f32.gmra.mrb[22].mxu0 %v36_v31  ;;  %623 = vmatmul.mubr.f32.gmra.mrb[22].mxu1 %v136_v32  ;;  %v68_v31 = vld [vmem:[%s2360_s0 + $0x1b0] sm:$0xff] }
  0x70   :  { %377 = vmatprep.mubr.f32.mxu0 %v39_v33  ;;  %627 = vmatprep.mubr.f32.mxu1 %v139_v34  ;;  %v168_v32 = vld [vmem:[%s2360_s0 + $0x4d0] sm:$0xff]  ;;  %v71_v33 = vld [vmem:[%s2360_s0 + $0x1c8] sm:$0xff] }
  0x71   :  { %v171_v34 = vld [vmem:[%s2360_s0 + $0x4e8] sm:$0xff] }
  0x73   :  { %378 = vmatmul.mubr.f32.gmra.mrb[24].mxu0 %v38_v35  ;;  %628 = vmatmul.mubr.f32.gmra.mrb[24].mxu1 %v138_v36  ;;  %v70_v35 = vld [vmem:[%s2360_s0 + $0x1c0] sm:$0xff] }
  0x74   :  { %382 = vmatprep.mubr.f32.mxu0 %v41_v37  ;;  %632 = vmatprep.mubr.f32.mxu1 %v141_v38  ;;  %v170_v36 = vld [vmem:[%s2360_s0 + $0x4e0] sm:$0xff]  ;;  %v73_v37 = vld [vmem:[%s2360_s0 + $0x1d8] sm:$0xff] }
  0x75   :  { %v173_v38 = vld [vmem:[%s2360_s0 + $0x4f8] sm:$0xff] }
  0x77   :  { %383 = vmatmul.mubr.f32.gmra.mrb[26].mxu0 %v40_v39  ;;  %633 = vmatmul.mubr.f32.gmra.mrb[26].mxu1 %v140_v40  ;;  %v72_v39 = vld [vmem:[%s2360_s0 + $0x1d0] sm:$0xff] }
  0x78   :  { %387 = vmatprep.mubr.f32.mxu0 %v43_v41  ;;  %637 = vmatprep.mubr.f32.mxu1 %v143_v42  ;;  %v172_v40 = vld [vmem:[%s2360_s0 + $0x4f0] sm:$0xff]  ;;  %v75_v41 = vld [vmem:[%s2360_s0 + $0x1e8] sm:$0xff] }
  0x79   :  { %v175_v42 = vld [vmem:[%s2360_s0 + $0x508] sm:$0xff] }
  0x7b   :  { %388 = vmatmul.mubr.f32.gmra.mrb[28].mxu0 %v42_v43  ;;  %638 = vmatmul.mubr.f32.gmra.mrb[28].mxu1 %v142_v44  ;;  %v74_v43 = vld [vmem:[%s2360_s0 + $0x1e0] sm:$0xff] }
  0x7c   :  { %392 = vmatprep.mubr.f32.mxu0 %v45_v45  ;;  %642 = vmatprep.mubr.f32.mxu1 %v145_v46  ;;  %v174_v44 = vld [vmem:[%s2360_s0 + $0x500] sm:$0xff]  ;;  %v77_v45 = vld [vmem:[%s2360_s0 + $0x1f8] sm:$0xff] }
  0x7d   :  { %v177_v46 = vld [vmem:[%s2360_s0 + $0x518] sm:$0xff] }
  0x7f   :  { %393 = vmatmul.mubr.f32.gmra.mrb[30].mxu0 %v44_v47  ;;  %643 = vmatmul.mubr.f32.gmra.mrb[30].mxu1 %v144_v48  ;;  %v76_v47 = vld [vmem:[%s2360_s0 + $0x1f0] sm:$0xff] }
  0x80   :  { %397 = vmatprep.mubr.f32.mxu0 %v47_v49  ;;  %647 = vmatprep.mubr.f32.mxu1 %v147_v50  ;;  %v176_v48 = vld [vmem:[%s2360_s0 + $0x510] sm:$0xff]  ;;  %v79_v49 = vld [vmem:[%s2360_s0 + $0x208] sm:$0xff] }
  0x81   :  { %v179_v50 = vld [vmem:[%s2360_s0 + $0x528] sm:$0xff] }
  0x83   :  { %398 = vmatmul.mubr.f32.gmra.mrb[32].mxu0 %v46_v51  ;;  %648 = vmatmul.mubr.f32.gmra.mrb[32].mxu1 %v146_v52  ;;  %v78_v51 = vld [vmem:[%s2360_s0 + $0x200] sm:$0xff] }
  0x84   :  { %402 = vmatprep.mubr.f32.mxu0 %v49_v53  ;;  %652 = vmatprep.mubr.f32.mxu1 %v149_v54  ;;  %v178_v52 = vld [vmem:[%s2360_s0 + $0x520] sm:$0xff]  ;;  %v81_v53 = vld [vmem:[%s2360_s0 + $0x218] sm:$0xff] }
  0x85   :  { %v181_v54 = vld [vmem:[%s2360_s0 + $0x538] sm:$0xff] }
  0x87   :  { %403 = vmatmul.mubr.f32.gmra.mrb[34].mxu0 %v48_v55  ;;  %653 = vmatmul.mubr.f32.gmra.mrb[34].mxu1 %v148_v56  ;;  %v80_v55 = vld [vmem:[%s2360_s0 + $0x210] sm:$0xff] }
  0x88   :  { %407 = vmatprep.mubr.f32.mxu0 %v51_v57  ;;  %657 = vmatprep.mubr.f32.mxu1 %v151_v58  ;;  %v180_v56 = vld [vmem:[%s2360_s0 + $0x530] sm:$0xff]  ;;  %v83_v57 = vld [vmem:[%s2360_s0 + $0x228] sm:$0xff] }
  0x89   :  { %v183_v58 = vld [vmem:[%s2360_s0 + $0x548] sm:$0xff] }
  0x8b   :  { %408 = vmatmul.mubr.f32.gmra.mrb[36].mxu0 %v50_v59  ;;  %658 = vmatmul.mubr.f32.gmra.mrb[36].mxu1 %v150_v60  ;;  %v82_v59 = vld [vmem:[%s2360_s0 + $0x220] sm:$0xff] }
  0x8c   :  { %412 = vmatprep.mubr.f32.mxu0 %v53_v61  ;;  %662 = vmatprep.mubr.f32.mxu1 %v153_v62  ;;  %v182_v60 = vld [vmem:[%s2360_s0 + $0x540] sm:$0xff]  ;;  %v85_v61 = vld [vmem:[%s2360_s0 + $0x238] sm:$0xff] }
  0x8d   :  { %v185_v62 = vld [vmem:[%s2360_s0 + $0x558] sm:$0xff] }
  0x8f   :  { %413 = vmatmul.mubr.f32.gmra.mrb[38].mxu0 %v52_v63  ;;  %663 = vmatmul.mubr.f32.gmra.mrb[38].mxu1 %v152_v0  ;;  %v84_v63 = vld [vmem:[%s2360_s0 + $0x230] sm:$0xff] }
  0x90   :  { %417 = vmatprep.mubr.f32.mxu0 %v55_v1  ;;  %667 = vmatprep.mubr.f32.mxu1 %v155_v2  ;;  %v184_v0 = vld [vmem:[%s2360_s0 + $0x550] sm:$0xff]  ;;  %v87_v1 = vld [vmem:[%s2360_s0 + $0x248] sm:$0xff] }
  0x91   :  { %v187_v2 = vld [vmem:[%s2360_s0 + $0x568] sm:$0xff] }
  0x93   :  { %418 = vmatmul.mubr.f32.gmra.mrb[40].mxu0 %v54_v3  ;;  %668 = vmatmul.mubr.f32.gmra.mrb[40].mxu1 %v154_v4  ;;  %v86_v3 = vld [vmem:[%s2360_s0 + $0x240] sm:$0xff] }
  0x94   :  { %422 = vmatprep.mubr.f32.mxu0 %v57_v5  ;;  %672 = vmatprep.mubr.f32.mxu1 %v157_v6  ;;  %v186_v4 = vld [vmem:[%s2360_s0 + $0x560] sm:$0xff]  ;;  %v89_v5 = vld [vmem:[%s2360_s0 + $0x258] sm:$0xff] }
  0x95   :  { %v189_v6 = vld [vmem:[%s2360_s0 + $0x578] sm:$0xff] }
  0x97   :  { %423 = vmatmul.mubr.f32.gmra.mrb[42].mxu0 %v56_v7  ;;  %673 = vmatmul.mubr.f32.gmra.mrb[42].mxu1 %v156_v8  ;;  %v88_v7 = vld [vmem:[%s2360_s0 + $0x250] sm:$0xff] }
  0x98   :  { %427 = vmatprep.mubr.f32.mxu0 %v59_v9  ;;  %677 = vmatprep.mubr.f32.mxu1 %v159_v10  ;;  %v188_v8 = vld [vmem:[%s2360_s0 + $0x570] sm:$0xff]  ;;  %v91_v9 = vld [vmem:[%s2360_s0 + $0x268] sm:$0xff] }
  0x99   :  { %v191_v10 = vld [vmem:[%s2360_s0 + $0x588] sm:$0xff] }
  0x9b   :  { %428 = vmatmul.mubr.f32.gmra.mrb[44].mxu0 %v58_v11  ;;  %678 = vmatmul.mubr.f32.gmra.mrb[44].mxu1 %v158_v12  ;;  %v90_v11 = vld [vmem:[%s2360_s0 + $0x260] sm:$0xff] }
  0x9c   :  { %432 = vmatprep.mubr.f32.mxu0 %v61_v13  ;;  %682 = vmatprep.mubr.f32.mxu1 %v161_v14  ;;  %v190_v12 = vld [vmem:[%s2360_s0 + $0x580] sm:$0xff]  ;;  %v93_v13 = vld [vmem:[%s2360_s0 + $0x278] sm:$0xff] }
  0x9d   :  { %v193_v14 = vld [vmem:[%s2360_s0 + $0x598] sm:$0xff] }
  0x9f   :  { %433 = vmatmul.mubr.f32.gmra.mrb[46].mxu0 %v60_v15  ;;  %683 = vmatmul.mubr.f32.gmra.mrb[46].mxu1 %v160_v16  ;;  %v92_v15 = vld [vmem:[%s2360_s0 + $0x270] sm:$0xff] }
  0xa0   :  { %437 = vmatprep.mubr.f32.mxu0 %v63_v17  ;;  %687 = vmatprep.mubr.f32.mxu1 %v163_v18  ;;  %v192_v16 = vld [vmem:[%s2360_s0 + $0x590] sm:$0xff]  ;;  %v95_v17 = vld [vmem:[%s2360_s0 + $0x288] sm:$0xff] }
  0xa1   :  { %v195_v18 = vld [vmem:[%s2360_s0 + $0x5a8] sm:$0xff] }
  0xa3   :  { %438 = vmatmul.mubr.f32.gmra.mrb[48].mxu0 %v62_v19  ;;  %688 = vmatmul.mubr.f32.gmra.mrb[48].mxu1 %v162_v20  ;;  %v94_v19 = vld [vmem:[%s2360_s0 + $0x280] sm:$0xff] }
  0xa4   :  { %442 = vmatprep.mubr.f32.mxu0 %v65_v21  ;;  %692 = vmatprep.mubr.f32.mxu1 %v165_v22  ;;  %v194_v20 = vld [vmem:[%s2360_s0 + $0x5a0] sm:$0xff]  ;;  %v97_v21 = vld [vmem:[%s2360_s0 + $0x298] sm:$0xff] }
  0xa5   :  { %v197_v22 = vld [vmem:[%s2360_s0 + $0x5b8] sm:$0xff] }
  0xa7   :  { %443 = vmatmul.mubr.f32.gmra.mrb[50].mxu0 %v64_v23  ;;  %693 = vmatmul.mubr.f32.gmra.mrb[50].mxu1 %v164_v24  ;;  %v96_v23 = vld [vmem:[%s2360_s0 + $0x290] sm:$0xff] }
  0xa8   :  { %447 = vmatprep.mubr.f32.mxu0 %v67_v25  ;;  %697 = vmatprep.mubr.f32.mxu1 %v167_v26  ;;  %v196_v24 = vld [vmem:[%s2360_s0 + $0x5b0] sm:$0xff]  ;;  %v99_v25 = vld [vmem:[%s2360_s0 + $0x2a8] sm:$0xff] }
  0xa9   :  { %v199_v26 = vld [vmem:[%s2360_s0 + $0x5c8] sm:$0xff] }
  0xab   :  { %448 = vmatmul.mubr.f32.gmra.mrb[52].mxu0 %v66_v27  ;;  %698 = vmatmul.mubr.f32.gmra.mrb[52].mxu1 %v166_v28  ;;  %v98_v27 = vld [vmem:[%s2360_s0 + $0x2a0] sm:$0xff] }
  0xac   :  { %452 = vmatprep.mubr.f32.mxu0 %v69_v29  ;;  %702 = vmatprep.mubr.f32.mxu1 %v169_v30  ;;  %v198_v28 = vld [vmem:[%s2360_s0 + $0x5c0] sm:$0xff]  ;;  %v101_v29 = vld [vmem:[%s2360_s0 + $0x2b8] sm:$0xff] }
  0xad   :  { %v201_v30 = vld [vmem:[%s2360_s0 + $0x5d8] sm:$0xff] }
  0xaf   :  { %453 = vmatmul.mubr.f32.gmra.mrb[54].mxu0 %v68_v31  ;;  %703 = vmatmul.mubr.f32.gmra.mrb[54].mxu1 %v168_v32  ;;  %v100_v31 = vld [vmem:[%s2360_s0 + $0x2b0] sm:$0xff] }
  0xb0   :  { %457 = vmatprep.mubr.f32.mxu0 %v71_v33  ;;  %707 = vmatprep.mubr.f32.mxu1 %v171_v34  ;;  %v200_v32 = vld [vmem:[%s2360_s0 + $0x5d0] sm:$0xff]  ;;  %v103_v33 = vld [vmem:[%s2360_s0 + $0x2c8] sm:$0xff] }
  0xb1   :  { %v203_v34 = vld [vmem:[%s2360_s0 + $0x5e8] sm:$0xff] }
  0xb3   :  { %458 = vmatmul.mubr.f32.gmra.mrb[56].mxu0 %v70_v35  ;;  %708 = vmatmul.mubr.f32.gmra.mrb[56].mxu1 %v170_v36  ;;  %v102_v35 = vld [vmem:[%s2360_s0 + $0x2c0] sm:$0xff] }
  0xb4   :  { %462 = vmatprep.mubr.f32.mxu0 %v73_v37  ;;  %712 = vmatprep.mubr.f32.mxu1 %v173_v38  ;;  %v202_v36 = vld [vmem:[%s2360_s0 + $0x5e0] sm:$0xff]  ;;  %v105_v37 = vld [vmem:[%s2360_s0 + $0x2d8] sm:$0xff] }
  0xb5   :  { %v205_v38 = vld [vmem:[%s2360_s0 + $0x5f8] sm:$0xff] }
  0xb7   :  { %463 = vmatmul.mubr.f32.gmra.mrb[58].mxu0 %v72_v39  ;;  %713 = vmatmul.mubr.f32.gmra.mrb[58].mxu1 %v172_v40  ;;  %v104_v39 = vld [vmem:[%s2360_s0 + $0x2d0] sm:$0xff] }
  0xb8   :  { %467 = vmatprep.mubr.f32.mxu0 %v75_v41  ;;  %717 = vmatprep.mubr.f32.mxu1 %v175_v42  ;;  %v204_v40 = vld [vmem:[%s2360_s0 + $0x5f0] sm:$0xff]  ;;  %v107_v41 = vld [vmem:[%s2360_s0 + $0x2e8] sm:$0xff] }
  0xb9   :  { %v207_v42 = vld [vmem:[%s2360_s0 + $0x608] sm:$0xff] }
  0xbb   :  { %468 = vmatmul.mubr.f32.gmra.mrb[60].mxu0 %v74_v43  ;;  %718 = vmatmul.mubr.f32.gmra.mrb[60].mxu1 %v174_v44  ;;  %v106_v43 = vld [vmem:[%s2360_s0 + $0x2e0] sm:$0xff] }
  0xbc   :  { %472 = vmatprep.mubr.f32.mxu0 %v77_v45  ;;  %722 = vmatprep.mubr.f32.mxu1 %v177_v46  ;;  %v206_v44 = vld [vmem:[%s2360_s0 + $0x600] sm:$0xff]  ;;  %v109_v45 = vld [vmem:[%s2360_s0 + $0x2f8] sm:$0xff] }
  0xbd   :  { %v209_v46 = vld [vmem:[%s2360_s0 + $0x618] sm:$0xff] }
  0xbf   :  { %473 = vmatmul.mubr.f32.gmra.mrb[62].mxu0 %v76_v47  ;;  %723 = vmatmul.mubr.f32.gmra.mrb[62].mxu1 %v176_v48  ;;  %v108_v47 = vld [vmem:[%s2360_s0 + $0x2f0] sm:$0xff] }
  0xc0   :  { %477 = vmatprep.mubr.f32.mxu0 %v79_v49  ;;  %727 = vmatprep.mubr.f32.mxu1 %v179_v50  ;;  %v208_v48 = vld [vmem:[%s2360_s0 + $0x610] sm:$0xff]  ;;  %v111_v49 = vld [vmem:[%s2360_s0 + $0x308] sm:$0xff] }
  0xc1   :  { %v211_v50 = vld [vmem:[%s2360_s0 + $0x628] sm:$0xff] }
  0xc3   :  { %478 = vmatmul.mubr.f32.gmra.mrb[64].mxu0 %v78_v51  ;;  %728 = vmatmul.mubr.f32.gmra.mrb[64].mxu1 %v178_v52  ;;  %v110_v51 = vld [vmem:[%s2360_s0 + $0x300] sm:$0xff] }
  0xc4   :  { %482 = vmatprep.mubr.f32.mxu0 %v81_v53  ;;  %732 = vmatprep.mubr.f32.mxu1 %v181_v54  ;;  %v210_v52 = vld [vmem:[%s2360_s0 + $0x620] sm:$0xff]  ;;  %v113_v53 = vld [vmem:[%s2360_s0 + $0x318] sm:$0xff] }
  0xc5   :  { %v213_v54 = vld [vmem:[%s2360_s0 + $0x638] sm:$0xff] }
  0xc7   :  { %483 = vmatmul.mubr.f32.gmra.mrb[66].mxu0 %v80_v55  ;;  %733 = vmatmul.mubr.f32.gmra.mrb[66].mxu1 %v180_v56  ;;  %v112_v55 = vld [vmem:[%s2360_s0 + $0x310] sm:$0xff] }
  0xc8   :  { %487 = vmatprep.mubr.f32.mxu0 %v83_v57  ;;  %737 = vmatprep.mubr.f32.mxu1 %v183_v58  ;;  %v212_v56 = vld [vmem:[%s2360_s0 + $0x630] sm:$0xff]  ;;  %v1857_v57 = vld [vmem:[%s2361_s2] ss:$0 sm:$0xff] }
  0xcb   :  { %488 = vmatmul.mubr.f32.gmra.mrb[68].mxu0 %v82_v59  ;;  %738 = vmatmul.mubr.f32.gmra.mrb[68].mxu1 %v182_v60 }
  0xcc   :  { %492 = vmatprep.mubr.f32.mxu0 %v85_v61  ;;  %742 = vmatprep.mubr.f32.mxu1 %v185_v62 }
  0xcf   :  { %493 = vmatmul.mubr.f32.gmra.mrb[70].mxu0 %v84_v63  ;;  %743 = vmatmul.mubr.f32.gmra.mrb[70].mxu1 %v184_v0 }
  0xd0   :  { %497 = vmatprep.mubr.f32.mxu0 %v87_v1  ;;  %747 = vmatprep.mubr.f32.mxu1 %v187_v2 }
  0xd3   :  { %498 = vmatmul.mubr.f32.gmra.mrb[72].mxu0 %v86_v3  ;;  %748 = vmatmul.mubr.f32.gmra.mrb[72].mxu1 %v186_v4 }
  0xd4   :  { %502 = vmatprep.mubr.f32.mxu0 %v89_v5  ;;  %752 = vmatprep.mubr.f32.mxu1 %v189_v6 }
  0xd7   :  { %503 = vmatmul.mubr.f32.gmra.mrb[74].mxu0 %v88_v7  ;;  %753 = vmatmul.mubr.f32.gmra.mrb[74].mxu1 %v188_v8 }
  0xd8   :  { %507 = vmatprep.mubr.f32.mxu0 %v91_v9  ;;  %757 = vmatprep.mubr.f32.mxu1 %v191_v10 }
  0xdb   :  { %508 = vmatmul.mubr.f32.gmra.mrb[76].mxu0 %v90_v11  ;;  %758 = vmatmul.mubr.f32.gmra.mrb[76].mxu1 %v190_v12 }
  0xdc   :  { %512 = vmatprep.mubr.f32.mxu0 %v93_v13  ;;  %762 = vmatprep.mubr.f32.mxu1 %v193_v14 }
  0xdf   :  { %513 = vmatmul.mubr.f32.gmra.mrb[78].mxu0 %v92_v15  ;;  %763 = vmatmul.mubr.f32.gmra.mrb[78].mxu1 %v192_v16 }
  0xe0   :  { %517 = vmatprep.mubr.f32.mxu0 %v95_v17  ;;  %767 = vmatprep.mubr.f32.mxu1 %v195_v18 }
  0xe3   :  { %518 = vmatmul.mubr.f32.gmra.mrb[80].mxu0 %v94_v19  ;;  %768 = vmatmul.mubr.f32.gmra.mrb[80].mxu1 %v194_v20 }
  0xe4   :  { %522 = vmatprep.mubr.f32.mxu0 %v97_v21  ;;  %772 = vmatprep.mubr.f32.mxu1 %v197_v22 }
  0xe7   :  { %523 = vmatmul.mubr.f32.gmra.mrb[82].mxu0 %v96_v23  ;;  %773 = vmatmul.mubr.f32.gmra.mrb[82].mxu1 %v196_v24 }
  0xe8   :  { %527 = vmatprep.mubr.f32.mxu0 %v99_v25  ;;  %777 = vmatprep.mubr.f32.mxu1 %v199_v26 }
  0xeb   :  { %528 = vmatmul.mubr.f32.gmra.mrb[84].mxu0 %v98_v27  ;;  %778 = vmatmul.mubr.f32.gmra.mrb[84].mxu1 %v198_v28 }
  0xec   :  { %532 = vmatprep.mubr.f32.mxu0 %v101_v29  ;;  %782 = vmatprep.mubr.f32.mxu1 %v201_v30 }
  0xef   :  { %533 = vmatmul.mubr.f32.gmra.mrb[86].mxu0 %v100_v31  ;;  %783 = vmatmul.mubr.f32.gmra.mrb[86].mxu1 %v200_v32 }
  0xf0   :  { %537 = vmatprep.mubr.f32.mxu0 %v103_v33  ;;  %787 = vmatprep.mubr.f32.mxu1 %v203_v34 }
  0xf3   :  { %538 = vmatmul.mubr.f32.gmra.mrb[88].mxu0 %v102_v35  ;;  %788 = vmatmul.mubr.f32.gmra.mrb[88].mxu1 %v202_v36 }
  0xf4   :  { %542 = vmatprep.mubr.f32.mxu0 %v105_v37  ;;  %792 = vmatprep.mubr.f32.mxu1 %v205_v38 }
  0xf7   :  { %543 = vmatmul.mubr.f32.gmra.mrb[90].mxu0 %v104_v39  ;;  %793 = vmatmul.mubr.f32.gmra.mrb[90].mxu1 %v204_v40 }
  0xf8   :  { %547 = vmatprep.mubr.f32.mxu0 %v107_v41  ;;  %797 = vmatprep.mubr.f32.mxu1 %v207_v42 }
  0xfb   :  { %548 = vmatmul.mubr.f32.gmra.mrb[92].mxu0 %v106_v43  ;;  %798 = vmatmul.mubr.f32.gmra.mrb[92].mxu1 %v206_v44 }
  0xfc   :  { %552 = vmatprep.mubr.f32.mxu0 %v109_v45  ;;  %802 = vmatprep.mubr.f32.mxu1 %v209_v46 }
  0xff   :  { %553 = vmatmul.mubr.f32.gmra.mrb[94].mxu0 %v108_v47  ;;  %803 = vmatmul.mubr.f32.gmra.mrb[94].mxu1 %v208_v48 }
 0x100   :  { %557 = vmatprep.mubr.f32.mxu0 %v111_v49  ;;  %807 = vmatprep.mubr.f32.mxu1 %v211_v50 }
 0x103   :  { %558 = vmatmul.mubr.f32.gmra.mrb[96].mxu0 %v110_v51  ;;  %808 = vmatmul.mubr.f32.gmra.mrb[96].mxu1 %v210_v52 }
 0x104   :  { %562 = vmatprep.mubr.f32.mxu0 %v113_v53  ;;  %812 = vmatprep.mubr.f32.mxu1 %v213_v54 }
 0x107   :  { %563 = vmatmul.mubr.f32.gmra.mrb[98].mxu0 %v112_v55  ;;  %813 = vmatmul.mubr.f32.gmra.mrb[98].mxu1 %v212_v56 }
 0x116   :  { %v319_v58 = vpop.f32.mrb[0].mxu0  ;;  %v569_v59 = vpop.f32.mrb[0].mxu1 }
 0x117   :  { %v320_v60 = vadd.f32 %v1857_v57, %v319_v58  ;;  %v570_v61 = vadd.f32 %v1857_v57, %v569_v59  ;;  %v321_v62 = vpop.f32.mrb[1].mxu0  ;;  %v571_v63 = vpop.f32.mrb[1].mxu1 }
 0x119   :  { %v818_v0 = vmax.f32 %v320_v60, 0.0  ;;  %v868_v1 = vmax.f32 %v570_v61, 0.0 }
 0x11a   :  { %v324_v2 = vpop.f32.mrb[2].mxu0  ;;  %v574_v3 = vpop.f32.mrb[2].mxu1 }
 0x11b   :  { %919 = vst.msk [vmem:[%s2362_s3] sm:$0xff] %vm918_vm0, %v818_v0  ;;  %969 = vst.msk [vmem:[%s2362_s3 + $0x190] sm:$0xff] %vm918_vm0, %v868_v1  ;;  %v325_v4 = vadd.f32 %v1857_v57, %v324_v2  ;;  %v575_v5 = vadd.f32 %v1857_v57, %v574_v3  ;;  %v326_v6 = vpop.f32.mrb[3].mxu0  ;;  %v576_v7 = vpop.f32.mrb[3].mxu1 }
 0x11d   :  { %v819_v8 = vmax.f32 %v325_v4, 0.0  ;;  %v869_v9 = vmax.f32 %v575_v5, 0.0 }
 0x11e   :  { %v329_v10 = vpop.f32.mrb[4].mxu0  ;;  %v579_v11 = vpop.f32.mrb[4].mxu1 }
 0x11f   :  { %920 = vst.msk [vmem:[%s2362_s3 + $0x8] sm:$0xff] %vm918_vm0, %v819_v8  ;;  %970 = vst.msk [vmem:[%s2362_s3 + $0x198] sm:$0xff] %vm918_vm0, %v869_v9  ;;  %v330_v12 = vadd.f32 %v1857_v57, %v329_v10  ;;  %v580_v13 = vadd.f32 %v1857_v57, %v579_v11  ;;  %v331_v14 = vpop.f32.mrb[5].mxu0  ;;  %v581_v15 = vpop.f32.mrb[5].mxu1 }
 0x121   :  { %v820_v16 = vmax.f32 %v330_v12, 0.0  ;;  %v870_v17 = vmax.f32 %v580_v13, 0.0 }
 0x122   :  { %v334_v18 = vpop.f32.mrb[6].mxu0  ;;  %v584_v19 = vpop.f32.mrb[6].mxu1 }
 0x123   :  { %921 = vst.msk [vmem:[%s2362_s3 + $0x10] sm:$0xff] %vm918_vm0, %v820_v16  ;;  %971 = vst.msk [vmem:[%s2362_s3 + $0x1a0] sm:$0xff] %vm918_vm0, %v870_v17  ;;  %v335_v20 = vadd.f32 %v1857_v57, %v334_v18  ;;  %v585_v21 = vadd.f32 %v1857_v57, %v584_v19  ;;  %v336_v22 = vpop.f32.mrb[7].mxu0  ;;  %v586_v23 = vpop.f32.mrb[7].mxu1 }
 0x125   :  { %v821_v24 = vmax.f32 %v335_v20, 0.0  ;;  %v871_v25 = vmax.f32 %v585_v21, 0.0 }
 0x126   :  { %v339_v26 = vpop.f32.mrb[8].mxu0  ;;  %v589_v27 = vpop.f32.mrb[8].mxu1 }
 0x127   :  { %922 = vst.msk [vmem:[%s2362_s3 + $0x18] sm:$0xff] %vm918_vm0, %v821_v24  ;;  %972 = vst.msk [vmem:[%s2362_s3 + $0x1a8] sm:$0xff] %vm918_vm0, %v871_v25  ;;  %v340_v28 = vadd.f32 %v1857_v57, %v339_v26  ;;  %v590_v29 = vadd.f32 %v1857_v57, %v589_v27  ;;  %v341_v30 = vpop.f32.mrb[9].mxu0  ;;  %v591_v31 = vpop.f32.mrb[9].mxu1 }
 0x129   :  { %v822_v32 = vmax.f32 %v340_v28, 0.0  ;;  %v872_v33 = vmax.f32 %v590_v29, 0.0 }
 0x12a   :  { %v344_v34 = vpop.f32.mrb[10].mxu0  ;;  %v594_v35 = vpop.f32.mrb[10].mxu1 }
 0x12b   :  { %923 = vst.msk [vmem:[%s2362_s3 + $0x20] sm:$0xff] %vm918_vm0, %v822_v32  ;;  %973 = vst.msk [vmem:[%s2362_s3 + $0x1b0] sm:$0xff] %vm918_vm0, %v872_v33  ;;  %v345_v36 = vadd.f32 %v1857_v57, %v344_v34  ;;  %v595_v37 = vadd.f32 %v1857_v57, %v594_v35  ;;  %v346_v38 = vpop.f32.mrb[11].mxu0  ;;  %v596_v39 = vpop.f32.mrb[11].mxu1 }
 0x12d   :  { %v823_v40 = vmax.f32 %v345_v36, 0.0  ;;  %v873_v41 = vmax.f32 %v595_v37, 0.0 }
 0x12e   :  { %v349_v42 = vpop.f32.mrb[12].mxu0  ;;  %v599_v43 = vpop.f32.mrb[12].mxu1 }
 0x12f   :  { %924 = vst.msk [vmem:[%s2362_s3 + $0x28] sm:$0xff] %vm918_vm0, %v823_v40  ;;  %974 = vst.msk [vmem:[%s2362_s3 + $0x1b8] sm:$0xff] %vm918_vm0, %v873_v41  ;;  %v350_v44 = vadd.f32 %v1857_v57, %v349_v42  ;;  %v600_v45 = vadd.f32 %v1857_v57, %v599_v43  ;;  %v351_v46 = vpop.f32.mrb[13].mxu0  ;;  %v601_v47 = vpop.f32.mrb[13].mxu1 }
 0x131   :  { %v824_v48 = vmax.f32 %v350_v44, 0.0  ;;  %v874_v49 = vmax.f32 %v600_v45, 0.0 }
 0x132   :  { %v354_v50 = vpop.f32.mrb[14].mxu0  ;;  %v604_v51 = vpop.f32.mrb[14].mxu1 }
 0x133   :  { %925 = vst.msk [vmem:[%s2362_s3 + $0x30] sm:$0xff] %vm918_vm0, %v824_v48  ;;  %975 = vst.msk [vmem:[%s2362_s3 + $0x1c0] sm:$0xff] %vm918_vm0, %v874_v49  ;;  %v355_v52 = vadd.f32 %v1857_v57, %v354_v50  ;;  %v605_v53 = vadd.f32 %v1857_v57, %v604_v51  ;;  %v356_v54 = vpop.f32.mrb[15].mxu0  ;;  %v606_v55 = vpop.f32.mrb[15].mxu1 }
 0x135   :  { %v825_v56 = vmax.f32 %v355_v52, 0.0  ;;  %v875_v58 = vmax.f32 %v605_v53, 0.0 }
 0x136   :  { %v359_v59 = vpop.f32.mrb[16].mxu0  ;;  %v609_v60 = vpop.f32.mrb[16].mxu1 }
 0x137   :  { %926 = vst.msk [vmem:[%s2362_s3 + $0x38] sm:$0xff] %vm918_vm0, %v825_v56  ;;  %976 = vst.msk [vmem:[%s2362_s3 + $0x1c8] sm:$0xff] %vm918_vm0, %v875_v58  ;;  %v360_v61 = vadd.f32 %v1857_v57, %v359_v59  ;;  %v610_v62 = vadd.f32 %v1857_v57, %v609_v60  ;;  %v361_v63 = vpop.f32.mrb[17].mxu0  ;;  %v611_v0 = vpop.f32.mrb[17].mxu1 }
 0x139   :  { %v826_v1 = vmax.f32 %v360_v61, 0.0  ;;  %v876_v2 = vmax.f32 %v610_v62, 0.0 }
 0x13a   :  { %v364_v3 = vpop.f32.mrb[18].mxu0  ;;  %v614_v4 = vpop.f32.mrb[18].mxu1 }
 0x13b   :  { %927 = vst.msk [vmem:[%s2362_s3 + $0x40] sm:$0xff] %vm918_vm0, %v826_v1  ;;  %977 = vst.msk [vmem:[%s2362_s3 + $0x1d0] sm:$0xff] %vm918_vm0, %v876_v2  ;;  %v365_v5 = vadd.f32 %v1857_v57, %v364_v3  ;;  %v615_v6 = vadd.f32 %v1857_v57, %v614_v4  ;;  %v366_v7 = vpop.f32.mrb[19].mxu0  ;;  %v616_v8 = vpop.f32.mrb[19].mxu1 }
 0x13d   :  { %v827_v9 = vmax.f32 %v365_v5, 0.0  ;;  %v877_v10 = vmax.f32 %v615_v6, 0.0 }
 0x13e   :  { %v369_v11 = vpop.f32.mrb[20].mxu0  ;;  %v619_v12 = vpop.f32.mrb[20].mxu1 }
 0x13f   :  { %928 = vst.msk [vmem:[%s2362_s3 + $0x48] sm:$0xff] %vm918_vm0, %v827_v9  ;;  %978 = vst.msk [vmem:[%s2362_s3 + $0x1d8] sm:$0xff] %vm918_vm0, %v877_v10  ;;  %v370_v13 = vadd.f32 %v1857_v57, %v369_v11  ;;  %v620_v14 = vadd.f32 %v1857_v57, %v619_v12  ;;  %v371_v15 = vpop.f32.mrb[21].mxu0  ;;  %v621_v16 = vpop.f32.mrb[21].mxu1 }
 0x141   :  { %v828_v17 = vmax.f32 %v370_v13, 0.0  ;;  %v878_v18 = vmax.f32 %v620_v14, 0.0 }
 0x142   :  { %v374_v19 = vpop.f32.mrb[22].mxu0  ;;  %v624_v20 = vpop.f32.mrb[22].mxu1 }
 0x143   :  { %929 = vst.msk [vmem:[%s2362_s3 + $0x50] sm:$0xff] %vm918_vm0, %v828_v17  ;;  %979 = vst.msk [vmem:[%s2362_s3 + $0x1e0] sm:$0xff] %vm918_vm0, %v878_v18  ;;  %v375_v21 = vadd.f32 %v1857_v57, %v374_v19  ;;  %v625_v22 = vadd.f32 %v1857_v57, %v624_v20  ;;  %v376_v23 = vpop.f32.mrb[23].mxu0  ;;  %v626_v24 = vpop.f32.mrb[23].mxu1 }
 0x145   :  { %v829_v25 = vmax.f32 %v375_v21, 0.0  ;;  %v879_v26 = vmax.f32 %v625_v22, 0.0 }
 0x146   :  { %v379_v27 = vpop.f32.mrb[24].mxu0  ;;  %v629_v28 = vpop.f32.mrb[24].mxu1 }
 0x147   :  { %930 = vst.msk [vmem:[%s2362_s3 + $0x58] sm:$0xff] %vm918_vm0, %v829_v25  ;;  %980 = vst.msk [vmem:[%s2362_s3 + $0x1e8] sm:$0xff] %vm918_vm0, %v879_v26  ;;  %v380_v29 = vadd.f32 %v1857_v57, %v379_v27  ;;  %v630_v30 = vadd.f32 %v1857_v57, %v629_v28  ;;  %v381_v31 = vpop.f32.mrb[25].mxu0  ;;  %v631_v32 = vpop.f32.mrb[25].mxu1 }
 0x149   :  { %v830_v33 = vmax.f32 %v380_v29, 0.0  ;;  %v880_v34 = vmax.f32 %v630_v30, 0.0 }
 0x14a   :  { %v384_v35 = vpop.f32.mrb[26].mxu0  ;;  %v634_v36 = vpop.f32.mrb[26].mxu1 }
 0x14b   :  { %931 = vst.msk [vmem:[%s2362_s3 + $0x60] sm:$0xff] %vm918_vm0, %v830_v33  ;;  %981 = vst.msk [vmem:[%s2362_s3 + $0x1f0] sm:$0xff] %vm918_vm0, %v880_v34  ;;  %v385_v37 = vadd.f32 %v1857_v57, %v384_v35  ;;  %v635_v38 = vadd.f32 %v1857_v57, %v634_v36  ;;  %v386_v39 = vpop.f32.mrb[27].mxu0  ;;  %v636_v40 = vpop.f32.mrb[27].mxu1 }
 0x14d   :  { %v831_v41 = vmax.f32 %v385_v37, 0.0  ;;  %v881_v42 = vmax.f32 %v635_v38, 0.0 }
 0x14e   :  { %v389_v43 = vpop.f32.mrb[28].mxu0  ;;  %v639_v44 = vpop.f32.mrb[28].mxu1 }
 0x14f   :  { %932 = vst.msk [vmem:[%s2362_s3 + $0x68] sm:$0xff] %vm918_vm0, %v831_v41  ;;  %982 = vst.msk [vmem:[%s2362_s3 + $0x1f8] sm:$0xff] %vm918_vm0, %v881_v42  ;;  %v390_v45 = vadd.f32 %v1857_v57, %v389_v43  ;;  %v640_v46 = vadd.f32 %v1857_v57, %v639_v44  ;;  %v391_v47 = vpop.f32.mrb[29].mxu0  ;;  %v641_v48 = vpop.f32.mrb[29].mxu1 }
 0x151   :  { %v832_v49 = vmax.f32 %v390_v45, 0.0  ;;  %v882_v50 = vmax.f32 %v640_v46, 0.0 }
 0x152   :  { %v394_v51 = vpop.f32.mrb[30].mxu0  ;;  %v644_v52 = vpop.f32.mrb[30].mxu1 }
 0x153   :  { %933 = vst.msk [vmem:[%s2362_s3 + $0x70] sm:$0xff] %vm918_vm0, %v832_v49  ;;  %983 = vst.msk [vmem:[%s2362_s3 + $0x200] sm:$0xff] %vm918_vm0, %v882_v50  ;;  %v395_v53 = vadd.f32 %v1857_v57, %v394_v51  ;;  %v645_v54 = vadd.f32 %v1857_v57, %v644_v52  ;;  %v396_v55 = vpop.f32.mrb[31].mxu0  ;;  %v646_v56 = vpop.f32.mrb[31].mxu1 }
 0x155   :  { %v833_v58 = vmax.f32 %v395_v53, 0.0  ;;  %v883_v59 = vmax.f32 %v645_v54, 0.0 }
 0x156   :  { %v399_v60 = vpop.f32.mrb[32].mxu0  ;;  %v649_v61 = vpop.f32.mrb[32].mxu1 }
 0x157   :  { %934 = vst.msk [vmem:[%s2362_s3 + $0x78] sm:$0xff] %vm918_vm0, %v833_v58  ;;  %984 = vst.msk [vmem:[%s2362_s3 + $0x208] sm:$0xff] %vm918_vm0, %v883_v59  ;;  %v400_v62 = vadd.f32 %v1857_v57, %v399_v60  ;;  %v650_v63 = vadd.f32 %v1857_v57, %v649_v61  ;;  %v401_v0 = vpop.f32.mrb[33].mxu0  ;;  %v651_v1 = vpop.f32.mrb[33].mxu1 }
 0x159   :  { %v834_v2 = vmax.f32 %v400_v62, 0.0  ;;  %v884_v3 = vmax.f32 %v650_v63, 0.0 }
 0x15a   :  { %v404_v4 = vpop.f32.mrb[34].mxu0  ;;  %v654_v5 = vpop.f32.mrb[34].mxu1 }
 0x15b   :  { %935 = vst.msk [vmem:[%s2362_s3 + $0x80] sm:$0xff] %vm918_vm0, %v834_v2  ;;  %985 = vst.msk [vmem:[%s2362_s3 + $0x210] sm:$0xff] %vm918_vm0, %v884_v3  ;;  %v405_v6 = vadd.f32 %v1857_v57, %v404_v4  ;;  %v655_v7 = vadd.f32 %v1857_v57, %v654_v5  ;;  %v406_v8 = vpop.f32.mrb[35].mxu0  ;;  %v656_v9 = vpop.f32.mrb[35].mxu1 }
 0x15d   :  { %v835_v10 = vmax.f32 %v405_v6, 0.0  ;;  %v885_v11 = vmax.f32 %v655_v7, 0.0 }
 0x15e   :  { %v409_v12 = vpop.f32.mrb[36].mxu0  ;;  %v659_v13 = vpop.f32.mrb[36].mxu1 }
 0x15f   :  { %936 = vst.msk [vmem:[%s2362_s3 + $0x88] sm:$0xff] %vm918_vm0, %v835_v10  ;;  %986 = vst.msk [vmem:[%s2362_s3 + $0x218] sm:$0xff] %vm918_vm0, %v885_v11  ;;  %v410_v14 = vadd.f32 %v1857_v57, %v409_v12  ;;  %v660_v15 = vadd.f32 %v1857_v57, %v659_v13  ;;  %v411_v16 = vpop.f32.mrb[37].mxu0  ;;  %v661_v17 = vpop.f32.mrb[37].mxu1 }
 0x161   :  { %v836_v18 = vmax.f32 %v410_v14, 0.0  ;;  %v886_v19 = vmax.f32 %v660_v15, 0.0 }
 0x162   :  { %v414_v20 = vpop.f32.mrb[38].mxu0  ;;  %v664_v21 = vpop.f32.mrb[38].mxu1 }
 0x163   :  { %937 = vst.msk [vmem:[%s2362_s3 + $0x90] sm:$0xff] %vm918_vm0, %v836_v18  ;;  %987 = vst.msk [vmem:[%s2362_s3 + $0x220] sm:$0xff] %vm918_vm0, %v886_v19  ;;  %v415_v22 = vadd.f32 %v1857_v57, %v414_v20  ;;  %v665_v23 = vadd.f32 %v1857_v57, %v664_v21  ;;  %v416_v24 = vpop.f32.mrb[39].mxu0  ;;  %v666_v25 = vpop.f32.mrb[39].mxu1 }
 0x165   :  { %v837_v26 = vmax.f32 %v415_v22, 0.0  ;;  %v887_v27 = vmax.f32 %v665_v23, 0.0 }
 0x166   :  { %v419_v28 = vpop.f32.mrb[40].mxu0  ;;  %v669_v29 = vpop.f32.mrb[40].mxu1 }
 0x167   :  { %938 = vst.msk [vmem:[%s2362_s3 + $0x98] sm:$0xff] %vm918_vm0, %v837_v26  ;;  %988 = vst.msk [vmem:[%s2362_s3 + $0x228] sm:$0xff] %vm918_vm0, %v887_v27  ;;  %v420_v30 = vadd.f32 %v1857_v57, %v419_v28  ;;  %v670_v31 = vadd.f32 %v1857_v57, %v669_v29  ;;  %v421_v32 = vpop.f32.mrb[41].mxu0  ;;  %v671_v33 = vpop.f32.mrb[41].mxu1 }
 0x169   :  { %v838_v34 = vmax.f32 %v420_v30, 0.0  ;;  %v888_v35 = vmax.f32 %v670_v31, 0.0 }
 0x16a   :  { %v424_v36 = vpop.f32.mrb[42].mxu0  ;;  %v674_v37 = vpop.f32.mrb[42].mxu1 }
 0x16b   :  { %939 = vst.msk [vmem:[%s2362_s3 + $0xa0] sm:$0xff] %vm918_vm0, %v838_v34  ;;  %989 = vst.msk [vmem:[%s2362_s3 + $0x230] sm:$0xff] %vm918_vm0, %v888_v35  ;;  %v425_v38 = vadd.f32 %v1857_v57, %v424_v36  ;;  %v675_v39 = vadd.f32 %v1857_v57, %v674_v37  ;;  %v426_v40 = vpop.f32.mrb[43].mxu0  ;;  %v676_v41 = vpop.f32.mrb[43].mxu1 }
 0x16d   :  { %v839_v42 = vmax.f32 %v425_v38, 0.0  ;;  %v889_v43 = vmax.f32 %v675_v39, 0.0 }
 0x16e   :  { %v429_v44 = vpop.f32.mrb[44].mxu0  ;;  %v679_v45 = vpop.f32.mrb[44].mxu1 }
 0x16f   :  { %940 = vst.msk [vmem:[%s2362_s3 + $0xa8] sm:$0xff] %vm918_vm0, %v839_v42  ;;  %990 = vst.msk [vmem:[%s2362_s3 + $0x238] sm:$0xff] %vm918_vm0, %v889_v43  ;;  %v430_v46 = vadd.f32 %v1857_v57, %v429_v44  ;;  %v680_v47 = vadd.f32 %v1857_v57, %v679_v45  ;;  %v431_v48 = vpop.f32.mrb[45].mxu0  ;;  %v681_v49 = vpop.f32.mrb[45].mxu1 }
 0x171   :  { %v840_v50 = vmax.f32 %v430_v46, 0.0  ;;  %v890_v51 = vmax.f32 %v680_v47, 0.0 }
 0x172   :  { %v434_v52 = vpop.f32.mrb[46].mxu0  ;;  %v684_v53 = vpop.f32.mrb[46].mxu1 }
 0x173   :  { %941 = vst.msk [vmem:[%s2362_s3 + $0xb0] sm:$0xff] %vm918_vm0, %v840_v50  ;;  %991 = vst.msk [vmem:[%s2362_s3 + $0x240] sm:$0xff] %vm918_vm0, %v890_v51  ;;  %v435_v54 = vadd.f32 %v1857_v57, %v434_v52  ;;  %v685_v55 = vadd.f32 %v1857_v57, %v684_v53  ;;  %v436_v56 = vpop.f32.mrb[47].mxu0  ;;  %v686_v58 = vpop.f32.mrb[47].mxu1 }
 0x175   :  { %v841_v59 = vmax.f32 %v435_v54, 0.0  ;;  %v891_v60 = vmax.f32 %v685_v55, 0.0 }
 0x176   :  { %v439_v61 = vpop.f32.mrb[48].mxu0  ;;  %v689_v62 = vpop.f32.mrb[48].mxu1 }
 0x177   :  { %942 = vst.msk [vmem:[%s2362_s3 + $0xb8] sm:$0xff] %vm918_vm0, %v841_v59  ;;  %992 = vst.msk [vmem:[%s2362_s3 + $0x248] sm:$0xff] %vm918_vm0, %v891_v60  ;;  %v440_v63 = vadd.f32 %v1857_v57, %v439_v61  ;;  %v690_v0 = vadd.f32 %v1857_v57, %v689_v62  ;;  %v441_v1 = vpop.f32.mrb[49].mxu0  ;;  %v691_v2 = vpop.f32.mrb[49].mxu1 }
 0x179   :  { %v842_v3 = vmax.f32 %v440_v63, 0.0  ;;  %v892_v4 = vmax.f32 %v690_v0, 0.0 }
 0x17a   :  { %v444_v5 = vpop.f32.mrb[50].mxu0  ;;  %v694_v6 = vpop.f32.mrb[50].mxu1 }
 0x17b   :  { %943 = vst.msk [vmem:[%s2362_s3 + $0xc0] sm:$0xff] %vm918_vm0, %v842_v3  ;;  %993 = vst.msk [vmem:[%s2362_s3 + $0x250] sm:$0xff] %vm918_vm0, %v892_v4  ;;  %v445_v7 = vadd.f32 %v1857_v57, %v444_v5  ;;  %v695_v8 = vadd.f32 %v1857_v57, %v694_v6  ;;  %v446_v9 = vpop.f32.mrb[51].mxu0  ;;  %v696_v10 = vpop.f32.mrb[51].mxu1 }
 0x17d   :  { %v843_v11 = vmax.f32 %v445_v7, 0.0  ;;  %v893_v12 = vmax.f32 %v695_v8, 0.0 }
 0x17e   :  { %v449_v13 = vpop.f32.mrb[52].mxu0  ;;  %v699_v14 = vpop.f32.mrb[52].mxu1 }
 0x17f   :  { %944 = vst.msk [vmem:[%s2362_s3 + $0xc8] sm:$0xff] %vm918_vm0, %v843_v11  ;;  %994 = vst.msk [vmem:[%s2362_s3 + $0x258] sm:$0xff] %vm918_vm0, %v893_v12  ;;  %v450_v15 = vadd.f32 %v1857_v57, %v449_v13  ;;  %v700_v16 = vadd.f32 %v1857_v57, %v699_v14  ;;  %v451_v17 = vpop.f32.mrb[53].mxu0  ;;  %v701_v18 = vpop.f32.mrb[53].mxu1 }
 0x181   :  { %v844_v19 = vmax.f32 %v450_v15, 0.0  ;;  %v894_v20 = vmax.f32 %v700_v16, 0.0 }
 0x182   :  { %v454_v21 = vpop.f32.mrb[54].mxu0  ;;  %v704_v22 = vpop.f32.mrb[54].mxu1 }
 0x183   :  { %945 = vst.msk [vmem:[%s2362_s3 + $0xd0] sm:$0xff] %vm918_vm0, %v844_v19  ;;  %995 = vst.msk [vmem:[%s2362_s3 + $0x260] sm:$0xff] %vm918_vm0, %v894_v20  ;;  %v455_v23 = vadd.f32 %v1857_v57, %v454_v21  ;;  %v705_v24 = vadd.f32 %v1857_v57, %v704_v22  ;;  %v456_v25 = vpop.f32.mrb[55].mxu0  ;;  %v706_v26 = vpop.f32.mrb[55].mxu1 }
 0x185   :  { %v845_v27 = vmax.f32 %v455_v23, 0.0  ;;  %v895_v28 = vmax.f32 %v705_v24, 0.0 }
 0x186   :  { %v459_v29 = vpop.f32.mrb[56].mxu0  ;;  %v709_v30 = vpop.f32.mrb[56].mxu1 }
 0x187   :  { %946 = vst.msk [vmem:[%s2362_s3 + $0xd8] sm:$0xff] %vm918_vm0, %v845_v27  ;;  %996 = vst.msk [vmem:[%s2362_s3 + $0x268] sm:$0xff] %vm918_vm0, %v895_v28  ;;  %v460_v31 = vadd.f32 %v1857_v57, %v459_v29  ;;  %v710_v32 = vadd.f32 %v1857_v57, %v709_v30  ;;  %v461_v33 = vpop.f32.mrb[57].mxu0  ;;  %v711_v34 = vpop.f32.mrb[57].mxu1 }
 0x189   :  { %v846_v35 = vmax.f32 %v460_v31, 0.0  ;;  %v896_v36 = vmax.f32 %v710_v32, 0.0 }
 0x18a   :  { %v464_v37 = vpop.f32.mrb[58].mxu0  ;;  %v714_v38 = vpop.f32.mrb[58].mxu1 }
 0x18b   :  { %947 = vst.msk [vmem:[%s2362_s3 + $0xe0] sm:$0xff] %vm918_vm0, %v846_v35  ;;  %997 = vst.msk [vmem:[%s2362_s3 + $0x270] sm:$0xff] %vm918_vm0, %v896_v36  ;;  %v465_v39 = vadd.f32 %v1857_v57, %v464_v37  ;;  %v715_v40 = vadd.f32 %v1857_v57, %v714_v38  ;;  %v466_v41 = vpop.f32.mrb[59].mxu0  ;;  %v716_v42 = vpop.f32.mrb[59].mxu1 }
 0x18d   :  { %v847_v43 = vmax.f32 %v465_v39, 0.0  ;;  %v897_v44 = vmax.f32 %v715_v40, 0.0 }
 0x18e   :  { %v469_v45 = vpop.f32.mrb[60].mxu0  ;;  %v719_v46 = vpop.f32.mrb[60].mxu1 }
 0x18f   :  { %948 = vst.msk [vmem:[%s2362_s3 + $0xe8] sm:$0xff] %vm918_vm0, %v847_v43  ;;  %998 = vst.msk [vmem:[%s2362_s3 + $0x278] sm:$0xff] %vm918_vm0, %v897_v44  ;;  %v470_v47 = vadd.f32 %v1857_v57, %v469_v45  ;;  %v720_v48 = vadd.f32 %v1857_v57, %v719_v46  ;;  %v471_v49 = vpop.f32.mrb[61].mxu0  ;;  %v721_v50 = vpop.f32.mrb[61].mxu1 }
 0x191   :  { %v848_v51 = vmax.f32 %v470_v47, 0.0  ;;  %v898_v52 = vmax.f32 %v720_v48, 0.0 }
 0x192   :  { %v474_v53 = vpop.f32.mrb[62].mxu0  ;;  %v724_v54 = vpop.f32.mrb[62].mxu1 }
 0x193   :  { %949 = vst.msk [vmem:[%s2362_s3 + $0xf0] sm:$0xff] %vm918_vm0, %v848_v51  ;;  %999 = vst.msk [vmem:[%s2362_s3 + $0x280] sm:$0xff] %vm918_vm0, %v898_v52  ;;  %v475_v55 = vadd.f32 %v1857_v57, %v474_v53  ;;  %v725_v56 = vadd.f32 %v1857_v57, %v724_v54  ;;  %v476_v58 = vpop.f32.mrb[63].mxu0  ;;  %v726_v59 = vpop.f32.mrb[63].mxu1 }
 0x195   :  { %v849_v60 = vmax.f32 %v475_v55, 0.0  ;;  %v899_v61 = vmax.f32 %v725_v56, 0.0 }
 0x196   :  { %v479_v62 = vpop.f32.mrb[64].mxu0  ;;  %v729_v63 = vpop.f32.mrb[64].mxu1 }
 0x197   :  { %950 = vst.msk [vmem:[%s2362_s3 + $0xf8] sm:$0xff] %vm918_vm0, %v849_v60  ;;  %1000 = vst.msk [vmem:[%s2362_s3 + $0x288] sm:$0xff] %vm918_vm0, %v899_v61  ;;  %v480_v0 = vadd.f32 %v1857_v57, %v479_v62  ;;  %v730_v1 = vadd.f32 %v1857_v57, %v729_v63  ;;  %v481_v2 = vpop.f32.mrb[65].mxu0  ;;  %v731_v3 = vpop.f32.mrb[65].mxu1 }
 0x199   :  { %v850_v4 = vmax.f32 %v480_v0, 0.0  ;;  %v900_v5 = vmax.f32 %v730_v1, 0.0 }
 0x19a   :  { %v484_v6 = vpop.f32.mrb[66].mxu0  ;;  %v734_v7 = vpop.f32.mrb[66].mxu1 }
 0x19b   :  { %951 = vst.msk [vmem:[%s2362_s3 + $0x100] sm:$0xff] %vm918_vm0, %v850_v4  ;;  %1001 = vst.msk [vmem:[%s2362_s3 + $0x290] sm:$0xff] %vm918_vm0, %v900_v5  ;;  %v485_v8 = vadd.f32 %v1857_v57, %v484_v6  ;;  %v735_v9 = vadd.f32 %v1857_v57, %v734_v7  ;;  %v486_v10 = vpop.f32.mrb[67].mxu0  ;;  %v736_v11 = vpop.f32.mrb[67].mxu1 }
 0x19d   :  { %v851_v12 = vmax.f32 %v485_v8, 0.0  ;;  %v901_v13 = vmax.f32 %v735_v9, 0.0 }
 0x19e   :  { %v489_v14 = vpop.f32.mrb[68].mxu0  ;;  %v739_v15 = vpop.f32.mrb[68].mxu1 }
 0x19f   :  { %952 = vst.msk [vmem:[%s2362_s3 + $0x108] sm:$0xff] %vm918_vm0, %v851_v12  ;;  %1002 = vst.msk [vmem:[%s2362_s3 + $0x298] sm:$0xff] %vm918_vm0, %v901_v13  ;;  %v490_v16 = vadd.f32 %v1857_v57, %v489_v14  ;;  %v740_v17 = vadd.f32 %v1857_v57, %v739_v15  ;;  %v491_v18 = vpop.f32.mrb[69].mxu0  ;;  %v741_v19 = vpop.f32.mrb[69].mxu1 }
 0x1a1   :  { %v852_v20 = vmax.f32 %v490_v16, 0.0  ;;  %v902_v21 = vmax.f32 %v740_v17, 0.0 }
 0x1a2   :  { %v494_v22 = vpop.f32.mrb[70].mxu0  ;;  %v744_v23 = vpop.f32.mrb[70].mxu1 }
 0x1a3   :  { %953 = vst.msk [vmem:[%s2362_s3 + $0x110] sm:$0xff] %vm918_vm0, %v852_v20  ;;  %1003 = vst.msk [vmem:[%s2362_s3 + $0x2a0] sm:$0xff] %vm918_vm0, %v902_v21  ;;  %v495_v24 = vadd.f32 %v1857_v57, %v494_v22  ;;  %v745_v25 = vadd.f32 %v1857_v57, %v744_v23  ;;  %v496_v26 = vpop.f32.mrb[71].mxu0  ;;  %v746_v27 = vpop.f32.mrb[71].mxu1 }
 0x1a5   :  { %v853_v28 = vmax.f32 %v495_v24, 0.0  ;;  %v903_v29 = vmax.f32 %v745_v25, 0.0 }
 0x1a6   :  { %v499_v30 = vpop.f32.mrb[72].mxu0  ;;  %v749_v31 = vpop.f32.mrb[72].mxu1 }
 0x1a7   :  { %954 = vst.msk [vmem:[%s2362_s3 + $0x118] sm:$0xff] %vm918_vm0, %v853_v28  ;;  %1004 = vst.msk [vmem:[%s2362_s3 + $0x2a8] sm:$0xff] %vm918_vm0, %v903_v29  ;;  %v500_v32 = vadd.f32 %v1857_v57, %v499_v30  ;;  %v750_v33 = vadd.f32 %v1857_v57, %v749_v31  ;;  %v501_v34 = vpop.f32.mrb[73].mxu0  ;;  %v751_v35 = vpop.f32.mrb[73].mxu1 }
 0x1a9   :  { %v854_v36 = vmax.f32 %v500_v32, 0.0  ;;  %v904_v37 = vmax.f32 %v750_v33, 0.0 }
 0x1aa   :  { %v504_v38 = vpop.f32.mrb[74].mxu0  ;;  %v754_v39 = vpop.f32.mrb[74].mxu1 }
 0x1ab   :  { %955 = vst.msk [vmem:[%s2362_s3 + $0x120] sm:$0xff] %vm918_vm0, %v854_v36  ;;  %1005 = vst.msk [vmem:[%s2362_s3 + $0x2b0] sm:$0xff] %vm918_vm0, %v904_v37  ;;  %v505_v40 = vadd.f32 %v1857_v57, %v504_v38  ;;  %v755_v41 = vadd.f32 %v1857_v57, %v754_v39  ;;  %v506_v42 = vpop.f32.mrb[75].mxu0  ;;  %v756_v43 = vpop.f32.mrb[75].mxu1 }
 0x1ad   :  { %v855_v44 = vmax.f32 %v505_v40, 0.0  ;;  %v905_v45 = vmax.f32 %v755_v41, 0.0 }
 0x1ae   :  { %v509_v46 = vpop.f32.mrb[76].mxu0  ;;  %v759_v47 = vpop.f32.mrb[76].mxu1 }
 0x1af   :  { %956 = vst.msk [vmem:[%s2362_s3 + $0x128] sm:$0xff] %vm918_vm0, %v855_v44  ;;  %1006 = vst.msk [vmem:[%s2362_s3 + $0x2b8] sm:$0xff] %vm918_vm0, %v905_v45  ;;  %v510_v48 = vadd.f32 %v1857_v57, %v509_v46  ;;  %v760_v49 = vadd.f32 %v1857_v57, %v759_v47  ;;  %v511_v50 = vpop.f32.mrb[77].mxu0  ;;  %v761_v51 = vpop.f32.mrb[77].mxu1 }
 0x1b1   :  { %v856_v52 = vmax.f32 %v510_v48, 0.0  ;;  %v906_v53 = vmax.f32 %v760_v49, 0.0 }
 0x1b2   :  { %v514_v54 = vpop.f32.mrb[78].mxu0  ;;  %v764_v55 = vpop.f32.mrb[78].mxu1 }
 0x1b3   :  { %957 = vst.msk [vmem:[%s2362_s3 + $0x130] sm:$0xff] %vm918_vm0, %v856_v52  ;;  %1007 = vst.msk [vmem:[%s2362_s3 + $0x2c0] sm:$0xff] %vm918_vm0, %v906_v53  ;;  %v515_v56 = vadd.f32 %v1857_v57, %v514_v54  ;;  %v765_v58 = vadd.f32 %v1857_v57, %v764_v55  ;;  %v516_v59 = vpop.f32.mrb[79].mxu0  ;;  %v766_v60 = vpop.f32.mrb[79].mxu1 }
 0x1b5   :  { %v857_v61 = vmax.f32 %v515_v56, 0.0  ;;  %v907_v62 = vmax.f32 %v765_v58, 0.0 }
 0x1b6   :  { %v519_v63 = vpop.f32.mrb[80].mxu0  ;;  %v769_v0 = vpop.f32.mrb[80].mxu1 }
 0x1b7   :  { %958 = vst.msk [vmem:[%s2362_s3 + $0x138] sm:$0xff] %vm918_vm0, %v857_v61  ;;  %1008 = vst.msk [vmem:[%s2362_s3 + $0x2c8] sm:$0xff] %vm918_vm0, %v907_v62  ;;  %v520_v1 = vadd.f32 %v1857_v57, %v519_v63  ;;  %v770_v2 = vadd.f32 %v1857_v57, %v769_v0  ;;  %v521_v3 = vpop.f32.mrb[81].mxu0  ;;  %v771_v4 = vpop.f32.mrb[81].mxu1 }
 0x1b9   :  { %v858_v5 = vmax.f32 %v520_v1, 0.0  ;;  %v908_v6 = vmax.f32 %v770_v2, 0.0 }
 0x1ba   :  { %v524_v7 = vpop.f32.mrb[82].mxu0  ;;  %v774_v8 = vpop.f32.mrb[82].mxu1 }
 0x1bb   :  { %959 = vst.msk [vmem:[%s2362_s3 + $0x140] sm:$0xff] %vm918_vm0, %v858_v5  ;;  %1009 = vst.msk [vmem:[%s2362_s3 + $0x2d0] sm:$0xff] %vm918_vm0, %v908_v6  ;;  %v525_v9 = vadd.f32 %v1857_v57, %v524_v7  ;;  %v775_v10 = vadd.f32 %v1857_v57, %v774_v8  ;;  %v526_v11 = vpop.f32.mrb[83].mxu0  ;;  %v776_v12 = vpop.f32.mrb[83].mxu1 }
 0x1bd   :  { %v859_v13 = vmax.f32 %v525_v9, 0.0  ;;  %v909_v14 = vmax.f32 %v775_v10, 0.0 }
 0x1be   :  { %v529_v15 = vpop.f32.mrb[84].mxu0  ;;  %v779_v16 = vpop.f32.mrb[84].mxu1 }
 0x1bf   :  { %960 = vst.msk [vmem:[%s2362_s3 + $0x148] sm:$0xff] %vm918_vm0, %v859_v13  ;;  %1010 = vst.msk [vmem:[%s2362_s3 + $0x2d8] sm:$0xff] %vm918_vm0, %v909_v14  ;;  %v530_v17 = vadd.f32 %v1857_v57, %v529_v15  ;;  %v780_v18 = vadd.f32 %v1857_v57, %v779_v16  ;;  %v531_v19 = vpop.f32.mrb[85].mxu0  ;;  %v781_v20 = vpop.f32.mrb[85].mxu1 }
 0x1c1   :  { %v860_v21 = vmax.f32 %v530_v17, 0.0  ;;  %v910_v22 = vmax.f32 %v780_v18, 0.0 }
 0x1c2   :  { %v534_v23 = vpop.f32.mrb[86].mxu0  ;;  %v784_v24 = vpop.f32.mrb[86].mxu1 }
 0x1c3   :  { %961 = vst.msk [vmem:[%s2362_s3 + $0x150] sm:$0xff] %vm918_vm0, %v860_v21  ;;  %1011 = vst.msk [vmem:[%s2362_s3 + $0x2e0] sm:$0xff] %vm918_vm0, %v910_v22  ;;  %v535_v25 = vadd.f32 %v1857_v57, %v534_v23  ;;  %v785_v26 = vadd.f32 %v1857_v57, %v784_v24  ;;  %v536_v27 = vpop.f32.mrb[87].mxu0  ;;  %v786_v28 = vpop.f32.mrb[87].mxu1 }
 0x1c5   :  { %v861_v29 = vmax.f32 %v535_v25, 0.0  ;;  %v911_v30 = vmax.f32 %v785_v26, 0.0 }
 0x1c6   :  { %v539_v31 = vpop.f32.mrb[88].mxu0  ;;  %v789_v32 = vpop.f32.mrb[88].mxu1 }
 0x1c7   :  { %962 = vst.msk [vmem:[%s2362_s3 + $0x158] sm:$0xff] %vm918_vm0, %v861_v29  ;;  %1012 = vst.msk [vmem:[%s2362_s3 + $0x2e8] sm:$0xff] %vm918_vm0, %v911_v30  ;;  %v540_v33 = vadd.f32 %v1857_v57, %v539_v31  ;;  %v790_v34 = vadd.f32 %v1857_v57, %v789_v32  ;;  %v541_v35 = vpop.f32.mrb[89].mxu0  ;;  %v791_v36 = vpop.f32.mrb[89].mxu1 }
 0x1c9   :  { %v862_v37 = vmax.f32 %v540_v33, 0.0  ;;  %v912_v38 = vmax.f32 %v790_v34, 0.0 }
 0x1ca   :  { %v544_v39 = vpop.f32.mrb[90].mxu0  ;;  %v794_v40 = vpop.f32.mrb[90].mxu1 }
 0x1cb   :  { %963 = vst.msk [vmem:[%s2362_s3 + $0x160] sm:$0xff] %vm918_vm0, %v862_v37  ;;  %1013 = vst.msk [vmem:[%s2362_s3 + $0x2f0] sm:$0xff] %vm918_vm0, %v912_v38  ;;  %v545_v41 = vadd.f32 %v1857_v57, %v544_v39  ;;  %v795_v42 = vadd.f32 %v1857_v57, %v794_v40  ;;  %v546_v43 = vpop.f32.mrb[91].mxu0  ;;  %v796_v44 = vpop.f32.mrb[91].mxu1 }
 0x1cd   :  { %v863_v45 = vmax.f32 %v545_v41, 0.0  ;;  %v913_v46 = vmax.f32 %v795_v42, 0.0 }
 0x1ce   :  { %v549_v47 = vpop.f32.mrb[92].mxu0  ;;  %v799_v48 = vpop.f32.mrb[92].mxu1 }
 0x1cf   :  { %964 = vst.msk [vmem:[%s2362_s3 + $0x168] sm:$0xff] %vm918_vm0, %v863_v45  ;;  %1014 = vst.msk [vmem:[%s2362_s3 + $0x2f8] sm:$0xff] %vm918_vm0, %v913_v46  ;;  %v550_v49 = vadd.f32 %v1857_v57, %v549_v47  ;;  %v800_v50 = vadd.f32 %v1857_v57, %v799_v48  ;;  %v551_v51 = vpop.f32.mrb[93].mxu0  ;;  %v801_v52 = vpop.f32.mrb[93].mxu1 }
 0x1d1   :  { %v864_v53 = vmax.f32 %v550_v49, 0.0  ;;  %v914_v54 = vmax.f32 %v800_v50, 0.0 }
 0x1d2   :  { %v554_v55 = vpop.f32.mrb[94].mxu0  ;;  %v804_v56 = vpop.f32.mrb[94].mxu1 }
 0x1d3   :  { %965 = vst.msk [vmem:[%s2362_s3 + $0x170] sm:$0xff] %vm918_vm0, %v864_v53  ;;  %1015 = vst.msk [vmem:[%s2362_s3 + $0x300] sm:$0xff] %vm918_vm0, %v914_v54  ;;  %v555_v58 = vadd.f32 %v1857_v57, %v554_v55  ;;  %v805_v59 = vadd.f32 %v1857_v57, %v804_v56  ;;  %v556_v60 = vpop.f32.mrb[95].mxu0  ;;  %v806_v61 = vpop.f32.mrb[95].mxu1 }
 0x1d5   :  { %v865_v62 = vmax.f32 %v555_v58, 0.0  ;;  %v915_v63 = vmax.f32 %v805_v59, 0.0 }
 0x1d6   :  { %v559_v0 = vpop.f32.mrb[96].mxu0  ;;  %v809_v1 = vpop.f32.mrb[96].mxu1 }
 0x1d7   :  { %966 = vst.msk [vmem:[%s2362_s3 + $0x178] sm:$0xff] %vm918_vm0, %v865_v62  ;;  %1016 = vst.msk [vmem:[%s2362_s3 + $0x308] sm:$0xff] %vm918_vm0, %v915_v63  ;;  %v560_v2 = vadd.f32 %v1857_v57, %v559_v0  ;;  %v810_v3 = vadd.f32 %v1857_v57, %v809_v1  ;;  %v561_v4 = vpop.f32.mrb[97].mxu0  ;;  %v811_v5 = vpop.f32.mrb[97].mxu1 }
 0x1d9   :  { %v866_v6 = vmax.f32 %v560_v2, 0.0  ;;  %v916_v7 = vmax.f32 %v810_v3, 0.0 }
 0x1da   :  { %v564_v8 = vpop.f32.mrb[98].mxu0  ;;  %v814_v9 = vpop.f32.mrb[98].mxu1 }
 0x1db   :  { %967 = vst.msk [vmem:[%s2362_s3 + $0x180] sm:$0xff] %vm918_vm0, %v866_v6  ;;  %1017 = vst.msk [vmem:[%s2362_s3 + $0x310] sm:$0xff] %vm918_vm0, %v916_v7  ;;  %v565_v10 = vadd.f32 %v1857_v57, %v564_v8  ;;  %v815_v11 = vadd.f32 %v1857_v57, %v814_v9  ;;  %v566_v12 = vpop.f32.mrb[99].mxu0  ;;  %v816_v13 = vpop.f32.mrb[99].mxu1 }
 0x1dd   :  { %v867_v14 = vmax.f32 %v565_v10, 0.0  ;;  %v917_v15 = vmax.f32 %v815_v11, 0.0 }
 0x1df   :  { %968 = vst.msk [vmem:[%s2362_s3 + $0x188] sm:$0xff] %vm918_vm0, %v867_v14  ;;  %1018 = vst.msk [vmem:[%s2362_s3 + $0x318] sm:$0xff] %vm918_vm0, %v917_v15 }

// kernel: dueling_dqn_forward.5
= control target key start
LH: loop header
LB: loop body
LE: loop exit
PB: predicated region body
PF: predicated region fallthrough
CT: control target
= control target key end

     0   :  { %v697_v0 = vmov 0.0|0.0   ;;  %vm530_vm0 = vcmask 523264   ;;  %vm551_vm1 = vcmask 517120   ;;  %s1303_s1 = inlined_call_operand.vmem [shape: f32[512,64], index: 1, kind: input, shape index: {}]   ;;  %s1304_s0 = inlined_call_operand.vmem [shape: f32[162,512], index: 0, kind: input, shape index: {}]   ;;  %s1305_s2 = inlined_call_operand.vmem [shape: f32[1,64], index: 2, kind: input, shape index: {}]   ;;  %s1306_s3 = inlined_call_operand.vmem [shape: f32[162,64], index: 3, kind: output, shape index: {}]  }
   0x1   :  { %558 = vmatprep.subr.bf16.mxu1 %v697_v0  ;;  %v98_v1 = vld [vmem:[%s1303_s1] sm:$0xff]  ;;  %v99_v2 = vld [vmem:[%s1303_s1 + $0x8] sm:$0xff]  ;;  %606 = vmatprep.subr.bf16.mxu0 %v697_v0  ;;  %v100_v6 = vld [vmem:[%s1303_s1 + $0x10] sm:$0xff] }
   0x2   :  { %v130_v3 = vld [vmem:[%s1303_s1 + $0x100] sm:$0xff]  ;;  %v559_v4 = vpack.c.bf16 %v99_v2, %v98_v1  ;;  %v131_v5 = vld [vmem:[%s1303_s1 + $0x108] sm:$0xff]  ;;  %v101_v7 = vld [vmem:[%s1303_s1 + $0x18] sm:$0xff] }
   0x3   :  { %v607_v8 = vpack.c.bf16 %v131_v5, %v130_v3  ;;  %v132_v9 = vld [vmem:[%s1303_s1 + $0x110] sm:$0xff]  ;;  %v133_v10 = vld [vmem:[%s1303_s1 + $0x118] sm:$0xff]  ;;  %v562_v11 = vpack.c.bf16 %v101_v7, %v100_v6  ;;  %v102_v13 = vld [vmem:[%s1303_s1 + $0x20] sm:$0xff] }
   0x4   :  { %560 = vmatpush1.bf16.msra.mxu1 %v559_v4  ;;  %v610_v12 = vpack.c.bf16 %v133_v10, %v132_v9  ;;  %v103_v14 = vld [vmem:[%s1303_s1 + $0x28] sm:$0xff]  ;;  %v134_v15 = vld [vmem:[%s1303_s1 + $0x120] sm:$0xff]  ;;  %v104_v19 = vld [vmem:[%s1303_s1 + $0x30] sm:$0xff] }
   0x5   :  { %608 = vmatpush1.bf16.msra.mxu0 %v607_v8  ;;  %561 = vmatprep.subr.bf16.mxu1 %v697_v0  ;;  %v135_v16 = vld [vmem:[%s1303_s1 + $0x128] sm:$0xff]  ;;  %v565_v17 = vpack.c.bf16 %v103_v14, %v102_v13  ;;  %v105_v20 = vld [vmem:[%s1303_s1 + $0x38] sm:$0xff]  ;;  %v136_v21 = vld [vmem:[%s1303_s1 + $0x130] sm:$0xff] }
   0x6   :  { %609 = vmatprep.subr.bf16.mxu0 %v697_v0  ;;  %v613_v18 = vpack.c.bf16 %v135_v16, %v134_v15  ;;  %v137_v22 = vld [vmem:[%s1303_s1 + $0x138] sm:$0xff]  ;;  %v568_v23 = vpack.c.bf16 %v105_v20, %v104_v19  ;;  %v106_v25 = vld [vmem:[%s1303_s1 + $0x40] sm:$0xff]  ;;  %v107_v26 = vld [vmem:[%s1303_s1 + $0x48] sm:$0xff] }
   0x7   :  { %v616_v24 = vpack.c.bf16 %v137_v22, %v136_v21  ;;  %v138_v27 = vld [vmem:[%s1303_s1 + $0x140] sm:$0xff]  ;;  %v139_v28 = vld [vmem:[%s1303_s1 + $0x148] sm:$0xff]  ;;  %v571_v29 = vpack.c.bf16 %v107_v26, %v106_v25  ;;  %v108_v31 = vld [vmem:[%s1303_s1 + $0x50] sm:$0xff] }
   0x8   :  { %563 = vmatpush1.bf16.msra.mxu1 %v562_v11  ;;  %v619_v30 = vpack.c.bf16 %v139_v28, %v138_v27  ;;  %v109_v32 = vld [vmem:[%s1303_s1 + $0x58] sm:$0xff]  ;;  %v140_v33 = vld [vmem:[%s1303_s1 + $0x150] sm:$0xff]  ;;  %v110_v37 = vld [vmem:[%s1303_s1 + $0x60] sm:$0xff] }
   0x9   :  { %611 = vmatpush1.bf16.msra.mxu0 %v610_v12  ;;  %564 = vmatprep.subr.bf16.mxu1 %v697_v0  ;;  %v141_v34 = vld [vmem:[%s1303_s1 + $0x158] sm:$0xff]  ;;  %v574_v35 = vpack.c.bf16 %v109_v32, %v108_v31  ;;  %v111_v38 = vld [vmem:[%s1303_s1 + $0x68] sm:$0xff]  ;;  %v142_v39 = vld [vmem:[%s1303_s1 + $0x160] sm:$0xff] }
   0xa   :  { %612 = vmatprep.subr.bf16.mxu0 %v697_v0  ;;  %v622_v36 = vpack.c.bf16 %v141_v34, %v140_v33  ;;  %v143_v40 = vld [vmem:[%s1303_s1 + $0x168] sm:$0xff]  ;;  %v17_v42 = vld [vmem:[%s1304_s0 + $0x18] sm:$0xff]  ;;  %v577_v43 = vpack.c.bf16 %v111_v38, %v110_v37  ;;  %v112_v45 = vld [vmem:[%s1303_s1 + $0x70] sm:$0xff] }
   0xb   :  { %v15_v41 = vld [vmem:[%s1304_s0 + $0x8] sm:$0xff]  ;;  %403 = vmatprep.mubr.f32.mxu0 %v17_v42  ;;  %v625_v44 = vpack.c.bf16 %v143_v40, %v142_v39  ;;  %v113_v46 = vld [vmem:[%s1303_s1 + $0x78] sm:$0xff]  ;;  %v144_v47 = vld [vmem:[%s1303_s1 + $0x170] sm:$0xff] }
   0xc   :  { %566 = vmatpush1.bf16.msra.mxu1 %v565_v17  ;;  %233 = vmatprep.mubr.f32.mxu1 %v15_v41  ;;  %v145_v48 = vld [vmem:[%s1303_s1 + $0x178] sm:$0xff]  ;;  %v580_v49 = vpack.c.bf16 %v113_v46, %v112_v45  ;;  %v114_v51 = vld [vmem:[%s1303_s1 + $0x80] sm:$0xff]  ;;  %v115_v52 = vld [vmem:[%s1303_s1 + $0x88] sm:$0xff] }
   0xd   :  { %614 = vmatpush1.bf16.msra.mxu0 %v613_v18  ;;  %567 = vmatprep.subr.bf16.mxu1 %v697_v0  ;;  %v628_v50 = vpack.c.bf16 %v145_v48, %v144_v47  ;;  %v146_v53 = vld [vmem:[%s1303_s1 + $0x180] sm:$0xff]  ;;  %v147_v54 = vld [vmem:[%s1303_s1 + $0x188] sm:$0xff]  ;;  %v583_v55 = vpack.c.bf16 %v115_v52, %v114_v51  ;;  %v116_v57 = vld [vmem:[%s1303_s1 + $0x90] sm:$0xff] }
   0xe   :  { %615 = vmatprep.subr.bf16.mxu0 %v697_v0  ;;  %v631_v56 = vpack.c.bf16 %v147_v54, %v146_v53  ;;  %v117_v58 = vld [vmem:[%s1303_s1 + $0x98] sm:$0xff]  ;;  %v148_v59 = vld [vmem:[%s1303_s1 + $0x190] sm:$0xff]  ;;  %v118_v63 = vld [vmem:[%s1303_s1 + $0xa0] sm:$0xff] }
   0xf   :  { %v149_v60 = vld [vmem:[%s1303_s1 + $0x198] sm:$0xff]  ;;  %v586_v61 = vpack.c.bf16 %v117_v58, %v116_v57  ;;  %v119_v1 = vld [vmem:[%s1303_s1 + $0xa8] sm:$0xff]  ;;  %v150_v2 = vld [vmem:[%s1303_s1 + $0x1a0] sm:$0xff] }
  0x10   :  { %569 = vmatpush1.bf16.msra.mxu1 %v568_v23  ;;  %v634_v62 = vpack.c.bf16 %v149_v60, %v148_v59  ;;  %v151_v3 = vld [vmem:[%s1303_s1 + $0x1a8] sm:$0xff]  ;;  %v589_v4 = vpack.c.bf16 %v119_v1, %v118_v63  ;;  %v120_v6 = vld [vmem:[%s1303_s1 + $0xb0] sm:$0xff]  ;;  %v121_v7 = vld [vmem:[%s1303_s1 + $0xb8] sm:$0xff] }
  0x11   :  { %617 = vmatpush1.bf16.msra.mxu0 %v616_v24  ;;  %570 = vmatprep.subr.bf16.mxu1 %v697_v0  ;;  %v637_v5 = vpack.c.bf16 %v151_v3, %v150_v2  ;;  %v152_v8 = vld [vmem:[%s1303_s1 + $0x1b0] sm:$0xff]  ;;  %v153_v9 = vld [vmem:[%s1303_s1 + $0x1b8] sm:$0xff]  ;;  %v592_v10 = vpack.c.bf16 %v121_v7, %v120_v6  ;;  %v122_v12 = vld [vmem:[%s1303_s1 + $0xc0] sm:$0xff] }
  0x12   :  { %618 = vmatprep.subr.bf16.mxu0 %v697_v0  ;;  %v640_v11 = vpack.c.bf16 %v153_v9, %v152_v8  ;;  %v123_v13 = vld [vmem:[%s1303_s1 + $0xc8] sm:$0xff]  ;;  %v154_v14 = vld [vmem:[%s1303_s1 + $0x1c0] sm:$0xff]  ;;  %v124_v18 = vld [vmem:[%s1303_s1 + $0xd0] sm:$0xff] }
  0x13   :  { %v155_v15 = vld [vmem:[%s1303_s1 + $0x1c8] sm:$0xff]  ;;  %v595_v16 = vpack.c.bf16 %v123_v13, %v122_v12  ;;  %v125_v19 = vld [vmem:[%s1303_s1 + $0xd8] sm:$0xff]  ;;  %v156_v20 = vld [vmem:[%s1303_s1 + $0x1d0] sm:$0xff] }
  0x14   :  { %572 = vmatpush1.bf16.msra.mxu1 %v571_v29  ;;  %v643_v17 = vpack.c.bf16 %v155_v15, %v154_v14  ;;  %v157_v21 = vld [vmem:[%s1303_s1 + $0x1d8] sm:$0xff]  ;;  %v598_v22 = vpack.c.bf16 %v125_v19, %v124_v18  ;;  %v126_v24 = vld [vmem:[%s1303_s1 + $0xe0] sm:$0xff]  ;;  %v127_v25 = vld [vmem:[%s1303_s1 + $0xe8] sm:$0xff] }
  0x15   :  { %620 = vmatpush1.bf16.msra.mxu0 %v619_v30  ;;  %573 = vmatprep.subr.bf16.mxu1 %v697_v0  ;;  %v646_v23 = vpack.c.bf16 %v157_v21, %v156_v20  ;;  %v158_v26 = vld [vmem:[%s1303_s1 + $0x1e0] sm:$0xff]  ;;  %v159_v27 = vld [vmem:[%s1303_s1 + $0x1e8] sm:$0xff]  ;;  %v601_v28 = vpack.c.bf16 %v127_v25, %v126_v24  ;;  %v128_v30 = vld [vmem:[%s1303_s1 + $0xf0] sm:$0xff] }
  0x16   :  { %621 = vmatprep.subr.bf16.mxu0 %v697_v0  ;;  %v649_v29 = vpack.c.bf16 %v159_v27, %v158_v26  ;;  %v129_v31 = vld [vmem:[%s1303_s1 + $0xf8] sm:$0xff]  ;;  %v160_v32 = vld [vmem:[%s1303_s1 + $0x1f0] sm:$0xff]  ;;  %v19_v38 = vld [vmem:[%s1304_s0 + $0x28] sm:$0xff] }
  0x17   :  { %v161_v33 = vld [vmem:[%s1303_s1 + $0x1f8] sm:$0xff]  ;;  %v604_v34 = vpack.c.bf16 %v129_v31, %v128_v30  ;;  %v16_v37 = vld [vmem:[%s1304_s0 + $0x10] sm:$0xff]  ;;  %v23_v41 = vld [vmem:[%s1304_s0 + $0x48] sm:$0xff] }
  0x18   :  { %575 = vmatpush1.bf16.msra.mxu1 %v574_v35  ;;  %v652_v35 = vpack.c.bf16 %v161_v33, %v160_v32  ;;  %v21_v39 = vld [vmem:[%s1304_s0 + $0x38] sm:$0xff]  ;;  %v20_v40 = vld [vmem:[%s1304_s0 + $0x30] sm:$0xff]  ;;  %v27_v45 = vld [vmem:[%s1304_s0 + $0x68] sm:$0xff] }
  0x19   :  { %623 = vmatpush1.bf16.msra.mxu0 %v622_v36  ;;  %576 = vmatprep.subr.bf16.mxu1 %v697_v0  ;;  %v14_v36 = vld [vmem:[%s1304_s0] sm:$0xff]  ;;  %v25_v42 = vld [vmem:[%s1304_s0 + $0x58] sm:$0xff]  ;;  %v28_v48 = vld [vmem:[%s1304_s0 + $0x70] sm:$0xff] }
  0x1a   :  { %624 = vmatprep.subr.bf16.mxu0 %v697_v0  ;;  %v29_v46 = vld [vmem:[%s1304_s0 + $0x78] sm:$0xff]  ;;  %v26_v47 = vld [vmem:[%s1304_s0 + $0x60] sm:$0xff]  ;;  %v32_v52 = vld [vmem:[%s1304_s0 + $0x90] sm:$0xff] }
  0x1b   :  { %v30_v51 = vld [vmem:[%s1304_s0 + $0x80] sm:$0xff]  ;;  %v35_v53 = vld [vmem:[%s1304_s0 + $0xa8] sm:$0xff]  ;;  %v37_v54 = vld [vmem:[%s1304_s0 + $0xb8] sm:$0xff] }
  0x1c   :  { %578 = vmatpush1.bf16.msra.mxu1 %v577_v43  ;;  %v22_v43 = vld [vmem:[%s1304_s0 + $0x40] sm:$0xff]  ;;  %v39_v57 = vld [vmem:[%s1304_s0 + $0xc8] sm:$0xff]  ;;  %v41_v58 = vld [vmem:[%s1304_s0 + $0xd8] sm:$0xff] }
  0x1d   :  { %626 = vmatpush1.bf16.msra.mxu0 %v625_v44  ;;  %579 = vmatprep.subr.bf16.mxu1 %v697_v0  ;;  %v24_v44 = vld [vmem:[%s1304_s0 + $0x50] sm:$0xff]  ;;  %v38_v59 = vld [vmem:[%s1304_s0 + $0xc0] sm:$0xff]  ;;  %v47_v2 = vld [vmem:[%s1304_s0 + $0x108] sm:$0xff] }
  0x1e   :  { %627 = vmatprep.subr.bf16.mxu0 %v697_v0  ;;  %v40_v60 = vld [vmem:[%s1304_s0 + $0xd0] sm:$0xff]  ;;  %v42_v63 = vld [vmem:[%s1304_s0 + $0xe0] sm:$0xff]  ;;  %v49_v3 = vld [vmem:[%s1304_s0 + $0x118] sm:$0xff] }
  0x1f   :  { %v44_v1 = vld [vmem:[%s1304_s0 + $0xf0] sm:$0xff]  ;;  %v51_v6 = vld [vmem:[%s1304_s0 + $0x128] sm:$0xff]  ;;  %v53_v7 = vld [vmem:[%s1304_s0 + $0x138] sm:$0xff] }
  0x20   :  { %581 = vmatpush1.bf16.msra.mxu1 %v580_v49  ;;  %v31_v49 = vld [vmem:[%s1304_s0 + $0x88] sm:$0xff]  ;;  %v50_v8 = vld [vmem:[%s1304_s0 + $0x120] sm:$0xff]  ;;  %v52_v9 = vld [vmem:[%s1304_s0 + $0x130] sm:$0xff] }
  0x21   :  { %629 = vmatpush1.bf16.msra.mxu0 %v628_v50  ;;  %582 = vmatprep.subr.bf16.mxu1 %v697_v0  ;;  %v33_v50 = vld [vmem:[%s1304_s0 + $0x98] sm:$0xff]  ;;  %v54_v12 = vld [vmem:[%s1304_s0 + $0x140] sm:$0xff]  ;;  %v56_v13 = vld [vmem:[%s1304_s0 + $0x150] sm:$0xff] }
  0x22   :  { %630 = vmatprep.subr.bf16.mxu0 %v697_v0  ;;  %v59_v14 = vld [vmem:[%s1304_s0 + $0x168] sm:$0xff]  ;;  %v61_v15 = vld [vmem:[%s1304_s0 + $0x178] sm:$0xff]  ;;  %v62_v20 = vld [vmem:[%s1304_s0 + $0x180] sm:$0xff] }
  0x23   :  { %v63_v18 = vld [vmem:[%s1304_s0 + $0x188] sm:$0xff]  ;;  %v65_v19 = vld [vmem:[%s1304_s0 + $0x198] sm:$0xff]  ;;  %v64_v21 = vld [vmem:[%s1304_s0 + $0x190] sm:$0xff] }
  0x24   :  { %584 = vmatpush1.bf16.msra.mxu1 %v583_v55  ;;  %v34_v55 = vld [vmem:[%s1304_s0 + $0xa0] sm:$0xff]  ;;  %v68_v25 = vld [vmem:[%s1304_s0 + $0x1b0] sm:$0xff]  ;;  %v71_v26 = vld [vmem:[%s1304_s0 + $0x1c8] sm:$0xff] }
  0x25   :  { %632 = vmatpush1.bf16.msra.mxu0 %v631_v56  ;;  %585 = vmatprep.subr.bf16.mxu1 %v697_v0  ;;  %v36_v56 = vld [vmem:[%s1304_s0 + $0xb0] sm:$0xff]  ;;  %v66_v24 = vld [vmem:[%s1304_s0 + $0x1a0] sm:$0xff]  ;;  %v73_v27 = vld [vmem:[%s1304_s0 + $0x1d8] sm:$0xff] }
  0x26   :  { %633 = vmatprep.subr.bf16.mxu0 %v697_v0  ;;  %v75_v30 = vld [vmem:[%s1304_s0 + $0x1e8] sm:$0xff]  ;;  %v77_v31 = vld [vmem:[%s1304_s0 + $0x1f8] sm:$0xff]  ;;  %v74_v32 = vld [vmem:[%s1304_s0 + $0x1e0] sm:$0xff] }
  0x27   :  { %v76_v33 = vld [vmem:[%s1304_s0 + $0x1f0] sm:$0xff] }
  0x28   :  { %587 = vmatpush1.bf16.msra.mxu1 %v586_v61  ;;  %v43_v61 = vld [vmem:[%s1304_s0 + $0xe8] sm:$0xff] }
  0x29   :  { %635 = vmatpush1.bf16.msra.mxu0 %v634_v62  ;;  %588 = vmatprep.subr.bf16.mxu1 %v697_v0  ;;  %v45_v62 = vld [vmem:[%s1304_s0 + $0xf8] sm:$0xff] }
  0x2a   :  { %636 = vmatprep.subr.bf16.mxu0 %v697_v0 }
  0x2c   :  { %590 = vmatpush1.bf16.msra.mxu1 %v589_v4  ;;  %v46_v4 = vld [vmem:[%s1304_s0 + $0x100] sm:$0xff] }
  0x2d   :  { %638 = vmatpush1.bf16.msra.mxu0 %v637_v5  ;;  %591 = vmatprep.subr.bf16.mxu1 %v697_v0  ;;  %v48_v5 = vld [vmem:[%s1304_s0 + $0x110] sm:$0xff] }
  0x2e   :  { %639 = vmatprep.subr.bf16.mxu0 %v697_v0 }
  0x30   :  { %593 = vmatpush1.bf16.msra.mxu1 %v592_v10  ;;  %v55_v10 = vld [vmem:[%s1304_s0 + $0x148] sm:$0xff] }
  0x31   :  { %641 = vmatpush1.bf16.msra.mxu0 %v640_v11  ;;  %594 = vmatprep.subr.bf16.mxu1 %v697_v0  ;;  %v57_v11 = vld [vmem:[%s1304_s0 + $0x158] sm:$0xff] }
  0x32   :  { %642 = vmatprep.subr.bf16.mxu0 %v697_v0 }
  0x34   :  { %596 = vmatpush1.bf16.msra.mxu1 %v595_v16  ;;  %v58_v16 = vld [vmem:[%s1304_s0 + $0x160] sm:$0xff] }
  0x35   :  { %644 = vmatpush1.bf16.msra.mxu0 %v643_v17  ;;  %597 = vmatprep.subr.bf16.mxu1 %v697_v0  ;;  %v60_v17 = vld [vmem:[%s1304_s0 + $0x170] sm:$0xff] }
  0x36   :  { %645 = vmatprep.subr.bf16.mxu0 %v697_v0 }
  0x38   :  { %599 = vmatpush1.bf16.msra.mxu1 %v598_v22  ;;  %v67_v22 = vld [vmem:[%s1304_s0 + $0x1a8] sm:$0xff] }
  0x39   :  { %647 = vmatpush1.bf16.msra.mxu0 %v646_v23  ;;  %600 = vmatprep.subr.bf16.mxu1 %v697_v0  ;;  %v69_v23 = vld [vmem:[%s1304_s0 + $0x1b8] sm:$0xff] }
  0x3a   :  { %648 = vmatprep.subr.bf16.mxu0 %v697_v0 }
  0x3c   :  { %602 = vmatpush1.bf16.msra.mxu1 %v601_v28  ;;  %v70_v28 = vld [vmem:[%s1304_s0 + $0x1c0] sm:$0xff] }
  0x3d   :  { %650 = vmatpush1.bf16.msra.mxu0 %v649_v29  ;;  %603 = vmatprep.subr.bf16.mxu1 %v697_v0  ;;  %v72_v29 = vld [vmem:[%s1304_s0 + $0x1d0] sm:$0xff] }
  0x3e   :  { %651 = vmatprep.subr.bf16.mxu0 %v697_v0  ;;  %v18_v0 = vld [vmem:[%s1304_s0 + $0x20] sm:$0xff] }
  0x40   :  { %605 = vmatpush1.bf16.msra.mxu1 %v604_v34  ;;  %v79_v34 = vld [vmem:[%s1304_s0 + $0x208] sm:$0xff] }
  0x41   :  { %653 = vmatpush1.bf16.msra.mxu0 %v652_v35  ;;  %v81_v35 = vld [vmem:[%s1304_s0 + $0x218] sm:$0xff] }
  0x43   :  { %234 = vmatmul.mubr.f32.vlgmr.msra.gmra.mrb[0].mxu1 %v14_v36  ;;  %v78_v36 = vld [vmem:[%s1304_s0 + $0x200] sm:$0xff] }
  0x44   :  { %404 = vmatmul.mubr.f32.vlgmr.msra.gmra.mrb[0].mxu0 %v16_v37  ;;  %238 = vmatprep.mubr.f32.mxu1 %v19_v38  ;;  %v80_v37 = vld [vmem:[%s1304_s0 + $0x210] sm:$0xff]  ;;  %v83_v38 = vld [vmem:[%s1304_s0 + $0x228] sm:$0xff] }
  0x45   :  { %408 = vmatprep.mubr.f32.mxu0 %v21_v39  ;;  %v85_v39 = vld [vmem:[%s1304_s0 + $0x238] sm:$0xff] }
  0x47   :  { %239 = vmatmul.mubr.f32.gmra.mrb[2].mxu1 %v18_v0  ;;  %v82_v0 = vld [vmem:[%s1304_s0 + $0x220] sm:$0xff] }
  0x48   :  { %409 = vmatmul.mubr.f32.gmra.mrb[2].mxu0 %v20_v40  ;;  %243 = vmatprep.mubr.f32.mxu1 %v23_v41  ;;  %v84_v40 = vld [vmem:[%s1304_s0 + $0x230] sm:$0xff]  ;;  %v87_v41 = vld [vmem:[%s1304_s0 + $0x248] sm:$0xff] }
  0x49   :  { %413 = vmatprep.mubr.f32.mxu0 %v25_v42  ;;  %v89_v42 = vld [vmem:[%s1304_s0 + $0x258] sm:$0xff] }
  0x4b   :  { %244 = vmatmul.mubr.f32.gmra.mrb[4].mxu1 %v22_v43  ;;  %v86_v43 = vld [vmem:[%s1304_s0 + $0x240] sm:$0xff] }
  0x4c   :  { %414 = vmatmul.mubr.f32.gmra.mrb[4].mxu0 %v24_v44  ;;  %248 = vmatprep.mubr.f32.mxu1 %v27_v45  ;;  %v88_v44 = vld [vmem:[%s1304_s0 + $0x250] sm:$0xff]  ;;  %v91_v45 = vld [vmem:[%s1304_s0 + $0x268] sm:$0xff] }
  0x4d   :  { %418 = vmatprep.mubr.f32.mxu0 %v29_v46  ;;  %v93_v46 = vld [vmem:[%s1304_s0 + $0x278] sm:$0xff] }
  0x4f   :  { %249 = vmatmul.mubr.f32.gmra.mrb[6].mxu1 %v26_v47  ;;  %v90_v47 = vld [vmem:[%s1304_s0 + $0x260] sm:$0xff] }
  0x50   :  { %419 = vmatmul.mubr.f32.gmra.mrb[6].mxu0 %v28_v48  ;;  %253 = vmatprep.mubr.f32.mxu1 %v31_v49  ;;  %v92_v48 = vld [vmem:[%s1304_s0 + $0x270] sm:$0xff]  ;;  %v95_v49 = vld [vmem:[%s1304_s0 + $0x288] sm:$0x3] }
  0x51   :  { %423 = vmatprep.mubr.f32.mxu0 %v33_v50  ;;  %v97_v50 = vld [vmem:[%s1304_s0 + $0x298] sm:$0x3] }
  0x53   :  { %254 = vmatmul.mubr.f32.gmra.mrb[8].mxu1 %v30_v51  ;;  %v94_v51 = vld [vmem:[%s1304_s0 + $0x280] sm:$0x3] }
  0x54   :  { %424 = vmatmul.mubr.f32.gmra.mrb[8].mxu0 %v32_v52  ;;  %258 = vmatprep.mubr.f32.mxu1 %v35_v53  ;;  %v96_v52 = vld [vmem:[%s1304_s0 + $0x290] sm:$0x3]  ;;  %v1197_v53 = vld [vmem:[%s1305_s2] ss:$0 sm:$0xff] }
  0x55   :  { %428 = vmatprep.mubr.f32.mxu0 %v37_v54 }
  0x57   :  { %259 = vmatmul.mubr.f32.gmra.mrb[10].mxu1 %v34_v55 }
  0x58   :  { %429 = vmatmul.mubr.f32.gmra.mrb[10].mxu0 %v36_v56  ;;  %263 = vmatprep.mubr.f32.mxu1 %v39_v57 }
  0x59   :  { %433 = vmatprep.mubr.f32.mxu0 %v41_v58 }
  0x5b   :  { %264 = vmatmul.mubr.f32.gmra.mrb[12].mxu1 %v38_v59 }
  0x5c   :  { %434 = vmatmul.mubr.f32.gmra.mrb[12].mxu0 %v40_v60  ;;  %268 = vmatprep.mubr.f32.mxu1 %v43_v61 }
  0x5d   :  { %438 = vmatprep.mubr.f32.mxu0 %v45_v62 }
  0x5f   :  { %269 = vmatmul.mubr.f32.gmra.mrb[14].mxu1 %v42_v63 }
  0x60   :  { %439 = vmatmul.mubr.f32.gmra.mrb[14].mxu0 %v44_v1  ;;  %273 = vmatprep.mubr.f32.mxu1 %v47_v2 }
  0x61   :  { %443 = vmatprep.mubr.f32.mxu0 %v49_v3 }
  0x63   :  { %274 = vmatmul.mubr.f32.gmra.mrb[16].mxu1 %v46_v4 }
  0x64   :  { %444 = vmatmul.mubr.f32.gmra.mrb[16].mxu0 %v48_v5  ;;  %278 = vmatprep.mubr.f32.mxu1 %v51_v6 }
  0x65   :  { %448 = vmatprep.mubr.f32.mxu0 %v53_v7 }
  0x67   :  { %279 = vmatmul.mubr.f32.gmra.mrb[18].mxu1 %v50_v8 }
  0x68   :  { %449 = vmatmul.mubr.f32.gmra.mrb[18].mxu0 %v52_v9  ;;  %283 = vmatprep.mubr.f32.mxu1 %v55_v10 }
  0x69   :  { %453 = vmatprep.mubr.f32.mxu0 %v57_v11 }
  0x6b   :  { %284 = vmatmul.mubr.f32.gmra.mrb[20].mxu1 %v54_v12 }
  0x6c   :  { %454 = vmatmul.mubr.f32.gmra.mrb[20].mxu0 %v56_v13  ;;  %288 = vmatprep.mubr.f32.mxu1 %v59_v14 }
  0x6d   :  { %458 = vmatprep.mubr.f32.mxu0 %v61_v15 }
  0x6f   :  { %289 = vmatmul.mubr.f32.gmra.mrb[22].mxu1 %v58_v16 }
  0x70   :  { %459 = vmatmul.mubr.f32.gmra.mrb[22].mxu0 %v60_v17  ;;  %293 = vmatprep.mubr.f32.mxu1 %v63_v18 }
  0x71   :  { %463 = vmatprep.mubr.f32.mxu0 %v65_v19 }
  0x73   :  { %294 = vmatmul.mubr.f32.gmra.mrb[24].mxu1 %v62_v20 }
  0x74   :  { %464 = vmatmul.mubr.f32.gmra.mrb[24].mxu0 %v64_v21  ;;  %298 = vmatprep.mubr.f32.mxu1 %v67_v22 }
  0x75   :  { %468 = vmatprep.mubr.f32.mxu0 %v69_v23 }
  0x77   :  { %299 = vmatmul.mubr.f32.gmra.mrb[26].mxu1 %v66_v24 }
  0x78   :  { %469 = vmatmul.mubr.f32.gmra.mrb[26].mxu0 %v68_v25  ;;  %303 = vmatprep.mubr.f32.mxu1 %v71_v26 }
  0x79   :  { %473 = vmatprep.mubr.f32.mxu0 %v73_v27 }
  0x7b   :  { %304 = vmatmul.mubr.f32.gmra.mrb[28].mxu1 %v70_v28 }
  0x7c   :  { %474 = vmatmul.mubr.f32.gmra.mrb[28].mxu0 %v72_v29  ;;  %308 = vmatprep.mubr.f32.mxu1 %v75_v30 }
  0x7d   :  { %478 = vmatprep.mubr.f32.mxu0 %v77_v31 }
  0x7f   :  { %309 = vmatmul.mubr.f32.gmra.mrb[30].mxu1 %v74_v32 }
  0x80   :  { %479 = vmatmul.mubr.f32.gmra.mrb[30].mxu0 %v76_v33  ;;  %313 = vmatprep.mubr.f32.mxu1 %v79_v34 }
  0x81   :  { %483 = vmatprep.mubr.f32.mxu0 %v81_v35 }
  0x83   :  { %314 = vmatmul.mubr.f32.gmra.mrb[32].mxu1 %v78_v36 }
  0x84   :  { %484 = vmatmul.mubr.f32.gmra.mrb[32].mxu0 %v80_v37  ;;  %318 = vmatprep.mubr.f32.mxu1 %v83_v38 }
  0x85   :  { %488 = vmatprep.mubr.f32.mxu0 %v85_v39 }
  0x87   :  { %319 = vmatmul.mubr.f32.gmra.mrb[34].mxu1 %v82_v0 }
  0x88   :  { %489 = vmatmul.mubr.f32.gmra.mrb[34].mxu0 %v84_v40  ;;  %323 = vmatprep.mubr.f32.mxu1 %v87_v41 }
  0x89   :  { %493 = vmatprep.mubr.f32.mxu0 %v89_v42 }
  0x8b   :  { %324 = vmatmul.mubr.f32.gmra.mrb[36].mxu1 %v86_v43 }
  0x8c   :  { %494 = vmatmul.mubr.f32.gmra.mrb[36].mxu0 %v88_v44  ;;  %328 = vmatprep.mubr.f32.mxu1 %v91_v45 }
  0x8d   :  { %498 = vmatprep.mubr.f32.mxu0 %v93_v46 }
  0x8f   :  { %329 = vmatmul.mubr.f32.gmra.mrb[38].mxu1 %v90_v47 }
  0x90   :  { %499 = vmatmul.mubr.f32.gmra.mrb[38].mxu0 %v92_v48  ;;  %333 = vmatprep.mubr.f32.mxu1 %v95_v49 }
  0x91   :  { %503 = vmatprep.mubr.f32.mxu0 %v97_v50 }
  0x93   :  { %334 = vmatmul.mubr.f32.gmra.mrb[40].mxu1 %v94_v51 }
  0x94   :  { %504 = vmatmul.mubr.f32.gmra.mrb[40].mxu0 %v96_v52 }
 0x116   :  { %v235_v54 = vpop.f32.mrb[0].mxu1 }
 0x117   :  { %v236_v55 = vadd.f32 %v1197_v53, %v235_v54  ;;  %v237_v56 = vpop.f32.mrb[1].mxu1  ;;  %v405_v57 = vpop.f32.mrb[0].mxu0 }
 0x118   :  { %v407_v58 = vpop.f32.mrb[1].mxu0 }
 0x119   :  { %v406_v59 = vadd.f32 %v405_v57, %v236_v55 }
 0x11a   :  { %v240_v60 = vpop.f32.mrb[2].mxu1 }
 0x11b   :  { %v509_v61 = vmax.f32 %v406_v59, 0.0  ;;  %v241_v62 = vadd.f32 %v1197_v53, %v240_v60  ;;  %v242_v63 = vpop.f32.mrb[3].mxu1  ;;  %v410_v1 = vpop.f32.mrb[2].mxu0 }
 0x11c   :  { %v412_v2 = vpop.f32.mrb[3].mxu0 }
 0x11d   :  { %531 = vst.msk [vmem:[%s1306_s3] sm:$0xff] %vm530_vm0, %v509_v61  ;;  %v411_v3 = vadd.f32 %v410_v1, %v241_v62 }
 0x11e   :  { %v245_v4 = vpop.f32.mrb[4].mxu1 }
 0x11f   :  { %v510_v5 = vmax.f32 %v411_v3, 0.0  ;;  %v246_v6 = vadd.f32 %v1197_v53, %v245_v4  ;;  %v247_v7 = vpop.f32.mrb[5].mxu1  ;;  %v415_v8 = vpop.f32.mrb[4].mxu0 }
 0x120   :  { %v417_v9 = vpop.f32.mrb[5].mxu0 }
 0x121   :  { %532 = vst.msk [vmem:[%s1306_s3 + $0x8] sm:$0xff] %vm530_vm0, %v510_v5  ;;  %v416_v10 = vadd.f32 %v415_v8, %v246_v6 }
 0x122   :  { %v250_v11 = vpop.f32.mrb[6].mxu1 }
 0x123   :  { %v511_v12 = vmax.f32 %v416_v10, 0.0  ;;  %v251_v13 = vadd.f32 %v1197_v53, %v250_v11  ;;  %v252_v14 = vpop.f32.mrb[7].mxu1  ;;  %v420_v15 = vpop.f32.mrb[6].mxu0 }
 0x124   :  { %v422_v16 = vpop.f32.mrb[7].mxu0 }
 0x125   :  { %533 = vst.msk [vmem:[%s1306_s3 + $0x10] sm:$0xff] %vm530_vm0, %v511_v12  ;;  %v421_v17 = vadd.f32 %v420_v15, %v251_v13 }
 0x126   :  { %v255_v18 = vpop.f32.mrb[8].mxu1 }
 0x127   :  { %v512_v19 = vmax.f32 %v421_v17, 0.0  ;;  %v256_v20 = vadd.f32 %v1197_v53, %v255_v18  ;;  %v257_v21 = vpop.f32.mrb[9].mxu1  ;;  %v425_v22 = vpop.f32.mrb[8].mxu0 }
 0x128   :  { %v427_v23 = vpop.f32.mrb[9].mxu0 }
 0x129   :  { %534 = vst.msk [vmem:[%s1306_s3 + $0x18] sm:$0xff] %vm530_vm0, %v512_v19  ;;  %v426_v24 = vadd.f32 %v425_v22, %v256_v20 }
 0x12a   :  { %v260_v25 = vpop.f32.mrb[10].mxu1 }
 0x12b   :  { %v513_v26 = vmax.f32 %v426_v24, 0.0  ;;  %v261_v27 = vadd.f32 %v1197_v53, %v260_v25  ;;  %v262_v28 = vpop.f32.mrb[11].mxu1  ;;  %v430_v29 = vpop.f32.mrb[10].mxu0 }
 0x12c   :  { %v432_v30 = vpop.f32.mrb[11].mxu0 }
 0x12d   :  { %535 = vst.msk [vmem:[%s1306_s3 + $0x20] sm:$0xff] %vm530_vm0, %v513_v26  ;;  %v431_v31 = vadd.f32 %v430_v29, %v261_v27 }
 0x12e   :  { %v265_v32 = vpop.f32.mrb[12].mxu1 }
 0x12f   :  { %v514_v33 = vmax.f32 %v431_v31, 0.0  ;;  %v266_v34 = vadd.f32 %v1197_v53, %v265_v32  ;;  %v267_v35 = vpop.f32.mrb[13].mxu1  ;;  %v435_v36 = vpop.f32.mrb[12].mxu0 }
 0x130   :  { %v437_v37 = vpop.f32.mrb[13].mxu0 }
 0x131   :  { %536 = vst.msk [vmem:[%s1306_s3 + $0x28] sm:$0xff] %vm530_vm0, %v514_v33  ;;  %v436_v38 = vadd.f32 %v435_v36, %v266_v34 }
 0x132   :  { %v270_v39 = vpop.f32.mrb[14].mxu1 }
 0x133   :  { %v515_v0 = vmax.f32 %v436_v38, 0.0  ;;  %v271_v40 = vadd.f32 %v1197_v53, %v270_v39  ;;  %v272_v41 = vpop.f32.mrb[15].mxu1  ;;  %v440_v42 = vpop.f32.mrb[14].mxu0 }
 0x134   :  { %v442_v43 = vpop.f32.mrb[15].mxu0 }
 0x135   :  { %537 = vst.msk [vmem:[%s1306_s3 + $0x30] sm:$0xff] %vm530_vm0, %v515_v0  ;;  %v441_v44 = vadd.f32 %v440_v42, %v271_v40 }
 0x136   :  { %v275_v45 = vpop.f32.mrb[16].mxu1 }
 0x137   :  { %v516_v46 = vmax.f32 %v441_v44, 0.0  ;;  %v276_v47 = vadd.f32 %v1197_v53, %v275_v45  ;;  %v277_v48 = vpop.f32.mrb[17].mxu1  ;;  %v445_v49 = vpop.f32.mrb[16].mxu0 }
 0x138   :  { %v447_v50 = vpop.f32.mrb[17].mxu0 }
 0x139   :  { %538 = vst.msk [vmem:[%s1306_s3 + $0x38] sm:$0xff] %vm530_vm0, %v516_v46  ;;  %v446_v51 = vadd.f32 %v445_v49, %v276_v47 }
 0x13a   :  { %v280_v52 = vpop.f32.mrb[18].mxu1 }
 0x13b   :  { %v517_v54 = vmax.f32 %v446_v51, 0.0  ;;  %v281_v55 = vadd.f32 %v1197_v53, %v280_v52  ;;  %v282_v56 = vpop.f32.mrb[19].mxu1  ;;  %v450_v57 = vpop.f32.mrb[18].mxu0 }
 0x13c   :  { %v452_v58 = vpop.f32.mrb[19].mxu0 }
 0x13d   :  { %539 = vst.msk [vmem:[%s1306_s3 + $0x40] sm:$0xff] %vm530_vm0, %v517_v54  ;;  %v451_v59 = vadd.f32 %v450_v57, %v281_v55 }
 0x13e   :  { %v285_v60 = vpop.f32.mrb[20].mxu1 }
 0x13f   :  { %v518_v61 = vmax.f32 %v451_v59, 0.0  ;;  %v286_v62 = vadd.f32 %v1197_v53, %v285_v60  ;;  %v287_v63 = vpop.f32.mrb[21].mxu1  ;;  %v455_v1 = vpop.f32.mrb[20].mxu0 }
 0x140   :  { %v457_v2 = vpop.f32.mrb[21].mxu0 }
 0x141   :  { %540 = vst.msk [vmem:[%s1306_s3 + $0x48] sm:$0xff] %vm530_vm0, %v518_v61  ;;  %v456_v3 = vadd.f32 %v455_v1, %v286_v62 }
 0x142   :  { %v290_v4 = vpop.f32.mrb[22].mxu1 }
 0x143   :  { %v519_v5 = vmax.f32 %v456_v3, 0.0  ;;  %v291_v6 = vadd.f32 %v1197_v53, %v290_v4  ;;  %v292_v7 = vpop.f32.mrb[23].mxu1  ;;  %v460_v8 = vpop.f32.mrb[22].mxu0 }
 0x144   :  { %v462_v9 = vpop.f32.mrb[23].mxu0 }
 0x145   :  { %541 = vst.msk [vmem:[%s1306_s3 + $0x50] sm:$0xff] %vm530_vm0, %v519_v5  ;;  %v461_v10 = vadd.f32 %v460_v8, %v291_v6 }
 0x146   :  { %v295_v11 = vpop.f32.mrb[24].mxu1 }
 0x147   :  { %v520_v12 = vmax.f32 %v461_v10, 0.0  ;;  %v296_v13 = vadd.f32 %v1197_v53, %v295_v11  ;;  %v297_v14 = vpop.f32.mrb[25].mxu1  ;;  %v465_v15 = vpop.f32.mrb[24].mxu0 }
 0x148   :  { %v467_v16 = vpop.f32.mrb[25].mxu0 }
 0x149   :  { %542 = vst.msk [vmem:[%s1306_s3 + $0x58] sm:$0xff] %vm530_vm0, %v520_v12  ;;  %v466_v17 = vadd.f32 %v465_v15, %v296_v13 }
 0x14a   :  { %v300_v18 = vpop.f32.mrb[26].mxu1 }
 0x14b   :  { %v521_v19 = vmax.f32 %v466_v17, 0.0  ;;  %v301_v20 = vadd.f32 %v1197_v53, %v300_v18  ;;  %v302_v21 = vpop.f32.mrb[27].mxu1  ;;  %v470_v22 = vpop.f32.mrb[26].mxu0 }
 0x14c   :  { %v472_v23 = vpop.f32.mrb[27].mxu0 }
 0x14d   :  { %543 = vst.msk [vmem:[%s1306_s3 + $0x60] sm:$0xff] %vm530_vm0, %v521_v19  ;;  %v471_v24 = vadd.f32 %v470_v22, %v301_v20 }
 0x14e   :  { %v305_v25 = vpop.f32.mrb[28].mxu1 }
 0x14f   :  { %v522_v26 = vmax.f32 %v471_v24, 0.0  ;;  %v306_v27 = vadd.f32 %v1197_v53, %v305_v25  ;;  %v307_v28 = vpop.f32.mrb[29].mxu1  ;;  %v475_v29 = vpop.f32.mrb[28].mxu0 }
 0x150   :  { %v477_v30 = vpop.f32.mrb[29].mxu0 }
 0x151   :  { %544 = vst.msk [vmem:[%s1306_s3 + $0x68] sm:$0xff] %vm530_vm0, %v522_v26  ;;  %v476_v31 = vadd.f32 %v475_v29, %v306_v27 }
 0x152   :  { %v310_v32 = vpop.f32.mrb[30].mxu1 }
 0x153   :  { %v523_v33 = vmax.f32 %v476_v31, 0.0  ;;  %v311_v34 = vadd.f32 %v1197_v53, %v310_v32  ;;  %v312_v35 = vpop.f32.mrb[31].mxu1  ;;  %v480_v36 = vpop.f32.mrb[30].mxu0 }
 0x154   :  { %v482_v37 = vpop.f32.mrb[31].mxu0 }
 0x155   :  { %545 = vst.msk [vmem:[%s1306_s3 + $0x70] sm:$0xff] %vm530_vm0, %v523_v33  ;;  %v481_v38 = vadd.f32 %v480_v36, %v311_v34 }
 0x156   :  { %v315_v39 = vpop.f32.mrb[32].mxu1 }
 0x157   :  { %v524_v0 = vmax.f32 %v481_v38, 0.0  ;;  %v316_v40 = vadd.f32 %v1197_v53, %v315_v39  ;;  %v317_v41 = vpop.f32.mrb[33].mxu1  ;;  %v485_v42 = vpop.f32.mrb[32].mxu0 }
 0x158   :  { %v487_v43 = vpop.f32.mrb[33].mxu0 }
 0x159   :  { %546 = vst.msk [vmem:[%s1306_s3 + $0x78] sm:$0xff] %vm530_vm0, %v524_v0  ;;  %v486_v44 = vadd.f32 %v485_v42, %v316_v40 }
 0x15a   :  { %v320_v45 = vpop.f32.mrb[34].mxu1 }
 0x15b   :  { %v525_v46 = vmax.f32 %v486_v44, 0.0  ;;  %v321_v47 = vadd.f32 %v1197_v53, %v320_v45  ;;  %v322_v48 = vpop.f32.mrb[35].mxu1  ;;  %v490_v49 = vpop.f32.mrb[34].mxu0 }
 0x15c   :  { %v492_v50 = vpop.f32.mrb[35].mxu0 }
 0x15d   :  { %547 = vst.msk [vmem:[%s1306_s3 + $0x80] sm:$0xff] %vm530_vm0, %v525_v46  ;;  %v491_v51 = vadd.f32 %v490_v49, %v321_v47 }
 0x15e   :  { %v325_v52 = vpop.f32.mrb[36].mxu1 }
 0x15f   :  { %v526_v54 = vmax.f32 %v491_v51, 0.0  ;;  %v326_v55 = vadd.f32 %v1197_v53, %v325_v52  ;;  %v327_v56 = vpop.f32.mrb[37].mxu1  ;;  %v495_v57 = vpop.f32.mrb[36].mxu0 }
 0x160   :  { %v497_v58 = vpop.f32.mrb[37].mxu0 }
 0x161   :  { %548 = vst.msk [vmem:[%s1306_s3 + $0x88] sm:$0xff] %vm530_vm0, %v526_v54  ;;  %v496_v59 = vadd.f32 %v495_v57, %v326_v55 }
 0x162   :  { %v330_v60 = vpop.f32.mrb[38].mxu1 }
 0x163   :  { %v527_v61 = vmax.f32 %v496_v59, 0.0  ;;  %v331_v62 = vadd.f32 %v1197_v53, %v330_v60  ;;  %v332_v63 = vpop.f32.mrb[39].mxu1  ;;  %v500_v1 = vpop.f32.mrb[38].mxu0 }
 0x164   :  { %v502_v2 = vpop.f32.mrb[39].mxu0 }
 0x165   :  { %549 = vst.msk [vmem:[%s1306_s3 + $0x90] sm:$0xff] %vm530_vm0, %v527_v61  ;;  %v501_v3 = vadd.f32 %v500_v1, %v331_v62 }
 0x166   :  { %v335_v4 = vpop.f32.mrb[40].mxu1 }
 0x167   :  { %v528_v5 = vmax.f32 %v501_v3, 0.0  ;;  %v336_v6 = vadd.f32 %v1197_v53, %v335_v4  ;;  %v337_v7 = vpop.f32.mrb[41].mxu1  ;;  %v505_v8 = vpop.f32.mrb[40].mxu0 }
 0x168   :  { %v507_v9 = vpop.f32.mrb[41].mxu0 }
 0x169   :  { %550 = vst.msk [vmem:[%s1306_s3 + $0x98] sm:$0xff] %vm530_vm0, %v528_v5  ;;  %v506_v10 = vadd.f32 %v505_v8, %v336_v6 }
 0x16b   :  { %v529_v11 = vmax.f32 %v506_v10, 0.0 }
 0x16d   :  { %552 = vst.msk [vmem:[%s1306_s3 + $0xa0] sm:$0x3] %vm551_vm1, %v529_v11 }

// kernel: dueling_dqn_forward.6
= control target key start
LH: loop header
LB: loop body
LE: loop exit
PB: predicated region body
PF: predicated region fallthrough
CT: control target
= control target key end

     0   :  { %vm939_vm0 = vmmov 0   ;;  %vm158_vm1 = vcmask 523264   ;;  %vm613_vm2 = vcmask 517120   ;;  %s1488_s1 = inlined_call_operand.vmem [shape: f32[576,64], index: 1, kind: input, shape index: {}]   ;;  %s1489_s0 = inlined_call_operand.vmem [shape: f32[98,576], index: 0, kind: input, shape index: {}]   ;;  %s1490_s2 = inlined_call_operand.vmem [shape: f32[1,64], index: 2, kind: input, shape index: {}]   ;;  %s1491_s3 = inlined_call_operand.vmem [shape: f32[98,64], index: 3, kind: output, shape index: {}]  }
   0x1   :  { %v95_v0 = vld [vmem:[%s1488_s1 + $0x80] sm:$0xff]  ;;  %v96_v1 = vld [vmem:[%s1488_s1 + $0x88] sm:$0xff]  ;;  %v97_v11 = vld [vmem:[%s1488_s1 + $0x90] sm:$0xff] }
   0x2   :  { %v127_v2 = vld [vmem:[%s1488_s1 + $0x180] sm:$0xff]  ;;  %v851_v3 = vpack.c.bf16 %v96_v1, %v95_v0  ;;  %v128_v4 = vld [vmem:[%s1488_s1 + $0x188] sm:$0xff]  ;;  %v98_v13 = vld [vmem:[%s1488_s1 + $0x98] sm:$0xff] }
   0x3   :  { %v79_v5 = vld [vmem:[%s1488_s1] sm:$0xff]  ;;  %v80_v6 = vld [vmem:[%s1488_s1 + $0x8] sm:$0xff]  ;;  %v883_v7 = vpack.c.bf16 %v128_v4, %v127_v2  ;;  %v129_v14 = vld [vmem:[%s1488_s1 + $0x190] sm:$0xff]  ;;  %v855_v16 = vpack.c.bf16 %v98_v13, %v97_v11 }
   0x4   :  { %v853_v8 = vpack.c.bf16 %v80_v6, %v79_v5  ;;  %v111_v9 = vld [vmem:[%s1488_s1 + $0x100] sm:$0xff]  ;;  %v112_v10 = vld [vmem:[%s1488_s1 + $0x108] sm:$0xff]  ;;  %852 = vmatprep.subr.bf16.mxu0 %v851_v3  ;;  %v130_v15 = vld [vmem:[%s1488_s1 + $0x198] sm:$0xff] }
   0x5   :  { %v885_v12 = vpack.c.bf16 %v112_v10, %v111_v9  ;;  %884 = vmatprep.subr.bf16.mxu1 %v883_v7  ;;  %v887_v17 = vpack.c.bf16 %v130_v15, %v129_v14  ;;  %v81_v18 = vld [vmem:[%s1488_s1 + $0x10] sm:$0xff]  ;;  %v82_v19 = vld [vmem:[%s1488_s1 + $0x18] sm:$0xff]  ;;  %v99_v23 = vld [vmem:[%s1488_s1 + $0xa0] sm:$0xff] }
   0x6   :  { %854 = vmatpush3.bf16.msra.mxu0 %v853_v8  ;;  %v113_v20 = vld [vmem:[%s1488_s1 + $0x110] sm:$0xff]  ;;  %v857_v21 = vpack.c.bf16 %v82_v19, %v81_v18  ;;  %v114_v22 = vld [vmem:[%s1488_s1 + $0x118] sm:$0xff]  ;;  %v100_v24 = vld [vmem:[%s1488_s1 + $0xa8] sm:$0xff] }
   0x7   :  { %886 = vmatpush3.bf16.msra.mxu1 %v885_v12  ;;  %856 = vmatprep.subr.bf16.mxu0 %v855_v16  ;;  %v889_v25 = vpack.c.bf16 %v114_v22, %v113_v20  ;;  %v859_v26 = vpack.c.bf16 %v100_v24, %v99_v23  ;;  %v131_v27 = vld [vmem:[%s1488_s1 + $0x1a0] sm:$0xff]  ;;  %v132_v28 = vld [vmem:[%s1488_s1 + $0x1a8] sm:$0xff]  ;;  %v101_v35 = vld [vmem:[%s1488_s1 + $0xb0] sm:$0xff] }
   0x8   :  { %888 = vmatprep.subr.bf16.mxu1 %v887_v17  ;;  %v83_v29 = vld [vmem:[%s1488_s1 + $0x20] sm:$0xff]  ;;  %v891_v30 = vpack.c.bf16 %v132_v28, %v131_v27  ;;  %v84_v31 = vld [vmem:[%s1488_s1 + $0x28] sm:$0xff]  ;;  %v102_v36 = vld [vmem:[%s1488_s1 + $0xb8] sm:$0xff] }
   0x9   :  { %v115_v32 = vld [vmem:[%s1488_s1 + $0x120] sm:$0xff]  ;;  %v116_v33 = vld [vmem:[%s1488_s1 + $0x128] sm:$0xff]  ;;  %v861_v34 = vpack.c.bf16 %v84_v31, %v83_v29  ;;  %v133_v37 = vld [vmem:[%s1488_s1 + $0x1b0] sm:$0xff]  ;;  %v863_v39 = vpack.c.bf16 %v102_v36, %v101_v35 }
   0xa   :  { %858 = vmatpush3.bf16.msra.mxu0 %v857_v21  ;;  %v893_v38 = vpack.c.bf16 %v116_v33, %v115_v32  ;;  %v134_v40 = vld [vmem:[%s1488_s1 + $0x1b8] sm:$0xff]  ;;  %v85_v41 = vld [vmem:[%s1488_s1 + $0x30] sm:$0xff]  ;;  %v103_v46 = vld [vmem:[%s1488_s1 + $0xc0] sm:$0xff] }
   0xb   :  { %890 = vmatpush3.bf16.msra.mxu1 %v889_v25  ;;  %860 = vmatprep.subr.bf16.mxu0 %v859_v26  ;;  %v86_v42 = vld [vmem:[%s1488_s1 + $0x38] sm:$0xff]  ;;  %v895_v43 = vpack.c.bf16 %v134_v40, %v133_v37  ;;  %v117_v44 = vld [vmem:[%s1488_s1 + $0x130] sm:$0xff]  ;;  %v104_v47 = vld [vmem:[%s1488_s1 + $0xc8] sm:$0xff] }
   0xc   :  { %892 = vmatprep.subr.bf16.mxu1 %v891_v30  ;;  %v118_v45 = vld [vmem:[%s1488_s1 + $0x138] sm:$0xff]  ;;  %v135_v48 = vld [vmem:[%s1488_s1 + $0x1c0] sm:$0xff]  ;;  %v136_v49 = vld [vmem:[%s1488_s1 + $0x1c8] sm:$0xff]  ;;  %v865_v50 = vpack.c.bf16 %v86_v42, %v85_v41  ;;  %v867_v52 = vpack.c.bf16 %v104_v47, %v103_v46 }
   0xd   :  { %v897_v51 = vpack.c.bf16 %v118_v45, %v117_v44  ;;  %v87_v53 = vld [vmem:[%s1488_s1 + $0x40] sm:$0xff]  ;;  %v88_v54 = vld [vmem:[%s1488_s1 + $0x48] sm:$0xff]  ;;  %v899_v56 = vpack.c.bf16 %v136_v49, %v135_v48  ;;  %v105_v58 = vld [vmem:[%s1488_s1 + $0xd0] sm:$0xff] }
   0xe   :  { %862 = vmatpush3.bf16.msra.mxu0 %v861_v34  ;;  %v119_v55 = vld [vmem:[%s1488_s1 + $0x140] sm:$0xff]  ;;  %v120_v57 = vld [vmem:[%s1488_s1 + $0x148] sm:$0xff]  ;;  %v106_v59 = vld [vmem:[%s1488_s1 + $0xd8] sm:$0xff]  ;;  %v869_v62 = vpack.c.bf16 %v88_v54, %v87_v53 }
   0xf   :  { %894 = vmatpush3.bf16.msra.mxu1 %v893_v38  ;;  %864 = vmatprep.subr.bf16.mxu0 %v863_v39  ;;  %v137_v60 = vld [vmem:[%s1488_s1 + $0x1d0] sm:$0xff]  ;;  %v138_v61 = vld [vmem:[%s1488_s1 + $0x1d8] sm:$0xff]  ;;  %v901_v63 = vpack.c.bf16 %v120_v57, %v119_v55  ;;  %v871_v0 = vpack.c.bf16 %v106_v59, %v105_v58  ;;  %v107_v6 = vld [vmem:[%s1488_s1 + $0xe0] sm:$0xff]  ;;  %v938_v39 = vmov 0.0|0.0  }
  0x10   :  { %896 = vmatprep.subr.bf16.mxu1 %v895_v43  ;;  %v89_v1 = vld [vmem:[%s1488_s1 + $0x50] sm:$0xff]  ;;  %v90_v2 = vld [vmem:[%s1488_s1 + $0x58] sm:$0xff]  ;;  %v903_v4 = vpack.c.bf16 %v138_v61, %v137_v60  ;;  %v108_v7 = vld [vmem:[%s1488_s1 + $0xe8] sm:$0xff] }
  0x11   :  { %v121_v3 = vld [vmem:[%s1488_s1 + $0x150] sm:$0xff]  ;;  %v122_v5 = vld [vmem:[%s1488_s1 + $0x158] sm:$0xff]  ;;  %v139_v8 = vld [vmem:[%s1488_s1 + $0x1e0] sm:$0xff]  ;;  %v873_v10 = vpack.c.bf16 %v90_v2, %v89_v1  ;;  %v875_v14 = vpack.c.bf16 %v108_v7, %v107_v6 }
  0x12   :  { %866 = vmatpush3.bf16.msra.mxu0 %v865_v50  ;;  %v140_v9 = vld [vmem:[%s1488_s1 + $0x1e8] sm:$0xff]  ;;  %v91_v11 = vld [vmem:[%s1488_s1 + $0x60] sm:$0xff]  ;;  %v905_v13 = vpack.c.bf16 %v122_v5, %v121_v3  ;;  %v17_v17 = vld [vmem:[%s1489_s0 + $0x18] sm:$0xff] }
  0x13   :  { %898 = vmatpush3.bf16.msra.mxu1 %v897_v51  ;;  %868 = vmatprep.subr.bf16.mxu0 %v867_v52  ;;  %v92_v12 = vld [vmem:[%s1488_s1 + $0x68] sm:$0xff]  ;;  %v123_v15 = vld [vmem:[%s1488_s1 + $0x160] sm:$0xff]  ;;  %v907_v18 = vpack.c.bf16 %v140_v9, %v139_v8  ;;  %v109_v20 = vld [vmem:[%s1488_s1 + $0xf0] sm:$0xff] }
  0x14   :  { %900 = vmatprep.subr.bf16.mxu1 %v899_v56  ;;  %v15_v16 = vld [vmem:[%s1489_s0 + $0x8] sm:$0xff]  ;;  %v110_v21 = vld [vmem:[%s1488_s1 + $0xf8] sm:$0xff]  ;;  %v141_v22 = vld [vmem:[%s1488_s1 + $0x1f0] sm:$0xff]  ;;  %392 = vmatprep.mubr.f32.mxu1 %v17_v17  ;;  %v877_v24 = vpack.c.bf16 %v92_v12, %v91_v11 }
  0x15   :  { %v124_v19 = vld [vmem:[%s1488_s1 + $0x168] sm:$0xff]  ;;  %262 = vmatprep.mubr.f32.mxu0 %v15_v16  ;;  %v142_v23 = vld [vmem:[%s1488_s1 + $0x1f8] sm:$0xff]  ;;  %v879_v26 = vpack.c.bf16 %v110_v21, %v109_v20  ;;  %v93_v27 = vld [vmem:[%s1488_s1 + $0x70] sm:$0xff] }
  0x16   :  { %870 = vmatpush3.bf16.msra.mxu0 %v869_v62  ;;  %v909_v25 = vpack.c.bf16 %v124_v19, %v123_v15  ;;  %v94_v28 = vld [vmem:[%s1488_s1 + $0x78] sm:$0xff]  ;;  %v911_v29 = vpack.c.bf16 %v142_v23, %v141_v22  ;;  %v125_v30 = vld [vmem:[%s1488_s1 + $0x170] sm:$0xff]  ;;  %v143_v34 = vld [vmem:[%s1488_s1 + $0x200] sm:$0xff] }
  0x17   :  { %902 = vmatpush3.bf16.msra.mxu1 %v901_v63  ;;  %872 = vmatprep.subr.bf16.mxu0 %v871_v0  ;;  %v126_v31 = vld [vmem:[%s1488_s1 + $0x178] sm:$0xff]  ;;  %v881_v32 = vpack.c.bf16 %v94_v28, %v93_v27  ;;  %v144_v35 = vld [vmem:[%s1488_s1 + $0x208] sm:$0xff]  ;;  %v14_v36 = vld [vmem:[%s1489_s0] sm:$0xff] }
  0x18   :  { %904 = vmatprep.subr.bf16.mxu1 %v903_v4  ;;  %v913_v33 = vpack.c.bf16 %v126_v31, %v125_v30  ;;  %v916_v37 = vpack.c.bf16 %v144_v35, %v143_v34  ;;  %v16_v38 = vld [vmem:[%s1489_s0 + $0x10] sm:$0xff]  ;;  %v22_v41 = vld [vmem:[%s1489_s0 + $0x40] sm:$0xff]  ;;  %v146_v43 = vld [vmem:[%s1488_s1 + $0x218] sm:$0xff] }
  0x19   :  { %v20_v40 = vld [vmem:[%s1489_s0 + $0x30] sm:$0xff]  ;;  %v19_v44 = vld [vmem:[%s1489_s0 + $0x28] sm:$0xff]  ;;  %v21_v45 = vld [vmem:[%s1489_s0 + $0x38] sm:$0xff] }
  0x1a   :  { %874 = vmatpush3.bf16.msra.mxu0 %v873_v10  ;;  %v145_v42 = vld [vmem:[%s1488_s1 + $0x210] sm:$0xff]  ;;  %v25_v46 = vld [vmem:[%s1489_s0 + $0x58] sm:$0xff]  ;;  %v27_v48 = vld [vmem:[%s1489_s0 + $0x68] sm:$0xff] }
  0x1b   :  { %906 = vmatpush3.bf16.msra.mxu1 %v905_v13  ;;  %876 = vmatprep.subr.bf16.mxu0 %v875_v14  ;;  %v919_v47 = vpack.c.bf16 %v146_v43, %v145_v42  ;;  %v147_v49 = vld [vmem:[%s1488_s1 + $0x220] sm:$0xff]  ;;  %v148_v50 = vld [vmem:[%s1488_s1 + $0x228] sm:$0xff]  ;;  %v24_v51 = vld [vmem:[%s1489_s0 + $0x50] sm:$0xff] }
  0x1c   :  { %908 = vmatprep.subr.bf16.mxu1 %v907_v18  ;;  %v26_v52 = vld [vmem:[%s1489_s0 + $0x60] sm:$0xff]  ;;  %v922_v54 = vpack.c.bf16 %v148_v50, %v147_v49  ;;  %v32_v55 = vld [vmem:[%s1489_s0 + $0x90] sm:$0xff]  ;;  %v150_v57 = vld [vmem:[%s1488_s1 + $0x238] sm:$0xff] }
  0x1d   :  { %v30_v53 = vld [vmem:[%s1489_s0 + $0x80] sm:$0xff]  ;;  %v149_v56 = vld [vmem:[%s1488_s1 + $0x230] sm:$0xff]  ;;  %v29_v58 = vld [vmem:[%s1489_s0 + $0x78] sm:$0xff] }
  0x1e   :  { %878 = vmatpush3.bf16.msra.mxu0 %v877_v24  ;;  %v31_v59 = vld [vmem:[%s1489_s0 + $0x88] sm:$0xff]  ;;  %v925_v61 = vpack.c.bf16 %v150_v57, %v149_v56  ;;  %v37_v62 = vld [vmem:[%s1489_s0 + $0xb8] sm:$0xff]  ;;  %v34_v63 = vld [vmem:[%s1489_s0 + $0xa0] sm:$0xff] }
  0x1f   :  { %910 = vmatpush3.bf16.msra.mxu1 %v909_v25  ;;  %880 = vmatprep.subr.bf16.mxu0 %v879_v26  ;;  %v35_v60 = vld [vmem:[%s1489_s0 + $0xa8] sm:$0xff]  ;;  %v36_v0 = vld [vmem:[%s1489_s0 + $0xb0] sm:$0xff]  ;;  %v42_v2 = vld [vmem:[%s1489_s0 + $0xe0] sm:$0xff] }
  0x20   :  { %912 = vmatprep.subr.bf16.mxu1 %v911_v29  ;;  %v40_v1 = vld [vmem:[%s1489_s0 + $0xd0] sm:$0xff]  ;;  %v39_v3 = vld [vmem:[%s1489_s0 + $0xc8] sm:$0xff]  ;;  %v41_v4 = vld [vmem:[%s1489_s0 + $0xd8] sm:$0xff] }
  0x21   :  { %v45_v5 = vld [vmem:[%s1489_s0 + $0xf8] sm:$0xff]  ;;  %v47_v6 = vld [vmem:[%s1489_s0 + $0x108] sm:$0xff]  ;;  %v44_v7 = vld [vmem:[%s1489_s0 + $0xf0] sm:$0xff] }
  0x22   :  { %882 = vmatpush3.bf16.msra.mxu0 %v881_v32  ;;  %v46_v8 = vld [vmem:[%s1489_s0 + $0x100] sm:$0xff]  ;;  %v52_v10 = vld [vmem:[%s1489_s0 + $0x130] sm:$0xff]  ;;  %v49_v11 = vld [vmem:[%s1489_s0 + $0x118] sm:$0xff] }
  0x23   :  { %914 = vmatpush3.bf16.msra.mxu1 %v913_v33  ;;  %915 = vmatprep.subr.bf16.mxu0 %v938_v39  ;;  %v50_v9 = vld [vmem:[%s1489_s0 + $0x120] sm:$0xff]  ;;  %v51_v12 = vld [vmem:[%s1489_s0 + $0x128] sm:$0xff]  ;;  %v57_v14 = vld [vmem:[%s1489_s0 + $0x158] sm:$0xff]  ;;  %v940_v33 = vmov 0.0  }
  0x24   :  { %927 = vmatprep.subr.bf16.mxu1 %v938_v39  ;;  %v55_v13 = vld [vmem:[%s1489_s0 + $0x148] sm:$0xff]  ;;  %v54_v15 = vld [vmem:[%s1489_s0 + $0x140] sm:$0xff]  ;;  %v56_v16 = vld [vmem:[%s1489_s0 + $0x150] sm:$0xff] }
  0x25   :  { %263 = vmatmul.mubr.f32.vlgmr.msra.gmra.mrb[0].mxu0 %v14_v36  ;;  %v60_v17 = vld [vmem:[%s1489_s0 + $0x170] sm:$0xff]  ;;  %v62_v18 = vld [vmem:[%s1489_s0 + $0x180] sm:$0xff]  ;;  %v59_v19 = vld [vmem:[%s1489_s0 + $0x168] sm:$0xff] }
  0x26   :  { %393 = vmatmul.mubr.f32.vlgmr.msra.gmra.mrb[0].mxu1 %v16_v38  ;;  %917 = vmatpush3.bf16.msra.mxu0 %v916_v37  ;;  %v61_v20 = vld [vmem:[%s1489_s0 + $0x178] sm:$0xff]  ;;  %v67_v22 = vld [vmem:[%s1489_s0 + $0x1a8] sm:$0xff]  ;;  %v64_v23 = vld [vmem:[%s1489_s0 + $0x190] sm:$0xff] }
  0x27   :  { %267 = vmatprep.mubr.f32.mxu0 %v20_v40  ;;  %397 = vmatprep.mubr.f32.mxu1 %v22_v41  ;;  %v65_v21 = vld [vmem:[%s1489_s0 + $0x198] sm:$0xff]  ;;  %v66_v24 = vld [vmem:[%s1489_s0 + $0x1a0] sm:$0xff]  ;;  %v72_v26 = vld [vmem:[%s1489_s0 + $0x1d0] sm:$0xff] }
  0x28   :  { %931 = vmatpush3.bf16.msra.mxu1 %v916_v37  ;;  %918 = vmatprep.subr.bf16.mxu0 %v938_v39  ;;  %v70_v25 = vld [vmem:[%s1489_s0 + $0x1c0] sm:$0xff]  ;;  %v69_v27 = vld [vmem:[%s1489_s0 + $0x1b8] sm:$0xff]  ;;  %v71_v28 = vld [vmem:[%s1489_s0 + $0x1c8] sm:$0xff] }
  0x29   :  { %268 = vmatmul.mubr.f32.gmra.mrb[2].mxu0 %v19_v44  ;;  %928 = vmatprep.subr.bf16.mxu1 %v938_v39  ;;  %v75_v29 = vld [vmem:[%s1489_s0 + $0x1e8] sm:$0x3]  ;;  %v77_v30 = vld [vmem:[%s1489_s0 + $0x1f8] sm:$0x3]  ;;  %v74_v31 = vld [vmem:[%s1489_s0 + $0x1e0] sm:$0x3] }
  0x2a   :  { %398 = vmatmul.mubr.f32.gmra.mrb[2].mxu1 %v21_v45  ;;  %272 = vmatprep.mubr.f32.mxu0 %v25_v46  ;;  %v76_v32 = vld [vmem:[%s1489_s0 + $0x1f0] sm:$0x3]  ;;  %v18_v34 = vld [vmem:[%s1489_s0 + $0x20] sm:$0xff]  ;;  %v53_v35 = vld [vmem:[%s1489_s0 + $0x138] sm:$0xff] }
  0x2b   :  { %402 = vmatprep.mubr.f32.mxu1 %v27_v48  ;;  %920 = vmatpush3.bf16.msra.mxu0 %v919_v47  ;;  %v23_v36 = vld [vmem:[%s1489_s0 + $0x48] sm:$0xff]  ;;  %v58_v37 = vld [vmem:[%s1489_s0 + $0x160] sm:$0xff]  ;;  %v28_v38 = vld [vmem:[%s1489_s0 + $0x70] sm:$0xff] }
  0x2c   :  { %932 = vmatpush3.bf16.msra.mxu1 %v919_v47  ;;  %921 = vmatprep.subr.bf16.mxu0 %v938_v39  ;;  %v33_v40 = vld [vmem:[%s1489_s0 + $0x98] sm:$0xff]  ;;  %v68_v41 = vld [vmem:[%s1489_s0 + $0x1b0] sm:$0xff]  ;;  %v38_v42 = vld [vmem:[%s1489_s0 + $0xc0] sm:$0xff] }
  0x2d   :  { %273 = vmatmul.mubr.f32.gmra.mrb[4].mxu0 %v24_v51  ;;  %929 = vmatprep.subr.bf16.mxu1 %v938_v39  ;;  %v73_v43 = vld [vmem:[%s1489_s0 + $0x1d8] sm:$0xff]  ;;  %v43_v44 = vld [vmem:[%s1489_s0 + $0xe8] sm:$0xff]  ;;  %v78_v45 = vld [vmem:[%s1489_s0 + $0x200] sm:$0x3] }
  0x2e   :  { %403 = vmatmul.mubr.f32.gmra.mrb[4].mxu1 %v26_v52  ;;  %277 = vmatprep.mubr.f32.mxu0 %v30_v53  ;;  %v48_v46 = vld [vmem:[%s1489_s0 + $0x110] sm:$0xff]  ;;  %v1401_v48 = vld [vmem:[%s1490_s2] ss:$0 sm:$0xff] }
  0x2f   :  { %407 = vmatprep.mubr.f32.mxu1 %v32_v55  ;;  %923 = vmatpush3.bf16.msra.mxu0 %v922_v54 }
  0x30   :  { %933 = vmatpush3.bf16.msra.mxu1 %v922_v54  ;;  %924 = vmatprep.subr.bf16.mxu0 %v938_v39 }
  0x31   :  { %278 = vmatmul.mubr.f32.gmra.mrb[6].mxu0 %v29_v58  ;;  %930 = vmatprep.subr.bf16.mxu1 %v938_v39  ;;  %v63_v39 = vld [vmem:[%s1489_s0 + $0x188] sm:$0xff] }
  0x32   :  { %408 = vmatmul.mubr.f32.gmra.mrb[6].mxu1 %v31_v59  ;;  %282 = vmatprep.mubr.f32.mxu0 %v35_v60 }
  0x33   :  { %412 = vmatprep.mubr.f32.mxu1 %v37_v62  ;;  %926 = vmatpush3.bf16.msra.mxu0 %v925_v61 }
  0x34   :  { %934 = vmatpush3.bf16.msra.mxu1 %v925_v61 }
  0x35   :  { %283 = vmatmul.mubr.f32.gmra.mrb[8].mxu0 %v34_v63 }
  0x36   :  { %413 = vmatmul.mubr.f32.gmra.mrb[8].mxu1 %v36_v0  ;;  %287 = vmatprep.mubr.f32.mxu0 %v40_v1 }
  0x37   :  { %417 = vmatprep.mubr.f32.mxu1 %v42_v2 }
  0x39   :  { %288 = vmatmul.mubr.f32.gmra.mrb[10].mxu0 %v39_v3 }
  0x3a   :  { %418 = vmatmul.mubr.f32.gmra.mrb[10].mxu1 %v41_v4  ;;  %292 = vmatprep.mubr.f32.mxu0 %v45_v5 }
  0x3b   :  { %422 = vmatprep.mubr.f32.mxu1 %v47_v6 }
  0x3d   :  { %293 = vmatmul.mubr.f32.gmra.mrb[12].mxu0 %v44_v7 }
  0x3e   :  { %423 = vmatmul.mubr.f32.gmra.mrb[12].mxu1 %v46_v8  ;;  %297 = vmatprep.mubr.f32.mxu0 %v50_v9 }
  0x3f   :  { %427 = vmatprep.mubr.f32.mxu1 %v52_v10 }
  0x41   :  { %298 = vmatmul.mubr.f32.gmra.mrb[14].mxu0 %v49_v11 }
  0x42   :  { %428 = vmatmul.mubr.f32.gmra.mrb[14].mxu1 %v51_v12  ;;  %302 = vmatprep.mubr.f32.mxu0 %v55_v13 }
  0x43   :  { %432 = vmatprep.mubr.f32.mxu1 %v57_v14 }
  0x45   :  { %303 = vmatmul.mubr.f32.gmra.mrb[16].mxu0 %v54_v15 }
  0x46   :  { %433 = vmatmul.mubr.f32.gmra.mrb[16].mxu1 %v56_v16  ;;  %307 = vmatprep.mubr.f32.mxu0 %v60_v17 }
  0x47   :  { %437 = vmatprep.mubr.f32.mxu1 %v62_v18 }
  0x49   :  { %308 = vmatmul.mubr.f32.gmra.mrb[18].mxu0 %v59_v19 }
  0x4a   :  { %438 = vmatmul.mubr.f32.gmra.mrb[18].mxu1 %v61_v20  ;;  %312 = vmatprep.mubr.f32.mxu0 %v65_v21 }
  0x4b   :  { %442 = vmatprep.mubr.f32.mxu1 %v67_v22 }
  0x4d   :  { %313 = vmatmul.mubr.f32.gmra.mrb[20].mxu0 %v64_v23 }
  0x4e   :  { %443 = vmatmul.mubr.f32.gmra.mrb[20].mxu1 %v66_v24  ;;  %317 = vmatprep.mubr.f32.mxu0 %v70_v25 }
  0x4f   :  { %447 = vmatprep.mubr.f32.mxu1 %v72_v26 }
  0x51   :  { %318 = vmatmul.mubr.f32.gmra.mrb[22].mxu0 %v69_v27 }
  0x52   :  { %448 = vmatmul.mubr.f32.gmra.mrb[22].mxu1 %v71_v28  ;;  %322 = vmatprep.mubr.f32.mxu0 %v75_v29 }
  0x53   :  { %452 = vmatprep.mubr.f32.mxu1 %v77_v30 }
  0x55   :  { %323 = vmatmul.mubr.f32.gmra.mrb[24].mxu0 %v74_v31 }
  0x56   :  { %453 = vmatmul.mubr.f32.gmra.mrb[24].mxu1 %v76_v32  ;;  %812 = vmatprep.mubr.msk.f32.mxu0 %vm939_vm0, %v940_v33 }
  0x57   :  { %833 = vmatprep.mubr.msk.f32.mxu1 %vm939_vm0, %v940_v33 }
  0x59   :  { %813 = vmatmul.mubr.msk.f32.vlgmr.msra.gmra.mrb[26].mxu0 %vm158_vm1, %v18_v34 }
  0x5a   :  { %834 = vmatmul.mubr.msk.f32.vlgmr.msra.gmra.mrb[26].mxu1 %vm158_vm1, %v53_v35  ;;  %815 = vmatprep.mubr.msk.f32.mxu0 %vm939_vm0, %v940_v33 }
  0x5b   :  { %836 = vmatprep.mubr.msk.f32.mxu1 %vm939_vm0, %v940_v33 }
  0x5d   :  { %816 = vmatmul.mubr.msk.f32.gmra.mrb[28].mxu0 %vm158_vm1, %v23_v36 }
  0x5e   :  { %837 = vmatmul.mubr.msk.f32.gmra.mrb[28].mxu1 %vm158_vm1, %v58_v37  ;;  %818 = vmatprep.mubr.msk.f32.mxu0 %vm939_vm0, %v940_v33 }
  0x5f   :  { %839 = vmatprep.mubr.msk.f32.mxu1 %vm939_vm0, %v940_v33 }
  0x61   :  { %819 = vmatmul.mubr.msk.f32.gmra.mrb[30].mxu0 %vm158_vm1, %v28_v38 }
  0x62   :  { %840 = vmatmul.mubr.msk.f32.gmra.mrb[30].mxu1 %vm158_vm1, %v63_v39  ;;  %821 = vmatprep.mubr.msk.f32.mxu0 %vm939_vm0, %v940_v33 }
  0x63   :  { %842 = vmatprep.mubr.msk.f32.mxu1 %vm939_vm0, %v940_v33 }
  0x65   :  { %822 = vmatmul.mubr.msk.f32.gmra.mrb[32].mxu0 %vm158_vm1, %v33_v40 }
  0x66   :  { %843 = vmatmul.mubr.msk.f32.gmra.mrb[32].mxu1 %vm158_vm1, %v68_v41  ;;  %824 = vmatprep.mubr.msk.f32.mxu0 %vm939_vm0, %v940_v33 }
  0x67   :  { %845 = vmatprep.mubr.msk.f32.mxu1 %vm939_vm0, %v940_v33 }
  0x69   :  { %825 = vmatmul.mubr.msk.f32.gmra.mrb[34].mxu0 %vm158_vm1, %v38_v42 }
  0x6a   :  { %846 = vmatmul.mubr.msk.f32.gmra.mrb[34].mxu1 %vm158_vm1, %v73_v43  ;;  %827 = vmatprep.mubr.msk.f32.mxu0 %vm939_vm0, %v940_v33 }
  0x6b   :  { %848 = vmatprep.mubr.msk.f32.mxu1 %vm939_vm0, %v940_v33 }
  0x6d   :  { %828 = vmatmul.mubr.msk.f32.gmra.mrb[36].mxu0 %vm158_vm1, %v43_v44 }
  0x6e   :  { %849 = vmatmul.mubr.msk.f32.gmra.mrb[36].mxu1 %vm158_vm1, %v78_v45  ;;  %830 = vmatprep.mubr.msk.f32.mxu0 %vm939_vm0, %v940_v33 }
  0x71   :  { %831 = vmatmul.mubr.msk.f32.gmra.mrb[38].mxu0 %vm158_vm1, %v48_v46 }
  0xf8   :  { %v665_v47 = vpop.f32.mrb[0].mxu0 }
  0xf9   :  { %v666_v49 = vpop.f32.mrb[1].mxu0  ;;  %v736_v50 = vpop.f32.mrb[0].mxu1 }
  0xfa   :  { %v667_v51 = vadd.f32 %v666_v49, %v665_v47  ;;  %v737_v52 = vpop.f32.mrb[1].mxu1 }
  0xfb   :  { %v738_v53 = vadd.f32 %v737_v52, %v736_v50 }
  0xfc   :  { %v265_v54 = vadd.f32 %v667_v51, %v1401_v48  ;;  %v668_v55 = vpop.f32.mrb[2].mxu0 }
  0xfd   :  { %v669_v56 = vpop.f32.mrb[3].mxu0  ;;  %v739_v57 = vpop.f32.mrb[2].mxu1 }
  0xfe   :  { %v670_v58 = vadd.f32 %v669_v56, %v668_v55  ;;  %v740_v59 = vpop.f32.mrb[3].mxu1  ;;  %v1404_v60 = vadd.f32 %v738_v53, %v265_v54 }
  0xff   :  { %v741_v61 = vadd.f32 %v740_v59, %v739_v57 }
 0x100   :  { %v270_v62 = vadd.f32 %v670_v58, %v1401_v48  ;;  %v671_v63 = vpop.f32.mrb[4].mxu0 }
 0x101   :  { %v672_v0 = vpop.f32.mrb[5].mxu0  ;;  %v742_v1 = vpop.f32.mrb[4].mxu1 }
 0x102   :  { %v673_v2 = vadd.f32 %v672_v0, %v671_v63  ;;  %v743_v3 = vpop.f32.mrb[5].mxu1  ;;  %v1407_v4 = vadd.f32 %v741_v61, %v270_v62 }
 0x103   :  { %v744_v5 = vadd.f32 %v743_v3, %v742_v1 }
 0x104   :  { %v275_v6 = vadd.f32 %v673_v2, %v1401_v48  ;;  %v674_v7 = vpop.f32.mrb[6].mxu0 }
 0x105   :  { %v675_v8 = vpop.f32.mrb[7].mxu0  ;;  %v745_v9 = vpop.f32.mrb[6].mxu1 }
 0x106   :  { %v676_v10 = vadd.f32 %v675_v8, %v674_v7  ;;  %v746_v11 = vpop.f32.mrb[7].mxu1  ;;  %v1410_v12 = vadd.f32 %v744_v5, %v275_v6 }
 0x107   :  { %v747_v13 = vadd.f32 %v746_v11, %v745_v9 }
 0x108   :  { %v280_v14 = vadd.f32 %v676_v10, %v1401_v48  ;;  %v677_v15 = vpop.f32.mrb[8].mxu0 }
 0x109   :  { %v678_v16 = vpop.f32.mrb[9].mxu0  ;;  %v748_v17 = vpop.f32.mrb[8].mxu1 }
 0x10a   :  { %v679_v18 = vadd.f32 %v678_v16, %v677_v15  ;;  %v749_v19 = vpop.f32.mrb[9].mxu1  ;;  %v1413_v20 = vadd.f32 %v747_v13, %v280_v14 }
 0x10b   :  { %v750_v21 = vadd.f32 %v749_v19, %v748_v17 }
 0x10c   :  { %v285_v22 = vadd.f32 %v679_v18, %v1401_v48  ;;  %v680_v23 = vpop.f32.mrb[10].mxu0 }
 0x10d   :  { %v681_v24 = vpop.f32.mrb[11].mxu0  ;;  %v751_v25 = vpop.f32.mrb[10].mxu1 }
 0x10e   :  { %v682_v26 = vadd.f32 %v681_v24, %v680_v23  ;;  %v752_v27 = vpop.f32.mrb[11].mxu1  ;;  %v1416_v28 = vadd.f32 %v750_v21, %v285_v22 }
 0x10f   :  { %v753_v29 = vadd.f32 %v752_v27, %v751_v25 }
 0x110   :  { %v290_v30 = vadd.f32 %v682_v26, %v1401_v48  ;;  %v683_v31 = vpop.f32.mrb[12].mxu0 }
 0x111   :  { %v684_v32 = vpop.f32.mrb[13].mxu0  ;;  %v754_v33 = vpop.f32.mrb[12].mxu1 }
 0x112   :  { %v685_v34 = vadd.f32 %v684_v32, %v683_v31  ;;  %v755_v35 = vpop.f32.mrb[13].mxu1  ;;  %v1419_v36 = vadd.f32 %v753_v29, %v290_v30 }
 0x113   :  { %v756_v37 = vadd.f32 %v755_v35, %v754_v33 }
 0x114   :  { %v295_v38 = vadd.f32 %v685_v34, %v1401_v48  ;;  %v686_v39 = vpop.f32.mrb[14].mxu0 }
 0x115   :  { %v687_v40 = vpop.f32.mrb[15].mxu0  ;;  %v757_v41 = vpop.f32.mrb[14].mxu1 }
 0x116   :  { %v688_v42 = vadd.f32 %v687_v40, %v686_v39  ;;  %v758_v43 = vpop.f32.mrb[15].mxu1  ;;  %v1422_v44 = vadd.f32 %v756_v37, %v295_v38 }
 0x117   :  { %v759_v45 = vadd.f32 %v758_v43, %v757_v41 }
 0x118   :  { %v300_v46 = vadd.f32 %v688_v42, %v1401_v48  ;;  %v689_v47 = vpop.f32.mrb[16].mxu0 }
 0x119   :  { %v690_v49 = vpop.f32.mrb[17].mxu0  ;;  %v760_v50 = vpop.f32.mrb[16].mxu1 }
 0x11a   :  { %v691_v51 = vadd.f32 %v690_v49, %v689_v47  ;;  %v761_v52 = vpop.f32.mrb[17].mxu1  ;;  %v430_v53 = vadd.f32 %v759_v45, %v300_v46 }
 0x11b   :  { %v762_v54 = vadd.f32 %v761_v52, %v760_v50 }
 0x11c   :  { %v305_v55 = vadd.f32 %v691_v51, %v1401_v48  ;;  %v692_v56 = vpop.f32.mrb[18].mxu0 }
 0x11d   :  { %v693_v57 = vpop.f32.mrb[19].mxu0  ;;  %v763_v58 = vpop.f32.mrb[18].mxu1 }
 0x11e   :  { %v694_v59 = vadd.f32 %v693_v57, %v692_v56  ;;  %v764_v61 = vpop.f32.mrb[19].mxu1  ;;  %v435_v62 = vadd.f32 %v762_v54, %v305_v55 }
 0x11f   :  { %v765_v63 = vadd.f32 %v764_v61, %v763_v58 }
 0x120   :  { %v310_v0 = vadd.f32 %v694_v59, %v1401_v48  ;;  %v695_v1 = vpop.f32.mrb[20].mxu0 }
 0x121   :  { %v696_v2 = vpop.f32.mrb[21].mxu0  ;;  %v766_v3 = vpop.f32.mrb[20].mxu1 }
 0x122   :  { %v697_v5 = vadd.f32 %v696_v2, %v695_v1  ;;  %v767_v6 = vpop.f32.mrb[21].mxu1  ;;  %v440_v7 = vadd.f32 %v765_v63, %v310_v0 }
 0x123   :  { %v768_v8 = vadd.f32 %v767_v6, %v766_v3 }
 0x124   :  { %v315_v9 = vadd.f32 %v697_v5, %v1401_v48  ;;  %v698_v10 = vpop.f32.mrb[22].mxu0 }
 0x125   :  { %v699_v11 = vpop.f32.mrb[23].mxu0  ;;  %v769_v13 = vpop.f32.mrb[22].mxu1 }
 0x126   :  { %v700_v14 = vadd.f32 %v699_v11, %v698_v10  ;;  %v770_v15 = vpop.f32.mrb[23].mxu1  ;;  %v445_v16 = vadd.f32 %v768_v8, %v315_v9 }
 0x127   :  { %v771_v17 = vadd.f32 %v770_v15, %v769_v13 }
 0x128   :  { %v320_v18 = vadd.f32 %v700_v14, %v1401_v48  ;;  %v701_v19 = vpop.f32.mrb[24].mxu0 }
 0x129   :  { %v702_v21 = vpop.f32.mrb[25].mxu0  ;;  %v772_v22 = vpop.f32.mrb[24].mxu1 }
 0x12a   :  { %v703_v23 = vadd.f32 %v702_v21, %v701_v19  ;;  %v773_v24 = vpop.f32.mrb[25].mxu1  ;;  %v450_v25 = vadd.f32 %v771_v17, %v320_v18 }
 0x12b   :  { %v774_v26 = vadd.f32 %v773_v24, %v772_v22 }
 0x12c   :  { %v325_v27 = vadd.f32 %v703_v23, %v1401_v48  ;;  %v524_v29 = vpop.f32.mrb[26].mxu0 }
 0x12d   :  { %v525_v30 = vadd.f32 %v524_v29, %v1404_v60  ;;  %v559_v31 = vpop.f32.mrb[26].mxu1  ;;  %v814_v32 = vpop.f32.mrb[27].mxu0 }
 0x12e   :  { %v560_v33 = vadd.f32 %v559_v31, %v430_v53  ;;  %v835_v34 = vpop.f32.mrb[27].mxu1  ;;  %v455_v35 = vadd.f32 %v774_v26, %v325_v27 }
 0x12f   :  { %v588_v37 = vmax.f32 %v525_v30, 0.0 }
 0x130   :  { %v595_v38 = vmax.f32 %v560_v33, 0.0  ;;  %v529_v39 = vpop.f32.mrb[28].mxu0 }
 0x131   :  { %601 = vst.msk [vmem:[%s1491_s3] sm:$0xff] %vm158_vm1, %v588_v37  ;;  %v530_v40 = vadd.f32 %v529_v39, %v1407_v4  ;;  %v564_v41 = vpop.f32.mrb[28].mxu1  ;;  %v817_v48 = vpop.f32.mrb[29].mxu0 }
 0x132   :  { %608 = vst.msk [vmem:[%s1491_s3 + $0x38] sm:$0xff] %vm158_vm1, %v595_v38  ;;  %v565_v60 = vadd.f32 %v564_v41, %v435_v62  ;;  %v838_v42 = vpop.f32.mrb[29].mxu1 }
 0x133   :  { %v589_v43 = vmax.f32 %v530_v40, 0.0 }
 0x134   :  { %v596_v45 = vmax.f32 %v565_v60, 0.0  ;;  %v534_v46 = vpop.f32.mrb[30].mxu0 }
 0x135   :  { %602 = vst.msk [vmem:[%s1491_s3 + $0x8] sm:$0xff] %vm158_vm1, %v589_v43  ;;  %v535_v47 = vadd.f32 %v534_v46, %v1410_v12  ;;  %v569_v4 = vpop.f32.mrb[30].mxu1  ;;  %v820_v49 = vpop.f32.mrb[31].mxu0 }
 0x136   :  { %609 = vst.msk [vmem:[%s1491_s3 + $0x40] sm:$0xff] %vm158_vm1, %v596_v45  ;;  %v570_v50 = vadd.f32 %v569_v4, %v440_v7  ;;  %v841_v51 = vpop.f32.mrb[31].mxu1 }
 0x137   :  { %v590_v52 = vmax.f32 %v535_v47, 0.0 }
 0x138   :  { %v597_v53 = vmax.f32 %v570_v50, 0.0  ;;  %v539_v54 = vpop.f32.mrb[32].mxu0 }
 0x139   :  { %603 = vst.msk [vmem:[%s1491_s3 + $0x10] sm:$0xff] %vm158_vm1, %v590_v52  ;;  %v540_v55 = vadd.f32 %v539_v54, %v1413_v20  ;;  %v574_v12 = vpop.f32.mrb[32].mxu1  ;;  %v823_v56 = vpop.f32.mrb[33].mxu0 }
 0x13a   :  { %610 = vst.msk [vmem:[%s1491_s3 + $0x48] sm:$0xff] %vm158_vm1, %v597_v53  ;;  %v575_v57 = vadd.f32 %v574_v12, %v445_v16  ;;  %v844_v58 = vpop.f32.mrb[33].mxu1 }
 0x13b   :  { %v591_v59 = vmax.f32 %v540_v55, 0.0 }
 0x13c   :  { %v598_v61 = vmax.f32 %v575_v57, 0.0  ;;  %v544_v62 = vpop.f32.mrb[34].mxu0 }
 0x13d   :  { %604 = vst.msk [vmem:[%s1491_s3 + $0x18] sm:$0xff] %vm158_vm1, %v591_v59  ;;  %v545_v63 = vadd.f32 %v544_v62, %v1416_v28  ;;  %v579_v20 = vpop.f32.mrb[34].mxu1  ;;  %v826_v0 = vpop.f32.mrb[35].mxu0 }
 0x13e   :  { %611 = vst.msk [vmem:[%s1491_s3 + $0x50] sm:$0xff] %vm158_vm1, %v598_v61  ;;  %v580_v1 = vadd.f32 %v579_v20, %v450_v25  ;;  %v847_v2 = vpop.f32.mrb[35].mxu1 }
 0x13f   :  { %v592_v3 = vmax.f32 %v545_v63, 0.0 }
 0x140   :  { %v599_v5 = vmax.f32 %v580_v1, 0.0  ;;  %v549_v6 = vpop.f32.mrb[36].mxu0 }
 0x141   :  { %605 = vst.msk [vmem:[%s1491_s3 + $0x20] sm:$0xff] %vm158_vm1, %v592_v3  ;;  %v550_v7 = vadd.f32 %v549_v6, %v1419_v36  ;;  %v584_v28 = vpop.f32.mrb[36].mxu1  ;;  %v829_v8 = vpop.f32.mrb[37].mxu0 }
 0x142   :  { %612 = vst.msk [vmem:[%s1491_s3 + $0x58] sm:$0xff] %vm158_vm1, %v599_v5  ;;  %v585_v9 = vadd.f32 %v584_v28, %v455_v35  ;;  %v850_v10 = vpop.f32.mrb[37].mxu1 }
 0x143   :  { %v593_v11 = vmax.f32 %v550_v7, 0.0 }
 0x144   :  { %v600_v13 = vmax.f32 %v585_v9, 0.0  ;;  %v554_v14 = vpop.f32.mrb[38].mxu0 }
 0x145   :  { %606 = vst.msk [vmem:[%s1491_s3 + $0x28] sm:$0xff] %vm158_vm1, %v593_v11  ;;  %v555_v36 = vadd.f32 %v554_v14, %v1422_v44  ;;  %v832_v15 = vpop.f32.mrb[39].mxu0 }
 0x146   :  { %614 = vst.msk [vmem:[%s1491_s3 + $0x60] sm:$0x3] %vm613_vm2, %v600_v13 }
 0x147   :  { %v594_v16 = vmax.f32 %v555_v36, 0.0 }
 0x149   :  { %607 = vst.msk [vmem:[%s1491_s3 + $0x30] sm:$0xff] %vm158_vm1, %v594_v16 }

// kernel: dueling_dqn_forward.7
= control target key start
LH: loop header
LB: loop body
LE: loop exit
PB: predicated region body
PF: predicated region fallthrough
CT: control target
= control target key end

     0   :  { %10 = vsyncpa [#allocation5], 0  ;;  %s4951_s18 = smov 0   ;;  %s4953_s19 = smov 0   ;;  %s7566_s0 = inlined_call_operand.vmem [shape: f32[2,3136], index: 0, kind: input, shape index: {}]   ;;  %s7567_s1 = inlined_call_operand.vmem [shape: f32[3136,1024], index: 1, kind: input, shape index: {}]   ;;  %s7568_s2 = inlined_call_operand.vmem [shape: f32[1,1024], index: 2, kind: input, shape index: {}]   ;;  %s7569_s3 = inlined_call_operand.vmem [shape: f32[1024,7], index: 3, kind: input, shape index: {}]   ;;  %s7570_s4 = inlined_call_operand.vmem [shape: f32[1,7], index: 4, kind: input, shape index: {}]   ;;  %s7571_s5 = inlined_call_operand.hbm [shape: f32[2,6], index: 5, kind: output, shape index: {}]  }
   0x1   :  { %s4955_s20 = smov 0  }
   0x2 LB: > { %s4967_s21 = sadd.s32 4294967295, %s4914_s20   ;;  %s4970_s22 = sadd.s32 1, %s4914_s20   ;;  %s4914_s20 = sphi %s4955_s20, %s7574_s20   ;;  %s4910_s19 = sphi %s4953_s19, %s7573_s19   ;;  %s4906_s18 = sphi %s4951_s18, %s7572_s18  }
   0x3   : > { %s41_s23 = ssub.s32 %s4914_s20, %s4970_s22  ;;  %s44_s24 = sadd.s32 1, %s4910_s19 }
   0x4   : > { %p42_p0 = scmp.eq.s32.totalorder %s41_s23, 0  ;;  %p51_p1 = scmp.ne.s32.totalorder %s4910_s19, %s4906_s18 }
   0x5   : > { %p52_p2 = scmp.eq.s32.totalorder %s4914_s20, 0  ;;  %p3924_p4 = scmp.ge.s32.totalorder %s4914_s20, 4 }
   0x6   : > { %s4979_s25 = scalar_select %p42_p0, %s4910_s19, %s44_s24  }
   0x7   : > { %p53_p3 = por %p52_p2, %p51_p1  ;;  %177 = sbr.rel (%p3924_p4) target bundleno = 410 (0x19a), region = 24 }
   0xe   : > { %180 = sbr.rel (!%p53_p3) target bundleno = 410 (0x19a), region = 28  ;;  %s182_s26 = sand.u32 (%p53_p3), 1, %s4910_s19  }
   0xf   : > { %s3940_s27 = sshll.u32 (%p53_p3), %s4914_s20, 4  ;;  %s4818_s28 = smul.u32 (%p53_p3), 6272, %s182_s26 }
  0x10   : > { %s4987_s6 = scalar_lea.vmem (%p53_p3), %s7567_s1, %s3940_s27 }
  0x11   : > { %v200_v0 = vld [vmem:[%s4987_s6] sm:$0xff] (%p53_p3)  ;;  %v202_v1 = vld [vmem:[%s4987_s6 + $0x8] sm:$0xff] (%p53_p3)  ;;  %s4995_s7 = scalar_lea.vmem (%p53_p3), [#allocation3], %s4818_s28 }
  0x12   : > { %v204_v2 = vld [vmem:[%s4987_s6 + $0x40] sm:$0xff] (%p53_p3)  ;;  %v206_v3 = vld [vmem:[%s4987_s6 + $0x48] sm:$0xff] (%p53_p3)  ;;  %201 = vst [vmem:[%s4995_s7] sm:$0xff] (%p53_p3), %v200_v0  ;;  %203 = vst [vmem:[%s4995_s7 + $0x8] sm:$0xff] (%p53_p3), %v202_v1 }
  0x13   : > { %v208_v4 = vld [vmem:[%s4987_s6 + $0x80] sm:$0xff] (%p53_p3)  ;;  %v210_v5 = vld [vmem:[%s4987_s6 + $0x88] sm:$0xff] (%p53_p3)  ;;  %205 = vst [vmem:[%s4995_s7 + $0x10] sm:$0xff] (%p53_p3), %v204_v2  ;;  %207 = vst [vmem:[%s4995_s7 + $0x18] sm:$0xff] (%p53_p3), %v206_v3 }
  0x14   : > { %209 = vst [vmem:[%s4995_s7 + $0x20] sm:$0xff] (%p53_p3), %v208_v4  ;;  %211 = vst [vmem:[%s4995_s7 + $0x28] sm:$0xff] (%p53_p3), %v210_v5  ;;  %v212_v6 = vld [vmem:[%s4987_s6 + $0xc0] sm:$0xff] (%p53_p3)  ;;  %v214_v7 = vld [vmem:[%s4987_s6 + $0xc8] sm:$0xff] (%p53_p3) }
  0x15   : > { %v216_v8 = vld [vmem:[%s4987_s6 + $0x100] sm:$0xff]  ;;  %213 = vst [vmem:[%s4995_s7 + $0x30] sm:$0xff] %v212_v6  ;;  %215 = vst [vmem:[%s4995_s7 + $0x38] sm:$0xff] %v214_v7  ;;  %v218_v9 = vld [vmem:[%s4987_s6 + $0x108] sm:$0xff] }
  0x16   : > { %217 = vst [vmem:[%s4995_s7 + $0x40] sm:$0xff] %v216_v8  ;;  %v220_v10 = vld [vmem:[%s4987_s6 + $0x140] sm:$0xff]  ;;  %v222_v11 = vld [vmem:[%s4987_s6 + $0x148] sm:$0xff]  ;;  %219 = vst [vmem:[%s4995_s7 + $0x48] sm:$0xff] %v218_v9 }
  0x17   : > { %221 = vst [vmem:[%s4995_s7 + $0x50] sm:$0xff] %v220_v10  ;;  %223 = vst [vmem:[%s4995_s7 + $0x58] sm:$0xff] %v222_v11  ;;  %v224_v12 = vld [vmem:[%s4987_s6 + $0x180] sm:$0xff]  ;;  %v226_v13 = vld [vmem:[%s4987_s6 + $0x188] sm:$0xff] }
  0x18   : > { %v228_v14 = vld [vmem:[%s4987_s6 + $0x1c0] sm:$0xff]  ;;  %225 = vst [vmem:[%s4995_s7 + $0x60] sm:$0xff] %v224_v12  ;;  %227 = vst [vmem:[%s4995_s7 + $0x68] sm:$0xff] %v226_v13  ;;  %v230_v15 = vld [vmem:[%s4987_s6 + $0x1c8] sm:$0xff] }
  0x19   : > { %229 = vst [vmem:[%s4995_s7 + $0x70] sm:$0xff] %v228_v14  ;;  %v232_v16 = vld [vmem:[%s4987_s6 + $0x200] sm:$0xff]  ;;  %v234_v17 = vld [vmem:[%s4987_s6 + $0x208] sm:$0xff]  ;;  %231 = vst [vmem:[%s4995_s7 + $0x78] sm:$0xff] %v230_v15 }
  0x1a   : > { %233 = vst [vmem:[%s4995_s7 + $0x80] sm:$0xff] %v232_v16  ;;  %235 = vst [vmem:[%s4995_s7 + $0x88] sm:$0xff] %v234_v17  ;;  %v236_v18 = vld [vmem:[%s4987_s6 + $0x240] sm:$0xff]  ;;  %v238_v19 = vld [vmem:[%s4987_s6 + $0x248] sm:$0xff] }
  0x1b   : > { %v240_v20 = vld [vmem:[%s4987_s6 + $0x280] sm:$0xff]  ;;  %237 = vst [vmem:[%s4995_s7 + $0x90] sm:$0xff] %v236_v18  ;;  %239 = vst [vmem:[%s4995_s7 + $0x98] sm:$0xff] %v238_v19  ;;  %v242_v21 = vld [vmem:[%s4987_s6 + $0x288] sm:$0xff] }
  0x1c   : > { %241 = vst [vmem:[%s4995_s7 + $0xa0] sm:$0xff] %v240_v20  ;;  %v244_v22 = vld [vmem:[%s4987_s6 + $0x2c0] sm:$0xff]  ;;  %v246_v23 = vld [vmem:[%s4987_s6 + $0x2c8] sm:$0xff]  ;;  %243 = vst [vmem:[%s4995_s7 + $0xa8] sm:$0xff] %v242_v21 }
  0x1d   : > { %245 = vst [vmem:[%s4995_s7 + $0xb0] sm:$0xff] %v244_v22  ;;  %247 = vst [vmem:[%s4995_s7 + $0xb8] sm:$0xff] %v246_v23  ;;  %v248_v24 = vld [vmem:[%s4987_s6 + $0x300] sm:$0xff]  ;;  %v250_v25 = vld [vmem:[%s4987_s6 + $0x308] sm:$0xff] }
  0x1e   : > { %v252_v26 = vld [vmem:[%s4987_s6 + $0x340] sm:$0xff]  ;;  %249 = vst [vmem:[%s4995_s7 + $0xc0] sm:$0xff] %v248_v24  ;;  %251 = vst [vmem:[%s4995_s7 + $0xc8] sm:$0xff] %v250_v25  ;;  %v254_v27 = vld [vmem:[%s4987_s6 + $0x348] sm:$0xff] }
  0x1f   : > { %253 = vst [vmem:[%s4995_s7 + $0xd0] sm:$0xff] %v252_v26  ;;  %v256_v28 = vld [vmem:[%s4987_s6 + $0x380] sm:$0xff]  ;;  %v258_v29 = vld [vmem:[%s4987_s6 + $0x388] sm:$0xff]  ;;  %255 = vst [vmem:[%s4995_s7 + $0xd8] sm:$0xff] %v254_v27 }
  0x20   : > { %257 = vst [vmem:[%s4995_s7 + $0xe0] sm:$0xff] %v256_v28  ;;  %259 = vst [vmem:[%s4995_s7 + $0xe8] sm:$0xff] %v258_v29  ;;  %v260_v30 = vld [vmem:[%s4987_s6 + $0x3c0] sm:$0xff]  ;;  %v262_v31 = vld [vmem:[%s4987_s6 + $0x3c8] sm:$0xff] }
  0x21   : > { %v264_v32 = vld [vmem:[%s4987_s6 + $0x400] sm:$0xff]  ;;  %261 = vst [vmem:[%s4995_s7 + $0xf0] sm:$0xff] %v260_v30  ;;  %263 = vst [vmem:[%s4995_s7 + $0xf8] sm:$0xff] %v262_v31  ;;  %v266_v33 = vld [vmem:[%s4987_s6 + $0x408] sm:$0xff] }
  0x22   : > { %265 = vst [vmem:[%s4995_s7 + $0x100] sm:$0xff] %v264_v32  ;;  %v268_v34 = vld [vmem:[%s4987_s6 + $0x440] sm:$0xff]  ;;  %v270_v35 = vld [vmem:[%s4987_s6 + $0x448] sm:$0xff]  ;;  %267 = vst [vmem:[%s4995_s7 + $0x108] sm:$0xff] %v266_v33 }
  0x23   : > { %269 = vst [vmem:[%s4995_s7 + $0x110] sm:$0xff] %v268_v34  ;;  %271 = vst [vmem:[%s4995_s7 + $0x118] sm:$0xff] %v270_v35  ;;  %v272_v36 = vld [vmem:[%s4987_s6 + $0x480] sm:$0xff]  ;;  %v274_v37 = vld [vmem:[%s4987_s6 + $0x488] sm:$0xff] }
  0x24   : > { %v276_v38 = vld [vmem:[%s4987_s6 + $0x4c0] sm:$0xff]  ;;  %273 = vst [vmem:[%s4995_s7 + $0x120] sm:$0xff] %v272_v36  ;;  %275 = vst [vmem:[%s4995_s7 + $0x128] sm:$0xff] %v274_v37  ;;  %v278_v39 = vld [vmem:[%s4987_s6 + $0x4c8] sm:$0xff] }
  0x25   : > { %277 = vst [vmem:[%s4995_s7 + $0x130] sm:$0xff] %v276_v38  ;;  %v280_v40 = vld [vmem:[%s4987_s6 + $0x500] sm:$0xff]  ;;  %v282_v41 = vld [vmem:[%s4987_s6 + $0x508] sm:$0xff]  ;;  %279 = vst [vmem:[%s4995_s7 + $0x138] sm:$0xff] %v278_v39 }
  0x26   : > { %281 = vst [vmem:[%s4995_s7 + $0x140] sm:$0xff] %v280_v40  ;;  %283 = vst [vmem:[%s4995_s7 + $0x148] sm:$0xff] %v282_v41  ;;  %v284_v42 = vld [vmem:[%s4987_s6 + $0x540] sm:$0xff]  ;;  %v286_v43 = vld [vmem:[%s4987_s6 + $0x548] sm:$0xff] }
  0x27   : > { %v288_v44 = vld [vmem:[%s4987_s6 + $0x580] sm:$0xff]  ;;  %285 = vst [vmem:[%s4995_s7 + $0x150] sm:$0xff] %v284_v42  ;;  %287 = vst [vmem:[%s4995_s7 + $0x158] sm:$0xff] %v286_v43  ;;  %v290_v45 = vld [vmem:[%s4987_s6 + $0x588] sm:$0xff] }
  0x28   : > { %289 = vst [vmem:[%s4995_s7 + $0x160] sm:$0xff] %v288_v44  ;;  %v292_v46 = vld [vmem:[%s4987_s6 + $0x5c0] sm:$0xff]  ;;  %v294_v47 = vld [vmem:[%s4987_s6 + $0x5c8] sm:$0xff]  ;;  %291 = vst [vmem:[%s4995_s7 + $0x168] sm:$0xff] %v290_v45 }
  0x29   : > { %293 = vst [vmem:[%s4995_s7 + $0x170] sm:$0xff] %v292_v46  ;;  %295 = vst [vmem:[%s4995_s7 + $0x178] sm:$0xff] %v294_v47  ;;  %v296_v48 = vld [vmem:[%s4987_s6 + $0x600] sm:$0xff]  ;;  %v298_v49 = vld [vmem:[%s4987_s6 + $0x608] sm:$0xff] }
  0x2a   : > { %v300_v50 = vld [vmem:[%s4987_s6 + $0x640] sm:$0xff]  ;;  %297 = vst [vmem:[%s4995_s7 + $0x180] sm:$0xff] %v296_v48  ;;  %299 = vst [vmem:[%s4995_s7 + $0x188] sm:$0xff] %v298_v49  ;;  %v302_v51 = vld [vmem:[%s4987_s6 + $0x648] sm:$0xff] }
  0x2b   : > { %301 = vst [vmem:[%s4995_s7 + $0x190] sm:$0xff] %v300_v50  ;;  %v304_v52 = vld [vmem:[%s4987_s6 + $0x680] sm:$0xff]  ;;  %v306_v53 = vld [vmem:[%s4987_s6 + $0x688] sm:$0xff]  ;;  %303 = vst [vmem:[%s4995_s7 + $0x198] sm:$0xff] %v302_v51 }
  0x2c   : > { %305 = vst [vmem:[%s4995_s7 + $0x1a0] sm:$0xff] %v304_v52  ;;  %307 = vst [vmem:[%s4995_s7 + $0x1a8] sm:$0xff] %v306_v53  ;;  %v308_v54 = vld [vmem:[%s4987_s6 + $0x6c0] sm:$0xff]  ;;  %v310_v55 = vld [vmem:[%s4987_s6 + $0x6c8] sm:$0xff] }
  0x2d   : > { %v312_v56 = vld [vmem:[%s4987_s6 + $0x700] sm:$0xff]  ;;  %309 = vst [vmem:[%s4995_s7 + $0x1b0] sm:$0xff] %v308_v54  ;;  %311 = vst [vmem:[%s4995_s7 + $0x1b8] sm:$0xff] %v310_v55  ;;  %v314_v57 = vld [vmem:[%s4987_s6 + $0x708] sm:$0xff] }
  0x2e   : > { %313 = vst [vmem:[%s4995_s7 + $0x1c0] sm:$0xff] %v312_v56  ;;  %v316_v58 = vld [vmem:[%s4987_s6 + $0x740] sm:$0xff]  ;;  %v318_v59 = vld [vmem:[%s4987_s6 + $0x748] sm:$0xff]  ;;  %315 = vst [vmem:[%s4995_s7 + $0x1c8] sm:$0xff] %v314_v57 }
  0x2f   : > { %317 = vst [vmem:[%s4995_s7 + $0x1d0] sm:$0xff] %v316_v58  ;;  %319 = vst [vmem:[%s4995_s7 + $0x1d8] sm:$0xff] %v318_v59  ;;  %v320_v60 = vld [vmem:[%s4987_s6 + $0x780] sm:$0xff]  ;;  %v322_v61 = vld [vmem:[%s4987_s6 + $0x788] sm:$0xff] }
  0x30   : > { %v324_v62 = vld [vmem:[%s4987_s6 + $0x7c0] sm:$0xff]  ;;  %321 = vst [vmem:[%s4995_s7 + $0x1e0] sm:$0xff] %v320_v60  ;;  %323 = vst [vmem:[%s4995_s7 + $0x1e8] sm:$0xff] %v322_v61  ;;  %v326_v63 = vld [vmem:[%s4987_s6 + $0x7c8] sm:$0xff] }
  0x31   : > { %325 = vst [vmem:[%s4995_s7 + $0x1f0] sm:$0xff] %v324_v62  ;;  %v328_v0 = vld [vmem:[%s4987_s6 + $0x800] sm:$0xff]  ;;  %v330_v1 = vld [vmem:[%s4987_s6 + $0x808] sm:$0xff]  ;;  %327 = vst [vmem:[%s4995_s7 + $0x1f8] sm:$0xff] %v326_v63 }
  0x32   : > { %329 = vst [vmem:[%s4995_s7 + $0x200] sm:$0xff] %v328_v0  ;;  %331 = vst [vmem:[%s4995_s7 + $0x208] sm:$0xff] %v330_v1  ;;  %v332_v2 = vld [vmem:[%s4987_s6 + $0x840] sm:$0xff]  ;;  %v334_v3 = vld [vmem:[%s4987_s6 + $0x848] sm:$0xff] }
  0x33   : > { %v336_v4 = vld [vmem:[%s4987_s6 + $0x880] sm:$0xff]  ;;  %333 = vst [vmem:[%s4995_s7 + $0x210] sm:$0xff] %v332_v2  ;;  %335 = vst [vmem:[%s4995_s7 + $0x218] sm:$0xff] %v334_v3  ;;  %v338_v5 = vld [vmem:[%s4987_s6 + $0x888] sm:$0xff] }
  0x34   : > { %337 = vst [vmem:[%s4995_s7 + $0x220] sm:$0xff] %v336_v4  ;;  %v340_v6 = vld [vmem:[%s4987_s6 + $0x8c0] sm:$0xff]  ;;  %v342_v7 = vld [vmem:[%s4987_s6 + $0x8c8] sm:$0xff]  ;;  %339 = vst [vmem:[%s4995_s7 + $0x228] sm:$0xff] %v338_v5 }
  0x35   : > { %341 = vst [vmem:[%s4995_s7 + $0x230] sm:$0xff] %v340_v6  ;;  %343 = vst [vmem:[%s4995_s7 + $0x238] sm:$0xff] %v342_v7  ;;  %v344_v8 = vld [vmem:[%s4987_s6 + $0x900] sm:$0xff]  ;;  %v346_v9 = vld [vmem:[%s4987_s6 + $0x908] sm:$0xff] }
  0x36   : > { %v348_v10 = vld [vmem:[%s4987_s6 + $0x940] sm:$0xff]  ;;  %345 = vst [vmem:[%s4995_s7 + $0x240] sm:$0xff] %v344_v8  ;;  %347 = vst [vmem:[%s4995_s7 + $0x248] sm:$0xff] %v346_v9  ;;  %v350_v11 = vld [vmem:[%s4987_s6 + $0x948] sm:$0xff] }
  0x37   : > { %349 = vst [vmem:[%s4995_s7 + $0x250] sm:$0xff] %v348_v10  ;;  %v352_v12 = vld [vmem:[%s4987_s6 + $0x980] sm:$0xff]  ;;  %v354_v13 = vld [vmem:[%s4987_s6 + $0x988] sm:$0xff]  ;;  %351 = vst [vmem:[%s4995_s7 + $0x258] sm:$0xff] %v350_v11 }
  0x38   : > { %353 = vst [vmem:[%s4995_s7 + $0x260] sm:$0xff] %v352_v12  ;;  %355 = vst [vmem:[%s4995_s7 + $0x268] sm:$0xff] %v354_v13  ;;  %v356_v14 = vld [vmem:[%s4987_s6 + $0x9c0] sm:$0xff]  ;;  %v358_v15 = vld [vmem:[%s4987_s6 + $0x9c8] sm:$0xff] }
  0x39   : > { %v360_v16 = vld [vmem:[%s4987_s6 + $0xa00] sm:$0xff]  ;;  %357 = vst [vmem:[%s4995_s7 + $0x270] sm:$0xff] %v356_v14  ;;  %359 = vst [vmem:[%s4995_s7 + $0x278] sm:$0xff] %v358_v15  ;;  %v362_v17 = vld [vmem:[%s4987_s6 + $0xa08] sm:$0xff] }
  0x3a   : > { %361 = vst [vmem:[%s4995_s7 + $0x280] sm:$0xff] %v360_v16  ;;  %v364_v18 = vld [vmem:[%s4987_s6 + $0xa40] sm:$0xff]  ;;  %v366_v19 = vld [vmem:[%s4987_s6 + $0xa48] sm:$0xff]  ;;  %363 = vst [vmem:[%s4995_s7 + $0x288] sm:$0xff] %v362_v17 }
  0x3b   : > { %365 = vst [vmem:[%s4995_s7 + $0x290] sm:$0xff] %v364_v18  ;;  %367 = vst [vmem:[%s4995_s7 + $0x298] sm:$0xff] %v366_v19  ;;  %v368_v20 = vld [vmem:[%s4987_s6 + $0xa80] sm:$0xff]  ;;  %v370_v21 = vld [vmem:[%s4987_s6 + $0xa88] sm:$0xff] }
  0x3c   : > { %v372_v22 = vld [vmem:[%s4987_s6 + $0xac0] sm:$0xff]  ;;  %369 = vst [vmem:[%s4995_s7 + $0x2a0] sm:$0xff] %v368_v20  ;;  %371 = vst [vmem:[%s4995_s7 + $0x2a8] sm:$0xff] %v370_v21  ;;  %v374_v23 = vld [vmem:[%s4987_s6 + $0xac8] sm:$0xff] }
  0x3d   : > { %373 = vst [vmem:[%s4995_s7 + $0x2b0] sm:$0xff] %v372_v22  ;;  %v376_v24 = vld [vmem:[%s4987_s6 + $0xb00] sm:$0xff]  ;;  %v378_v25 = vld [vmem:[%s4987_s6 + $0xb08] sm:$0xff]  ;;  %375 = vst [vmem:[%s4995_s7 + $0x2b8] sm:$0xff] %v374_v23 }
  0x3e   : > { %377 = vst [vmem:[%s4995_s7 + $0x2c0] sm:$0xff] %v376_v24  ;;  %379 = vst [vmem:[%s4995_s7 + $0x2c8] sm:$0xff] %v378_v25  ;;  %v380_v26 = vld [vmem:[%s4987_s6 + $0xb40] sm:$0xff]  ;;  %v382_v27 = vld [vmem:[%s4987_s6 + $0xb48] sm:$0xff] }
  0x3f   : > { %v384_v28 = vld [vmem:[%s4987_s6 + $0xb80] sm:$0xff]  ;;  %381 = vst [vmem:[%s4995_s7 + $0x2d0] sm:$0xff] %v380_v26  ;;  %383 = vst [vmem:[%s4995_s7 + $0x2d8] sm:$0xff] %v382_v27  ;;  %v386_v29 = vld [vmem:[%s4987_s6 + $0xb88] sm:$0xff] }
  0x40   : > { %385 = vst [vmem:[%s4995_s7 + $0x2e0] sm:$0xff] %v384_v28  ;;  %v388_v30 = vld [vmem:[%s4987_s6 + $0xbc0] sm:$0xff]  ;;  %v390_v31 = vld [vmem:[%s4987_s6 + $0xbc8] sm:$0xff]  ;;  %387 = vst [vmem:[%s4995_s7 + $0x2e8] sm:$0xff] %v386_v29 }
  0x41   : > { %389 = vst [vmem:[%s4995_s7 + $0x2f0] sm:$0xff] %v388_v30  ;;  %391 = vst [vmem:[%s4995_s7 + $0x2f8] sm:$0xff] %v390_v31  ;;  %v392_v32 = vld [vmem:[%s4987_s6 + $0xc00] sm:$0xff]  ;;  %v394_v33 = vld [vmem:[%s4987_s6 + $0xc08] sm:$0xff] }
  0x42   : > { %v396_v34 = vld [vmem:[%s4987_s6 + $0xc40] sm:$0xff]  ;;  %393 = vst [vmem:[%s4995_s7 + $0x300] sm:$0xff] %v392_v32  ;;  %395 = vst [vmem:[%s4995_s7 + $0x308] sm:$0xff] %v394_v33  ;;  %v398_v35 = vld [vmem:[%s4987_s6 + $0xc48] sm:$0xff] }
  0x43   : > { %397 = vst [vmem:[%s4995_s7 + $0x310] sm:$0xff] %v396_v34  ;;  %v400_v36 = vld [vmem:[%s4987_s6 + $0xc80] sm:$0xff]  ;;  %v402_v37 = vld [vmem:[%s4987_s6 + $0xc88] sm:$0xff]  ;;  %399 = vst [vmem:[%s4995_s7 + $0x318] sm:$0xff] %v398_v35 }
  0x44   : > { %401 = vst [vmem:[%s4995_s7 + $0x320] sm:$0xff] %v400_v36  ;;  %403 = vst [vmem:[%s4995_s7 + $0x328] sm:$0xff] %v402_v37  ;;  %v404_v38 = vld [vmem:[%s4987_s6 + $0xcc0] sm:$0xff]  ;;  %v406_v39 = vld [vmem:[%s4987_s6 + $0xcc8] sm:$0xff] }
  0x45   : > { %v408_v40 = vld [vmem:[%s4987_s6 + $0xd00] sm:$0xff]  ;;  %405 = vst [vmem:[%s4995_s7 + $0x330] sm:$0xff] %v404_v38  ;;  %407 = vst [vmem:[%s4995_s7 + $0x338] sm:$0xff] %v406_v39  ;;  %v410_v41 = vld [vmem:[%s4987_s6 + $0xd08] sm:$0xff] }
  0x46   : > { %409 = vst [vmem:[%s4995_s7 + $0x340] sm:$0xff] %v408_v40  ;;  %v412_v42 = vld [vmem:[%s4987_s6 + $0xd40] sm:$0xff]  ;;  %v414_v43 = vld [vmem:[%s4987_s6 + $0xd48] sm:$0xff]  ;;  %411 = vst [vmem:[%s4995_s7 + $0x348] sm:$0xff] %v410_v41 }
  0x47   : > { %413 = vst [vmem:[%s4995_s7 + $0x350] sm:$0xff] %v412_v42  ;;  %415 = vst [vmem:[%s4995_s7 + $0x358] sm:$0xff] %v414_v43  ;;  %v416_v44 = vld [vmem:[%s4987_s6 + $0xd80] sm:$0xff]  ;;  %v418_v45 = vld [vmem:[%s4987_s6 + $0xd88] sm:$0xff] }
  0x48   : > { %v420_v46 = vld [vmem:[%s4987_s6 + $0xdc0] sm:$0xff]  ;;  %417 = vst [vmem:[%s4995_s7 + $0x360] sm:$0xff] %v416_v44  ;;  %419 = vst [vmem:[%s4995_s7 + $0x368] sm:$0xff] %v418_v45  ;;  %v422_v47 = vld [vmem:[%s4987_s6 + $0xdc8] sm:$0xff] }
  0x49   : > { %421 = vst [vmem:[%s4995_s7 + $0x370] sm:$0xff] %v420_v46  ;;  %v424_v48 = vld [vmem:[%s4987_s6 + $0xe00] sm:$0xff]  ;;  %v426_v49 = vld [vmem:[%s4987_s6 + $0xe08] sm:$0xff]  ;;  %423 = vst [vmem:[%s4995_s7 + $0x378] sm:$0xff] %v422_v47 }
  0x4a   : > { %425 = vst [vmem:[%s4995_s7 + $0x380] sm:$0xff] %v424_v48  ;;  %427 = vst [vmem:[%s4995_s7 + $0x388] sm:$0xff] %v426_v49  ;;  %v428_v50 = vld [vmem:[%s4987_s6 + $0xe40] sm:$0xff]  ;;  %v430_v51 = vld [vmem:[%s4987_s6 + $0xe48] sm:$0xff] }
  0x4b   : > { %v432_v52 = vld [vmem:[%s4987_s6 + $0xe80] sm:$0xff]  ;;  %429 = vst [vmem:[%s4995_s7 + $0x390] sm:$0xff] %v428_v50  ;;  %431 = vst [vmem:[%s4995_s7 + $0x398] sm:$0xff] %v430_v51  ;;  %v434_v53 = vld [vmem:[%s4987_s6 + $0xe88] sm:$0xff] }
  0x4c   : > { %433 = vst [vmem:[%s4995_s7 + $0x3a0] sm:$0xff] %v432_v52  ;;  %v436_v54 = vld [vmem:[%s4987_s6 + $0xec0] sm:$0xff]  ;;  %v438_v55 = vld [vmem:[%s4987_s6 + $0xec8] sm:$0xff]  ;;  %435 = vst [vmem:[%s4995_s7 + $0x3a8] sm:$0xff] %v434_v53 }
  0x4d   : > { %437 = vst [vmem:[%s4995_s7 + $0x3b0] sm:$0xff] %v436_v54  ;;  %439 = vst [vmem:[%s4995_s7 + $0x3b8] sm:$0xff] %v438_v55  ;;  %v440_v56 = vld [vmem:[%s4987_s6 + $0xf00] sm:$0xff]  ;;  %v442_v57 = vld [vmem:[%s4987_s6 + $0xf08] sm:$0xff] }
  0x4e   : > { %v444_v58 = vld [vmem:[%s4987_s6 + $0xf40] sm:$0xff]  ;;  %441 = vst [vmem:[%s4995_s7 + $0x3c0] sm:$0xff] %v440_v56  ;;  %443 = vst [vmem:[%s4995_s7 + $0x3c8] sm:$0xff] %v442_v57  ;;  %v446_v59 = vld [vmem:[%s4987_s6 + $0xf48] sm:$0xff] }
  0x4f   : > { %445 = vst [vmem:[%s4995_s7 + $0x3d0] sm:$0xff] %v444_v58  ;;  %v448_v60 = vld [vmem:[%s4987_s6 + $0xf80] sm:$0xff]  ;;  %v450_v61 = vld [vmem:[%s4987_s6 + $0xf88] sm:$0xff]  ;;  %447 = vst [vmem:[%s4995_s7 + $0x3d8] sm:$0xff] %v446_v59 }
  0x50   : > { %449 = vst [vmem:[%s4995_s7 + $0x3e0] sm:$0xff] %v448_v60  ;;  %451 = vst [vmem:[%s4995_s7 + $0x3e8] sm:$0xff] %v450_v61  ;;  %v452_v62 = vld [vmem:[%s4987_s6 + $0xfc0] sm:$0xff]  ;;  %v454_v63 = vld [vmem:[%s4987_s6 + $0xfc8] sm:$0xff] }
  0x51   : > { %v456_v0 = vld [vmem:[%s4987_s6 + $0x1000] sm:$0xff]  ;;  %453 = vst [vmem:[%s4995_s7 + $0x3f0] sm:$0xff] %v452_v62  ;;  %455 = vst [vmem:[%s4995_s7 + $0x3f8] sm:$0xff] %v454_v63  ;;  %v458_v1 = vld [vmem:[%s4987_s6 + $0x1008] sm:$0xff] }
  0x52   : > { %457 = vst [vmem:[%s4995_s7 + $0x400] sm:$0xff] %v456_v0  ;;  %v460_v2 = vld [vmem:[%s4987_s6 + $0x1040] sm:$0xff]  ;;  %v462_v3 = vld [vmem:[%s4987_s6 + $0x1048] sm:$0xff]  ;;  %459 = vst [vmem:[%s4995_s7 + $0x408] sm:$0xff] %v458_v1 }
  0x53   : > { %461 = vst [vmem:[%s4995_s7 + $0x410] sm:$0xff] %v460_v2  ;;  %463 = vst [vmem:[%s4995_s7 + $0x418] sm:$0xff] %v462_v3  ;;  %v464_v4 = vld [vmem:[%s4987_s6 + $0x1080] sm:$0xff]  ;;  %v466_v5 = vld [vmem:[%s4987_s6 + $0x1088] sm:$0xff] }
  0x54   : > { %v468_v6 = vld [vmem:[%s4987_s6 + $0x10c0] sm:$0xff]  ;;  %465 = vst [vmem:[%s4995_s7 + $0x420] sm:$0xff] %v464_v4  ;;  %467 = vst [vmem:[%s4995_s7 + $0x428] sm:$0xff] %v466_v5  ;;  %v470_v7 = vld [vmem:[%s4987_s6 + $0x10c8] sm:$0xff] }
  0x55   : > { %469 = vst [vmem:[%s4995_s7 + $0x430] sm:$0xff] %v468_v6  ;;  %v472_v8 = vld [vmem:[%s4987_s6 + $0x1100] sm:$0xff]  ;;  %v474_v9 = vld [vmem:[%s4987_s6 + $0x1108] sm:$0xff]  ;;  %471 = vst [vmem:[%s4995_s7 + $0x438] sm:$0xff] %v470_v7 }
  0x56   : > { %473 = vst [vmem:[%s4995_s7 + $0x440] sm:$0xff] %v472_v8  ;;  %475 = vst [vmem:[%s4995_s7 + $0x448] sm:$0xff] %v474_v9  ;;  %v476_v10 = vld [vmem:[%s4987_s6 + $0x1140] sm:$0xff]  ;;  %v478_v11 = vld [vmem:[%s4987_s6 + $0x1148] sm:$0xff] }
  0x57   : > { %v480_v12 = vld [vmem:[%s4987_s6 + $0x1180] sm:$0xff]  ;;  %477 = vst [vmem:[%s4995_s7 + $0x450] sm:$0xff] %v476_v10  ;;  %479 = vst [vmem:[%s4995_s7 + $0x458] sm:$0xff] %v478_v11  ;;  %v482_v13 = vld [vmem:[%s4987_s6 + $0x1188] sm:$0xff] }
  0x58   : > { %481 = vst [vmem:[%s4995_s7 + $0x460] sm:$0xff] %v480_v12  ;;  %v484_v14 = vld [vmem:[%s4987_s6 + $0x11c0] sm:$0xff]  ;;  %v486_v15 = vld [vmem:[%s4987_s6 + $0x11c8] sm:$0xff]  ;;  %483 = vst [vmem:[%s4995_s7 + $0x468] sm:$0xff] %v482_v13 }
  0x59   : > { %485 = vst [vmem:[%s4995_s7 + $0x470] sm:$0xff] %v484_v14  ;;  %487 = vst [vmem:[%s4995_s7 + $0x478] sm:$0xff] %v486_v15  ;;  %v488_v16 = vld [vmem:[%s4987_s6 + $0x1200] sm:$0xff]  ;;  %v490_v17 = vld [vmem:[%s4987_s6 + $0x1208] sm:$0xff] }
  0x5a   : > { %v492_v18 = vld [vmem:[%s4987_s6 + $0x1240] sm:$0xff]  ;;  %489 = vst [vmem:[%s4995_s7 + $0x480] sm:$0xff] %v488_v16  ;;  %491 = vst [vmem:[%s4995_s7 + $0x488] sm:$0xff] %v490_v17  ;;  %v494_v19 = vld [vmem:[%s4987_s6 + $0x1248] sm:$0xff] }
  0x5b   : > { %493 = vst [vmem:[%s4995_s7 + $0x490] sm:$0xff] %v492_v18  ;;  %v496_v20 = vld [vmem:[%s4987_s6 + $0x1280] sm:$0xff]  ;;  %v498_v21 = vld [vmem:[%s4987_s6 + $0x1288] sm:$0xff]  ;;  %495 = vst [vmem:[%s4995_s7 + $0x498] sm:$0xff] %v494_v19 }
  0x5c   : > { %497 = vst [vmem:[%s4995_s7 + $0x4a0] sm:$0xff] %v496_v20  ;;  %499 = vst [vmem:[%s4995_s7 + $0x4a8] sm:$0xff] %v498_v21  ;;  %v500_v22 = vld [vmem:[%s4987_s6 + $0x12c0] sm:$0xff]  ;;  %v502_v23 = vld [vmem:[%s4987_s6 + $0x12c8] sm:$0xff] }
  0x5d   : > { %v504_v24 = vld [vmem:[%s4987_s6 + $0x1300] sm:$0xff]  ;;  %501 = vst [vmem:[%s4995_s7 + $0x4b0] sm:$0xff] %v500_v22  ;;  %503 = vst [vmem:[%s4995_s7 + $0x4b8] sm:$0xff] %v502_v23  ;;  %v506_v25 = vld [vmem:[%s4987_s6 + $0x1308] sm:$0xff] }
  0x5e   : > { %505 = vst [vmem:[%s4995_s7 + $0x4c0] sm:$0xff] %v504_v24  ;;  %v508_v26 = vld [vmem:[%s4987_s6 + $0x1340] sm:$0xff]  ;;  %v510_v27 = vld [vmem:[%s4987_s6 + $0x1348] sm:$0xff]  ;;  %507 = vst [vmem:[%s4995_s7 + $0x4c8] sm:$0xff] %v506_v25 }
  0x5f   : > { %509 = vst [vmem:[%s4995_s7 + $0x4d0] sm:$0xff] %v508_v26  ;;  %511 = vst [vmem:[%s4995_s7 + $0x4d8] sm:$0xff] %v510_v27  ;;  %v512_v28 = vld [vmem:[%s4987_s6 + $0x1380] sm:$0xff]  ;;  %v514_v29 = vld [vmem:[%s4987_s6 + $0x1388] sm:$0xff] }
  0x60   : > { %v516_v30 = vld [vmem:[%s4987_s6 + $0x13c0] sm:$0xff]  ;;  %513 = vst [vmem:[%s4995_s7 + $0x4e0] sm:$0xff] %v512_v28  ;;  %515 = vst [vmem:[%s4995_s7 + $0x4e8] sm:$0xff] %v514_v29  ;;  %v518_v31 = vld [vmem:[%s4987_s6 + $0x13c8] sm:$0xff] }
  0x61   : > { %517 = vst [vmem:[%s4995_s7 + $0x4f0] sm:$0xff] %v516_v30  ;;  %v520_v32 = vld [vmem:[%s4987_s6 + $0x1400] sm:$0xff]  ;;  %v522_v33 = vld [vmem:[%s4987_s6 + $0x1408] sm:$0xff]  ;;  %519 = vst [vmem:[%s4995_s7 + $0x4f8] sm:$0xff] %v518_v31 }
  0x62   : > { %521 = vst [vmem:[%s4995_s7 + $0x500] sm:$0xff] %v520_v32  ;;  %523 = vst [vmem:[%s4995_s7 + $0x508] sm:$0xff] %v522_v33  ;;  %v524_v34 = vld [vmem:[%s4987_s6 + $0x1440] sm:$0xff]  ;;  %v526_v35 = vld [vmem:[%s4987_s6 + $0x1448] sm:$0xff] }
  0x63   : > { %v528_v36 = vld [vmem:[%s4987_s6 + $0x1480] sm:$0xff]  ;;  %525 = vst [vmem:[%s4995_s7 + $0x510] sm:$0xff] %v524_v34  ;;  %527 = vst [vmem:[%s4995_s7 + $0x518] sm:$0xff] %v526_v35  ;;  %v530_v37 = vld [vmem:[%s4987_s6 + $0x1488] sm:$0xff] }
  0x64   : > { %529 = vst [vmem:[%s4995_s7 + $0x520] sm:$0xff] %v528_v36  ;;  %v532_v38 = vld [vmem:[%s4987_s6 + $0x14c0] sm:$0xff]  ;;  %v534_v39 = vld [vmem:[%s4987_s6 + $0x14c8] sm:$0xff]  ;;  %531 = vst [vmem:[%s4995_s7 + $0x528] sm:$0xff] %v530_v37 }
  0x65   : > { %533 = vst [vmem:[%s4995_s7 + $0x530] sm:$0xff] %v532_v38  ;;  %535 = vst [vmem:[%s4995_s7 + $0x538] sm:$0xff] %v534_v39  ;;  %v536_v40 = vld [vmem:[%s4987_s6 + $0x1500] sm:$0xff]  ;;  %v538_v41 = vld [vmem:[%s4987_s6 + $0x1508] sm:$0xff] }
  0x66   : > { %v540_v42 = vld [vmem:[%s4987_s6 + $0x1540] sm:$0xff]  ;;  %537 = vst [vmem:[%s4995_s7 + $0x540] sm:$0xff] %v536_v40  ;;  %539 = vst [vmem:[%s4995_s7 + $0x548] sm:$0xff] %v538_v41  ;;  %v542_v43 = vld [vmem:[%s4987_s6 + $0x1548] sm:$0xff] }
  0x67   : > { %541 = vst [vmem:[%s4995_s7 + $0x550] sm:$0xff] %v540_v42  ;;  %v544_v44 = vld [vmem:[%s4987_s6 + $0x1580] sm:$0xff]  ;;  %v546_v45 = vld [vmem:[%s4987_s6 + $0x1588] sm:$0xff]  ;;  %543 = vst [vmem:[%s4995_s7 + $0x558] sm:$0xff] %v542_v43 }
  0x68   : > { %545 = vst [vmem:[%s4995_s7 + $0x560] sm:$0xff] %v544_v44  ;;  %547 = vst [vmem:[%s4995_s7 + $0x568] sm:$0xff] %v546_v45  ;;  %v548_v46 = vld [vmem:[%s4987_s6 + $0x15c0] sm:$0xff]  ;;  %v550_v47 = vld [vmem:[%s4987_s6 + $0x15c8] sm:$0xff] }
  0x69   : > { %v552_v48 = vld [vmem:[%s4987_s6 + $0x1600] sm:$0xff]  ;;  %549 = vst [vmem:[%s4995_s7 + $0x570] sm:$0xff] %v548_v46  ;;  %551 = vst [vmem:[%s4995_s7 + $0x578] sm:$0xff] %v550_v47  ;;  %v554_v49 = vld [vmem:[%s4987_s6 + $0x1608] sm:$0xff] }
  0x6a   : > { %553 = vst [vmem:[%s4995_s7 + $0x580] sm:$0xff] %v552_v48  ;;  %v556_v50 = vld [vmem:[%s4987_s6 + $0x1640] sm:$0xff]  ;;  %v558_v51 = vld [vmem:[%s4987_s6 + $0x1648] sm:$0xff]  ;;  %555 = vst [vmem:[%s4995_s7 + $0x588] sm:$0xff] %v554_v49 }
  0x6b   : > { %557 = vst [vmem:[%s4995_s7 + $0x590] sm:$0xff] %v556_v50  ;;  %559 = vst [vmem:[%s4995_s7 + $0x598] sm:$0xff] %v558_v51  ;;  %v560_v52 = vld [vmem:[%s4987_s6 + $0x1680] sm:$0xff]  ;;  %v562_v53 = vld [vmem:[%s4987_s6 + $0x1688] sm:$0xff] }
  0x6c   : > { %v564_v54 = vld [vmem:[%s4987_s6 + $0x16c0] sm:$0xff]  ;;  %561 = vst [vmem:[%s4995_s7 + $0x5a0] sm:$0xff] %v560_v52  ;;  %563 = vst [vmem:[%s4995_s7 + $0x5a8] sm:$0xff] %v562_v53  ;;  %v566_v55 = vld [vmem:[%s4987_s6 + $0x16c8] sm:$0xff] }
  0x6d   : > { %565 = vst [vmem:[%s4995_s7 + $0x5b0] sm:$0xff] %v564_v54  ;;  %v568_v56 = vld [vmem:[%s4987_s6 + $0x1700] sm:$0xff]  ;;  %v570_v57 = vld [vmem:[%s4987_s6 + $0x1708] sm:$0xff]  ;;  %567 = vst [vmem:[%s4995_s7 + $0x5b8] sm:$0xff] %v566_v55 }
  0x6e   : > { %569 = vst [vmem:[%s4995_s7 + $0x5c0] sm:$0xff] %v568_v56  ;;  %571 = vst [vmem:[%s4995_s7 + $0x5c8] sm:$0xff] %v570_v57  ;;  %v572_v58 = vld [vmem:[%s4987_s6 + $0x1740] sm:$0xff]  ;;  %v574_v59 = vld [vmem:[%s4987_s6 + $0x1748] sm:$0xff] }
  0x6f   : > { %v576_v60 = vld [vmem:[%s4987_s6 + $0x1780] sm:$0xff]  ;;  %573 = vst [vmem:[%s4995_s7 + $0x5d0] sm:$0xff] %v572_v58  ;;  %575 = vst [vmem:[%s4995_s7 + $0x5d8] sm:$0xff] %v574_v59  ;;  %v578_v61 = vld [vmem:[%s4987_s6 + $0x1788] sm:$0xff] }
  0x70   : > { %577 = vst [vmem:[%s4995_s7 + $0x5e0] sm:$0xff] %v576_v60  ;;  %v580_v62 = vld [vmem:[%s4987_s6 + $0x17c0] sm:$0xff]  ;;  %v582_v63 = vld [vmem:[%s4987_s6 + $0x17c8] sm:$0xff]  ;;  %579 = vst [vmem:[%s4995_s7 + $0x5e8] sm:$0xff] %v578_v61 }
  0x71   : > { %581 = vst [vmem:[%s4995_s7 + $0x5f0] sm:$0xff] %v580_v62  ;;  %583 = vst [vmem:[%s4995_s7 + $0x5f8] sm:$0xff] %v582_v63  ;;  %v584_v0 = vld [vmem:[%s4987_s6 + $0x1800] sm:$0xff]  ;;  %v586_v1 = vld [vmem:[%s4987_s6 + $0x1808] sm:$0xff] }
  0x72   : > { %v588_v2 = vld [vmem:[%s4987_s6 + $0x1840] sm:$0xff]  ;;  %585 = vst [vmem:[%s4995_s7 + $0x600] sm:$0xff] %v584_v0  ;;  %587 = vst [vmem:[%s4995_s7 + $0x608] sm:$0xff] %v586_v1  ;;  %v590_v3 = vld [vmem:[%s4987_s6 + $0x1848] sm:$0xff] }
  0x73   : > { %589 = vst [vmem:[%s4995_s7 + $0x610] sm:$0xff] %v588_v2  ;;  %v592_v4 = vld [vmem:[%s4987_s6 + $0x1880] sm:$0xff]  ;;  %v594_v5 = vld [vmem:[%s4987_s6 + $0x1888] sm:$0xff]  ;;  %591 = vst [vmem:[%s4995_s7 + $0x618] sm:$0xff] %v590_v3 }
  0x74   : > { %593 = vst [vmem:[%s4995_s7 + $0x620] sm:$0xff] %v592_v4  ;;  %595 = vst [vmem:[%s4995_s7 + $0x628] sm:$0xff] %v594_v5  ;;  %v596_v6 = vld [vmem:[%s4987_s6 + $0x18c0] sm:$0xff]  ;;  %v598_v7 = vld [vmem:[%s4987_s6 + $0x18c8] sm:$0xff] }
  0x75   : > { %v600_v8 = vld [vmem:[%s4987_s6 + $0x1900] sm:$0xff]  ;;  %597 = vst [vmem:[%s4995_s7 + $0x630] sm:$0xff] %v596_v6  ;;  %599 = vst [vmem:[%s4995_s7 + $0x638] sm:$0xff] %v598_v7  ;;  %v602_v9 = vld [vmem:[%s4987_s6 + $0x1908] sm:$0xff] }
  0x76   : > { %601 = vst [vmem:[%s4995_s7 + $0x640] sm:$0xff] %v600_v8  ;;  %v604_v10 = vld [vmem:[%s4987_s6 + $0x1940] sm:$0xff]  ;;  %v606_v11 = vld [vmem:[%s4987_s6 + $0x1948] sm:$0xff]  ;;  %603 = vst [vmem:[%s4995_s7 + $0x648] sm:$0xff] %v602_v9 }
  0x77   : > { %605 = vst [vmem:[%s4995_s7 + $0x650] sm:$0xff] %v604_v10  ;;  %607 = vst [vmem:[%s4995_s7 + $0x658] sm:$0xff] %v606_v11  ;;  %v608_v12 = vld [vmem:[%s4987_s6 + $0x1980] sm:$0xff]  ;;  %v610_v13 = vld [vmem:[%s4987_s6 + $0x1988] sm:$0xff] }
  0x78   : > { %v612_v14 = vld [vmem:[%s4987_s6 + $0x19c0] sm:$0xff]  ;;  %609 = vst [vmem:[%s4995_s7 + $0x660] sm:$0xff] %v608_v12  ;;  %611 = vst [vmem:[%s4995_s7 + $0x668] sm:$0xff] %v610_v13  ;;  %v614_v15 = vld [vmem:[%s4987_s6 + $0x19c8] sm:$0xff] }
  0x79   : > { %613 = vst [vmem:[%s4995_s7 + $0x670] sm:$0xff] %v612_v14  ;;  %v616_v16 = vld [vmem:[%s4987_s6 + $0x1a00] sm:$0xff]  ;;  %v618_v17 = vld [vmem:[%s4987_s6 + $0x1a08] sm:$0xff]  ;;  %615 = vst [vmem:[%s4995_s7 + $0x678] sm:$0xff] %v614_v15 }
  0x7a   : > { %617 = vst [vmem:[%s4995_s7 + $0x680] sm:$0xff] %v616_v16  ;;  %619 = vst [vmem:[%s4995_s7 + $0x688] sm:$0xff] %v618_v17  ;;  %v620_v18 = vld [vmem:[%s4987_s6 + $0x1a40] sm:$0xff]  ;;  %v622_v19 = vld [vmem:[%s4987_s6 + $0x1a48] sm:$0xff] }
  0x7b   : > { %v624_v20 = vld [vmem:[%s4987_s6 + $0x1a80] sm:$0xff]  ;;  %621 = vst [vmem:[%s4995_s7 + $0x690] sm:$0xff] %v620_v18  ;;  %623 = vst [vmem:[%s4995_s7 + $0x698] sm:$0xff] %v622_v19  ;;  %v626_v21 = vld [vmem:[%s4987_s6 + $0x1a88] sm:$0xff] }
  0x7c   : > { %625 = vst [vmem:[%s4995_s7 + $0x6a0] sm:$0xff] %v624_v20  ;;  %v628_v22 = vld [vmem:[%s4987_s6 + $0x1ac0] sm:$0xff]  ;;  %v630_v23 = vld [vmem:[%s4987_s6 + $0x1ac8] sm:$0xff]  ;;  %627 = vst [vmem:[%s4995_s7 + $0x6a8] sm:$0xff] %v626_v21 }
  0x7d   : > { %629 = vst [vmem:[%s4995_s7 + $0x6b0] sm:$0xff] %v628_v22  ;;  %631 = vst [vmem:[%s4995_s7 + $0x6b8] sm:$0xff] %v630_v23  ;;  %v632_v24 = vld [vmem:[%s4987_s6 + $0x1b00] sm:$0xff]  ;;  %v634_v25 = vld [vmem:[%s4987_s6 + $0x1b08] sm:$0xff] }
  0x7e   : > { %v636_v26 = vld [vmem:[%s4987_s6 + $0x1b40] sm:$0xff]  ;;  %633 = vst [vmem:[%s4995_s7 + $0x6c0] sm:$0xff] %v632_v24  ;;  %635 = vst [vmem:[%s4995_s7 + $0x6c8] sm:$0xff] %v634_v25  ;;  %v638_v27 = vld [vmem:[%s4987_s6 + $0x1b48] sm:$0xff] }
  0x7f   : > { %637 = vst [vmem:[%s4995_s7 + $0x6d0] sm:$0xff] %v636_v26  ;;  %v640_v28 = vld [vmem:[%s4987_s6 + $0x1b80] sm:$0xff]  ;;  %v642_v29 = vld [vmem:[%s4987_s6 + $0x1b88] sm:$0xff]  ;;  %639 = vst [vmem:[%s4995_s7 + $0x6d8] sm:$0xff] %v638_v27 }
  0x80   : > { %641 = vst [vmem:[%s4995_s7 + $0x6e0] sm:$0xff] %v640_v28  ;;  %643 = vst [vmem:[%s4995_s7 + $0x6e8] sm:$0xff] %v642_v29  ;;  %v644_v30 = vld [vmem:[%s4987_s6 + $0x1bc0] sm:$0xff]  ;;  %v646_v31 = vld [vmem:[%s4987_s6 + $0x1bc8] sm:$0xff] }
  0x81   : > { %v648_v32 = vld [vmem:[%s4987_s6 + $0x1c00] sm:$0xff]  ;;  %645 = vst [vmem:[%s4995_s7 + $0x6f0] sm:$0xff] %v644_v30  ;;  %647 = vst [vmem:[%s4995_s7 + $0x6f8] sm:$0xff] %v646_v31  ;;  %v650_v33 = vld [vmem:[%s4987_s6 + $0x1c08] sm:$0xff] }
  0x82   : > { %649 = vst [vmem:[%s4995_s7 + $0x700] sm:$0xff] %v648_v32  ;;  %v652_v34 = vld [vmem:[%s4987_s6 + $0x1c40] sm:$0xff]  ;;  %v654_v35 = vld [vmem:[%s4987_s6 + $0x1c48] sm:$0xff]  ;;  %651 = vst [vmem:[%s4995_s7 + $0x708] sm:$0xff] %v650_v33 }
  0x83   : > { %653 = vst [vmem:[%s4995_s7 + $0x710] sm:$0xff] %v652_v34  ;;  %655 = vst [vmem:[%s4995_s7 + $0x718] sm:$0xff] %v654_v35  ;;  %v656_v36 = vld [vmem:[%s4987_s6 + $0x1c80] sm:$0xff]  ;;  %v658_v37 = vld [vmem:[%s4987_s6 + $0x1c88] sm:$0xff] }
  0x84   : > { %v660_v38 = vld [vmem:[%s4987_s6 + $0x1cc0] sm:$0xff]  ;;  %657 = vst [vmem:[%s4995_s7 + $0x720] sm:$0xff] %v656_v36  ;;  %659 = vst [vmem:[%s4995_s7 + $0x728] sm:$0xff] %v658_v37  ;;  %v662_v39 = vld [vmem:[%s4987_s6 + $0x1cc8] sm:$0xff] }
  0x85   : > { %661 = vst [vmem:[%s4995_s7 + $0x730] sm:$0xff] %v660_v38  ;;  %v664_v40 = vld [vmem:[%s4987_s6 + $0x1d00] sm:$0xff]  ;;  %v666_v41 = vld [vmem:[%s4987_s6 + $0x1d08] sm:$0xff]  ;;  %663 = vst [vmem:[%s4995_s7 + $0x738] sm:$0xff] %v662_v39 }
  0x86   : > { %665 = vst [vmem:[%s4995_s7 + $0x740] sm:$0xff] %v664_v40  ;;  %667 = vst [vmem:[%s4995_s7 + $0x748] sm:$0xff] %v666_v41  ;;  %v668_v42 = vld [vmem:[%s4987_s6 + $0x1d40] sm:$0xff]  ;;  %v670_v43 = vld [vmem:[%s4987_s6 + $0x1d48] sm:$0xff] }
  0x87   : > { %v672_v44 = vld [vmem:[%s4987_s6 + $0x1d80] sm:$0xff]  ;;  %669 = vst [vmem:[%s4995_s7 + $0x750] sm:$0xff] %v668_v42  ;;  %671 = vst [vmem:[%s4995_s7 + $0x758] sm:$0xff] %v670_v43  ;;  %v674_v45 = vld [vmem:[%s4987_s6 + $0x1d88] sm:$0xff] }
  0x88   : > { %673 = vst [vmem:[%s4995_s7 + $0x760] sm:$0xff] %v672_v44  ;;  %v676_v46 = vld [vmem:[%s4987_s6 + $0x1dc0] sm:$0xff]  ;;  %v678_v47 = vld [vmem:[%s4987_s6 + $0x1dc8] sm:$0xff]  ;;  %675 = vst [vmem:[%s4995_s7 + $0x768] sm:$0xff] %v674_v45 }
  0x89   : > { %677 = vst [vmem:[%s4995_s7 + $0x770] sm:$0xff] %v676_v46  ;;  %679 = vst [vmem:[%s4995_s7 + $0x778] sm:$0xff] %v678_v47  ;;  %v680_v48 = vld [vmem:[%s4987_s6 + $0x1e00] sm:$0xff]  ;;  %v682_v49 = vld [vmem:[%s4987_s6 + $0x1e08] sm:$0xff] }
  0x8a   : > { %v684_v50 = vld [vmem:[%s4987_s6 + $0x1e40] sm:$0xff]  ;;  %681 = vst [vmem:[%s4995_s7 + $0x780] sm:$0xff] %v680_v48  ;;  %683 = vst [vmem:[%s4995_s7 + $0x788] sm:$0xff] %v682_v49  ;;  %v686_v51 = vld [vmem:[%s4987_s6 + $0x1e48] sm:$0xff] }
  0x8b   : > { %685 = vst [vmem:[%s4995_s7 + $0x790] sm:$0xff] %v684_v50  ;;  %v688_v52 = vld [vmem:[%s4987_s6 + $0x1e80] sm:$0xff]  ;;  %v690_v53 = vld [vmem:[%s4987_s6 + $0x1e88] sm:$0xff]  ;;  %687 = vst [vmem:[%s4995_s7 + $0x798] sm:$0xff] %v686_v51 }
  0x8c   : > { %689 = vst [vmem:[%s4995_s7 + $0x7a0] sm:$0xff] %v688_v52  ;;  %691 = vst [vmem:[%s4995_s7 + $0x7a8] sm:$0xff] %v690_v53  ;;  %v692_v54 = vld [vmem:[%s4987_s6 + $0x1ec0] sm:$0xff]  ;;  %v694_v55 = vld [vmem:[%s4987_s6 + $0x1ec8] sm:$0xff] }
  0x8d   : > { %v696_v56 = vld [vmem:[%s4987_s6 + $0x1f00] sm:$0xff]  ;;  %693 = vst [vmem:[%s4995_s7 + $0x7b0] sm:$0xff] %v692_v54  ;;  %695 = vst [vmem:[%s4995_s7 + $0x7b8] sm:$0xff] %v694_v55  ;;  %v698_v57 = vld [vmem:[%s4987_s6 + $0x1f08] sm:$0xff] }
  0x8e   : > { %697 = vst [vmem:[%s4995_s7 + $0x7c0] sm:$0xff] %v696_v56  ;;  %v700_v58 = vld [vmem:[%s4987_s6 + $0x1f40] sm:$0xff]  ;;  %v702_v59 = vld [vmem:[%s4987_s6 + $0x1f48] sm:$0xff]  ;;  %699 = vst [vmem:[%s4995_s7 + $0x7c8] sm:$0xff] %v698_v57 }
  0x8f   : > { %701 = vst [vmem:[%s4995_s7 + $0x7d0] sm:$0xff] %v700_v58  ;;  %703 = vst [vmem:[%s4995_s7 + $0x7d8] sm:$0xff] %v702_v59  ;;  %v704_v60 = vld [vmem:[%s4987_s6 + $0x1f80] sm:$0xff]  ;;  %v706_v61 = vld [vmem:[%s4987_s6 + $0x1f88] sm:$0xff] }
  0x90   : > { %v708_v62 = vld [vmem:[%s4987_s6 + $0x1fc0] sm:$0xff]  ;;  %705 = vst [vmem:[%s4995_s7 + $0x7e0] sm:$0xff] %v704_v60  ;;  %707 = vst [vmem:[%s4995_s7 + $0x7e8] sm:$0xff] %v706_v61  ;;  %v710_v63 = vld [vmem:[%s4987_s6 + $0x1fc8] sm:$0xff] }
  0x91   : > { %709 = vst [vmem:[%s4995_s7 + $0x7f0] sm:$0xff] %v708_v62  ;;  %v712_v0 = vld [vmem:[%s4987_s6 + $0x2000] sm:$0xff]  ;;  %v714_v1 = vld [vmem:[%s4987_s6 + $0x2008] sm:$0xff]  ;;  %711 = vst [vmem:[%s4995_s7 + $0x7f8] sm:$0xff] %v710_v63 }
  0x92   : > { %713 = vst [vmem:[%s4995_s7 + $0x800] sm:$0xff] %v712_v0  ;;  %715 = vst [vmem:[%s4995_s7 + $0x808] sm:$0xff] %v714_v1  ;;  %v716_v2 = vld [vmem:[%s4987_s6 + $0x2040] sm:$0xff]  ;;  %v718_v3 = vld [vmem:[%s4987_s6 + $0x2048] sm:$0xff] }
  0x93   : > { %v720_v4 = vld [vmem:[%s4987_s6 + $0x2080] sm:$0xff]  ;;  %717 = vst [vmem:[%s4995_s7 + $0x810] sm:$0xff] %v716_v2  ;;  %719 = vst [vmem:[%s4995_s7 + $0x818] sm:$0xff] %v718_v3  ;;  %v722_v5 = vld [vmem:[%s4987_s6 + $0x2088] sm:$0xff] }
  0x94   : > { %721 = vst [vmem:[%s4995_s7 + $0x820] sm:$0xff] %v720_v4  ;;  %v724_v6 = vld [vmem:[%s4987_s6 + $0x20c0] sm:$0xff]  ;;  %v726_v7 = vld [vmem:[%s4987_s6 + $0x20c8] sm:$0xff]  ;;  %723 = vst [vmem:[%s4995_s7 + $0x828] sm:$0xff] %v722_v5 }
  0x95   : > { %725 = vst [vmem:[%s4995_s7 + $0x830] sm:$0xff] %v724_v6  ;;  %727 = vst [vmem:[%s4995_s7 + $0x838] sm:$0xff] %v726_v7  ;;  %v728_v8 = vld [vmem:[%s4987_s6 + $0x2100] sm:$0xff]  ;;  %v730_v9 = vld [vmem:[%s4987_s6 + $0x2108] sm:$0xff] }
  0x96   : > { %v732_v10 = vld [vmem:[%s4987_s6 + $0x2140] sm:$0xff]  ;;  %729 = vst [vmem:[%s4995_s7 + $0x840] sm:$0xff] %v728_v8  ;;  %731 = vst [vmem:[%s4995_s7 + $0x848] sm:$0xff] %v730_v9  ;;  %v734_v11 = vld [vmem:[%s4987_s6 + $0x2148] sm:$0xff] }
  0x97   : > { %733 = vst [vmem:[%s4995_s7 + $0x850] sm:$0xff] %v732_v10  ;;  %v736_v12 = vld [vmem:[%s4987_s6 + $0x2180] sm:$0xff]  ;;  %v738_v13 = vld [vmem:[%s4987_s6 + $0x2188] sm:$0xff]  ;;  %735 = vst [vmem:[%s4995_s7 + $0x858] sm:$0xff] %v734_v11 }
  0x98   : > { %737 = vst [vmem:[%s4995_s7 + $0x860] sm:$0xff] %v736_v12  ;;  %739 = vst [vmem:[%s4995_s7 + $0x868] sm:$0xff] %v738_v13  ;;  %v740_v14 = vld [vmem:[%s4987_s6 + $0x21c0] sm:$0xff]  ;;  %v742_v15 = vld [vmem:[%s4987_s6 + $0x21c8] sm:$0xff] }
  0x99   : > { %v744_v16 = vld [vmem:[%s4987_s6 + $0x2200] sm:$0xff]  ;;  %741 = vst [vmem:[%s4995_s7 + $0x870] sm:$0xff] %v740_v14  ;;  %743 = vst [vmem:[%s4995_s7 + $0x878] sm:$0xff] %v742_v15  ;;  %v746_v17 = vld [vmem:[%s4987_s6 + $0x2208] sm:$0xff] }
  0x9a   : > { %745 = vst [vmem:[%s4995_s7 + $0x880] sm:$0xff] %v744_v16  ;;  %v748_v18 = vld [vmem:[%s4987_s6 + $0x2240] sm:$0xff]  ;;  %v750_v19 = vld [vmem:[%s4987_s6 + $0x2248] sm:$0xff]  ;;  %747 = vst [vmem:[%s4995_s7 + $0x888] sm:$0xff] %v746_v17 }
  0x9b   : > { %749 = vst [vmem:[%s4995_s7 + $0x890] sm:$0xff] %v748_v18  ;;  %751 = vst [vmem:[%s4995_s7 + $0x898] sm:$0xff] %v750_v19  ;;  %v752_v20 = vld [vmem:[%s4987_s6 + $0x2280] sm:$0xff]  ;;  %v754_v21 = vld [vmem:[%s4987_s6 + $0x2288] sm:$0xff] }
  0x9c   : > { %v756_v22 = vld [vmem:[%s4987_s6 + $0x22c0] sm:$0xff]  ;;  %753 = vst [vmem:[%s4995_s7 + $0x8a0] sm:$0xff] %v752_v20  ;;  %755 = vst [vmem:[%s4995_s7 + $0x8a8] sm:$0xff] %v754_v21  ;;  %v758_v23 = vld [vmem:[%s4987_s6 + $0x22c8] sm:$0xff] }
  0x9d   : > { %757 = vst [vmem:[%s4995_s7 + $0x8b0] sm:$0xff] %v756_v22  ;;  %v760_v24 = vld [vmem:[%s4987_s6 + $0x2300] sm:$0xff]  ;;  %v762_v25 = vld [vmem:[%s4987_s6 + $0x2308] sm:$0xff]  ;;  %759 = vst [vmem:[%s4995_s7 + $0x8b8] sm:$0xff] %v758_v23 }
  0x9e   : > { %761 = vst [vmem:[%s4995_s7 + $0x8c0] sm:$0xff] %v760_v24  ;;  %763 = vst [vmem:[%s4995_s7 + $0x8c8] sm:$0xff] %v762_v25  ;;  %v764_v26 = vld [vmem:[%s4987_s6 + $0x2340] sm:$0xff]  ;;  %v766_v27 = vld [vmem:[%s4987_s6 + $0x2348] sm:$0xff] }
  0x9f   : > { %v768_v28 = vld [vmem:[%s4987_s6 + $0x2380] sm:$0xff]  ;;  %765 = vst [vmem:[%s4995_s7 + $0x8d0] sm:$0xff] %v764_v26  ;;  %767 = vst [vmem:[%s4995_s7 + $0x8d8] sm:$0xff] %v766_v27  ;;  %v770_v29 = vld [vmem:[%s4987_s6 + $0x2388] sm:$0xff] }
  0xa0   : > { %769 = vst [vmem:[%s4995_s7 + $0x8e0] sm:$0xff] %v768_v28  ;;  %v772_v30 = vld [vmem:[%s4987_s6 + $0x23c0] sm:$0xff]  ;;  %v774_v31 = vld [vmem:[%s4987_s6 + $0x23c8] sm:$0xff]  ;;  %771 = vst [vmem:[%s4995_s7 + $0x8e8] sm:$0xff] %v770_v29 }
  0xa1   : > { %773 = vst [vmem:[%s4995_s7 + $0x8f0] sm:$0xff] %v772_v30  ;;  %775 = vst [vmem:[%s4995_s7 + $0x8f8] sm:$0xff] %v774_v31  ;;  %v776_v32 = vld [vmem:[%s4987_s6 + $0x2400] sm:$0xff]  ;;  %v778_v33 = vld [vmem:[%s4987_s6 + $0x2408] sm:$0xff] }
  0xa2   : > { %v780_v34 = vld [vmem:[%s4987_s6 + $0x2440] sm:$0xff]  ;;  %777 = vst [vmem:[%s4995_s7 + $0x900] sm:$0xff] %v776_v32  ;;  %779 = vst [vmem:[%s4995_s7 + $0x908] sm:$0xff] %v778_v33  ;;  %v782_v35 = vld [vmem:[%s4987_s6 + $0x2448] sm:$0xff] }
  0xa3   : > { %781 = vst [vmem:[%s4995_s7 + $0x910] sm:$0xff] %v780_v34  ;;  %v784_v36 = vld [vmem:[%s4987_s6 + $0x2480] sm:$0xff]  ;;  %v786_v37 = vld [vmem:[%s4987_s6 + $0x2488] sm:$0xff]  ;;  %783 = vst [vmem:[%s4995_s7 + $0x918] sm:$0xff] %v782_v35 }
  0xa4   : > { %785 = vst [vmem:[%s4995_s7 + $0x920] sm:$0xff] %v784_v36  ;;  %787 = vst [vmem:[%s4995_s7 + $0x928] sm:$0xff] %v786_v37  ;;  %v788_v38 = vld [vmem:[%s4987_s6 + $0x24c0] sm:$0xff]  ;;  %v790_v39 = vld [vmem:[%s4987_s6 + $0x24c8] sm:$0xff] }
  0xa5   : > { %v792_v40 = vld [vmem:[%s4987_s6 + $0x2500] sm:$0xff]  ;;  %789 = vst [vmem:[%s4995_s7 + $0x930] sm:$0xff] %v788_v38  ;;  %791 = vst [vmem:[%s4995_s7 + $0x938] sm:$0xff] %v790_v39  ;;  %v794_v41 = vld [vmem:[%s4987_s6 + $0x2508] sm:$0xff] }
  0xa6   : > { %793 = vst [vmem:[%s4995_s7 + $0x940] sm:$0xff] %v792_v40  ;;  %v796_v42 = vld [vmem:[%s4987_s6 + $0x2540] sm:$0xff]  ;;  %v798_v43 = vld [vmem:[%s4987_s6 + $0x2548] sm:$0xff]  ;;  %795 = vst [vmem:[%s4995_s7 + $0x948] sm:$0xff] %v794_v41 }
  0xa7   : > { %797 = vst [vmem:[%s4995_s7 + $0x950] sm:$0xff] %v796_v42  ;;  %799 = vst [vmem:[%s4995_s7 + $0x958] sm:$0xff] %v798_v43  ;;  %v800_v44 = vld [vmem:[%s4987_s6 + $0x2580] sm:$0xff]  ;;  %v802_v45 = vld [vmem:[%s4987_s6 + $0x2588] sm:$0xff] }
  0xa8   : > { %v804_v46 = vld [vmem:[%s4987_s6 + $0x25c0] sm:$0xff]  ;;  %801 = vst [vmem:[%s4995_s7 + $0x960] sm:$0xff] %v800_v44  ;;  %803 = vst [vmem:[%s4995_s7 + $0x968] sm:$0xff] %v802_v45  ;;  %v806_v47 = vld [vmem:[%s4987_s6 + $0x25c8] sm:$0xff] }
  0xa9   : > { %805 = vst [vmem:[%s4995_s7 + $0x970] sm:$0xff] %v804_v46  ;;  %v808_v48 = vld [vmem:[%s4987_s6 + $0x2600] sm:$0xff]  ;;  %v810_v49 = vld [vmem:[%s4987_s6 + $0x2608] sm:$0xff]  ;;  %807 = vst [vmem:[%s4995_s7 + $0x978] sm:$0xff] %v806_v47 }
  0xaa   : > { %809 = vst [vmem:[%s4995_s7 + $0x980] sm:$0xff] %v808_v48  ;;  %811 = vst [vmem:[%s4995_s7 + $0x988] sm:$0xff] %v810_v49  ;;  %v812_v50 = vld [vmem:[%s4987_s6 + $0x2640] sm:$0xff]  ;;  %v814_v51 = vld [vmem:[%s4987_s6 + $0x2648] sm:$0xff] }
  0xab   : > { %v816_v52 = vld [vmem:[%s4987_s6 + $0x2680] sm:$0xff]  ;;  %813 = vst [vmem:[%s4995_s7 + $0x990] sm:$0xff] %v812_v50  ;;  %815 = vst [vmem:[%s4995_s7 + $0x998] sm:$0xff] %v814_v51  ;;  %v818_v53 = vld [vmem:[%s4987_s6 + $0x2688] sm:$0xff] }
  0xac   : > { %817 = vst [vmem:[%s4995_s7 + $0x9a0] sm:$0xff] %v816_v52  ;;  %v820_v54 = vld [vmem:[%s4987_s6 + $0x26c0] sm:$0xff]  ;;  %v822_v55 = vld [vmem:[%s4987_s6 + $0x26c8] sm:$0xff]  ;;  %819 = vst [vmem:[%s4995_s7 + $0x9a8] sm:$0xff] %v818_v53 }
  0xad   : > { %821 = vst [vmem:[%s4995_s7 + $0x9b0] sm:$0xff] %v820_v54  ;;  %823 = vst [vmem:[%s4995_s7 + $0x9b8] sm:$0xff] %v822_v55  ;;  %v824_v56 = vld [vmem:[%s4987_s6 + $0x2700] sm:$0xff]  ;;  %v826_v57 = vld [vmem:[%s4987_s6 + $0x2708] sm:$0xff] }
  0xae   : > { %v828_v58 = vld [vmem:[%s4987_s6 + $0x2740] sm:$0xff]  ;;  %825 = vst [vmem:[%s4995_s7 + $0x9c0] sm:$0xff] %v824_v56  ;;  %827 = vst [vmem:[%s4995_s7 + $0x9c8] sm:$0xff] %v826_v57  ;;  %v830_v59 = vld [vmem:[%s4987_s6 + $0x2748] sm:$0xff] }
  0xaf   : > { %829 = vst [vmem:[%s4995_s7 + $0x9d0] sm:$0xff] %v828_v58  ;;  %v832_v60 = vld [vmem:[%s4987_s6 + $0x2780] sm:$0xff]  ;;  %v834_v61 = vld [vmem:[%s4987_s6 + $0x2788] sm:$0xff]  ;;  %831 = vst [vmem:[%s4995_s7 + $0x9d8] sm:$0xff] %v830_v59 }
  0xb0   : > { %833 = vst [vmem:[%s4995_s7 + $0x9e0] sm:$0xff] %v832_v60  ;;  %835 = vst [vmem:[%s4995_s7 + $0x9e8] sm:$0xff] %v834_v61  ;;  %v836_v62 = vld [vmem:[%s4987_s6 + $0x27c0] sm:$0xff]  ;;  %v838_v63 = vld [vmem:[%s4987_s6 + $0x27c8] sm:$0xff] }
  0xb1   : > { %v840_v0 = vld [vmem:[%s4987_s6 + $0x2800] sm:$0xff]  ;;  %837 = vst [vmem:[%s4995_s7 + $0x9f0] sm:$0xff] %v836_v62  ;;  %839 = vst [vmem:[%s4995_s7 + $0x9f8] sm:$0xff] %v838_v63  ;;  %v842_v1 = vld [vmem:[%s4987_s6 + $0x2808] sm:$0xff] }
  0xb2   : > { %841 = vst [vmem:[%s4995_s7 + $0xa00] sm:$0xff] %v840_v0  ;;  %v844_v2 = vld [vmem:[%s4987_s6 + $0x2840] sm:$0xff]  ;;  %v846_v3 = vld [vmem:[%s4987_s6 + $0x2848] sm:$0xff]  ;;  %843 = vst [vmem:[%s4995_s7 + $0xa08] sm:$0xff] %v842_v1 }
  0xb3   : > { %845 = vst [vmem:[%s4995_s7 + $0xa10] sm:$0xff] %v844_v2  ;;  %847 = vst [vmem:[%s4995_s7 + $0xa18] sm:$0xff] %v846_v3  ;;  %v848_v4 = vld [vmem:[%s4987_s6 + $0x2880] sm:$0xff]  ;;  %v850_v5 = vld [vmem:[%s4987_s6 + $0x2888] sm:$0xff] }
  0xb4   : > { %v852_v6 = vld [vmem:[%s4987_s6 + $0x28c0] sm:$0xff]  ;;  %849 = vst [vmem:[%s4995_s7 + $0xa20] sm:$0xff] %v848_v4  ;;  %851 = vst [vmem:[%s4995_s7 + $0xa28] sm:$0xff] %v850_v5  ;;  %v854_v7 = vld [vmem:[%s4987_s6 + $0x28c8] sm:$0xff] }
  0xb5   : > { %853 = vst [vmem:[%s4995_s7 + $0xa30] sm:$0xff] %v852_v6  ;;  %v856_v8 = vld [vmem:[%s4987_s6 + $0x2900] sm:$0xff]  ;;  %v858_v9 = vld [vmem:[%s4987_s6 + $0x2908] sm:$0xff]  ;;  %855 = vst [vmem:[%s4995_s7 + $0xa38] sm:$0xff] %v854_v7 }
  0xb6   : > { %857 = vst [vmem:[%s4995_s7 + $0xa40] sm:$0xff] %v856_v8  ;;  %859 = vst [vmem:[%s4995_s7 + $0xa48] sm:$0xff] %v858_v9  ;;  %v860_v10 = vld [vmem:[%s4987_s6 + $0x2940] sm:$0xff]  ;;  %v862_v11 = vld [vmem:[%s4987_s6 + $0x2948] sm:$0xff] }
  0xb7   : > { %v864_v12 = vld [vmem:[%s4987_s6 + $0x2980] sm:$0xff]  ;;  %861 = vst [vmem:[%s4995_s7 + $0xa50] sm:$0xff] %v860_v10  ;;  %863 = vst [vmem:[%s4995_s7 + $0xa58] sm:$0xff] %v862_v11  ;;  %v866_v13 = vld [vmem:[%s4987_s6 + $0x2988] sm:$0xff] }
  0xb8   : > { %865 = vst [vmem:[%s4995_s7 + $0xa60] sm:$0xff] %v864_v12  ;;  %v868_v14 = vld [vmem:[%s4987_s6 + $0x29c0] sm:$0xff]  ;;  %v870_v15 = vld [vmem:[%s4987_s6 + $0x29c8] sm:$0xff]  ;;  %867 = vst [vmem:[%s4995_s7 + $0xa68] sm:$0xff] %v866_v13 }
  0xb9   : > { %869 = vst [vmem:[%s4995_s7 + $0xa70] sm:$0xff] %v868_v14  ;;  %871 = vst [vmem:[%s4995_s7 + $0xa78] sm:$0xff] %v870_v15  ;;  %v872_v16 = vld [vmem:[%s4987_s6 + $0x2a00] sm:$0xff]  ;;  %v874_v17 = vld [vmem:[%s4987_s6 + $0x2a08] sm:$0xff] }
  0xba   : > { %v876_v18 = vld [vmem:[%s4987_s6 + $0x2a40] sm:$0xff]  ;;  %873 = vst [vmem:[%s4995_s7 + $0xa80] sm:$0xff] %v872_v16  ;;  %875 = vst [vmem:[%s4995_s7 + $0xa88] sm:$0xff] %v874_v17  ;;  %v878_v19 = vld [vmem:[%s4987_s6 + $0x2a48] sm:$0xff] }
  0xbb   : > { %877 = vst [vmem:[%s4995_s7 + $0xa90] sm:$0xff] %v876_v18  ;;  %v880_v20 = vld [vmem:[%s4987_s6 + $0x2a80] sm:$0xff]  ;;  %v882_v21 = vld [vmem:[%s4987_s6 + $0x2a88] sm:$0xff]  ;;  %879 = vst [vmem:[%s4995_s7 + $0xa98] sm:$0xff] %v878_v19 }
  0xbc   : > { %881 = vst [vmem:[%s4995_s7 + $0xaa0] sm:$0xff] %v880_v20  ;;  %883 = vst [vmem:[%s4995_s7 + $0xaa8] sm:$0xff] %v882_v21  ;;  %v884_v22 = vld [vmem:[%s4987_s6 + $0x2ac0] sm:$0xff]  ;;  %v886_v23 = vld [vmem:[%s4987_s6 + $0x2ac8] sm:$0xff] }
  0xbd   : > { %v888_v24 = vld [vmem:[%s4987_s6 + $0x2b00] sm:$0xff]  ;;  %885 = vst [vmem:[%s4995_s7 + $0xab0] sm:$0xff] %v884_v22  ;;  %887 = vst [vmem:[%s4995_s7 + $0xab8] sm:$0xff] %v886_v23  ;;  %v890_v25 = vld [vmem:[%s4987_s6 + $0x2b08] sm:$0xff] }
  0xbe   : > { %889 = vst [vmem:[%s4995_s7 + $0xac0] sm:$0xff] %v888_v24  ;;  %v892_v26 = vld [vmem:[%s4987_s6 + $0x2b40] sm:$0xff]  ;;  %v894_v27 = vld [vmem:[%s4987_s6 + $0x2b48] sm:$0xff]  ;;  %891 = vst [vmem:[%s4995_s7 + $0xac8] sm:$0xff] %v890_v25 }
  0xbf   : > { %893 = vst [vmem:[%s4995_s7 + $0xad0] sm:$0xff] %v892_v26  ;;  %895 = vst [vmem:[%s4995_s7 + $0xad8] sm:$0xff] %v894_v27  ;;  %v896_v28 = vld [vmem:[%s4987_s6 + $0x2b80] sm:$0xff]  ;;  %v898_v29 = vld [vmem:[%s4987_s6 + $0x2b88] sm:$0xff] }
  0xc0   : > { %v900_v30 = vld [vmem:[%s4987_s6 + $0x2bc0] sm:$0xff]  ;;  %897 = vst [vmem:[%s4995_s7 + $0xae0] sm:$0xff] %v896_v28  ;;  %899 = vst [vmem:[%s4995_s7 + $0xae8] sm:$0xff] %v898_v29  ;;  %v902_v31 = vld [vmem:[%s4987_s6 + $0x2bc8] sm:$0xff] }
  0xc1   : > { %901 = vst [vmem:[%s4995_s7 + $0xaf0] sm:$0xff] %v900_v30  ;;  %v904_v32 = vld [vmem:[%s4987_s6 + $0x2c00] sm:$0xff]  ;;  %v906_v33 = vld [vmem:[%s4987_s6 + $0x2c08] sm:$0xff]  ;;  %903 = vst [vmem:[%s4995_s7 + $0xaf8] sm:$0xff] %v902_v31 }
  0xc2   : > { %905 = vst [vmem:[%s4995_s7 + $0xb00] sm:$0xff] %v904_v32  ;;  %907 = vst [vmem:[%s4995_s7 + $0xb08] sm:$0xff] %v906_v33  ;;  %v908_v34 = vld [vmem:[%s4987_s6 + $0x2c40] sm:$0xff]  ;;  %v910_v35 = vld [vmem:[%s4987_s6 + $0x2c48] sm:$0xff] }
  0xc3   : > { %v912_v36 = vld [vmem:[%s4987_s6 + $0x2c80] sm:$0xff]  ;;  %909 = vst [vmem:[%s4995_s7 + $0xb10] sm:$0xff] %v908_v34  ;;  %911 = vst [vmem:[%s4995_s7 + $0xb18] sm:$0xff] %v910_v35  ;;  %v914_v37 = vld [vmem:[%s4987_s6 + $0x2c88] sm:$0xff] }
  0xc4   : > { %913 = vst [vmem:[%s4995_s7 + $0xb20] sm:$0xff] %v912_v36  ;;  %v916_v38 = vld [vmem:[%s4987_s6 + $0x2cc0] sm:$0xff]  ;;  %v918_v39 = vld [vmem:[%s4987_s6 + $0x2cc8] sm:$0xff]  ;;  %915 = vst [vmem:[%s4995_s7 + $0xb28] sm:$0xff] %v914_v37 }
  0xc5   : > { %917 = vst [vmem:[%s4995_s7 + $0xb30] sm:$0xff] %v916_v38  ;;  %919 = vst [vmem:[%s4995_s7 + $0xb38] sm:$0xff] %v918_v39  ;;  %v920_v40 = vld [vmem:[%s4987_s6 + $0x2d00] sm:$0xff]  ;;  %v922_v41 = vld [vmem:[%s4987_s6 + $0x2d08] sm:$0xff] }
  0xc6   : > { %v924_v42 = vld [vmem:[%s4987_s6 + $0x2d40] sm:$0xff]  ;;  %921 = vst [vmem:[%s4995_s7 + $0xb40] sm:$0xff] %v920_v40  ;;  %923 = vst [vmem:[%s4995_s7 + $0xb48] sm:$0xff] %v922_v41  ;;  %v926_v43 = vld [vmem:[%s4987_s6 + $0x2d48] sm:$0xff] }
  0xc7   : > { %925 = vst [vmem:[%s4995_s7 + $0xb50] sm:$0xff] %v924_v42  ;;  %v928_v44 = vld [vmem:[%s4987_s6 + $0x2d80] sm:$0xff]  ;;  %v930_v45 = vld [vmem:[%s4987_s6 + $0x2d88] sm:$0xff]  ;;  %927 = vst [vmem:[%s4995_s7 + $0xb58] sm:$0xff] %v926_v43 }
  0xc8   : > { %929 = vst [vmem:[%s4995_s7 + $0xb60] sm:$0xff] %v928_v44  ;;  %931 = vst [vmem:[%s4995_s7 + $0xb68] sm:$0xff] %v930_v45  ;;  %v932_v46 = vld [vmem:[%s4987_s6 + $0x2dc0] sm:$0xff]  ;;  %v934_v47 = vld [vmem:[%s4987_s6 + $0x2dc8] sm:$0xff] }
  0xc9   : > { %v936_v48 = vld [vmem:[%s4987_s6 + $0x2e00] sm:$0xff]  ;;  %933 = vst [vmem:[%s4995_s7 + $0xb70] sm:$0xff] %v932_v46  ;;  %935 = vst [vmem:[%s4995_s7 + $0xb78] sm:$0xff] %v934_v47  ;;  %v938_v49 = vld [vmem:[%s4987_s6 + $0x2e08] sm:$0xff] }
  0xca   : > { %937 = vst [vmem:[%s4995_s7 + $0xb80] sm:$0xff] %v936_v48  ;;  %v940_v50 = vld [vmem:[%s4987_s6 + $0x2e40] sm:$0xff]  ;;  %v942_v51 = vld [vmem:[%s4987_s6 + $0x2e48] sm:$0xff]  ;;  %939 = vst [vmem:[%s4995_s7 + $0xb88] sm:$0xff] %v938_v49 }
  0xcb   : > { %941 = vst [vmem:[%s4995_s7 + $0xb90] sm:$0xff] %v940_v50  ;;  %943 = vst [vmem:[%s4995_s7 + $0xb98] sm:$0xff] %v942_v51  ;;  %v944_v52 = vld [vmem:[%s4987_s6 + $0x2e80] sm:$0xff]  ;;  %v946_v53 = vld [vmem:[%s4987_s6 + $0x2e88] sm:$0xff] }
  0xcc   : > { %v948_v54 = vld [vmem:[%s4987_s6 + $0x2ec0] sm:$0xff]  ;;  %945 = vst [vmem:[%s4995_s7 + $0xba0] sm:$0xff] %v944_v52  ;;  %947 = vst [vmem:[%s4995_s7 + $0xba8] sm:$0xff] %v946_v53  ;;  %v950_v55 = vld [vmem:[%s4987_s6 + $0x2ec8] sm:$0xff] }
  0xcd   : > { %949 = vst [vmem:[%s4995_s7 + $0xbb0] sm:$0xff] %v948_v54  ;;  %v952_v56 = vld [vmem:[%s4987_s6 + $0x2f00] sm:$0xff]  ;;  %v954_v57 = vld [vmem:[%s4987_s6 + $0x2f08] sm:$0xff]  ;;  %951 = vst [vmem:[%s4995_s7 + $0xbb8] sm:$0xff] %v950_v55 }
  0xce   : > { %953 = vst [vmem:[%s4995_s7 + $0xbc0] sm:$0xff] %v952_v56  ;;  %955 = vst [vmem:[%s4995_s7 + $0xbc8] sm:$0xff] %v954_v57  ;;  %v956_v58 = vld [vmem:[%s4987_s6 + $0x2f40] sm:$0xff]  ;;  %v958_v59 = vld [vmem:[%s4987_s6 + $0x2f48] sm:$0xff] }
  0xcf   : > { %v960_v60 = vld [vmem:[%s4987_s6 + $0x2f80] sm:$0xff]  ;;  %957 = vst [vmem:[%s4995_s7 + $0xbd0] sm:$0xff] %v956_v58  ;;  %959 = vst [vmem:[%s4995_s7 + $0xbd8] sm:$0xff] %v958_v59  ;;  %v962_v61 = vld [vmem:[%s4987_s6 + $0x2f88] sm:$0xff] }
  0xd0   : > { %961 = vst [vmem:[%s4995_s7 + $0xbe0] sm:$0xff] %v960_v60  ;;  %v964_v62 = vld [vmem:[%s4987_s6 + $0x2fc0] sm:$0xff]  ;;  %v966_v63 = vld [vmem:[%s4987_s6 + $0x2fc8] sm:$0xff]  ;;  %963 = vst [vmem:[%s4995_s7 + $0xbe8] sm:$0xff] %v962_v61 }
  0xd1   : > { %965 = vst [vmem:[%s4995_s7 + $0xbf0] sm:$0xff] %v964_v62  ;;  %967 = vst [vmem:[%s4995_s7 + $0xbf8] sm:$0xff] %v966_v63  ;;  %v968_v0 = vld [vmem:[%s4987_s6 + $0x3000] sm:$0xff]  ;;  %v970_v1 = vld [vmem:[%s4987_s6 + $0x3008] sm:$0xff] }
  0xd2   : > { %v972_v2 = vld [vmem:[%s4987_s6 + $0x3040] sm:$0xff]  ;;  %969 = vst [vmem:[%s4995_s7 + $0xc00] sm:$0xff] %v968_v0  ;;  %971 = vst [vmem:[%s4995_s7 + $0xc08] sm:$0xff] %v970_v1  ;;  %v974_v3 = vld [vmem:[%s4987_s6 + $0x3048] sm:$0xff] }
  0xd3   : > { %973 = vst [vmem:[%s4995_s7 + $0xc10] sm:$0xff] %v972_v2  ;;  %v976_v4 = vld [vmem:[%s4987_s6 + $0x3080] sm:$0xff]  ;;  %v978_v5 = vld [vmem:[%s4987_s6 + $0x3088] sm:$0xff]  ;;  %975 = vst [vmem:[%s4995_s7 + $0xc18] sm:$0xff] %v974_v3 }
  0xd4   : > { %977 = vst [vmem:[%s4995_s7 + $0xc20] sm:$0xff] %v976_v4  ;;  %979 = vst [vmem:[%s4995_s7 + $0xc28] sm:$0xff] %v978_v5  ;;  %v980_v6 = vld [vmem:[%s4987_s6 + $0x30c0] sm:$0xff]  ;;  %v982_v7 = vld [vmem:[%s4987_s6 + $0x30c8] sm:$0xff] }
  0xd5   : > { %v984_v8 = vld [vmem:[%s4987_s6 + $0x3100] sm:$0xff]  ;;  %981 = vst [vmem:[%s4995_s7 + $0xc30] sm:$0xff] %v980_v6  ;;  %983 = vst [vmem:[%s4995_s7 + $0xc38] sm:$0xff] %v982_v7  ;;  %v986_v9 = vld [vmem:[%s4987_s6 + $0x3108] sm:$0xff] }
  0xd6   : > { %985 = vst [vmem:[%s4995_s7 + $0xc40] sm:$0xff] %v984_v8  ;;  %v988_v10 = vld [vmem:[%s4987_s6 + $0x3140] sm:$0xff]  ;;  %v990_v11 = vld [vmem:[%s4987_s6 + $0x3148] sm:$0xff]  ;;  %987 = vst [vmem:[%s4995_s7 + $0xc48] sm:$0xff] %v986_v9 }
  0xd7   : > { %989 = vst [vmem:[%s4995_s7 + $0xc50] sm:$0xff] %v988_v10  ;;  %991 = vst [vmem:[%s4995_s7 + $0xc58] sm:$0xff] %v990_v11  ;;  %v992_v12 = vld [vmem:[%s4987_s6 + $0x3180] sm:$0xff]  ;;  %v994_v13 = vld [vmem:[%s4987_s6 + $0x3188] sm:$0xff] }
  0xd8   : > { %v996_v14 = vld [vmem:[%s4987_s6 + $0x31c0] sm:$0xff]  ;;  %993 = vst [vmem:[%s4995_s7 + $0xc60] sm:$0xff] %v992_v12  ;;  %995 = vst [vmem:[%s4995_s7 + $0xc68] sm:$0xff] %v994_v13  ;;  %v998_v15 = vld [vmem:[%s4987_s6 + $0x31c8] sm:$0xff] }
  0xd9   : > { %997 = vst [vmem:[%s4995_s7 + $0xc70] sm:$0xff] %v996_v14  ;;  %v1000_v16 = vld [vmem:[%s4987_s6 + $0x3200] sm:$0xff]  ;;  %v1002_v17 = vld [vmem:[%s4987_s6 + $0x3208] sm:$0xff]  ;;  %999 = vst [vmem:[%s4995_s7 + $0xc78] sm:$0xff] %v998_v15 }
  0xda   : > { %1001 = vst [vmem:[%s4995_s7 + $0xc80] sm:$0xff] %v1000_v16  ;;  %1003 = vst [vmem:[%s4995_s7 + $0xc88] sm:$0xff] %v1002_v17  ;;  %v1004_v18 = vld [vmem:[%s4987_s6 + $0x3240] sm:$0xff]  ;;  %v1006_v19 = vld [vmem:[%s4987_s6 + $0x3248] sm:$0xff] }
  0xdb   : > { %v1008_v20 = vld [vmem:[%s4987_s6 + $0x3280] sm:$0xff]  ;;  %1005 = vst [vmem:[%s4995_s7 + $0xc90] sm:$0xff] %v1004_v18  ;;  %1007 = vst [vmem:[%s4995_s7 + $0xc98] sm:$0xff] %v1006_v19  ;;  %v1010_v21 = vld [vmem:[%s4987_s6 + $0x3288] sm:$0xff] }
  0xdc   : > { %1009 = vst [vmem:[%s4995_s7 + $0xca0] sm:$0xff] %v1008_v20  ;;  %v1012_v22 = vld [vmem:[%s4987_s6 + $0x32c0] sm:$0xff]  ;;  %v1014_v23 = vld [vmem:[%s4987_s6 + $0x32c8] sm:$0xff]  ;;  %1011 = vst [vmem:[%s4995_s7 + $0xca8] sm:$0xff] %v1010_v21 }
  0xdd   : > { %1013 = vst [vmem:[%s4995_s7 + $0xcb0] sm:$0xff] %v1012_v22  ;;  %1015 = vst [vmem:[%s4995_s7 + $0xcb8] sm:$0xff] %v1014_v23  ;;  %v1016_v24 = vld [vmem:[%s4987_s6 + $0x3300] sm:$0xff]  ;;  %v1018_v25 = vld [vmem:[%s4987_s6 + $0x3308] sm:$0xff] }
  0xde   : > { %v1020_v26 = vld [vmem:[%s4987_s6 + $0x3340] sm:$0xff]  ;;  %1017 = vst [vmem:[%s4995_s7 + $0xcc0] sm:$0xff] %v1016_v24  ;;  %1019 = vst [vmem:[%s4995_s7 + $0xcc8] sm:$0xff] %v1018_v25  ;;  %v1022_v27 = vld [vmem:[%s4987_s6 + $0x3348] sm:$0xff] }
  0xdf   : > { %1021 = vst [vmem:[%s4995_s7 + $0xcd0] sm:$0xff] %v1020_v26  ;;  %v1024_v28 = vld [vmem:[%s4987_s6 + $0x3380] sm:$0xff]  ;;  %v1026_v29 = vld [vmem:[%s4987_s6 + $0x3388] sm:$0xff]  ;;  %1023 = vst [vmem:[%s4995_s7 + $0xcd8] sm:$0xff] %v1022_v27 }
  0xe0   : > { %1025 = vst [vmem:[%s4995_s7 + $0xce0] sm:$0xff] %v1024_v28  ;;  %1027 = vst [vmem:[%s4995_s7 + $0xce8] sm:$0xff] %v1026_v29  ;;  %v1028_v30 = vld [vmem:[%s4987_s6 + $0x33c0] sm:$0xff]  ;;  %v1030_v31 = vld [vmem:[%s4987_s6 + $0x33c8] sm:$0xff] }
  0xe1   : > { %v1032_v32 = vld [vmem:[%s4987_s6 + $0x3400] sm:$0xff]  ;;  %1029 = vst [vmem:[%s4995_s7 + $0xcf0] sm:$0xff] %v1028_v30  ;;  %1031 = vst [vmem:[%s4995_s7 + $0xcf8] sm:$0xff] %v1030_v31  ;;  %v1034_v33 = vld [vmem:[%s4987_s6 + $0x3408] sm:$0xff] }
  0xe2   : > { %1033 = vst [vmem:[%s4995_s7 + $0xd00] sm:$0xff] %v1032_v32  ;;  %v1036_v34 = vld [vmem:[%s4987_s6 + $0x3440] sm:$0xff]  ;;  %v1038_v35 = vld [vmem:[%s4987_s6 + $0x3448] sm:$0xff]  ;;  %1035 = vst [vmem:[%s4995_s7 + $0xd08] sm:$0xff] %v1034_v33 }
  0xe3   : > { %1037 = vst [vmem:[%s4995_s7 + $0xd10] sm:$0xff] %v1036_v34  ;;  %1039 = vst [vmem:[%s4995_s7 + $0xd18] sm:$0xff] %v1038_v35  ;;  %v1040_v36 = vld [vmem:[%s4987_s6 + $0x3480] sm:$0xff]  ;;  %v1042_v37 = vld [vmem:[%s4987_s6 + $0x3488] sm:$0xff] }
  0xe4   : > { %v1044_v38 = vld [vmem:[%s4987_s6 + $0x34c0] sm:$0xff]  ;;  %1041 = vst [vmem:[%s4995_s7 + $0xd20] sm:$0xff] %v1040_v36  ;;  %1043 = vst [vmem:[%s4995_s7 + $0xd28] sm:$0xff] %v1042_v37  ;;  %v1046_v39 = vld [vmem:[%s4987_s6 + $0x34c8] sm:$0xff] }
  0xe5   : > { %1045 = vst [vmem:[%s4995_s7 + $0xd30] sm:$0xff] %v1044_v38  ;;  %v1048_v40 = vld [vmem:[%s4987_s6 + $0x3500] sm:$0xff]  ;;  %v1050_v41 = vld [vmem:[%s4987_s6 + $0x3508] sm:$0xff]  ;;  %1047 = vst [vmem:[%s4995_s7 + $0xd38] sm:$0xff] %v1046_v39 }
  0xe6   : > { %1049 = vst [vmem:[%s4995_s7 + $0xd40] sm:$0xff] %v1048_v40  ;;  %1051 = vst [vmem:[%s4995_s7 + $0xd48] sm:$0xff] %v1050_v41  ;;  %v1052_v42 = vld [vmem:[%s4987_s6 + $0x3540] sm:$0xff]  ;;  %v1054_v43 = vld [vmem:[%s4987_s6 + $0x3548] sm:$0xff] }
  0xe7   : > { %v1056_v44 = vld [vmem:[%s4987_s6 + $0x3580] sm:$0xff]  ;;  %1053 = vst [vmem:[%s4995_s7 + $0xd50] sm:$0xff] %v1052_v42  ;;  %1055 = vst [vmem:[%s4995_s7 + $0xd58] sm:$0xff] %v1054_v43  ;;  %v1058_v45 = vld [vmem:[%s4987_s6 + $0x3588] sm:$0xff] }
  0xe8   : > { %1057 = vst [vmem:[%s4995_s7 + $0xd60] sm:$0xff] %v1056_v44  ;;  %v1060_v46 = vld [vmem:[%s4987_s6 + $0x35c0] sm:$0xff]  ;;  %v1062_v47 = vld [vmem:[%s4987_s6 + $0x35c8] sm:$0xff]  ;;  %1059 = vst [vmem:[%s4995_s7 + $0xd68] sm:$0xff] %v1058_v45 }
  0xe9   : > { %1061 = vst [vmem:[%s4995_s7 + $0xd70] sm:$0xff] %v1060_v46  ;;  %1063 = vst [vmem:[%s4995_s7 + $0xd78] sm:$0xff] %v1062_v47  ;;  %v1064_v48 = vld [vmem:[%s4987_s6 + $0x3600] sm:$0xff]  ;;  %v1066_v49 = vld [vmem:[%s4987_s6 + $0x3608] sm:$0xff] }
  0xea   : > { %v1068_v50 = vld [vmem:[%s4987_s6 + $0x3640] sm:$0xff]  ;;  %1065 = vst [vmem:[%s4995_s7 + $0xd80] sm:$0xff] %v1064_v48  ;;  %1067 = vst [vmem:[%s4995_s7 + $0xd88] sm:$0xff] %v1066_v49  ;;  %v1070_v51 = vld [vmem:[%s4987_s6 + $0x3648] sm:$0xff] }
  0xeb   : > { %1069 = vst [vmem:[%s4995_s7 + $0xd90] sm:$0xff] %v1068_v50  ;;  %v1072_v52 = vld [vmem:[%s4987_s6 + $0x3680] sm:$0xff]  ;;  %v1074_v53 = vld [vmem:[%s4987_s6 + $0x3688] sm:$0xff]  ;;  %1071 = vst [vmem:[%s4995_s7 + $0xd98] sm:$0xff] %v1070_v51 }
  0xec   : > { %1073 = vst [vmem:[%s4995_s7 + $0xda0] sm:$0xff] %v1072_v52  ;;  %1075 = vst [vmem:[%s4995_s7 + $0xda8] sm:$0xff] %v1074_v53  ;;  %v1076_v54 = vld [vmem:[%s4987_s6 + $0x36c0] sm:$0xff]  ;;  %v1078_v55 = vld [vmem:[%s4987_s6 + $0x36c8] sm:$0xff] }
  0xed   : > { %v1080_v56 = vld [vmem:[%s4987_s6 + $0x3700] sm:$0xff]  ;;  %1077 = vst [vmem:[%s4995_s7 + $0xdb0] sm:$0xff] %v1076_v54  ;;  %1079 = vst [vmem:[%s4995_s7 + $0xdb8] sm:$0xff] %v1078_v55  ;;  %v1082_v57 = vld [vmem:[%s4987_s6 + $0x3708] sm:$0xff] }
  0xee   : > { %1081 = vst [vmem:[%s4995_s7 + $0xdc0] sm:$0xff] %v1080_v56  ;;  %v1084_v58 = vld [vmem:[%s4987_s6 + $0x3740] sm:$0xff]  ;;  %v1086_v59 = vld [vmem:[%s4987_s6 + $0x3748] sm:$0xff]  ;;  %1083 = vst [vmem:[%s4995_s7 + $0xdc8] sm:$0xff] %v1082_v57 }
  0xef   : > { %1085 = vst [vmem:[%s4995_s7 + $0xdd0] sm:$0xff] %v1084_v58  ;;  %1087 = vst [vmem:[%s4995_s7 + $0xdd8] sm:$0xff] %v1086_v59  ;;  %v1088_v60 = vld [vmem:[%s4987_s6 + $0x3780] sm:$0xff]  ;;  %v1090_v61 = vld [vmem:[%s4987_s6 + $0x3788] sm:$0xff] }
  0xf0   : > { %v1092_v62 = vld [vmem:[%s4987_s6 + $0x37c0] sm:$0xff]  ;;  %1089 = vst [vmem:[%s4995_s7 + $0xde0] sm:$0xff] %v1088_v60  ;;  %1091 = vst [vmem:[%s4995_s7 + $0xde8] sm:$0xff] %v1090_v61  ;;  %v1094_v63 = vld [vmem:[%s4987_s6 + $0x37c8] sm:$0xff] }
  0xf1   : > { %1093 = vst [vmem:[%s4995_s7 + $0xdf0] sm:$0xff] %v1092_v62  ;;  %v1096_v0 = vld [vmem:[%s4987_s6 + $0x3800] sm:$0xff]  ;;  %v1098_v1 = vld [vmem:[%s4987_s6 + $0x3808] sm:$0xff]  ;;  %1095 = vst [vmem:[%s4995_s7 + $0xdf8] sm:$0xff] %v1094_v63 }
  0xf2   : > { %1097 = vst [vmem:[%s4995_s7 + $0xe00] sm:$0xff] %v1096_v0  ;;  %1099 = vst [vmem:[%s4995_s7 + $0xe08] sm:$0xff] %v1098_v1  ;;  %v1100_v2 = vld [vmem:[%s4987_s6 + $0x3840] sm:$0xff]  ;;  %v1102_v3 = vld [vmem:[%s4987_s6 + $0x3848] sm:$0xff] }
  0xf3   : > { %v1104_v4 = vld [vmem:[%s4987_s6 + $0x3880] sm:$0xff]  ;;  %1101 = vst [vmem:[%s4995_s7 + $0xe10] sm:$0xff] %v1100_v2  ;;  %1103 = vst [vmem:[%s4995_s7 + $0xe18] sm:$0xff] %v1102_v3  ;;  %v1106_v5 = vld [vmem:[%s4987_s6 + $0x3888] sm:$0xff] }
  0xf4   : > { %1105 = vst [vmem:[%s4995_s7 + $0xe20] sm:$0xff] %v1104_v4  ;;  %v1108_v6 = vld [vmem:[%s4987_s6 + $0x38c0] sm:$0xff]  ;;  %v1110_v7 = vld [vmem:[%s4987_s6 + $0x38c8] sm:$0xff]  ;;  %1107 = vst [vmem:[%s4995_s7 + $0xe28] sm:$0xff] %v1106_v5 }
  0xf5   : > { %1109 = vst [vmem:[%s4995_s7 + $0xe30] sm:$0xff] %v1108_v6  ;;  %1111 = vst [vmem:[%s4995_s7 + $0xe38] sm:$0xff] %v1110_v7  ;;  %v1112_v8 = vld [vmem:[%s4987_s6 + $0x3900] sm:$0xff]  ;;  %v1114_v9 = vld [vmem:[%s4987_s6 + $0x3908] sm:$0xff] }
  0xf6   : > { %v1116_v10 = vld [vmem:[%s4987_s6 + $0x3940] sm:$0xff]  ;;  %1113 = vst [vmem:[%s4995_s7 + $0xe40] sm:$0xff] %v1112_v8  ;;  %1115 = vst [vmem:[%s4995_s7 + $0xe48] sm:$0xff] %v1114_v9  ;;  %v1118_v11 = vld [vmem:[%s4987_s6 + $0x3948] sm:$0xff] }
  0xf7   : > { %1117 = vst [vmem:[%s4995_s7 + $0xe50] sm:$0xff] %v1116_v10  ;;  %v1120_v12 = vld [vmem:[%s4987_s6 + $0x3980] sm:$0xff]  ;;  %v1122_v13 = vld [vmem:[%s4987_s6 + $0x3988] sm:$0xff]  ;;  %1119 = vst [vmem:[%s4995_s7 + $0xe58] sm:$0xff] %v1118_v11 }
  0xf8   : > { %1121 = vst [vmem:[%s4995_s7 + $0xe60] sm:$0xff] %v1120_v12  ;;  %1123 = vst [vmem:[%s4995_s7 + $0xe68] sm:$0xff] %v1122_v13  ;;  %v1124_v14 = vld [vmem:[%s4987_s6 + $0x39c0] sm:$0xff]  ;;  %v1126_v15 = vld [vmem:[%s4987_s6 + $0x39c8] sm:$0xff] }
  0xf9   : > { %v1128_v16 = vld [vmem:[%s4987_s6 + $0x3a00] sm:$0xff]  ;;  %1125 = vst [vmem:[%s4995_s7 + $0xe70] sm:$0xff] %v1124_v14  ;;  %1127 = vst [vmem:[%s4995_s7 + $0xe78] sm:$0xff] %v1126_v15  ;;  %v1130_v17 = vld [vmem:[%s4987_s6 + $0x3a08] sm:$0xff] }
  0xfa   : > { %1129 = vst [vmem:[%s4995_s7 + $0xe80] sm:$0xff] %v1128_v16  ;;  %v1132_v18 = vld [vmem:[%s4987_s6 + $0x3a40] sm:$0xff]  ;;  %v1134_v19 = vld [vmem:[%s4987_s6 + $0x3a48] sm:$0xff]  ;;  %1131 = vst [vmem:[%s4995_s7 + $0xe88] sm:$0xff] %v1130_v17 }
  0xfb   : > { %1133 = vst [vmem:[%s4995_s7 + $0xe90] sm:$0xff] %v1132_v18  ;;  %1135 = vst [vmem:[%s4995_s7 + $0xe98] sm:$0xff] %v1134_v19  ;;  %v1136_v20 = vld [vmem:[%s4987_s6 + $0x3a80] sm:$0xff]  ;;  %v1138_v21 = vld [vmem:[%s4987_s6 + $0x3a88] sm:$0xff] }
  0xfc   : > { %v1140_v22 = vld [vmem:[%s4987_s6 + $0x3ac0] sm:$0xff]  ;;  %1137 = vst [vmem:[%s4995_s7 + $0xea0] sm:$0xff] %v1136_v20  ;;  %1139 = vst [vmem:[%s4995_s7 + $0xea8] sm:$0xff] %v1138_v21  ;;  %v1142_v23 = vld [vmem:[%s4987_s6 + $0x3ac8] sm:$0xff] }
  0xfd   : > { %1141 = vst [vmem:[%s4995_s7 + $0xeb0] sm:$0xff] %v1140_v22  ;;  %v1144_v24 = vld [vmem:[%s4987_s6 + $0x3b00] sm:$0xff]  ;;  %v1146_v25 = vld [vmem:[%s4987_s6 + $0x3b08] sm:$0xff]  ;;  %1143 = vst [vmem:[%s4995_s7 + $0xeb8] sm:$0xff] %v1142_v23 }
  0xfe   : > { %1145 = vst [vmem:[%s4995_s7 + $0xec0] sm:$0xff] %v1144_v24  ;;  %1147 = vst [vmem:[%s4995_s7 + $0xec8] sm:$0xff] %v1146_v25  ;;  %v1148_v26 = vld [vmem:[%s4987_s6 + $0x3b40] sm:$0xff]  ;;  %v1150_v27 = vld [vmem:[%s4987_s6 + $0x3b48] sm:$0xff] }
  0xff   : > { %v1152_v28 = vld [vmem:[%s4987_s6 + $0x3b80] sm:$0xff]  ;;  %1149 = vst [vmem:[%s4995_s7 + $0xed0] sm:$0xff] %v1148_v26  ;;  %1151 = vst [vmem:[%s4995_s7 + $0xed8] sm:$0xff] %v1150_v27  ;;  %v1154_v29 = vld [vmem:[%s4987_s6 + $0x3b88] sm:$0xff] }
 0x100   : > { %1153 = vst [vmem:[%s4995_s7 + $0xee0] sm:$0xff] %v1152_v28  ;;  %v1156_v30 = vld [vmem:[%s4987_s6 + $0x3bc0] sm:$0xff]  ;;  %v1158_v31 = vld [vmem:[%s4987_s6 + $0x3bc8] sm:$0xff]  ;;  %1155 = vst [vmem:[%s4995_s7 + $0xee8] sm:$0xff] %v1154_v29 }
 0x101   : > { %1157 = vst [vmem:[%s4995_s7 + $0xef0] sm:$0xff] %v1156_v30  ;;  %1159 = vst [vmem:[%s4995_s7 + $0xef8] sm:$0xff] %v1158_v31  ;;  %v1160_v32 = vld [vmem:[%s4987_s6 + $0x3c00] sm:$0xff]  ;;  %v1162_v33 = vld [vmem:[%s4987_s6 + $0x3c08] sm:$0xff] }
 0x102   : > { %v1164_v34 = vld [vmem:[%s4987_s6 + $0x3c40] sm:$0xff]  ;;  %1161 = vst [vmem:[%s4995_s7 + $0xf00] sm:$0xff] %v1160_v32  ;;  %1163 = vst [vmem:[%s4995_s7 + $0xf08] sm:$0xff] %v1162_v33  ;;  %v1166_v35 = vld [vmem:[%s4987_s6 + $0x3c48] sm:$0xff] }
 0x103   : > { %1165 = vst [vmem:[%s4995_s7 + $0xf10] sm:$0xff] %v1164_v34  ;;  %v1168_v36 = vld [vmem:[%s4987_s6 + $0x3c80] sm:$0xff]  ;;  %v1170_v37 = vld [vmem:[%s4987_s6 + $0x3c88] sm:$0xff]  ;;  %1167 = vst [vmem:[%s4995_s7 + $0xf18] sm:$0xff] %v1166_v35 }
 0x104   : > { %1169 = vst [vmem:[%s4995_s7 + $0xf20] sm:$0xff] %v1168_v36  ;;  %1171 = vst [vmem:[%s4995_s7 + $0xf28] sm:$0xff] %v1170_v37  ;;  %v1172_v38 = vld [vmem:[%s4987_s6 + $0x3cc0] sm:$0xff]  ;;  %v1174_v39 = vld [vmem:[%s4987_s6 + $0x3cc8] sm:$0xff] }
 0x105   : > { %v1176_v40 = vld [vmem:[%s4987_s6 + $0x3d00] sm:$0xff]  ;;  %1173 = vst [vmem:[%s4995_s7 + $0xf30] sm:$0xff] %v1172_v38  ;;  %1175 = vst [vmem:[%s4995_s7 + $0xf38] sm:$0xff] %v1174_v39  ;;  %v1178_v41 = vld [vmem:[%s4987_s6 + $0x3d08] sm:$0xff] }
 0x106   : > { %1177 = vst [vmem:[%s4995_s7 + $0xf40] sm:$0xff] %v1176_v40  ;;  %v1180_v42 = vld [vmem:[%s4987_s6 + $0x3d40] sm:$0xff]  ;;  %v1182_v43 = vld [vmem:[%s4987_s6 + $0x3d48] sm:$0xff]  ;;  %1179 = vst [vmem:[%s4995_s7 + $0xf48] sm:$0xff] %v1178_v41 }
 0x107   : > { %1181 = vst [vmem:[%s4995_s7 + $0xf50] sm:$0xff] %v1180_v42  ;;  %1183 = vst [vmem:[%s4995_s7 + $0xf58] sm:$0xff] %v1182_v43  ;;  %v1184_v44 = vld [vmem:[%s4987_s6 + $0x3d80] sm:$0xff]  ;;  %v1186_v45 = vld [vmem:[%s4987_s6 + $0x3d88] sm:$0xff] }
 0x108   : > { %v1188_v46 = vld [vmem:[%s4987_s6 + $0x3dc0] sm:$0xff]  ;;  %1185 = vst [vmem:[%s4995_s7 + $0xf60] sm:$0xff] %v1184_v44  ;;  %1187 = vst [vmem:[%s4995_s7 + $0xf68] sm:$0xff] %v1186_v45  ;;  %v1190_v47 = vld [vmem:[%s4987_s6 + $0x3dc8] sm:$0xff] }
 0x109   : > { %1189 = vst [vmem:[%s4995_s7 + $0xf70] sm:$0xff] %v1188_v46  ;;  %v1192_v48 = vld [vmem:[%s4987_s6 + $0x3e00] sm:$0xff]  ;;  %v1194_v49 = vld [vmem:[%s4987_s6 + $0x3e08] sm:$0xff]  ;;  %1191 = vst [vmem:[%s4995_s7 + $0xf78] sm:$0xff] %v1190_v47 }
 0x10a   : > { %1193 = vst [vmem:[%s4995_s7 + $0xf80] sm:$0xff] %v1192_v48  ;;  %1195 = vst [vmem:[%s4995_s7 + $0xf88] sm:$0xff] %v1194_v49  ;;  %v1196_v50 = vld [vmem:[%s4987_s6 + $0x3e40] sm:$0xff]  ;;  %v1198_v51 = vld [vmem:[%s4987_s6 + $0x3e48] sm:$0xff] }
 0x10b   : > { %v1200_v52 = vld [vmem:[%s4987_s6 + $0x3e80] sm:$0xff]  ;;  %1197 = vst [vmem:[%s4995_s7 + $0xf90] sm:$0xff] %v1196_v50  ;;  %1199 = vst [vmem:[%s4995_s7 + $0xf98] sm:$0xff] %v1198_v51  ;;  %v1202_v53 = vld [vmem:[%s4987_s6 + $0x3e88] sm:$0xff] }
 0x10c   : > { %1201 = vst [vmem:[%s4995_s7 + $0xfa0] sm:$0xff] %v1200_v52  ;;  %v1204_v54 = vld [vmem:[%s4987_s6 + $0x3ec0] sm:$0xff]  ;;  %v1206_v55 = vld [vmem:[%s4987_s6 + $0x3ec8] sm:$0xff]  ;;  %1203 = vst [vmem:[%s4995_s7 + $0xfa8] sm:$0xff] %v1202_v53 }
 0x10d   : > { %1205 = vst [vmem:[%s4995_s7 + $0xfb0] sm:$0xff] %v1204_v54  ;;  %1207 = vst [vmem:[%s4995_s7 + $0xfb8] sm:$0xff] %v1206_v55  ;;  %v1208_v56 = vld [vmem:[%s4987_s6 + $0x3f00] sm:$0xff]  ;;  %v1210_v57 = vld [vmem:[%s4987_s6 + $0x3f08] sm:$0xff] }
 0x10e   : > { %v1212_v58 = vld [vmem:[%s4987_s6 + $0x3f40] sm:$0xff]  ;;  %1209 = vst [vmem:[%s4995_s7 + $0xfc0] sm:$0xff] %v1208_v56  ;;  %1211 = vst [vmem:[%s4995_s7 + $0xfc8] sm:$0xff] %v1210_v57  ;;  %v1214_v59 = vld [vmem:[%s4987_s6 + $0x3f48] sm:$0xff] }
 0x10f   : > { %1213 = vst [vmem:[%s4995_s7 + $0xfd0] sm:$0xff] %v1212_v58  ;;  %v1216_v60 = vld [vmem:[%s4987_s6 + $0x3f80] sm:$0xff]  ;;  %v1218_v61 = vld [vmem:[%s4987_s6 + $0x3f88] sm:$0xff]  ;;  %1215 = vst [vmem:[%s4995_s7 + $0xfd8] sm:$0xff] %v1214_v59 }
 0x110   : > { %1217 = vst [vmem:[%s4995_s7 + $0xfe0] sm:$0xff] %v1216_v60  ;;  %1219 = vst [vmem:[%s4995_s7 + $0xfe8] sm:$0xff] %v1218_v61  ;;  %v1220_v62 = vld [vmem:[%s4987_s6 + $0x3fc0] sm:$0xff]  ;;  %v1222_v63 = vld [vmem:[%s4987_s6 + $0x3fc8] sm:$0xff] }
 0x111   : > { %v1224_v0 = vld [vmem:[%s4987_s6 + $0x4000] sm:$0xff]  ;;  %1221 = vst [vmem:[%s4995_s7 + $0xff0] sm:$0xff] %v1220_v62  ;;  %1223 = vst [vmem:[%s4995_s7 + $0xff8] sm:$0xff] %v1222_v63  ;;  %v1226_v1 = vld [vmem:[%s4987_s6 + $0x4008] sm:$0xff] }
 0x112   : > { %1225 = vst [vmem:[%s4995_s7 + $0x1000] sm:$0xff] %v1224_v0  ;;  %v1228_v2 = vld [vmem:[%s4987_s6 + $0x4040] sm:$0xff]  ;;  %v1230_v3 = vld [vmem:[%s4987_s6 + $0x4048] sm:$0xff]  ;;  %1227 = vst [vmem:[%s4995_s7 + $0x1008] sm:$0xff] %v1226_v1 }
 0x113   : > { %1229 = vst [vmem:[%s4995_s7 + $0x1010] sm:$0xff] %v1228_v2  ;;  %1231 = vst [vmem:[%s4995_s7 + $0x1018] sm:$0xff] %v1230_v3  ;;  %v1232_v4 = vld [vmem:[%s4987_s6 + $0x4080] sm:$0xff]  ;;  %v1234_v5 = vld [vmem:[%s4987_s6 + $0x4088] sm:$0xff] }
 0x114   : > { %v1236_v6 = vld [vmem:[%s4987_s6 + $0x40c0] sm:$0xff]  ;;  %1233 = vst [vmem:[%s4995_s7 + $0x1020] sm:$0xff] %v1232_v4  ;;  %1235 = vst [vmem:[%s4995_s7 + $0x1028] sm:$0xff] %v1234_v5  ;;  %v1238_v7 = vld [vmem:[%s4987_s6 + $0x40c8] sm:$0xff] }
 0x115   : > { %1237 = vst [vmem:[%s4995_s7 + $0x1030] sm:$0xff] %v1236_v6  ;;  %v1240_v8 = vld [vmem:[%s4987_s6 + $0x4100] sm:$0xff]  ;;  %v1242_v9 = vld [vmem:[%s4987_s6 + $0x4108] sm:$0xff]  ;;  %1239 = vst [vmem:[%s4995_s7 + $0x1038] sm:$0xff] %v1238_v7 }
 0x116   : > { %1241 = vst [vmem:[%s4995_s7 + $0x1040] sm:$0xff] %v1240_v8  ;;  %1243 = vst [vmem:[%s4995_s7 + $0x1048] sm:$0xff] %v1242_v9  ;;  %v1244_v10 = vld [vmem:[%s4987_s6 + $0x4140] sm:$0xff]  ;;  %v1246_v11 = vld [vmem:[%s4987_s6 + $0x4148] sm:$0xff] }
 0x117   : > { %v1248_v12 = vld [vmem:[%s4987_s6 + $0x4180] sm:$0xff]  ;;  %1245 = vst [vmem:[%s4995_s7 + $0x1050] sm:$0xff] %v1244_v10  ;;  %1247 = vst [vmem:[%s4995_s7 + $0x1058] sm:$0xff] %v1246_v11  ;;  %v1250_v13 = vld [vmem:[%s4987_s6 + $0x4188] sm:$0xff] }
 0x118   : > { %1249 = vst [vmem:[%s4995_s7 + $0x1060] sm:$0xff] %v1248_v12  ;;  %v1252_v14 = vld [vmem:[%s4987_s6 + $0x41c0] sm:$0xff]  ;;  %v1254_v15 = vld [vmem:[%s4987_s6 + $0x41c8] sm:$0xff]  ;;  %1251 = vst [vmem:[%s4995_s7 + $0x1068] sm:$0xff] %v1250_v13 }
 0x119   : > { %1253 = vst [vmem:[%s4995_s7 + $0x1070] sm:$0xff] %v1252_v14  ;;  %1255 = vst [vmem:[%s4995_s7 + $0x1078] sm:$0xff] %v1254_v15  ;;  %v1256_v16 = vld [vmem:[%s4987_s6 + $0x4200] sm:$0xff]  ;;  %v1258_v17 = vld [vmem:[%s4987_s6 + $0x4208] sm:$0xff] }
 0x11a   : > { %v1260_v18 = vld [vmem:[%s4987_s6 + $0x4240] sm:$0xff]  ;;  %1257 = vst [vmem:[%s4995_s7 + $0x1080] sm:$0xff] %v1256_v16  ;;  %1259 = vst [vmem:[%s4995_s7 + $0x1088] sm:$0xff] %v1258_v17  ;;  %v1262_v19 = vld [vmem:[%s4987_s6 + $0x4248] sm:$0xff] }
 0x11b   : > { %1261 = vst [vmem:[%s4995_s7 + $0x1090] sm:$0xff] %v1260_v18  ;;  %v1264_v20 = vld [vmem:[%s4987_s6 + $0x4280] sm:$0xff]  ;;  %v1266_v21 = vld [vmem:[%s4987_s6 + $0x4288] sm:$0xff]  ;;  %1263 = vst [vmem:[%s4995_s7 + $0x1098] sm:$0xff] %v1262_v19 }
 0x11c   : > { %1265 = vst [vmem:[%s4995_s7 + $0x10a0] sm:$0xff] %v1264_v20  ;;  %1267 = vst [vmem:[%s4995_s7 + $0x10a8] sm:$0xff] %v1266_v21  ;;  %v1268_v22 = vld [vmem:[%s4987_s6 + $0x42c0] sm:$0xff]  ;;  %v1270_v23 = vld [vmem:[%s4987_s6 + $0x42c8] sm:$0xff] }
 0x11d   : > { %v1272_v24 = vld [vmem:[%s4987_s6 + $0x4300] sm:$0xff]  ;;  %1269 = vst [vmem:[%s4995_s7 + $0x10b0] sm:$0xff] %v1268_v22  ;;  %1271 = vst [vmem:[%s4995_s7 + $0x10b8] sm:$0xff] %v1270_v23  ;;  %v1274_v25 = vld [vmem:[%s4987_s6 + $0x4308] sm:$0xff] }
 0x11e   : > { %1273 = vst [vmem:[%s4995_s7 + $0x10c0] sm:$0xff] %v1272_v24  ;;  %v1276_v26 = vld [vmem:[%s4987_s6 + $0x4340] sm:$0xff]  ;;  %v1278_v27 = vld [vmem:[%s4987_s6 + $0x4348] sm:$0xff]  ;;  %1275 = vst [vmem:[%s4995_s7 + $0x10c8] sm:$0xff] %v1274_v25 }
 0x11f   : > { %1277 = vst [vmem:[%s4995_s7 + $0x10d0] sm:$0xff] %v1276_v26  ;;  %1279 = vst [vmem:[%s4995_s7 + $0x10d8] sm:$0xff] %v1278_v27  ;;  %v1280_v28 = vld [vmem:[%s4987_s6 + $0x4380] sm:$0xff]  ;;  %v1282_v29 = vld [vmem:[%s4987_s6 + $0x4388] sm:$0xff] }
 0x120   : > { %v1284_v30 = vld [vmem:[%s4987_s6 + $0x43c0] sm:$0xff]  ;;  %1281 = vst [vmem:[%s4995_s7 + $0x10e0] sm:$0xff] %v1280_v28  ;;  %1283 = vst [vmem:[%s4995_s7 + $0x10e8] sm:$0xff] %v1282_v29  ;;  %v1286_v31 = vld [vmem:[%s4987_s6 + $0x43c8] sm:$0xff] }
 0x121   : > { %1285 = vst [vmem:[%s4995_s7 + $0x10f0] sm:$0xff] %v1284_v30  ;;  %v1288_v32 = vld [vmem:[%s4987_s6 + $0x4400] sm:$0xff]  ;;  %v1290_v33 = vld [vmem:[%s4987_s6 + $0x4408] sm:$0xff]  ;;  %1287 = vst [vmem:[%s4995_s7 + $0x10f8] sm:$0xff] %v1286_v31 }
 0x122   : > { %1289 = vst [vmem:[%s4995_s7 + $0x1100] sm:$0xff] %v1288_v32  ;;  %1291 = vst [vmem:[%s4995_s7 + $0x1108] sm:$0xff] %v1290_v33  ;;  %v1292_v34 = vld [vmem:[%s4987_s6 + $0x4440] sm:$0xff]  ;;  %v1294_v35 = vld [vmem:[%s4987_s6 + $0x4448] sm:$0xff] }
 0x123   : > { %v1296_v36 = vld [vmem:[%s4987_s6 + $0x4480] sm:$0xff]  ;;  %1293 = vst [vmem:[%s4995_s7 + $0x1110] sm:$0xff] %v1292_v34  ;;  %1295 = vst [vmem:[%s4995_s7 + $0x1118] sm:$0xff] %v1294_v35  ;;  %v1298_v37 = vld [vmem:[%s4987_s6 + $0x4488] sm:$0xff] }
 0x124   : > { %1297 = vst [vmem:[%s4995_s7 + $0x1120] sm:$0xff] %v1296_v36  ;;  %v1300_v38 = vld [vmem:[%s4987_s6 + $0x44c0] sm:$0xff]  ;;  %v1302_v39 = vld [vmem:[%s4987_s6 + $0x44c8] sm:$0xff]  ;;  %1299 = vst [vmem:[%s4995_s7 + $0x1128] sm:$0xff] %v1298_v37 }
 0x125   : > { %1301 = vst [vmem:[%s4995_s7 + $0x1130] sm:$0xff] %v1300_v38  ;;  %1303 = vst [vmem:[%s4995_s7 + $0x1138] sm:$0xff] %v1302_v39  ;;  %v1304_v40 = vld [vmem:[%s4987_s6 + $0x4500] sm:$0xff]  ;;  %v1306_v41 = vld [vmem:[%s4987_s6 + $0x4508] sm:$0xff] }
 0x126   : > { %v1308_v42 = vld [vmem:[%s4987_s6 + $0x4540] sm:$0xff]  ;;  %1305 = vst [vmem:[%s4995_s7 + $0x1140] sm:$0xff] %v1304_v40  ;;  %1307 = vst [vmem:[%s4995_s7 + $0x1148] sm:$0xff] %v1306_v41  ;;  %v1310_v43 = vld [vmem:[%s4987_s6 + $0x4548] sm:$0xff] }
 0x127   : > { %1309 = vst [vmem:[%s4995_s7 + $0x1150] sm:$0xff] %v1308_v42  ;;  %v1312_v44 = vld [vmem:[%s4987_s6 + $0x4580] sm:$0xff]  ;;  %v1314_v45 = vld [vmem:[%s4987_s6 + $0x4588] sm:$0xff]  ;;  %1311 = vst [vmem:[%s4995_s7 + $0x1158] sm:$0xff] %v1310_v43 }
 0x128   : > { %1313 = vst [vmem:[%s4995_s7 + $0x1160] sm:$0xff] %v1312_v44  ;;  %1315 = vst [vmem:[%s4995_s7 + $0x1168] sm:$0xff] %v1314_v45  ;;  %v1316_v46 = vld [vmem:[%s4987_s6 + $0x45c0] sm:$0xff]  ;;  %v1318_v47 = vld [vmem:[%s4987_s6 + $0x45c8] sm:$0xff] }
 0x129   : > { %v1320_v48 = vld [vmem:[%s4987_s6 + $0x4600] sm:$0xff]  ;;  %1317 = vst [vmem:[%s4995_s7 + $0x1170] sm:$0xff] %v1316_v46  ;;  %1319 = vst [vmem:[%s4995_s7 + $0x1178] sm:$0xff] %v1318_v47  ;;  %v1322_v49 = vld [vmem:[%s4987_s6 + $0x4608] sm:$0xff] }
 0x12a   : > { %1321 = vst [vmem:[%s4995_s7 + $0x1180] sm:$0xff] %v1320_v48  ;;  %v1324_v50 = vld [vmem:[%s4987_s6 + $0x4640] sm:$0xff]  ;;  %v1326_v51 = vld [vmem:[%s4987_s6 + $0x4648] sm:$0xff]  ;;  %1323 = vst [vmem:[%s4995_s7 + $0x1188] sm:$0xff] %v1322_v49 }
 0x12b   : > { %1325 = vst [vmem:[%s4995_s7 + $0x1190] sm:$0xff] %v1324_v50  ;;  %1327 = vst [vmem:[%s4995_s7 + $0x1198] sm:$0xff] %v1326_v51  ;;  %v1328_v52 = vld [vmem:[%s4987_s6 + $0x4680] sm:$0xff]  ;;  %v1330_v53 = vld [vmem:[%s4987_s6 + $0x4688] sm:$0xff] }
 0x12c   : > { %v1332_v54 = vld [vmem:[%s4987_s6 + $0x46c0] sm:$0xff]  ;;  %1329 = vst [vmem:[%s4995_s7 + $0x11a0] sm:$0xff] %v1328_v52  ;;  %1331 = vst [vmem:[%s4995_s7 + $0x11a8] sm:$0xff] %v1330_v53  ;;  %v1334_v55 = vld [vmem:[%s4987_s6 + $0x46c8] sm:$0xff] }
 0x12d   : > { %1333 = vst [vmem:[%s4995_s7 + $0x11b0] sm:$0xff] %v1332_v54  ;;  %v1336_v56 = vld [vmem:[%s4987_s6 + $0x4700] sm:$0xff]  ;;  %v1338_v57 = vld [vmem:[%s4987_s6 + $0x4708] sm:$0xff]  ;;  %1335 = vst [vmem:[%s4995_s7 + $0x11b8] sm:$0xff] %v1334_v55 }
 0x12e   : > { %1337 = vst [vmem:[%s4995_s7 + $0x11c0] sm:$0xff] %v1336_v56  ;;  %1339 = vst [vmem:[%s4995_s7 + $0x11c8] sm:$0xff] %v1338_v57  ;;  %v1340_v58 = vld [vmem:[%s4987_s6 + $0x4740] sm:$0xff]  ;;  %v1342_v59 = vld [vmem:[%s4987_s6 + $0x4748] sm:$0xff] }
 0x12f   : > { %v1344_v60 = vld [vmem:[%s4987_s6 + $0x4780] sm:$0xff]  ;;  %1341 = vst [vmem:[%s4995_s7 + $0x11d0] sm:$0xff] %v1340_v58  ;;  %1343 = vst [vmem:[%s4995_s7 + $0x11d8] sm:$0xff] %v1342_v59  ;;  %v1346_v61 = vld [vmem:[%s4987_s6 + $0x4788] sm:$0xff] }
 0x130   : > { %1345 = vst [vmem:[%s4995_s7 + $0x11e0] sm:$0xff] %v1344_v60  ;;  %v1348_v62 = vld [vmem:[%s4987_s6 + $0x47c0] sm:$0xff]  ;;  %v1350_v63 = vld [vmem:[%s4987_s6 + $0x47c8] sm:$0xff]  ;;  %1347 = vst [vmem:[%s4995_s7 + $0x11e8] sm:$0xff] %v1346_v61 }
 0x131   : > { %1349 = vst [vmem:[%s4995_s7 + $0x11f0] sm:$0xff] %v1348_v62  ;;  %1351 = vst [vmem:[%s4995_s7 + $0x11f8] sm:$0xff] %v1350_v63  ;;  %v1352_v0 = vld [vmem:[%s4987_s6 + $0x4800] sm:$0xff]  ;;  %v1354_v1 = vld [vmem:[%s4987_s6 + $0x4808] sm:$0xff] }
 0x132   : > { %v1356_v2 = vld [vmem:[%s4987_s6 + $0x4840] sm:$0xff]  ;;  %1353 = vst [vmem:[%s4995_s7 + $0x1200] sm:$0xff] %v1352_v0  ;;  %1355 = vst [vmem:[%s4995_s7 + $0x1208] sm:$0xff] %v1354_v1  ;;  %v1358_v3 = vld [vmem:[%s4987_s6 + $0x4848] sm:$0xff] }
 0x133   : > { %1357 = vst [vmem:[%s4995_s7 + $0x1210] sm:$0xff] %v1356_v2  ;;  %v1360_v4 = vld [vmem:[%s4987_s6 + $0x4880] sm:$0xff]  ;;  %v1362_v5 = vld [vmem:[%s4987_s6 + $0x4888] sm:$0xff]  ;;  %1359 = vst [vmem:[%s4995_s7 + $0x1218] sm:$0xff] %v1358_v3 }
 0x134   : > { %1361 = vst [vmem:[%s4995_s7 + $0x1220] sm:$0xff] %v1360_v4  ;;  %1363 = vst [vmem:[%s4995_s7 + $0x1228] sm:$0xff] %v1362_v5  ;;  %v1364_v6 = vld [vmem:[%s4987_s6 + $0x48c0] sm:$0xff]  ;;  %v1366_v7 = vld [vmem:[%s4987_s6 + $0x48c8] sm:$0xff] }
 0x135   : > { %v1368_v8 = vld [vmem:[%s4987_s6 + $0x4900] sm:$0xff]  ;;  %1365 = vst [vmem:[%s4995_s7 + $0x1230] sm:$0xff] %v1364_v6  ;;  %1367 = vst [vmem:[%s4995_s7 + $0x1238] sm:$0xff] %v1366_v7  ;;  %v1370_v9 = vld [vmem:[%s4987_s6 + $0x4908] sm:$0xff] }
 0x136   : > { %1369 = vst [vmem:[%s4995_s7 + $0x1240] sm:$0xff] %v1368_v8  ;;  %v1372_v10 = vld [vmem:[%s4987_s6 + $0x4940] sm:$0xff]  ;;  %v1374_v11 = vld [vmem:[%s4987_s6 + $0x4948] sm:$0xff]  ;;  %1371 = vst [vmem:[%s4995_s7 + $0x1248] sm:$0xff] %v1370_v9 }
 0x137   : > { %1373 = vst [vmem:[%s4995_s7 + $0x1250] sm:$0xff] %v1372_v10  ;;  %1375 = vst [vmem:[%s4995_s7 + $0x1258] sm:$0xff] %v1374_v11  ;;  %v1376_v12 = vld [vmem:[%s4987_s6 + $0x4980] sm:$0xff]  ;;  %v1378_v13 = vld [vmem:[%s4987_s6 + $0x4988] sm:$0xff] }
 0x138   : > { %v1380_v14 = vld [vmem:[%s4987_s6 + $0x49c0] sm:$0xff]  ;;  %1377 = vst [vmem:[%s4995_s7 + $0x1260] sm:$0xff] %v1376_v12  ;;  %1379 = vst [vmem:[%s4995_s7 + $0x1268] sm:$0xff] %v1378_v13  ;;  %v1382_v15 = vld [vmem:[%s4987_s6 + $0x49c8] sm:$0xff] }
 0x139   : > { %1381 = vst [vmem:[%s4995_s7 + $0x1270] sm:$0xff] %v1380_v14  ;;  %v1384_v16 = vld [vmem:[%s4987_s6 + $0x4a00] sm:$0xff]  ;;  %v1386_v17 = vld [vmem:[%s4987_s6 + $0x4a08] sm:$0xff]  ;;  %1383 = vst [vmem:[%s4995_s7 + $0x1278] sm:$0xff] %v1382_v15 }
 0x13a   : > { %1385 = vst [vmem:[%s4995_s7 + $0x1280] sm:$0xff] %v1384_v16  ;;  %1387 = vst [vmem:[%s4995_s7 + $0x1288] sm:$0xff] %v1386_v17  ;;  %v1388_v18 = vld [vmem:[%s4987_s6 + $0x4a40] sm:$0xff]  ;;  %v1390_v19 = vld [vmem:[%s4987_s6 + $0x4a48] sm:$0xff] }
 0x13b   : > { %v1392_v20 = vld [vmem:[%s4987_s6 + $0x4a80] sm:$0xff]  ;;  %1389 = vst [vmem:[%s4995_s7 + $0x1290] sm:$0xff] %v1388_v18  ;;  %1391 = vst [vmem:[%s4995_s7 + $0x1298] sm:$0xff] %v1390_v19  ;;  %v1394_v21 = vld [vmem:[%s4987_s6 + $0x4a88] sm:$0xff] }
 0x13c   : > { %1393 = vst [vmem:[%s4995_s7 + $0x12a0] sm:$0xff] %v1392_v20  ;;  %v1396_v22 = vld [vmem:[%s4987_s6 + $0x4ac0] sm:$0xff]  ;;  %v1398_v23 = vld [vmem:[%s4987_s6 + $0x4ac8] sm:$0xff]  ;;  %1395 = vst [vmem:[%s4995_s7 + $0x12a8] sm:$0xff] %v1394_v21 }
 0x13d   : > { %1397 = vst [vmem:[%s4995_s7 + $0x12b0] sm:$0xff] %v1396_v22  ;;  %1399 = vst [vmem:[%s4995_s7 + $0x12b8] sm:$0xff] %v1398_v23  ;;  %v1400_v24 = vld [vmem:[%s4987_s6 + $0x4b00] sm:$0xff]  ;;  %v1402_v25 = vld [vmem:[%s4987_s6 + $0x4b08] sm:$0xff] }
 0x13e   : > { %v1404_v26 = vld [vmem:[%s4987_s6 + $0x4b40] sm:$0xff]  ;;  %1401 = vst [vmem:[%s4995_s7 + $0x12c0] sm:$0xff] %v1400_v24  ;;  %1403 = vst [vmem:[%s4995_s7 + $0x12c8] sm:$0xff] %v1402_v25  ;;  %v1406_v27 = vld [vmem:[%s4987_s6 + $0x4b48] sm:$0xff] }
 0x13f   : > { %1405 = vst [vmem:[%s4995_s7 + $0x12d0] sm:$0xff] %v1404_v26  ;;  %v1408_v28 = vld [vmem:[%s4987_s6 + $0x4b80] sm:$0xff]  ;;  %v1410_v29 = vld [vmem:[%s4987_s6 + $0x4b88] sm:$0xff]  ;;  %1407 = vst [vmem:[%s4995_s7 + $0x12d8] sm:$0xff] %v1406_v27 }
 0x140   : > { %1409 = vst [vmem:[%s4995_s7 + $0x12e0] sm:$0xff] %v1408_v28  ;;  %1411 = vst [vmem:[%s4995_s7 + $0x12e8] sm:$0xff] %v1410_v29  ;;  %v1412_v30 = vld [vmem:[%s4987_s6 + $0x4bc0] sm:$0xff]  ;;  %v1414_v31 = vld [vmem:[%s4987_s6 + $0x4bc8] sm:$0xff] }
 0x141   : > { %v1416_v32 = vld [vmem:[%s4987_s6 + $0x4c00] sm:$0xff]  ;;  %1413 = vst [vmem:[%s4995_s7 + $0x12f0] sm:$0xff] %v1412_v30  ;;  %1415 = vst [vmem:[%s4995_s7 + $0x12f8] sm:$0xff] %v1414_v31  ;;  %v1418_v33 = vld [vmem:[%s4987_s6 + $0x4c08] sm:$0xff] }
 0x142   : > { %1417 = vst [vmem:[%s4995_s7 + $0x1300] sm:$0xff] %v1416_v32  ;;  %v1420_v34 = vld [vmem:[%s4987_s6 + $0x4c40] sm:$0xff]  ;;  %v1422_v35 = vld [vmem:[%s4987_s6 + $0x4c48] sm:$0xff]  ;;  %1419 = vst [vmem:[%s4995_s7 + $0x1308] sm:$0xff] %v1418_v33 }
 0x143   : > { %1421 = vst [vmem:[%s4995_s7 + $0x1310] sm:$0xff] %v1420_v34  ;;  %1423 = vst [vmem:[%s4995_s7 + $0x1318] sm:$0xff] %v1422_v35  ;;  %v1424_v36 = vld [vmem:[%s4987_s6 + $0x4c80] sm:$0xff]  ;;  %v1426_v37 = vld [vmem:[%s4987_s6 + $0x4c88] sm:$0xff] }
 0x144   : > { %v1428_v38 = vld [vmem:[%s4987_s6 + $0x4cc0] sm:$0xff]  ;;  %1425 = vst [vmem:[%s4995_s7 + $0x1320] sm:$0xff] %v1424_v36  ;;  %1427 = vst [vmem:[%s4995_s7 + $0x1328] sm:$0xff] %v1426_v37  ;;  %v1430_v39 = vld [vmem:[%s4987_s6 + $0x4cc8] sm:$0xff] }
 0x145   : > { %1429 = vst [vmem:[%s4995_s7 + $0x1330] sm:$0xff] %v1428_v38  ;;  %v1432_v40 = vld [vmem:[%s4987_s6 + $0x4d00] sm:$0xff]  ;;  %v1434_v41 = vld [vmem:[%s4987_s6 + $0x4d08] sm:$0xff]  ;;  %1431 = vst [vmem:[%s4995_s7 + $0x1338] sm:$0xff] %v1430_v39 }
 0x146   : > { %1433 = vst [vmem:[%s4995_s7 + $0x1340] sm:$0xff] %v1432_v40  ;;  %1435 = vst [vmem:[%s4995_s7 + $0x1348] sm:$0xff] %v1434_v41  ;;  %v1436_v42 = vld [vmem:[%s4987_s6 + $0x4d40] sm:$0xff]  ;;  %v1438_v43 = vld [vmem:[%s4987_s6 + $0x4d48] sm:$0xff] }
 0x147   : > { %v1440_v44 = vld [vmem:[%s4987_s6 + $0x4d80] sm:$0xff]  ;;  %1437 = vst [vmem:[%s4995_s7 + $0x1350] sm:$0xff] %v1436_v42  ;;  %1439 = vst [vmem:[%s4995_s7 + $0x1358] sm:$0xff] %v1438_v43  ;;  %v1442_v45 = vld [vmem:[%s4987_s6 + $0x4d88] sm:$0xff] }
 0x148   : > { %1441 = vst [vmem:[%s4995_s7 + $0x1360] sm:$0xff] %v1440_v44  ;;  %v1444_v46 = vld [vmem:[%s4987_s6 + $0x4dc0] sm:$0xff]  ;;  %v1446_v47 = vld [vmem:[%s4987_s6 + $0x4dc8] sm:$0xff]  ;;  %1443 = vst [vmem:[%s4995_s7 + $0x1368] sm:$0xff] %v1442_v45 }
 0x149   : > { %1445 = vst [vmem:[%s4995_s7 + $0x1370] sm:$0xff] %v1444_v46  ;;  %1447 = vst [vmem:[%s4995_s7 + $0x1378] sm:$0xff] %v1446_v47  ;;  %v1448_v48 = vld [vmem:[%s4987_s6 + $0x4e00] sm:$0xff]  ;;  %v1450_v49 = vld [vmem:[%s4987_s6 + $0x4e08] sm:$0xff] }
 0x14a   : > { %v1452_v50 = vld [vmem:[%s4987_s6 + $0x4e40] sm:$0xff]  ;;  %1449 = vst [vmem:[%s4995_s7 + $0x1380] sm:$0xff] %v1448_v48  ;;  %1451 = vst [vmem:[%s4995_s7 + $0x1388] sm:$0xff] %v1450_v49  ;;  %v1454_v51 = vld [vmem:[%s4987_s6 + $0x4e48] sm:$0xff] }
 0x14b   : > { %1453 = vst [vmem:[%s4995_s7 + $0x1390] sm:$0xff] %v1452_v50  ;;  %v1456_v52 = vld [vmem:[%s4987_s6 + $0x4e80] sm:$0xff]  ;;  %v1458_v53 = vld [vmem:[%s4987_s6 + $0x4e88] sm:$0xff]  ;;  %1455 = vst [vmem:[%s4995_s7 + $0x1398] sm:$0xff] %v1454_v51 }
 0x14c   : > { %1457 = vst [vmem:[%s4995_s7 + $0x13a0] sm:$0xff] %v1456_v52  ;;  %1459 = vst [vmem:[%s4995_s7 + $0x13a8] sm:$0xff] %v1458_v53  ;;  %v1460_v54 = vld [vmem:[%s4987_s6 + $0x4ec0] sm:$0xff]  ;;  %v1462_v55 = vld [vmem:[%s4987_s6 + $0x4ec8] sm:$0xff] }
 0x14d   : > { %v1464_v56 = vld [vmem:[%s4987_s6 + $0x4f00] sm:$0xff]  ;;  %1461 = vst [vmem:[%s4995_s7 + $0x13b0] sm:$0xff] %v1460_v54  ;;  %1463 = vst [vmem:[%s4995_s7 + $0x13b8] sm:$0xff] %v1462_v55  ;;  %v1466_v57 = vld [vmem:[%s4987_s6 + $0x4f08] sm:$0xff] }
 0x14e   : > { %1465 = vst [vmem:[%s4995_s7 + $0x13c0] sm:$0xff] %v1464_v56  ;;  %v1468_v58 = vld [vmem:[%s4987_s6 + $0x4f40] sm:$0xff]  ;;  %v1470_v59 = vld [vmem:[%s4987_s6 + $0x4f48] sm:$0xff]  ;;  %1467 = vst [vmem:[%s4995_s7 + $0x13c8] sm:$0xff] %v1466_v57 }
 0x14f   : > { %1469 = vst [vmem:[%s4995_s7 + $0x13d0] sm:$0xff] %v1468_v58  ;;  %1471 = vst [vmem:[%s4995_s7 + $0x13d8] sm:$0xff] %v1470_v59  ;;  %v1472_v60 = vld [vmem:[%s4987_s6 + $0x4f80] sm:$0xff]  ;;  %v1474_v61 = vld [vmem:[%s4987_s6 + $0x4f88] sm:$0xff] }
 0x150   : > { %v1476_v62 = vld [vmem:[%s4987_s6 + $0x4fc0] sm:$0xff]  ;;  %1473 = vst [vmem:[%s4995_s7 + $0x13e0] sm:$0xff] %v1472_v60  ;;  %1475 = vst [vmem:[%s4995_s7 + $0x13e8] sm:$0xff] %v1474_v61  ;;  %v1478_v63 = vld [vmem:[%s4987_s6 + $0x4fc8] sm:$0xff] }
 0x151   : > { %1477 = vst [vmem:[%s4995_s7 + $0x13f0] sm:$0xff] %v1476_v62  ;;  %v1480_v0 = vld [vmem:[%s4987_s6 + $0x5000] sm:$0xff]  ;;  %v1482_v1 = vld [vmem:[%s4987_s6 + $0x5008] sm:$0xff]  ;;  %1479 = vst [vmem:[%s4995_s7 + $0x13f8] sm:$0xff] %v1478_v63 }
 0x152   : > { %1481 = vst [vmem:[%s4995_s7 + $0x1400] sm:$0xff] %v1480_v0  ;;  %1483 = vst [vmem:[%s4995_s7 + $0x1408] sm:$0xff] %v1482_v1  ;;  %v1484_v2 = vld [vmem:[%s4987_s6 + $0x5040] sm:$0xff]  ;;  %v1486_v3 = vld [vmem:[%s4987_s6 + $0x5048] sm:$0xff] }
 0x153   : > { %v1488_v4 = vld [vmem:[%s4987_s6 + $0x5080] sm:$0xff]  ;;  %1485 = vst [vmem:[%s4995_s7 + $0x1410] sm:$0xff] %v1484_v2  ;;  %1487 = vst [vmem:[%s4995_s7 + $0x1418] sm:$0xff] %v1486_v3  ;;  %v1490_v5 = vld [vmem:[%s4987_s6 + $0x5088] sm:$0xff] }
 0x154   : > { %1489 = vst [vmem:[%s4995_s7 + $0x1420] sm:$0xff] %v1488_v4  ;;  %v1492_v6 = vld [vmem:[%s4987_s6 + $0x50c0] sm:$0xff]  ;;  %v1494_v7 = vld [vmem:[%s4987_s6 + $0x50c8] sm:$0xff]  ;;  %1491 = vst [vmem:[%s4995_s7 + $0x1428] sm:$0xff] %v1490_v5 }
 0x155   : > { %1493 = vst [vmem:[%s4995_s7 + $0x1430] sm:$0xff] %v1492_v6  ;;  %1495 = vst [vmem:[%s4995_s7 + $0x1438] sm:$0xff] %v1494_v7  ;;  %v1496_v8 = vld [vmem:[%s4987_s6 + $0x5100] sm:$0xff]  ;;  %v1498_v9 = vld [vmem:[%s4987_s6 + $0x5108] sm:$0xff] }
 0x156   : > { %v1500_v10 = vld [vmem:[%s4987_s6 + $0x5140] sm:$0xff]  ;;  %1497 = vst [vmem:[%s4995_s7 + $0x1440] sm:$0xff] %v1496_v8  ;;  %1499 = vst [vmem:[%s4995_s7 + $0x1448] sm:$0xff] %v1498_v9  ;;  %v1502_v11 = vld [vmem:[%s4987_s6 + $0x5148] sm:$0xff] }
 0x157   : > { %1501 = vst [vmem:[%s4995_s7 + $0x1450] sm:$0xff] %v1500_v10  ;;  %v1504_v12 = vld [vmem:[%s4987_s6 + $0x5180] sm:$0xff]  ;;  %v1506_v13 = vld [vmem:[%s4987_s6 + $0x5188] sm:$0xff]  ;;  %1503 = vst [vmem:[%s4995_s7 + $0x1458] sm:$0xff] %v1502_v11 }
 0x158   : > { %1505 = vst [vmem:[%s4995_s7 + $0x1460] sm:$0xff] %v1504_v12  ;;  %1507 = vst [vmem:[%s4995_s7 + $0x1468] sm:$0xff] %v1506_v13  ;;  %v1508_v14 = vld [vmem:[%s4987_s6 + $0x51c0] sm:$0xff]  ;;  %v1510_v15 = vld [vmem:[%s4987_s6 + $0x51c8] sm:$0xff] }
 0x159   : > { %v1512_v16 = vld [vmem:[%s4987_s6 + $0x5200] sm:$0xff]  ;;  %1509 = vst [vmem:[%s4995_s7 + $0x1470] sm:$0xff] %v1508_v14  ;;  %1511 = vst [vmem:[%s4995_s7 + $0x1478] sm:$0xff] %v1510_v15  ;;  %v1514_v17 = vld [vmem:[%s4987_s6 + $0x5208] sm:$0xff] }
 0x15a   : > { %1513 = vst [vmem:[%s4995_s7 + $0x1480] sm:$0xff] %v1512_v16  ;;  %v1516_v18 = vld [vmem:[%s4987_s6 + $0x5240] sm:$0xff]  ;;  %v1518_v19 = vld [vmem:[%s4987_s6 + $0x5248] sm:$0xff]  ;;  %1515 = vst [vmem:[%s4995_s7 + $0x1488] sm:$0xff] %v1514_v17 }
 0x15b   : > { %1517 = vst [vmem:[%s4995_s7 + $0x1490] sm:$0xff] %v1516_v18  ;;  %1519 = vst [vmem:[%s4995_s7 + $0x1498] sm:$0xff] %v1518_v19  ;;  %v1520_v20 = vld [vmem:[%s4987_s6 + $0x5280] sm:$0xff]  ;;  %v1522_v21 = vld [vmem:[%s4987_s6 + $0x5288] sm:$0xff] }
 0x15c   : > { %v1524_v22 = vld [vmem:[%s4987_s6 + $0x52c0] sm:$0xff]  ;;  %1521 = vst [vmem:[%s4995_s7 + $0x14a0] sm:$0xff] %v1520_v20  ;;  %1523 = vst [vmem:[%s4995_s7 + $0x14a8] sm:$0xff] %v1522_v21  ;;  %v1526_v23 = vld [vmem:[%s4987_s6 + $0x52c8] sm:$0xff] }
 0x15d   : > { %1525 = vst [vmem:[%s4995_s7 + $0x14b0] sm:$0xff] %v1524_v22  ;;  %v1528_v24 = vld [vmem:[%s4987_s6 + $0x5300] sm:$0xff]  ;;  %v1530_v25 = vld [vmem:[%s4987_s6 + $0x5308] sm:$0xff]  ;;  %1527 = vst [vmem:[%s4995_s7 + $0x14b8] sm:$0xff] %v1526_v23 }
 0x15e   : > { %1529 = vst [vmem:[%s4995_s7 + $0x14c0] sm:$0xff] %v1528_v24  ;;  %1531 = vst [vmem:[%s4995_s7 + $0x14c8] sm:$0xff] %v1530_v25  ;;  %v1532_v26 = vld [vmem:[%s4987_s6 + $0x5340] sm:$0xff]  ;;  %v1534_v27 = vld [vmem:[%s4987_s6 + $0x5348] sm:$0xff] }
 0x15f   : > { %v1536_v28 = vld [vmem:[%s4987_s6 + $0x5380] sm:$0xff]  ;;  %1533 = vst [vmem:[%s4995_s7 + $0x14d0] sm:$0xff] %v1532_v26  ;;  %1535 = vst [vmem:[%s4995_s7 + $0x14d8] sm:$0xff] %v1534_v27  ;;  %v1538_v29 = vld [vmem:[%s4987_s6 + $0x5388] sm:$0xff] }
 0x160   : > { %1537 = vst [vmem:[%s4995_s7 + $0x14e0] sm:$0xff] %v1536_v28  ;;  %v1540_v30 = vld [vmem:[%s4987_s6 + $0x53c0] sm:$0xff]  ;;  %v1542_v31 = vld [vmem:[%s4987_s6 + $0x53c8] sm:$0xff]  ;;  %1539 = vst [vmem:[%s4995_s7 + $0x14e8] sm:$0xff] %v1538_v29 }
 0x161   : > { %1541 = vst [vmem:[%s4995_s7 + $0x14f0] sm:$0xff] %v1540_v30  ;;  %1543 = vst [vmem:[%s4995_s7 + $0x14f8] sm:$0xff] %v1542_v31  ;;  %v1544_v32 = vld [vmem:[%s4987_s6 + $0x5400] sm:$0xff]  ;;  %v1546_v33 = vld [vmem:[%s4987_s6 + $0x5408] sm:$0xff] }
 0x162   : > { %v1548_v34 = vld [vmem:[%s4987_s6 + $0x5440] sm:$0xff]  ;;  %1545 = vst [vmem:[%s4995_s7 + $0x1500] sm:$0xff] %v1544_v32  ;;  %1547 = vst [vmem:[%s4995_s7 + $0x1508] sm:$0xff] %v1546_v33  ;;  %v1550_v35 = vld [vmem:[%s4987_s6 + $0x5448] sm:$0xff] }
 0x163   : > { %1549 = vst [vmem:[%s4995_s7 + $0x1510] sm:$0xff] %v1548_v34  ;;  %v1552_v36 = vld [vmem:[%s4987_s6 + $0x5480] sm:$0xff]  ;;  %v1554_v37 = vld [vmem:[%s4987_s6 + $0x5488] sm:$0xff]  ;;  %1551 = vst [vmem:[%s4995_s7 + $0x1518] sm:$0xff] %v1550_v35 }
 0x164   : > { %1553 = vst [vmem:[%s4995_s7 + $0x1520] sm:$0xff] %v1552_v36  ;;  %1555 = vst [vmem:[%s4995_s7 + $0x1528] sm:$0xff] %v1554_v37  ;;  %v1556_v38 = vld [vmem:[%s4987_s6 + $0x54c0] sm:$0xff]  ;;  %v1558_v39 = vld [vmem:[%s4987_s6 + $0x54c8] sm:$0xff] }
 0x165   : > { %v1560_v40 = vld [vmem:[%s4987_s6 + $0x5500] sm:$0xff]  ;;  %1557 = vst [vmem:[%s4995_s7 + $0x1530] sm:$0xff] %v1556_v38  ;;  %1559 = vst [vmem:[%s4995_s7 + $0x1538] sm:$0xff] %v1558_v39  ;;  %v1562_v41 = vld [vmem:[%s4987_s6 + $0x5508] sm:$0xff] }
 0x166   : > { %1561 = vst [vmem:[%s4995_s7 + $0x1540] sm:$0xff] %v1560_v40  ;;  %v1564_v42 = vld [vmem:[%s4987_s6 + $0x5540] sm:$0xff]  ;;  %v1566_v43 = vld [vmem:[%s4987_s6 + $0x5548] sm:$0xff]  ;;  %1563 = vst [vmem:[%s4995_s7 + $0x1548] sm:$0xff] %v1562_v41 }
 0x167   : > { %1565 = vst [vmem:[%s4995_s7 + $0x1550] sm:$0xff] %v1564_v42  ;;  %1567 = vst [vmem:[%s4995_s7 + $0x1558] sm:$0xff] %v1566_v43  ;;  %v1568_v44 = vld [vmem:[%s4987_s6 + $0x5580] sm:$0xff]  ;;  %v1570_v45 = vld [vmem:[%s4987_s6 + $0x5588] sm:$0xff] }
 0x168   : > { %v1572_v46 = vld [vmem:[%s4987_s6 + $0x55c0] sm:$0xff]  ;;  %1569 = vst [vmem:[%s4995_s7 + $0x1560] sm:$0xff] %v1568_v44  ;;  %1571 = vst [vmem:[%s4995_s7 + $0x1568] sm:$0xff] %v1570_v45  ;;  %v1574_v47 = vld [vmem:[%s4987_s6 + $0x55c8] sm:$0xff] }
 0x169   : > { %1573 = vst [vmem:[%s4995_s7 + $0x1570] sm:$0xff] %v1572_v46  ;;  %v1576_v48 = vld [vmem:[%s4987_s6 + $0x5600] sm:$0xff]  ;;  %v1578_v49 = vld [vmem:[%s4987_s6 + $0x5608] sm:$0xff]  ;;  %1575 = vst [vmem:[%s4995_s7 + $0x1578] sm:$0xff] %v1574_v47 }
 0x16a   : > { %1577 = vst [vmem:[%s4995_s7 + $0x1580] sm:$0xff] %v1576_v48  ;;  %1579 = vst [vmem:[%s4995_s7 + $0x1588] sm:$0xff] %v1578_v49  ;;  %v1580_v50 = vld [vmem:[%s4987_s6 + $0x5640] sm:$0xff]  ;;  %v1582_v51 = vld [vmem:[%s4987_s6 + $0x5648] sm:$0xff] }
 0x16b   : > { %v1584_v52 = vld [vmem:[%s4987_s6 + $0x5680] sm:$0xff]  ;;  %1581 = vst [vmem:[%s4995_s7 + $0x1590] sm:$0xff] %v1580_v50  ;;  %1583 = vst [vmem:[%s4995_s7 + $0x1598] sm:$0xff] %v1582_v51  ;;  %v1586_v53 = vld [vmem:[%s4987_s6 + $0x5688] sm:$0xff] }
 0x16c   : > { %1585 = vst [vmem:[%s4995_s7 + $0x15a0] sm:$0xff] %v1584_v52  ;;  %v1588_v54 = vld [vmem:[%s4987_s6 + $0x56c0] sm:$0xff]  ;;  %v1590_v55 = vld [vmem:[%s4987_s6 + $0x56c8] sm:$0xff]  ;;  %1587 = vst [vmem:[%s4995_s7 + $0x15a8] sm:$0xff] %v1586_v53 }
 0x16d   : > { %1589 = vst [vmem:[%s4995_s7 + $0x15b0] sm:$0xff] %v1588_v54  ;;  %1591 = vst [vmem:[%s4995_s7 + $0x15b8] sm:$0xff] %v1590_v55  ;;  %v1592_v56 = vld [vmem:[%s4987_s6 + $0x5700] sm:$0xff]  ;;  %v1594_v57 = vld [vmem:[%s4987_s6 + $0x5708] sm:$0xff] }
 0x16e   : > { %v1596_v58 = vld [vmem:[%s4987_s6 + $0x5740] sm:$0xff]  ;;  %1593 = vst [vmem:[%s4995_s7 + $0x15c0] sm:$0xff] %v1592_v56  ;;  %1595 = vst [vmem:[%s4995_s7 + $0x15c8] sm:$0xff] %v1594_v57  ;;  %v1598_v59 = vld [vmem:[%s4987_s6 + $0x5748] sm:$0xff] }
 0x16f   : > { %1597 = vst [vmem:[%s4995_s7 + $0x15d0] sm:$0xff] %v1596_v58  ;;  %v1600_v60 = vld [vmem:[%s4987_s6 + $0x5780] sm:$0xff]  ;;  %v1602_v61 = vld [vmem:[%s4987_s6 + $0x5788] sm:$0xff]  ;;  %1599 = vst [vmem:[%s4995_s7 + $0x15d8] sm:$0xff] %v1598_v59 }
 0x170   : > { %1601 = vst [vmem:[%s4995_s7 + $0x15e0] sm:$0xff] %v1600_v60  ;;  %1603 = vst [vmem:[%s4995_s7 + $0x15e8] sm:$0xff] %v1602_v61  ;;  %v1604_v62 = vld [vmem:[%s4987_s6 + $0x57c0] sm:$0xff]  ;;  %v1606_v63 = vld [vmem:[%s4987_s6 + $0x57c8] sm:$0xff] }
 0x171   : > { %v1608_v0 = vld [vmem:[%s4987_s6 + $0x5800] sm:$0xff]  ;;  %1605 = vst [vmem:[%s4995_s7 + $0x15f0] sm:$0xff] %v1604_v62  ;;  %1607 = vst [vmem:[%s4995_s7 + $0x15f8] sm:$0xff] %v1606_v63  ;;  %v1610_v1 = vld [vmem:[%s4987_s6 + $0x5808] sm:$0xff] }
 0x172   : > { %1609 = vst [vmem:[%s4995_s7 + $0x1600] sm:$0xff] %v1608_v0  ;;  %v1612_v2 = vld [vmem:[%s4987_s6 + $0x5840] sm:$0xff]  ;;  %v1614_v3 = vld [vmem:[%s4987_s6 + $0x5848] sm:$0xff]  ;;  %1611 = vst [vmem:[%s4995_s7 + $0x1608] sm:$0xff] %v1610_v1 }
 0x173   : > { %1613 = vst [vmem:[%s4995_s7 + $0x1610] sm:$0xff] %v1612_v2  ;;  %1615 = vst [vmem:[%s4995_s7 + $0x1618] sm:$0xff] %v1614_v3  ;;  %v1616_v4 = vld [vmem:[%s4987_s6 + $0x5880] sm:$0xff]  ;;  %v1618_v5 = vld [vmem:[%s4987_s6 + $0x5888] sm:$0xff] }
 0x174   : > { %v1620_v6 = vld [vmem:[%s4987_s6 + $0x58c0] sm:$0xff]  ;;  %1617 = vst [vmem:[%s4995_s7 + $0x1620] sm:$0xff] %v1616_v4  ;;  %1619 = vst [vmem:[%s4995_s7 + $0x1628] sm:$0xff] %v1618_v5  ;;  %v1622_v7 = vld [vmem:[%s4987_s6 + $0x58c8] sm:$0xff] }
 0x175   : > { %1621 = vst [vmem:[%s4995_s7 + $0x1630] sm:$0xff] %v1620_v6  ;;  %v1624_v8 = vld [vmem:[%s4987_s6 + $0x5900] sm:$0xff]  ;;  %v1626_v9 = vld [vmem:[%s4987_s6 + $0x5908] sm:$0xff]  ;;  %1623 = vst [vmem:[%s4995_s7 + $0x1638] sm:$0xff] %v1622_v7 }
 0x176   : > { %1625 = vst [vmem:[%s4995_s7 + $0x1640] sm:$0xff] %v1624_v8  ;;  %1627 = vst [vmem:[%s4995_s7 + $0x1648] sm:$0xff] %v1626_v9  ;;  %v1628_v10 = vld [vmem:[%s4987_s6 + $0x5940] sm:$0xff]  ;;  %v1630_v11 = vld [vmem:[%s4987_s6 + $0x5948] sm:$0xff] }
 0x177   : > { %v1632_v12 = vld [vmem:[%s4987_s6 + $0x5980] sm:$0xff]  ;;  %1629 = vst [vmem:[%s4995_s7 + $0x1650] sm:$0xff] %v1628_v10  ;;  %1631 = vst [vmem:[%s4995_s7 + $0x1658] sm:$0xff] %v1630_v11  ;;  %v1634_v13 = vld [vmem:[%s4987_s6 + $0x5988] sm:$0xff] }
 0x178   : > { %1633 = vst [vmem:[%s4995_s7 + $0x1660] sm:$0xff] %v1632_v12  ;;  %v1636_v14 = vld [vmem:[%s4987_s6 + $0x59c0] sm:$0xff]  ;;  %v1638_v15 = vld [vmem:[%s4987_s6 + $0x59c8] sm:$0xff]  ;;  %1635 = vst [vmem:[%s4995_s7 + $0x1668] sm:$0xff] %v1634_v13 }
 0x179   : > { %1637 = vst [vmem:[%s4995_s7 + $0x1670] sm:$0xff] %v1636_v14  ;;  %1639 = vst [vmem:[%s4995_s7 + $0x1678] sm:$0xff] %v1638_v15  ;;  %v1640_v16 = vld [vmem:[%s4987_s6 + $0x5a00] sm:$0xff]  ;;  %v1642_v17 = vld [vmem:[%s4987_s6 + $0x5a08] sm:$0xff] }
 0x17a   : > { %v1644_v18 = vld [vmem:[%s4987_s6 + $0x5a40] sm:$0xff]  ;;  %1641 = vst [vmem:[%s4995_s7 + $0x1680] sm:$0xff] %v1640_v16  ;;  %1643 = vst [vmem:[%s4995_s7 + $0x1688] sm:$0xff] %v1642_v17  ;;  %v1646_v19 = vld [vmem:[%s4987_s6 + $0x5a48] sm:$0xff] }
 0x17b   : > { %1645 = vst [vmem:[%s4995_s7 + $0x1690] sm:$0xff] %v1644_v18  ;;  %v1648_v20 = vld [vmem:[%s4987_s6 + $0x5a80] sm:$0xff]  ;;  %v1650_v21 = vld [vmem:[%s4987_s6 + $0x5a88] sm:$0xff]  ;;  %1647 = vst [vmem:[%s4995_s7 + $0x1698] sm:$0xff] %v1646_v19 }
 0x17c   : > { %1649 = vst [vmem:[%s4995_s7 + $0x16a0] sm:$0xff] %v1648_v20  ;;  %1651 = vst [vmem:[%s4995_s7 + $0x16a8] sm:$0xff] %v1650_v21  ;;  %v1652_v22 = vld [vmem:[%s4987_s6 + $0x5ac0] sm:$0xff]  ;;  %v1654_v23 = vld [vmem:[%s4987_s6 + $0x5ac8] sm:$0xff] }
 0x17d   : > { %v1656_v24 = vld [vmem:[%s4987_s6 + $0x5b00] sm:$0xff]  ;;  %1653 = vst [vmem:[%s4995_s7 + $0x16b0] sm:$0xff] %v1652_v22  ;;  %1655 = vst [vmem:[%s4995_s7 + $0x16b8] sm:$0xff] %v1654_v23  ;;  %v1658_v25 = vld [vmem:[%s4987_s6 + $0x5b08] sm:$0xff] }
 0x17e   : > { %1657 = vst [vmem:[%s4995_s7 + $0x16c0] sm:$0xff] %v1656_v24  ;;  %v1660_v26 = vld [vmem:[%s4987_s6 + $0x5b40] sm:$0xff]  ;;  %v1662_v27 = vld [vmem:[%s4987_s6 + $0x5b48] sm:$0xff]  ;;  %1659 = vst [vmem:[%s4995_s7 + $0x16c8] sm:$0xff] %v1658_v25 }
 0x17f   : > { %1661 = vst [vmem:[%s4995_s7 + $0x16d0] sm:$0xff] %v1660_v26  ;;  %1663 = vst [vmem:[%s4995_s7 + $0x16d8] sm:$0xff] %v1662_v27  ;;  %v1664_v28 = vld [vmem:[%s4987_s6 + $0x5b80] sm:$0xff]  ;;  %v1666_v29 = vld [vmem:[%s4987_s6 + $0x5b88] sm:$0xff] }
 0x180   : > { %v1668_v30 = vld [vmem:[%s4987_s6 + $0x5bc0] sm:$0xff]  ;;  %1665 = vst [vmem:[%s4995_s7 + $0x16e0] sm:$0xff] %v1664_v28  ;;  %1667 = vst [vmem:[%s4995_s7 + $0x16e8] sm:$0xff] %v1666_v29  ;;  %v1670_v31 = vld [vmem:[%s4987_s6 + $0x5bc8] sm:$0xff] }
 0x181   : > { %1669 = vst [vmem:[%s4995_s7 + $0x16f0] sm:$0xff] %v1668_v30  ;;  %v1672_v32 = vld [vmem:[%s4987_s6 + $0x5c00] sm:$0xff]  ;;  %v1674_v33 = vld [vmem:[%s4987_s6 + $0x5c08] sm:$0xff]  ;;  %1671 = vst [vmem:[%s4995_s7 + $0x16f8] sm:$0xff] %v1670_v31 }
 0x182   : > { %1673 = vst [vmem:[%s4995_s7 + $0x1700] sm:$0xff] %v1672_v32  ;;  %1675 = vst [vmem:[%s4995_s7 + $0x1708] sm:$0xff] %v1674_v33  ;;  %v1676_v34 = vld [vmem:[%s4987_s6 + $0x5c40] sm:$0xff]  ;;  %v1678_v35 = vld [vmem:[%s4987_s6 + $0x5c48] sm:$0xff] }
 0x183   : > { %v1680_v36 = vld [vmem:[%s4987_s6 + $0x5c80] sm:$0xff]  ;;  %1677 = vst [vmem:[%s4995_s7 + $0x1710] sm:$0xff] %v1676_v34  ;;  %1679 = vst [vmem:[%s4995_s7 + $0x1718] sm:$0xff] %v1678_v35  ;;  %v1682_v37 = vld [vmem:[%s4987_s6 + $0x5c88] sm:$0xff] }
 0x184   : > { %1681 = vst [vmem:[%s4995_s7 + $0x1720] sm:$0xff] %v1680_v36  ;;  %v1684_v38 = vld [vmem:[%s4987_s6 + $0x5cc0] sm:$0xff]  ;;  %v1686_v39 = vld [vmem:[%s4987_s6 + $0x5cc8] sm:$0xff]  ;;  %1683 = vst [vmem:[%s4995_s7 + $0x1728] sm:$0xff] %v1682_v37 }
 0x185   : > { %1685 = vst [vmem:[%s4995_s7 + $0x1730] sm:$0xff] %v1684_v38  ;;  %1687 = vst [vmem:[%s4995_s7 + $0x1738] sm:$0xff] %v1686_v39  ;;  %v1688_v40 = vld [vmem:[%s4987_s6 + $0x5d00] sm:$0xff]  ;;  %v1690_v41 = vld [vmem:[%s4987_s6 + $0x5d08] sm:$0xff] }
 0x186   : > { %v1692_v42 = vld [vmem:[%s4987_s6 + $0x5d40] sm:$0xff]  ;;  %1689 = vst [vmem:[%s4995_s7 + $0x1740] sm:$0xff] %v1688_v40  ;;  %1691 = vst [vmem:[%s4995_s7 + $0x1748] sm:$0xff] %v1690_v41  ;;  %v1694_v43 = vld [vmem:[%s4987_s6 + $0x5d48] sm:$0xff] }
 0x187   : > { %1693 = vst [vmem:[%s4995_s7 + $0x1750] sm:$0xff] %v1692_v42  ;;  %v1696_v44 = vld [vmem:[%s4987_s6 + $0x5d80] sm:$0xff]  ;;  %v1698_v45 = vld [vmem:[%s4987_s6 + $0x5d88] sm:$0xff]  ;;  %1695 = vst [vmem:[%s4995_s7 + $0x1758] sm:$0xff] %v1694_v43 }
 0x188   : > { %1697 = vst [vmem:[%s4995_s7 + $0x1760] sm:$0xff] %v1696_v44  ;;  %1699 = vst [vmem:[%s4995_s7 + $0x1768] sm:$0xff] %v1698_v45  ;;  %v1700_v46 = vld [vmem:[%s4987_s6 + $0x5dc0] sm:$0xff]  ;;  %v1702_v47 = vld [vmem:[%s4987_s6 + $0x5dc8] sm:$0xff] }
 0x189   : > { %v1704_v48 = vld [vmem:[%s4987_s6 + $0x5e00] sm:$0xff]  ;;  %1701 = vst [vmem:[%s4995_s7 + $0x1770] sm:$0xff] %v1700_v46  ;;  %1703 = vst [vmem:[%s4995_s7 + $0x1778] sm:$0xff] %v1702_v47  ;;  %v1706_v49 = vld [vmem:[%s4987_s6 + $0x5e08] sm:$0xff] }
 0x18a   : > { %1705 = vst [vmem:[%s4995_s7 + $0x1780] sm:$0xff] %v1704_v48  ;;  %v1708_v50 = vld [vmem:[%s4987_s6 + $0x5e40] sm:$0xff]  ;;  %v1710_v51 = vld [vmem:[%s4987_s6 + $0x5e48] sm:$0xff]  ;;  %1707 = vst [vmem:[%s4995_s7 + $0x1788] sm:$0xff] %v1706_v49 }
 0x18b   : > { %1709 = vst [vmem:[%s4995_s7 + $0x1790] sm:$0xff] %v1708_v50  ;;  %1711 = vst [vmem:[%s4995_s7 + $0x1798] sm:$0xff] %v1710_v51  ;;  %v1712_v52 = vld [vmem:[%s4987_s6 + $0x5e80] sm:$0xff]  ;;  %v1714_v53 = vld [vmem:[%s4987_s6 + $0x5e88] sm:$0xff] }
 0x18c   : > { %v1716_v54 = vld [vmem:[%s4987_s6 + $0x5ec0] sm:$0xff]  ;;  %1713 = vst [vmem:[%s4995_s7 + $0x17a0] sm:$0xff] %v1712_v52  ;;  %1715 = vst [vmem:[%s4995_s7 + $0x17a8] sm:$0xff] %v1714_v53  ;;  %v1718_v55 = vld [vmem:[%s4987_s6 + $0x5ec8] sm:$0xff] }
 0x18d   : > { %1717 = vst [vmem:[%s4995_s7 + $0x17b0] sm:$0xff] %v1716_v54  ;;  %v1720_v56 = vld [vmem:[%s4987_s6 + $0x5f00] sm:$0xff]  ;;  %v1722_v57 = vld [vmem:[%s4987_s6 + $0x5f08] sm:$0xff]  ;;  %1719 = vst [vmem:[%s4995_s7 + $0x17b8] sm:$0xff] %v1718_v55 }
 0x18e   : > { %1721 = vst [vmem:[%s4995_s7 + $0x17c0] sm:$0xff] %v1720_v56  ;;  %1723 = vst [vmem:[%s4995_s7 + $0x17c8] sm:$0xff] %v1722_v57  ;;  %v1724_v58 = vld [vmem:[%s4987_s6 + $0x5f40] sm:$0xff]  ;;  %v1726_v59 = vld [vmem:[%s4987_s6 + $0x5f48] sm:$0xff] }
 0x18f   : > { %v1728_v60 = vld [vmem:[%s4987_s6 + $0x5f80] sm:$0xff]  ;;  %1725 = vst [vmem:[%s4995_s7 + $0x17d0] sm:$0xff] %v1724_v58  ;;  %1727 = vst [vmem:[%s4995_s7 + $0x17d8] sm:$0xff] %v1726_v59  ;;  %v1730_v61 = vld [vmem:[%s4987_s6 + $0x5f88] sm:$0xff] }
 0x190   : > { %1729 = vst [vmem:[%s4995_s7 + $0x17e0] sm:$0xff] %v1728_v60  ;;  %v1732_v62 = vld [vmem:[%s4987_s6 + $0x5fc0] sm:$0xff]  ;;  %v1734_v63 = vld [vmem:[%s4987_s6 + $0x5fc8] sm:$0xff]  ;;  %1731 = vst [vmem:[%s4995_s7 + $0x17e8] sm:$0xff] %v1730_v61 }
 0x191   : > { %1733 = vst [vmem:[%s4995_s7 + $0x17f0] sm:$0xff] %v1732_v62  ;;  %1735 = vst [vmem:[%s4995_s7 + $0x17f8] sm:$0xff] %v1734_v63  ;;  %v1736_v0 = vld [vmem:[%s4987_s6 + $0x6000] sm:$0xff]  ;;  %v1738_v1 = vld [vmem:[%s4987_s6 + $0x6008] sm:$0xff] }
 0x192   : > { %v1740_v2 = vld [vmem:[%s4987_s6 + $0x6040] sm:$0xff]  ;;  %1737 = vst [vmem:[%s4995_s7 + $0x1800] sm:$0xff] %v1736_v0  ;;  %1739 = vst [vmem:[%s4995_s7 + $0x1808] sm:$0xff] %v1738_v1  ;;  %v1742_v3 = vld [vmem:[%s4987_s6 + $0x6048] sm:$0xff] }
 0x193   : > { %1741 = vst [vmem:[%s4995_s7 + $0x1810] sm:$0xff] %v1740_v2  ;;  %v1744_v4 = vld [vmem:[%s4987_s6 + $0x6080] sm:$0xff]  ;;  %v1746_v5 = vld [vmem:[%s4987_s6 + $0x6088] sm:$0xff]  ;;  %1743 = vst [vmem:[%s4995_s7 + $0x1818] sm:$0xff] %v1742_v3 }
 0x194   : > { %1745 = vst [vmem:[%s4995_s7 + $0x1820] sm:$0xff] %v1744_v4  ;;  %1747 = vst [vmem:[%s4995_s7 + $0x1828] sm:$0xff] %v1746_v5  ;;  %v1748_v6 = vld [vmem:[%s4987_s6 + $0x60c0] sm:$0xff]  ;;  %v1750_v7 = vld [vmem:[%s4987_s6 + $0x60c8] sm:$0xff] }
 0x195   : > { %v1752_v8 = vld [vmem:[%s4987_s6 + $0x6100] sm:$0xff]  ;;  %1749 = vst [vmem:[%s4995_s7 + $0x1830] sm:$0xff] %v1748_v6  ;;  %1751 = vst [vmem:[%s4995_s7 + $0x1838] sm:$0xff] %v1750_v7  ;;  %v1754_v9 = vld [vmem:[%s4987_s6 + $0x6108] sm:$0xff] }
 0x196   : > { %1753 = vst [vmem:[%s4995_s7 + $0x1840] sm:$0xff] %v1752_v8  ;;  %v1756_v10 = vld [vmem:[%s4987_s6 + $0x6140] sm:$0xff]  ;;  %v1758_v11 = vld [vmem:[%s4987_s6 + $0x6148] sm:$0xff]  ;;  %1755 = vst [vmem:[%s4995_s7 + $0x1848] sm:$0xff] %v1754_v9 }
 0x197   : > { %1757 = vst [vmem:[%s4995_s7 + $0x1850] sm:$0xff] %v1756_v10  ;;  %1759 = vst [vmem:[%s4995_s7 + $0x1858] sm:$0xff] %v1758_v11  ;;  %v1760_v12 = vld [vmem:[%s4987_s6 + $0x6180] sm:$0xff]  ;;  %v1762_v13 = vld [vmem:[%s4987_s6 + $0x6188] sm:$0xff] }
 0x198   : > { %v1764_v14 = vld [vmem:[%s4987_s6 + $0x61c0] sm:$0xff]  ;;  %1761 = vst [vmem:[%s4995_s7 + $0x1860] sm:$0xff] %v1760_v12  ;;  %1763 = vst [vmem:[%s4995_s7 + $0x1868] sm:$0xff] %v1762_v13  ;;  %v1766_v15 = vld [vmem:[%s4987_s6 + $0x61c8] sm:$0xff] }
 0x199   : > { %1765 = vst [vmem:[%s4995_s7 + $0x1870] sm:$0xff] %v1764_v14  ;;  %1767 = vst [vmem:[%s4995_s7 + $0x1878] sm:$0xff] %v1766_v15 }
 0x19a PF: > { %p3927_p5 = scmp.ge.s32.totalorder %s4914_s20, 1  ;;  %p1789_p6 = scmp.lt.s32.totalorder %s4914_s20, 5 }
 0x19c   : > { %p1790_p7 = pnand %p3927_p5, %p1789_p6 }
 0x19d   : > { %s1796_s8 = sand.u32 (!%p1790_p7), 1, %s4906_s18   ;;  %s3928_s9 = sshll.u32 (!%p1790_p7), %s4967_s21, 1 }
 0x19e   : > { %1793 = sbr.rel (%p1790_p7) target bundleno = 1460 (0x5b4), region = 59  ;;  %p1829_p8 = scmp.lt.s32.totalorder (!%p1790_p7), %s3928_s9, 7 }
 0x19f   : > { %s4819_s10 = smul.u32 (!%p1790_p7), 6272, %s1796_s8  ;;  %s3929_s11 = sshll.u32 (!%p1790_p7), %s4967_s21, 5 }
 0x1a0   : > { %p1834_p9 = scmp.lt.s32.totalorder (!%p1790_p7), %s3929_s11, 127  ;;  %p3931_p10 = scmp.ne.s32.totalorder (!%p1790_p7), %s4967_s21, 0 }
 0x1a1   : > { %s6575_s18 = scalar_lea.vmem (!%p1790_p7), [#allocation3], %s4819_s10 }
 0x1a5   : > { %s7576_s9 = smov (!%p1829_p8, %s3928_s9), 7  ;;  %s7578_s11 = smov (!%p1834_p9, %s3929_s11), 127 }
 0x1a6   : > { %s1831_s14 = scalar_lea.vmem %s7568_s2, %s7576_s9  ;;  %s3930_s15 = sshll.u32 %s7578_s11, 3  ;;  %vm1843_vm0 = vcmask (!%p3931_p10), 50176   ;;  %v4916_v16 = vmov (!%p3931_p10), 0.0  }
 0x1a7   : > { %s6573_s20 = scalar_lea.vmem %s7569_s3, %s3930_s15  ;;  %1842 = sbr.rel (%p3931_p10) target bundleno = 430 (0x1ae), region = 67  ;;  %1844 = vst.msk [vmem:[#allocation2] sm:$0x3] (!%p3931_p10), %vm1843_vm0, %v4916_v16 }
 0x1ae PF: > { %v1853_v17 = vld [vmem:[%s6575_s18 + $0x8] sm:$0xff]  ;;  %v1855_v18 = vld [vmem:[%s6575_s18 + $0x18] sm:$0xff]  ;;  %v1852_v22 = vld [vmem:[%s6575_s18] sm:$0xff]  ;;  %vm2788_vm1 = vcmask 523264   ;;  %vm3820_vm2 = vcmask 50176   ;;  %p3934_p11 = scmp.ne.s32.totalorder %s4967_s21, 3 }
 0x1af   : > { %v2237_v19 = vld [vmem:[%s6575_s18 + $0xc08] sm:$0xff]  ;;  %v3976_v20 = vpack.c.bf16 %v1855_v18, %v1853_v17  ;;  %v2239_v21 = vld [vmem:[%s6575_s18 + $0xc18] sm:$0xff]  ;;  %v1854_v23 = vld [vmem:[%s6575_s18 + $0x10] sm:$0xff]  ;;  %vm3841_vm3 = vcmask (!%p3934_p11), 41984  }
 0x1b0   : > { %v4360_v24 = vpack.c.bf16 %v2239_v21, %v2237_v19  ;;  %v3978_v25 = vpack.c.bf16 %v1854_v23, %v1852_v22  ;;  %v2236_v26 = vld [vmem:[%s6575_s18 + $0xc00] sm:$0xff]  ;;  %v2238_v27 = vld [vmem:[%s6575_s18 + $0xc10] sm:$0xff]  ;;  %v1857_v28 = vld [vmem:[%s6575_s18 + $0x28] sm:$0xff] }
 0x1b1   : > { %3977 = vmatprep.subr.bf16.mxu1 %v3976_v20  ;;  %v4362_v29 = vpack.c.bf16 %v2238_v27, %v2236_v26  ;;  %v1859_v30 = vld [vmem:[%s6575_s18 + $0x38] sm:$0xff]  ;;  %v2241_v31 = vld [vmem:[%s6575_s18 + $0xc28] sm:$0xff]  ;;  %v1856_v35 = vld [vmem:[%s6575_s18 + $0x20] sm:$0xff] }
 0x1b2   : > { %v2243_v32 = vld [vmem:[%s6575_s18 + $0xc38] sm:$0xff]  ;;  %4361 = vmatprep.subr.bf16.mxu0 %v4360_v24  ;;  %3979 = vmatpush1.bf16.msra.mxu1 %v3978_v25  ;;  %v3980_v33 = vpack.c.bf16 %v1859_v30, %v1857_v28  ;;  %v1858_v36 = vld [vmem:[%s6575_s18 + $0x30] sm:$0xff]  ;;  %v2240_v37 = vld [vmem:[%s6575_s18 + $0xc20] sm:$0xff] }
 0x1b3   : > { %v4364_v34 = vpack.c.bf16 %v2243_v32, %v2241_v31  ;;  %4363 = vmatpush1.bf16.msra.mxu0 %v4362_v29  ;;  %v3982_v38 = vpack.c.bf16 %v1858_v36, %v1856_v35  ;;  %v2242_v39 = vld [vmem:[%s6575_s18 + $0xc30] sm:$0xff]  ;;  %v1861_v40 = vld [vmem:[%s6575_s18 + $0x48] sm:$0xff]  ;;  %v1863_v41 = vld [vmem:[%s6575_s18 + $0x58] sm:$0xff] }
 0x1b4   : > { %3981 = vmatprep.subr.bf16.mxu1 %v3980_v33  ;;  %v4366_v42 = vpack.c.bf16 %v2242_v39, %v2240_v37  ;;  %v3984_v43 = vpack.c.bf16 %v1863_v41, %v1861_v40  ;;  %v2245_v44 = vld [vmem:[%s6575_s18 + $0xc48] sm:$0xff]  ;;  %v2247_v45 = vld [vmem:[%s6575_s18 + $0xc58] sm:$0xff]  ;;  %v1860_v46 = vld [vmem:[%s6575_s18 + $0x40] sm:$0xff] }
 0x1b5   : > { %4365 = vmatprep.subr.bf16.mxu0 %v4364_v34  ;;  %v4368_v47 = vpack.c.bf16 %v2247_v45, %v2245_v44  ;;  %v1862_v48 = vld [vmem:[%s6575_s18 + $0x50] sm:$0xff]  ;;  %v2244_v49 = vld [vmem:[%s6575_s18 + $0xc40] sm:$0xff]  ;;  %v1865_v52 = vld [vmem:[%s6575_s18 + $0x68] sm:$0xff] }
 0x1b6   : > { %v2246_v50 = vld [vmem:[%s6575_s18 + $0xc50] sm:$0xff]  ;;  %3983 = vmatpush1.bf16.msra.mxu1 %v3982_v38  ;;  %v3986_v51 = vpack.c.bf16 %v1862_v48, %v1860_v46  ;;  %v1867_v53 = vld [vmem:[%s6575_s18 + $0x78] sm:$0xff]  ;;  %v2249_v54 = vld [vmem:[%s6575_s18 + $0xc68] sm:$0xff] }
 0x1b7   : > { %4367 = vmatpush1.bf16.msra.mxu0 %v4366_v42  ;;  %3985 = vmatprep.subr.bf16.mxu1 %v3984_v43  ;;  %v4370_v55 = vpack.c.bf16 %v2246_v50, %v2244_v49  ;;  %v3988_v56 = vpack.c.bf16 %v1867_v53, %v1865_v52  ;;  %v2251_v57 = vld [vmem:[%s6575_s18 + $0xc78] sm:$0xff]  ;;  %v1864_v58 = vld [vmem:[%s6575_s18 + $0x60] sm:$0xff]  ;;  %v1866_v59 = vld [vmem:[%s6575_s18 + $0x70] sm:$0xff] }
 0x1b8   : > { %4369 = vmatprep.subr.bf16.mxu0 %v4368_v47  ;;  %v4372_v60 = vpack.c.bf16 %v2251_v57, %v2249_v54  ;;  %v2248_v61 = vld [vmem:[%s6575_s18 + $0xc60] sm:$0xff]  ;;  %v2250_v62 = vld [vmem:[%s6575_s18 + $0xc70] sm:$0xff]  ;;  %v1869_v63 = vld [vmem:[%s6575_s18 + $0x88] sm:$0xff]  ;;  %v3990_v3 = vpack.c.bf16 %v1866_v59, %v1864_v58 }
 0x1b9   : > { %v1871_v0 = vld [vmem:[%s6575_s18 + $0x98] sm:$0xff]  ;;  %v2253_v1 = vld [vmem:[%s6575_s18 + $0xc88] sm:$0xff]  ;;  %v4374_v4 = vpack.c.bf16 %v2250_v62, %v2248_v61  ;;  %v1868_v6 = vld [vmem:[%s6575_s18 + $0x80] sm:$0xff] }
 0x1ba   : > { %v2255_v2 = vld [vmem:[%s6575_s18 + $0xc98] sm:$0xff]  ;;  %3987 = vmatpush1.bf16.msra.mxu1 %v3986_v51  ;;  %v3992_v5 = vpack.c.bf16 %v1871_v0, %v1869_v63  ;;  %v1870_v7 = vld [vmem:[%s6575_s18 + $0x90] sm:$0xff]  ;;  %v2252_v8 = vld [vmem:[%s6575_s18 + $0xc80] sm:$0xff]  ;;  %v2638_v63 = vlaneseq  ;;  %v4917_v0 = vmov 1983009808  }
 0x1bb   : > { %4371 = vmatpush1.bf16.msra.mxu0 %v4370_v55  ;;  %3989 = vmatprep.subr.bf16.mxu1 %v3988_v56  ;;  %v4376_v9 = vpack.c.bf16 %v2255_v2, %v2253_v1  ;;  %v2254_v10 = vld [vmem:[%s6575_s18 + $0xc90] sm:$0xff]  ;;  %v1873_v11 = vld [vmem:[%s6575_s18 + $0xa8] sm:$0xff]  ;;  %v1875_v12 = vld [vmem:[%s6575_s18 + $0xb8] sm:$0xff]  ;;  %v3994_v15 = vpack.c.bf16 %v1870_v7, %v1868_v6  ;;  %v2657_v1 = vunpack.c.l.s4 %v4917_v0 }
 0x1bc   : > { %4373 = vmatprep.subr.bf16.mxu0 %v4372_v60  ;;  %v2257_v13 = vld [vmem:[%s6575_s18 + $0xca8] sm:$0xff]  ;;  %v2259_v14 = vld [vmem:[%s6575_s18 + $0xcb8] sm:$0xff]  ;;  %v4378_v16 = vpack.c.bf16 %v2254_v10, %v2252_v8  ;;  %v3996_v17 = vpack.c.bf16 %v1875_v12, %v1873_v11  ;;  %v1872_v18 = vld [vmem:[%s6575_s18 + $0xa0] sm:$0xff] }
 0x1bd   : > { %v1874_v19 = vld [vmem:[%s6575_s18 + $0xb0] sm:$0xff]  ;;  %v2256_v20 = vld [vmem:[%s6575_s18 + $0xca0] sm:$0xff]  ;;  %v4380_v21 = vpack.c.bf16 %v2259_v14, %v2257_v13  ;;  %v1877_v23 = vld [vmem:[%s6575_s18 + $0xc8] sm:$0xff]  ;;  %v6662_v14 = vshrl.u32 %v2638_v63, 7 }
 0x1be   : > { %3991 = vmatpush1.bf16.msra.mxu1 %v3990_v3  ;;  %v2258_v22 = vld [vmem:[%s6575_s18 + $0xcb0] sm:$0xff]  ;;  %v1879_v24 = vld [vmem:[%s6575_s18 + $0xd8] sm:$0xff]  ;;  %v2261_v25 = vld [vmem:[%s6575_s18 + $0xcc8] sm:$0xff]  ;;  %v3998_v27 = vpack.c.bf16 %v1874_v19, %v1872_v18 }
 0x1bf   : > { %4375 = vmatpush1.bf16.msra.mxu0 %v4374_v4  ;;  %3993 = vmatprep.subr.bf16.mxu1 %v3992_v5  ;;  %v2263_v26 = vld [vmem:[%s6575_s18 + $0xcd8] sm:$0xff]  ;;  %v4382_v28 = vpack.c.bf16 %v2258_v22, %v2256_v20  ;;  %v4000_v29 = vpack.c.bf16 %v1879_v24, %v1877_v23  ;;  %v1876_v30 = vld [vmem:[%s6575_s18 + $0xc0] sm:$0xff]  ;;  %v1878_v31 = vld [vmem:[%s6575_s18 + $0xd0] sm:$0xff] }
 0x1c0   : > { %4377 = vmatprep.subr.bf16.mxu0 %v4376_v9  ;;  %v2260_v32 = vld [vmem:[%s6575_s18 + $0xcc0] sm:$0xff]  ;;  %v4384_v33 = vpack.c.bf16 %v2263_v26, %v2261_v25  ;;  %v2262_v34 = vld [vmem:[%s6575_s18 + $0xcd0] sm:$0xff]  ;;  %v1881_v35 = vld [vmem:[%s6575_s18 + $0xe8] sm:$0xff]  ;;  %v4002_v39 = vpack.c.bf16 %v1878_v31, %v1876_v30 }
 0x1c1   : > { %v1883_v36 = vld [vmem:[%s6575_s18 + $0xf8] sm:$0xff]  ;;  %v2265_v37 = vld [vmem:[%s6575_s18 + $0xce8] sm:$0xff]  ;;  %v4386_v40 = vpack.c.bf16 %v2262_v34, %v2260_v32  ;;  %v1880_v42 = vld [vmem:[%s6575_s18 + $0xe0] sm:$0xff] }
 0x1c2   : > { %3995 = vmatpush1.bf16.msra.mxu1 %v3994_v15  ;;  %v2267_v38 = vld [vmem:[%s6575_s18 + $0xcf8] sm:$0xff]  ;;  %v4004_v41 = vpack.c.bf16 %v1883_v36, %v1881_v35  ;;  %v1882_v43 = vld [vmem:[%s6575_s18 + $0xf0] sm:$0xff]  ;;  %v2264_v44 = vld [vmem:[%s6575_s18 + $0xce0] sm:$0xff]  ;;  %v2658_v15 = vunpack.c.0.s8 %v2657_v1 }
 0x1c3   : > { %4379 = vmatpush1.bf16.msra.mxu0 %v4378_v16  ;;  %3997 = vmatprep.subr.bf16.mxu1 %v3996_v17  ;;  %v4388_v45 = vpack.c.bf16 %v2267_v38, %v2265_v37  ;;  %v2266_v46 = vld [vmem:[%s6575_s18 + $0xcf0] sm:$0xff]  ;;  %v1885_v47 = vld [vmem:[%s6575_s18 + $0x108] sm:$0xff]  ;;  %v1887_v48 = vld [vmem:[%s6575_s18 + $0x118] sm:$0xff]  ;;  %v4006_v51 = vpack.c.bf16 %v1882_v43, %v1880_v42 }
 0x1c4   : > { %4381 = vmatprep.subr.bf16.mxu0 %v4380_v21  ;;  %v2269_v49 = vld [vmem:[%s6575_s18 + $0xd08] sm:$0xff]  ;;  %v2271_v50 = vld [vmem:[%s6575_s18 + $0xd18] sm:$0xff]  ;;  %v4390_v52 = vpack.c.bf16 %v2266_v46, %v2264_v44  ;;  %v4008_v53 = vpack.c.bf16 %v1887_v48, %v1885_v47  ;;  %v1884_v54 = vld [vmem:[%s6575_s18 + $0x100] sm:$0xff] }
 0x1c5   : > { %v1886_v55 = vld [vmem:[%s6575_s18 + $0x110] sm:$0xff]  ;;  %v2268_v56 = vld [vmem:[%s6575_s18 + $0xd00] sm:$0xff]  ;;  %v4392_v57 = vpack.c.bf16 %v2271_v50, %v2269_v49  ;;  %v1889_v59 = vld [vmem:[%s6575_s18 + $0x128] sm:$0xff] }
 0x1c6   : > { %3999 = vmatpush1.bf16.msra.mxu1 %v3998_v27  ;;  %v2270_v58 = vld [vmem:[%s6575_s18 + $0xd10] sm:$0xff]  ;;  %v1891_v60 = vld [vmem:[%s6575_s18 + $0x138] sm:$0xff]  ;;  %v2273_v61 = vld [vmem:[%s6575_s18 + $0xd28] sm:$0xff]  ;;  %v4010_v2 = vpack.c.bf16 %v1886_v55, %v1884_v54 }
 0x1c7   : > { %4383 = vmatpush1.bf16.msra.mxu0 %v4382_v28  ;;  %4001 = vmatprep.subr.bf16.mxu1 %v4000_v29  ;;  %v2275_v62 = vld [vmem:[%s6575_s18 + $0xd38] sm:$0xff]  ;;  %v4394_v3 = vpack.c.bf16 %v2270_v58, %v2268_v56  ;;  %v4012_v4 = vpack.c.bf16 %v1891_v60, %v1889_v59  ;;  %v1888_v5 = vld [vmem:[%s6575_s18 + $0x120] sm:$0xff]  ;;  %v1890_v6 = vld [vmem:[%s6575_s18 + $0x130] sm:$0xff]  ;;  %v6673_v28 = vsub.s32 %v2658_v15, %v6662_v14 }
 0x1c8   : > { %4385 = vmatprep.subr.bf16.mxu0 %v4384_v33  ;;  %v2272_v7 = vld [vmem:[%s6575_s18 + $0xd20] sm:$0xff]  ;;  %v4396_v8 = vpack.c.bf16 %v2275_v62, %v2273_v61  ;;  %v2274_v9 = vld [vmem:[%s6575_s18 + $0xd30] sm:$0xff]  ;;  %v1893_v10 = vld [vmem:[%s6575_s18 + $0x148] sm:$0xff]  ;;  %v4014_v16 = vpack.c.bf16 %v1890_v6, %v1888_v5 }
 0x1c9   : > { %v1895_v11 = vld [vmem:[%s6575_s18 + $0x158] sm:$0xff]  ;;  %v2277_v12 = vld [vmem:[%s6575_s18 + $0xd48] sm:$0xff]  ;;  %v4398_v17 = vpack.c.bf16 %v2274_v9, %v2272_v7  ;;  %v1892_v19 = vld [vmem:[%s6575_s18 + $0x140] sm:$0xff] }
 0x1ca   : > { %4003 = vmatpush1.bf16.msra.mxu1 %v4002_v39  ;;  %v2279_v13 = vld [vmem:[%s6575_s18 + $0xd58] sm:$0xff]  ;;  %v4016_v18 = vpack.c.bf16 %v1895_v11, %v1893_v10  ;;  %v1894_v20 = vld [vmem:[%s6575_s18 + $0x150] sm:$0xff]  ;;  %v2276_v21 = vld [vmem:[%s6575_s18 + $0xd40] sm:$0xff] }
 0x1cb   : > { %4387 = vmatpush1.bf16.msra.mxu0 %v4386_v40  ;;  %4005 = vmatprep.subr.bf16.mxu1 %v4004_v41  ;;  %v4400_v22 = vpack.c.bf16 %v2279_v13, %v2277_v12  ;;  %v2278_v23 = vld [vmem:[%s6575_s18 + $0xd50] sm:$0xff]  ;;  %v1897_v24 = vld [vmem:[%s6575_s18 + $0x168] sm:$0xff]  ;;  %v1899_v25 = vld [vmem:[%s6575_s18 + $0x178] sm:$0xff]  ;;  %v4018_v29 = vpack.c.bf16 %v1894_v20, %v1892_v19 }
 0x1cc   : > { %4389 = vmatprep.subr.bf16.mxu0 %v4388_v45  ;;  %v2281_v26 = vld [vmem:[%s6575_s18 + $0xd68] sm:$0xff]  ;;  %v2283_v27 = vld [vmem:[%s6575_s18 + $0xd78] sm:$0xff]  ;;  %v1896_v30 = vld [vmem:[%s6575_s18 + $0x160] sm:$0xff]  ;;  %v4402_v31 = vpack.c.bf16 %v2278_v23, %v2276_v21  ;;  %v4020_v32 = vpack.c.bf16 %v1899_v25, %v1897_v24 }
 0x1cd   : > { %v1898_v33 = vld [vmem:[%s6575_s18 + $0x170] sm:$0xff]  ;;  %v2280_v34 = vld [vmem:[%s6575_s18 + $0xd60] sm:$0xff]  ;;  %v4404_v36 = vpack.c.bf16 %v2283_v27, %v2281_v26  ;;  %v1901_v37 = vld [vmem:[%s6575_s18 + $0x188] sm:$0xff] }
 0x1ce   : > { %4007 = vmatpush1.bf16.msra.mxu1 %v4006_v51  ;;  %v2282_v35 = vld [vmem:[%s6575_s18 + $0xd70] sm:$0xff]  ;;  %v1903_v38 = vld [vmem:[%s6575_s18 + $0x198] sm:$0xff]  ;;  %v2285_v40 = vld [vmem:[%s6575_s18 + $0xd88] sm:$0xff]  ;;  %v4022_v44 = vpack.c.bf16 %v1898_v33, %v1896_v30 }
 0x1cf   : > { %4391 = vmatpush1.bf16.msra.mxu0 %v4390_v52  ;;  %4009 = vmatprep.subr.bf16.mxu1 %v4008_v53  ;;  %v6684_v39 = vld [vmem:[%s7566_s0] sm:$0xff]  ;;  %v6695_v43 = vld [vmem:[%s7566_s0 + $0x18] sm:$0xff]  ;;  %v4406_v46 = vpack.c.bf16 %v2282_v35, %v2280_v34  ;;  %v4024_v47 = vpack.c.bf16 %v1903_v38, %v1901_v37  ;;  %v1905_v54 = vld [vmem:[%s6575_s18 + $0x1a8] sm:$0xff] }
 0x1d0   : > { %4393 = vmatprep.subr.bf16.mxu0 %v4392_v57  ;;  %v2287_v41 = vld [vmem:[%s6575_s18 + $0xd98] sm:$0xff]  ;;  %v6690_v42 = vrot.slane %v6684_v39, %v6673_v28  ;;  %v6699_v45 = vrot.slane %v6695_v43, %v6673_v28  ;;  %v1900_v48 = vld [vmem:[%s6575_s18 + $0x180] sm:$0xff]  ;;  %v1902_v49 = vld [vmem:[%s6575_s18 + $0x190] sm:$0xff] }
 0x1d1   : > { %v2284_v50 = vld [vmem:[%s6575_s18 + $0xd80] sm:$0xff]  ;;  %v4408_v52 = vpack.c.bf16 %v2287_v41, %v2285_v40  ;;  %v2286_v53 = vld [vmem:[%s6575_s18 + $0xd90] sm:$0xff]  ;;  %v1907_v55 = vld [vmem:[%s6575_s18 + $0x1b8] sm:$0xff]  ;;  %v4026_v59 = vpack.c.bf16 %v1902_v49, %v1900_v48 }
 0x1d2   : > { %4011 = vmatpush1.bf16.msra.mxu1 %v4010_v2  ;;  %v2670_v51 = vcombine.high %v6690_v42, %v6690_v42  ;;  %v2721_v56 = vcombine.high %v6699_v45, %v6699_v45  ;;  %v2289_v57 = vld [vmem:[%s6575_s18 + $0xda8] sm:$0xff]  ;;  %v2291_v58 = vld [vmem:[%s6575_s18 + $0xdb8] sm:$0xff]  ;;  %v4410_v60 = vpack.c.bf16 %v2286_v53, %v2284_v50  ;;  %v4028_v61 = vpack.c.bf16 %v1907_v55, %v1905_v54  ;;  %v1904_v62 = vld [vmem:[%s6575_s18 + $0x1a0] sm:$0xff] }
 0x1d3   : > { %4395 = vmatpush1.bf16.msra.mxu0 %v4394_v3  ;;  %4013 = vmatprep.subr.bf16.mxu1 %v4012_v4  ;;  %v1906_v63 = vld [vmem:[%s6575_s18 + $0x1b0] sm:$0xff]  ;;  %v2288_v0 = vld [vmem:[%s6575_s18 + $0xda0] sm:$0xff]  ;;  %v4412_v1 = vpack.c.bf16 %v2291_v58, %v2289_v57  ;;  %v1909_v3 = vld [vmem:[%s6575_s18 + $0x1c8] sm:$0xff] }
 0x1d4   : > { %4397 = vmatprep.subr.bf16.mxu0 %v4396_v8  ;;  %2855 = vmatprep.mubr.f32.mxu1 %v2670_v51  ;;  %v2290_v2 = vld [vmem:[%s6575_s18 + $0xdb0] sm:$0xff]  ;;  %v1911_v4 = vld [vmem:[%s6575_s18 + $0x1d8] sm:$0xff]  ;;  %v2293_v5 = vld [vmem:[%s6575_s18 + $0xdc8] sm:$0xff]  ;;  %v4030_v7 = vpack.c.bf16 %v1906_v63, %v1904_v62 }
 0x1d5   : > { %3281 = vmatprep.mubr.f32.mxu0 %v2721_v56  ;;  %v2295_v6 = vld [vmem:[%s6575_s18 + $0xdd8] sm:$0xff]  ;;  %v4414_v8 = vpack.c.bf16 %v2290_v2, %v2288_v0  ;;  %v4032_v9 = vpack.c.bf16 %v1911_v4, %v1909_v3  ;;  %v1908_v10 = vld [vmem:[%s6575_s18 + $0x1c0] sm:$0xff]  ;;  %v1910_v11 = vld [vmem:[%s6575_s18 + $0x1d0] sm:$0xff] }
 0x1d6   : > { %4015 = vmatpush1.bf16.msra.mxu1 %v4014_v16  ;;  %v2292_v12 = vld [vmem:[%s6575_s18 + $0xdc0] sm:$0xff]  ;;  %v4416_v13 = vpack.c.bf16 %v2295_v6, %v2293_v5  ;;  %v2294_v15 = vld [vmem:[%s6575_s18 + $0xdd0] sm:$0xff]  ;;  %v1913_v16 = vld [vmem:[%s6575_s18 + $0x1e8] sm:$0xff]  ;;  %v4034_v20 = vpack.c.bf16 %v1910_v11, %v1908_v10 }
 0x1d7   : > { %4399 = vmatpush1.bf16.msra.mxu0 %v4398_v17  ;;  %4017 = vmatprep.subr.bf16.mxu1 %v4016_v18  ;;  %v1915_v17 = vld [vmem:[%s6575_s18 + $0x1f8] sm:$0xff]  ;;  %v2297_v18 = vld [vmem:[%s6575_s18 + $0xde8] sm:$0xff]  ;;  %v4418_v21 = vpack.c.bf16 %v2294_v15, %v2292_v12  ;;  %v1912_v23 = vld [vmem:[%s6575_s18 + $0x1e0] sm:$0xff] }
 0x1d8   : > { %4401 = vmatprep.subr.bf16.mxu0 %v4400_v22  ;;  %v2299_v19 = vld [vmem:[%s6575_s18 + $0xdf8] sm:$0xff]  ;;  %v4036_v22 = vpack.c.bf16 %v1915_v17, %v1913_v16  ;;  %v1914_v24 = vld [vmem:[%s6575_s18 + $0x1f0] sm:$0xff]  ;;  %v2296_v25 = vld [vmem:[%s6575_s18 + $0xde0] sm:$0xff] }
 0x1d9   : > { %v4420_v26 = vpack.c.bf16 %v2299_v19, %v2297_v18  ;;  %v2298_v27 = vld [vmem:[%s6575_s18 + $0xdf0] sm:$0xff]  ;;  %v1917_v30 = vld [vmem:[%s6575_s18 + $0x208] sm:$0xff]  ;;  %v2303_v34 = vld [vmem:[%s6575_s18 + $0xe18] sm:$0xff]  ;;  %v4038_v35 = vpack.c.bf16 %v1914_v24, %v1912_v23 }
 0x1da   : > { %4019 = vmatpush1.bf16.msra.mxu1 %v4018_v29  ;;  %v2655_v29 = vcombine.high %v6684_v39, %v6684_v39  ;;  %v2301_v33 = vld [vmem:[%s6575_s18 + $0xe08] sm:$0xff]  ;;  %v1916_v38 = vld [vmem:[%s6575_s18 + $0x200] sm:$0xff]  ;;  %v1918_v39 = vld [vmem:[%s6575_s18 + $0x210] sm:$0xff] }
 0x1db   : > { %4403 = vmatpush1.bf16.msra.mxu0 %v4402_v31  ;;  %4021 = vmatprep.subr.bf16.mxu1 %v4020_v32  ;;  %v1919_v31 = vld [vmem:[%s6575_s18 + $0x218] sm:$0xff]  ;;  %v2706_v32 = vcombine.high %v6695_v43, %v6695_v43  ;;  %v2300_v40 = vld [vmem:[%s6575_s18 + $0xe00] sm:$0xff]  ;;  %v4424_v41 = vpack.c.bf16 %v2303_v34, %v2301_v33  ;;  %v2302_v43 = vld [vmem:[%s6575_s18 + $0xe10] sm:$0xff]  ;;  %v4042_v51 = vpack.c.bf16 %v1918_v39, %v1916_v38 }
 0x1dc   : > { %4405 = vmatprep.subr.bf16.mxu0 %v4404_v36  ;;  %v4422_v36 = vpack.c.bf16 %v2298_v27, %v2296_v25  ;;  %v4040_v37 = vpack.c.bf16 %v1919_v31, %v1917_v30  ;;  %v2305_v48 = vld [vmem:[%s6575_s18 + $0xe28] sm:$0xff]  ;;  %v2307_v49 = vld [vmem:[%s6575_s18 + $0xe38] sm:$0xff]  ;;  %v1920_v54 = vld [vmem:[%s6575_s18 + $0x220] sm:$0xff] }
 0x1dd   : > { %v6753_v50 = vrot.slane %v2706_v32, %v6673_v28  ;;  %v1922_v55 = vld [vmem:[%s6575_s18 + $0x230] sm:$0xff]  ;;  %v2304_v56 = vld [vmem:[%s6575_s18 + $0xe20] sm:$0xff]  ;;  %v4428_v57 = vpack.c.bf16 %v2307_v49, %v2305_v48  ;;  %v2309_v62 = vld [vmem:[%s6575_s18 + $0xe48] sm:$0xff] }
 0x1de   : > { %4023 = vmatpush1.bf16.msra.mxu1 %v4022_v44  ;;  %v1921_v44 = vld [vmem:[%s6575_s18 + $0x228] sm:$0xff]  ;;  %v2306_v58 = vld [vmem:[%s6575_s18 + $0xe30] sm:$0xff]  ;;  %v2311_v63 = vld [vmem:[%s6575_s18 + $0xe58] sm:$0xff] }
 0x1df   : > { %4407 = vmatpush1.bf16.msra.mxu0 %v4406_v46  ;;  %4025 = vmatprep.subr.bf16.mxu1 %v4024_v47  ;;  %v1923_v46 = vld [vmem:[%s6575_s18 + $0x238] sm:$0xff]  ;;  %v6748_v47 = vrot.slane %v2655_v29, %v6673_v28  ;;  %v2722_v0 = vcombine.high %v6753_v50, %v6753_v50  ;;  %v4430_v2 = vpack.c.bf16 %v2306_v58, %v2304_v56  ;;  %v1924_v4 = vld [vmem:[%s6575_s18 + $0x240] sm:$0xff]  ;;  %v1930_v16 = vld [vmem:[%s6575_s18 + $0x270] sm:$0xff] }
 0x1e0   : > { %4409 = vmatprep.subr.bf16.mxu0 %v4408_v52  ;;  %v4426_v52 = vpack.c.bf16 %v2302_v43, %v2300_v40  ;;  %v4044_v53 = vpack.c.bf16 %v1923_v46, %v1921_v44  ;;  %v2308_v5 = vld [vmem:[%s6575_s18 + $0xe40] sm:$0xff]  ;;  %v4432_v6 = vpack.c.bf16 %v2311_v63, %v2309_v62  ;;  %v2315_v10 = vld [vmem:[%s6575_s18 + $0xe78] sm:$0xff]  ;;  %v2314_v19 = vld [vmem:[%s6575_s18 + $0xe70] sm:$0xff] }
 0x1e1   : > { %v1928_v15 = vld [vmem:[%s6575_s18 + $0x260] sm:$0xff]  ;;  %v2319_v23 = vld [vmem:[%s6575_s18 + $0xe98] sm:$0xff]  ;;  %v1934_v29 = vld [vmem:[%s6575_s18 + $0x290] sm:$0xff] }
 0x1e2   : > { %4027 = vmatpush1.bf16.msra.mxu1 %v4026_v59  ;;  %v1925_v59 = vld [vmem:[%s6575_s18 + $0x248] sm:$0xff]  ;;  %v2312_v17 = vld [vmem:[%s6575_s18 + $0xe60] sm:$0xff]  ;;  %v4054_v24 = vpack.c.bf16 %v1930_v16, %v1928_v15  ;;  %v2318_v32 = vld [vmem:[%s6575_s18 + $0xe90] sm:$0xff] }
 0x1e3   : > { %4411 = vmatpush1.bf16.msra.mxu0 %v4410_v60  ;;  %4029 = vmatprep.subr.bf16.mxu1 %v4028_v61  ;;  %v1927_v60 = vld [vmem:[%s6575_s18 + $0x258] sm:$0xff]  ;;  %v2671_v61 = vcombine.high %v6748_v47, %v6748_v47  ;;  %v4438_v25 = vpack.c.bf16 %v2314_v19, %v2312_v17  ;;  %v1932_v27 = vld [vmem:[%s6575_s18 + $0x280] sm:$0xff]  ;;  %v1937_v33 = vld [vmem:[%s6575_s18 + $0x2a8] sm:$0xff] }
 0x1e4   : > { %4413 = vmatprep.subr.bf16.mxu0 %v4412_v1  ;;  %v4046_v1 = vpack.c.bf16 %v1922_v55, %v1920_v54  ;;  %v4048_v3 = vpack.c.bf16 %v1927_v60, %v1925_v59  ;;  %v2316_v30 = vld [vmem:[%s6575_s18 + $0xe80] sm:$0xff]  ;;  %v1939_v34 = vld [vmem:[%s6575_s18 + $0x2b8] sm:$0xff]  ;;  %v2322_v46 = vld [vmem:[%s6575_s18 + $0xeb0] sm:$0xff] }
 0x1e5   : > { %v4442_v38 = vpack.c.bf16 %v2318_v32, %v2316_v30  ;;  %v4060_v39 = vpack.c.bf16 %v1939_v34, %v1937_v33  ;;  %v1936_v40 = vld [vmem:[%s6575_s18 + $0x2a0] sm:$0xff]  ;;  %v1941_v48 = vld [vmem:[%s6575_s18 + $0x2c8] sm:$0xff]  ;;  %v1943_v49 = vld [vmem:[%s6575_s18 + $0x2d8] sm:$0xff] }
 0x1e6   : > { %4031 = vmatpush1.bf16.msra.mxu1 %v4030_v7  ;;  %v2310_v7 = vld [vmem:[%s6575_s18 + $0xe50] sm:$0xff]  ;;  %v2320_v43 = vld [vmem:[%s6575_s18 + $0xea0] sm:$0xff]  ;;  %v4064_v55 = vpack.c.bf16 %v1943_v49, %v1941_v48  ;;  %v1947_v62 = vld [vmem:[%s6575_s18 + $0x2f8] sm:$0xff] }
 0x1e7   : > { %4415 = vmatpush1.bf16.msra.mxu0 %v4414_v8  ;;  %4033 = vmatprep.subr.bf16.mxu1 %v4032_v9  ;;  %v1929_v8 = vld [vmem:[%s6575_s18 + $0x268] sm:$0xff]  ;;  %v1931_v9 = vld [vmem:[%s6575_s18 + $0x278] sm:$0xff]  ;;  %v4434_v12 = vpack.c.bf16 %v2310_v7, %v2308_v5  ;;  %v4446_v54 = vpack.c.bf16 %v2322_v46, %v2320_v43  ;;  %v1940_v56 = vld [vmem:[%s6575_s18 + $0x2c0] sm:$0xff] }
 0x1e8   : > { %4417 = vmatprep.subr.bf16.mxu0 %v4416_v13  ;;  %v4052_v13 = vpack.c.bf16 %v1931_v9, %v1929_v8  ;;  %v2324_v58 = vld [vmem:[%s6575_s18 + $0xec0] sm:$0xff]  ;;  %v2326_v60 = vld [vmem:[%s6575_s18 + $0xed0] sm:$0xff]  ;;  %v2329_v63 = vld [vmem:[%s6575_s18 + $0xee8] sm:$0xff] }
 0x1e9   : > { %v2328_v5 = vld [vmem:[%s6575_s18 + $0xee0] sm:$0xff]  ;;  %v2330_v7 = vld [vmem:[%s6575_s18 + $0xef0] sm:$0xff]  ;;  %v1949_v8 = vld [vmem:[%s6575_s18 + $0x308] sm:$0xff] }
 0x1ea   : > { %4035 = vmatpush1.bf16.msra.mxu1 %v4034_v20  ;;  %v1933_v20 = vld [vmem:[%s6575_s18 + $0x288] sm:$0xff]  ;;  %v1951_v9 = vld [vmem:[%s6575_s18 + $0x318] sm:$0xff]  ;;  %v1948_v15 = vld [vmem:[%s6575_s18 + $0x300] sm:$0xff] }
 0x1eb   : > { %4419 = vmatpush1.bf16.msra.mxu0 %v4418_v21  ;;  %4037 = vmatprep.subr.bf16.mxu1 %v4036_v22  ;;  %v1935_v21 = vld [vmem:[%s6575_s18 + $0x298] sm:$0xff]  ;;  %v2317_v22 = vld [vmem:[%s6575_s18 + $0xe88] sm:$0xff]  ;;  %v1950_v16 = vld [vmem:[%s6575_s18 + $0x310] sm:$0xff] }
 0x1ec   : > { %4421 = vmatprep.subr.bf16.mxu0 %v4420_v26  ;;  %v4056_v26 = vpack.c.bf16 %v1935_v21, %v1933_v20  ;;  %v4440_v31 = vpack.c.bf16 %v2319_v23, %v2317_v22  ;;  %v2332_v17 = vld [vmem:[%s6575_s18 + $0xf00] sm:$0xff]  ;;  %v2334_v19 = vld [vmem:[%s6575_s18 + $0xf10] sm:$0xff]  ;;  %v1953_v20 = vld [vmem:[%s6575_s18 + $0x328] sm:$0xff] }
 0x1ed   : > { %v1955_v21 = vld [vmem:[%s6575_s18 + $0x338] sm:$0xff]  ;;  %v2337_v22 = vld [vmem:[%s6575_s18 + $0xf28] sm:$0xff]  ;;  %v2336_v30 = vld [vmem:[%s6575_s18 + $0xf20] sm:$0xff] }
 0x1ee   : > { %4039 = vmatpush1.bf16.msra.mxu1 %v4038_v35  ;;  %v2321_v35 = vld [vmem:[%s6575_s18 + $0xea8] sm:$0xff]  ;;  %v2339_v23 = vld [vmem:[%s6575_s18 + $0xf38] sm:$0xff]  ;;  %v2338_v32 = vld [vmem:[%s6575_s18 + $0xf30] sm:$0xff] }
 0x1ef   : > { %4423 = vmatpush1.bf16.msra.mxu0 %v4422_v36  ;;  %4041 = vmatprep.subr.bf16.mxu1 %v4040_v37  ;;  %v2323_v36 = vld [vmem:[%s6575_s18 + $0xeb8] sm:$0xff]  ;;  %v4058_v37 = vpack.c.bf16 %v1934_v29, %v1932_v27  ;;  %v1952_v27 = vld [vmem:[%s6575_s18 + $0x320] sm:$0xff]  ;;  %v1954_v29 = vld [vmem:[%s6575_s18 + $0x330] sm:$0xff] }
 0x1f0   : > { %4425 = vmatprep.subr.bf16.mxu0 %v4424_v41  ;;  %v1938_v41 = vld [vmem:[%s6575_s18 + $0x2b0] sm:$0xff]  ;;  %v4444_v44 = vpack.c.bf16 %v2323_v36, %v2321_v35  ;;  %v1957_v33 = vld [vmem:[%s6575_s18 + $0x348] sm:$0xff]  ;;  %v1959_v34 = vld [vmem:[%s6575_s18 + $0x358] sm:$0xff] }
 0x1f1   : > { %2856 = vmatmul.mubr.f32.vlgmr.msra.gmra.mrb[0].mxu1 %v6690_v42  ;;  %v1926_v42 = vld [vmem:[%s6575_s18 + $0x250] sm:$0xff]  ;;  %v2341_v35 = vld [vmem:[%s6575_s18 + $0xf48] sm:$0xff]  ;;  %v2343_v36 = vld [vmem:[%s6575_s18 + $0xf58] sm:$0xff] }
 0x1f2   : > { %4043 = vmatpush1.bf16.msra.mxu1 %v4042_v51  ;;  %3282 = vmatmul.mubr.f32.vlgmr.msra.gmra.mrb[0].mxu0 %v6699_v45  ;;  %v2313_v45 = vld [vmem:[%s6575_s18 + $0xe68] sm:$0xff]  ;;  %v4050_v11 = vpack.c.bf16 %v1926_v42, %v1924_v4  ;;  %v1944_v4 = vld [vmem:[%s6575_s18 + $0x2e0] sm:$0xff]  ;;  %v1946_v42 = vld [vmem:[%s6575_s18 + $0x2f0] sm:$0xff] }
 0x1f3   : > { %4427 = vmatpush1.bf16.msra.mxu0 %v4426_v52  ;;  %4045 = vmatprep.subr.bf16.mxu1 %v4044_v53  ;;  %v4436_v18 = vpack.c.bf16 %v2315_v10, %v2313_v45  ;;  %v2325_v51 = vld [vmem:[%s6575_s18 + $0xec8] sm:$0xff]  ;;  %v2327_v52 = vld [vmem:[%s6575_s18 + $0xed8] sm:$0xff]  ;;  %v4062_v53 = vpack.c.bf16 %v1938_v41, %v1936_v40  ;;  %v1956_v40 = vld [vmem:[%s6575_s18 + $0x340] sm:$0xff] }
 0x1f4   : > { %4429 = vmatprep.subr.bf16.mxu0 %v4428_v57  ;;  %2926 = vmatprep.mubr.f32.mxu1 %v2671_v61  ;;  %v1942_v57 = vld [vmem:[%s6575_s18 + $0x2d0] sm:$0xff]  ;;  %v4448_v59 = vpack.c.bf16 %v2327_v52, %v2325_v51  ;;  %v1945_v61 = vld [vmem:[%s6575_s18 + $0x2e8] sm:$0xff]  ;;  %v2335_v10 = vld [vmem:[%s6575_s18 + $0xf18] sm:$0xff] }
 0x1f5   : > { %3352 = vmatprep.mubr.f32.mxu0 %v2722_v0  ;;  %v2331_v0 = vld [vmem:[%s6575_s18 + $0xef8] sm:$0xff]  ;;  %v2333_v45 = vld [vmem:[%s6575_s18 + $0xf08] sm:$0xff]  ;;  %v1958_v41 = vld [vmem:[%s6575_s18 + $0x350] sm:$0xff] }
 0x1f6   : > { %4047 = vmatpush1.bf16.msra.mxu1 %v4046_v1  ;;  %v4066_v1 = vpack.c.bf16 %v1942_v57, %v1940_v56  ;;  %v2340_v43 = vld [vmem:[%s6575_s18 + $0xf40] sm:$0xff]  ;;  %v2342_v46 = vld [vmem:[%s6575_s18 + $0xf50] sm:$0xff]  ;;  %v1961_v48 = vld [vmem:[%s6575_s18 + $0x368] sm:$0xff] }
 0x1f7   : > { %4431 = vmatpush1.bf16.msra.mxu0 %v4430_v2  ;;  %4049 = vmatprep.subr.bf16.mxu1 %v4048_v3  ;;  %v4450_v2 = vpack.c.bf16 %v2326_v60, %v2324_v58  ;;  %v4068_v3 = vpack.c.bf16 %v1947_v62, %v1945_v61  ;;  %v1963_v49 = vld [vmem:[%s6575_s18 + $0x378] sm:$0xff]  ;;  %v2345_v51 = vld [vmem:[%s6575_s18 + $0xf68] sm:$0xff]  ;;  %v1960_v56 = vld [vmem:[%s6575_s18 + $0x360] sm:$0xff] }
 0x1f8   : > { %4433 = vmatprep.subr.bf16.mxu0 %v4432_v6  ;;  %v4452_v6 = vpack.c.bf16 %v2331_v0, %v2329_v63  ;;  %v2347_v52 = vld [vmem:[%s6575_s18 + $0xf78] sm:$0xff]  ;;  %v1962_v57 = vld [vmem:[%s6575_s18 + $0x370] sm:$0xff]  ;;  %v2344_v58 = vld [vmem:[%s6575_s18 + $0xf60] sm:$0xff] }
 0x1f9   : > { %v2346_v60 = vld [vmem:[%s6575_s18 + $0xf70] sm:$0xff]  ;;  %v1965_v61 = vld [vmem:[%s6575_s18 + $0x388] sm:$0xff]  ;;  %v1967_v62 = vld [vmem:[%s6575_s18 + $0x398] sm:$0xff] }
 0x1fa   : > { %4051 = vmatpush1.bf16.msra.mxu1 %v4050_v11  ;;  %v4070_v11 = vpack.c.bf16 %v1946_v42, %v1944_v4  ;;  %v2349_v63 = vld [vmem:[%s6575_s18 + $0xf88] sm:$0xff]  ;;  %v2351_v0 = vld [vmem:[%s6575_s18 + $0xf98] sm:$0xff]  ;;  %v1964_v4 = vld [vmem:[%s6575_s18 + $0x380] sm:$0xff] }
 0x1fb   : > { %4435 = vmatpush1.bf16.msra.mxu0 %v4434_v12  ;;  %4053 = vmatprep.subr.bf16.mxu1 %v4052_v13  ;;  %v4454_v12 = vpack.c.bf16 %v2330_v7, %v2328_v5  ;;  %v4072_v13 = vpack.c.bf16 %v1951_v9, %v1949_v8  ;;  %v1966_v42 = vld [vmem:[%s6575_s18 + $0x390] sm:$0xff]  ;;  %v2348_v5 = vld [vmem:[%s6575_s18 + $0xf80] sm:$0xff]  ;;  %v1969_v8 = vld [vmem:[%s6575_s18 + $0x3a8] sm:$0xff] }
 0x1fc   : > { %4437 = vmatprep.subr.bf16.mxu0 %v4436_v18  ;;  %v4456_v18 = vpack.c.bf16 %v2335_v10, %v2333_v45  ;;  %v2350_v7 = vld [vmem:[%s6575_s18 + $0xf90] sm:$0xff]  ;;  %v1971_v9 = vld [vmem:[%s6575_s18 + $0x3b8] sm:$0xff]  ;;  %v2353_v45 = vld [vmem:[%s6575_s18 + $0xfa8] sm:$0xff] }
 0x1fd   : > { %v2355_v10 = vld [vmem:[%s6575_s18 + $0xfb8] sm:$0xff] }
 0x1fe   : > { %4055 = vmatpush1.bf16.msra.mxu1 %v4054_v24  ;;  %v4074_v24 = vpack.c.bf16 %v1950_v16, %v1948_v15  ;;  %v1968_v15 = vld [vmem:[%s6575_s18 + $0x3a0] sm:$0xff]  ;;  %v1970_v16 = vld [vmem:[%s6575_s18 + $0x3b0] sm:$0xff] }
 0x1ff   : > { %4439 = vmatpush1.bf16.msra.mxu0 %v4438_v25  ;;  %4057 = vmatprep.subr.bf16.mxu1 %v4056_v26  ;;  %v4458_v25 = vpack.c.bf16 %v2334_v19, %v2332_v17  ;;  %v4076_v26 = vpack.c.bf16 %v1955_v21, %v1953_v20  ;;  %v2352_v17 = vld [vmem:[%s6575_s18 + $0xfa0] sm:$0xff]  ;;  %v2354_v19 = vld [vmem:[%s6575_s18 + $0xfb0] sm:$0xff]  ;;  %v1973_v20 = vld [vmem:[%s6575_s18 + $0x3c8] sm:$0xff] }
 0x200   : > { %4441 = vmatprep.subr.bf16.mxu0 %v4440_v31  ;;  %v4460_v31 = vpack.c.bf16 %v2339_v23, %v2337_v22  ;;  %v1975_v21 = vld [vmem:[%s6575_s18 + $0x3d8] sm:$0xff]  ;;  %v2357_v22 = vld [vmem:[%s6575_s18 + $0xfc8] sm:$0xff] }
 0x201   : > { %v2359_v23 = vld [vmem:[%s6575_s18 + $0xfd8] sm:$0xff] }
 0x202   : > { %4059 = vmatpush1.bf16.msra.mxu1 %v4058_v37  ;;  %v4078_v37 = vpack.c.bf16 %v1954_v29, %v1952_v27  ;;  %v1972_v27 = vld [vmem:[%s6575_s18 + $0x3c0] sm:$0xff]  ;;  %v1974_v29 = vld [vmem:[%s6575_s18 + $0x3d0] sm:$0xff] }
 0x203   : > { %4443 = vmatpush1.bf16.msra.mxu0 %v4442_v38  ;;  %4061 = vmatprep.subr.bf16.mxu1 %v4060_v39  ;;  %v4462_v38 = vpack.c.bf16 %v2338_v32, %v2336_v30  ;;  %v4080_v39 = vpack.c.bf16 %v1959_v34, %v1957_v33  ;;  %v2356_v30 = vld [vmem:[%s6575_s18 + $0xfc0] sm:$0xff]  ;;  %v2358_v32 = vld [vmem:[%s6575_s18 + $0xfd0] sm:$0xff]  ;;  %v1977_v33 = vld [vmem:[%s6575_s18 + $0x3e8] sm:$0xff] }
 0x204   : > { %4445 = vmatprep.subr.bf16.mxu0 %v4444_v44  ;;  %v4464_v44 = vpack.c.bf16 %v2343_v36, %v2341_v35  ;;  %v1979_v34 = vld [vmem:[%s6575_s18 + $0x3f8] sm:$0xff]  ;;  %v2361_v35 = vld [vmem:[%s6575_s18 + $0xfe8] sm:$0xff] }
 0x205   : > { %v2363_v36 = vld [vmem:[%s6575_s18 + $0xff8] sm:$0xff] }
 0x206   : > { %4063 = vmatpush1.bf16.msra.mxu1 %v4062_v53  ;;  %v4082_v53 = vpack.c.bf16 %v1958_v41, %v1956_v40  ;;  %v1976_v40 = vld [vmem:[%s6575_s18 + $0x3e0] sm:$0xff]  ;;  %v1978_v41 = vld [vmem:[%s6575_s18 + $0x3f0] sm:$0xff] }
 0x207   : > { %4447 = vmatpush1.bf16.msra.mxu0 %v4446_v54  ;;  %4065 = vmatprep.subr.bf16.mxu1 %v4064_v55  ;;  %v4466_v54 = vpack.c.bf16 %v2342_v46, %v2340_v43  ;;  %v4084_v55 = vpack.c.bf16 %v1963_v49, %v1961_v48  ;;  %v2360_v43 = vld [vmem:[%s6575_s18 + $0xfe0] sm:$0xff]  ;;  %v2362_v46 = vld [vmem:[%s6575_s18 + $0xff0] sm:$0xff]  ;;  %v1981_v48 = vld [vmem:[%s6575_s18 + $0x408] sm:$0xff] }
 0x208   : > { %4449 = vmatprep.subr.bf16.mxu0 %v4448_v59  ;;  %v4468_v59 = vpack.c.bf16 %v2347_v52, %v2345_v51  ;;  %v1983_v49 = vld [vmem:[%s6575_s18 + $0x418] sm:$0xff]  ;;  %v2365_v51 = vld [vmem:[%s6575_s18 + $0x1008] sm:$0xff] }
 0x209   : > { %v2367_v52 = vld [vmem:[%s6575_s18 + $0x1018] sm:$0xff] }
 0x20a   : > { %4067 = vmatpush1.bf16.msra.mxu1 %v4066_v1  ;;  %v4086_v1 = vpack.c.bf16 %v1962_v57, %v1960_v56  ;;  %v1980_v56 = vld [vmem:[%s6575_s18 + $0x400] sm:$0xff]  ;;  %v1982_v57 = vld [vmem:[%s6575_s18 + $0x410] sm:$0xff] }
 0x20b   : > { %4451 = vmatpush1.bf16.msra.mxu0 %v4450_v2  ;;  %4069 = vmatprep.subr.bf16.mxu1 %v4068_v3  ;;  %v4470_v2 = vpack.c.bf16 %v2346_v60, %v2344_v58  ;;  %v4088_v3 = vpack.c.bf16 %v1967_v62, %v1965_v61  ;;  %v2364_v58 = vld [vmem:[%s6575_s18 + $0x1000] sm:$0xff]  ;;  %v2366_v60 = vld [vmem:[%s6575_s18 + $0x1010] sm:$0xff]  ;;  %v1985_v61 = vld [vmem:[%s6575_s18 + $0x428] sm:$0xff] }
 0x20c   : > { %4453 = vmatprep.subr.bf16.mxu0 %v4452_v6  ;;  %v4472_v6 = vpack.c.bf16 %v2351_v0, %v2349_v63  ;;  %v1987_v62 = vld [vmem:[%s6575_s18 + $0x438] sm:$0xff]  ;;  %v2369_v63 = vld [vmem:[%s6575_s18 + $0x1028] sm:$0xff] }
 0x20d   : > { %v2371_v0 = vld [vmem:[%s6575_s18 + $0x1038] sm:$0xff] }
 0x20e   : > { %4071 = vmatpush1.bf16.msra.mxu1 %v4070_v11  ;;  %v4090_v11 = vpack.c.bf16 %v1966_v42, %v1964_v4  ;;  %v4490_v4 = vpack.c.bf16 %v2366_v60, %v2364_v58  ;;  %v4108_v42 = vpack.c.bf16 %v1987_v62, %v1985_v61  ;;  %v2000_v60 = vld [vmem:[%s6575_s18 + $0x4a0] sm:$0xff]  ;;  %v2002_v61 = vld [vmem:[%s6575_s18 + $0x4b0] sm:$0xff] }
 0x20f   : > { %4455 = vmatpush1.bf16.msra.mxu0 %v4454_v12  ;;  %4073 = vmatprep.subr.bf16.mxu1 %v4072_v13  ;;  %v4474_v12 = vpack.c.bf16 %v2350_v7, %v2348_v5  ;;  %v4092_v13 = vpack.c.bf16 %v1971_v9, %v1969_v8  ;;  %v1986_v5 = vld [vmem:[%s6575_s18 + $0x430] sm:$0xff]  ;;  %v6904_v8 = vld [vmem:[%s7566_s0 + $0x20] sm:$0xff]  ;;  %v4492_v9 = vpack.c.bf16 %v2371_v0, %v2369_v63 }
 0x210   : > { %4457 = vmatprep.subr.bf16.mxu0 %v4456_v18  ;;  %v4476_v18 = vpack.c.bf16 %v2355_v10, %v2353_v45  ;;  %v2370_v45 = vld [vmem:[%s6575_s18 + $0x1030] sm:$0xff]  ;;  %v1989_v10 = vld [vmem:[%s6575_s18 + $0x448] sm:$0xff]  ;;  %v2384_v62 = vld [vmem:[%s6575_s18 + $0x10a0] sm:$0xff] }
 0x211   : > { %v2386_v0 = vld [vmem:[%s6575_s18 + $0x10b0] sm:$0xff] }
 0x212   : > { %4075 = vmatpush1.bf16.msra.mxu1 %v4074_v24  ;;  %v4094_v24 = vpack.c.bf16 %v1970_v16, %v1968_v15  ;;  %v2375_v15 = vld [vmem:[%s6575_s18 + $0x1058] sm:$0xff] }
 0x213   : > { %4459 = vmatpush1.bf16.msra.mxu0 %v4458_v25  ;;  %4077 = vmatprep.subr.bf16.mxu1 %v4076_v26  ;;  %v4478_v25 = vpack.c.bf16 %v2354_v19, %v2352_v17  ;;  %v4096_v26 = vpack.c.bf16 %v1975_v21, %v1973_v20  ;;  %v1988_v20 = vld [vmem:[%s6575_s18 + $0x440] sm:$0xff]  ;;  %v1990_v21 = vld [vmem:[%s6575_s18 + $0x450] sm:$0xff] }
 0x214   : > { %4461 = vmatprep.subr.bf16.mxu0 %v4460_v31  ;;  %v4480_v31 = vpack.c.bf16 %v2359_v23, %v2357_v22  ;;  %v2372_v22 = vld [vmem:[%s6575_s18 + $0x1040] sm:$0xff] }
 0x216   : > { %4079 = vmatpush1.bf16.msra.mxu1 %v4078_v37  ;;  %v4098_v37 = vpack.c.bf16 %v1974_v29, %v1972_v27  ;;  %v2379_v27 = vld [vmem:[%s6575_s18 + $0x1078] sm:$0xff]  ;;  %v4114_v29 = vpack.c.bf16 %v1990_v21, %v1988_v20 }
 0x217   : > { %4463 = vmatpush1.bf16.msra.mxu0 %v4462_v38  ;;  %4081 = vmatprep.subr.bf16.mxu1 %v4080_v39  ;;  %v4482_v38 = vpack.c.bf16 %v2358_v32, %v2356_v30  ;;  %v4100_v39 = vpack.c.bf16 %v1979_v34, %v1977_v33  ;;  %v1992_v32 = vld [vmem:[%s6575_s18 + $0x460] sm:$0xff]  ;;  %v1994_v33 = vld [vmem:[%s6575_s18 + $0x470] sm:$0xff] }
 0x218   : > { %4465 = vmatprep.subr.bf16.mxu0 %v4464_v44  ;;  %v4484_v44 = vpack.c.bf16 %v2363_v36, %v2361_v35  ;;  %v2376_v34 = vld [vmem:[%s6575_s18 + $0x1060] sm:$0xff]  ;;  %v2378_v36 = vld [vmem:[%s6575_s18 + $0x1070] sm:$0xff] }
 0x21a   : > { %4083 = vmatpush1.bf16.msra.mxu1 %v4082_v53  ;;  %v4102_v53 = vpack.c.bf16 %v1978_v41, %v1976_v40  ;;  %v2383_v40 = vld [vmem:[%s6575_s18 + $0x1098] sm:$0xff]  ;;  %v4118_v41 = vpack.c.bf16 %v1994_v33, %v1992_v32 }
 0x21b   : > { %4467 = vmatpush1.bf16.msra.mxu0 %v4466_v54  ;;  %4085 = vmatprep.subr.bf16.mxu1 %v4084_v55  ;;  %v4486_v54 = vpack.c.bf16 %v2362_v46, %v2360_v43  ;;  %v4104_v55 = vpack.c.bf16 %v1983_v49, %v1981_v48  ;;  %v4502_v43 = vpack.c.bf16 %v2378_v36, %v2376_v34  ;;  %v1996_v46 = vld [vmem:[%s6575_s18 + $0x480] sm:$0xff]  ;;  %v1998_v48 = vld [vmem:[%s6575_s18 + $0x490] sm:$0xff] }
 0x21c   : > { %4469 = vmatprep.subr.bf16.mxu0 %v4468_v59  ;;  %v4488_v59 = vpack.c.bf16 %v2367_v52, %v2365_v51  ;;  %v2380_v49 = vld [vmem:[%s6575_s18 + $0x1080] sm:$0xff]  ;;  %v2382_v52 = vld [vmem:[%s6575_s18 + $0x1090] sm:$0xff] }
 0x21d   : > { %v4506_v58 = vpack.c.bf16 %v2382_v52, %v2380_v49  ;;  %v2012_v34 = vld [vmem:[%s6575_s18 + $0x500] sm:$0xff] }
 0x21e   : > { %4087 = vmatpush1.bf16.msra.mxu1 %v4086_v1  ;;  %v4106_v1 = vpack.c.bf16 %v1982_v57, %v1980_v56  ;;  %v2387_v56 = vld [vmem:[%s6575_s18 + $0x10b8] sm:$0xff]  ;;  %v4122_v57 = vpack.c.bf16 %v1998_v48, %v1996_v46  ;;  %v2396_v36 = vld [vmem:[%s6575_s18 + $0x1100] sm:$0xff] }
 0x21f   : > { %4471 = vmatpush1.bf16.msra.mxu0 %v4470_v2  ;;  %4089 = vmatprep.subr.bf16.mxu1 %v4088_v3  ;;  %v1984_v2 = vld [vmem:[%s6575_s18 + $0x420] sm:$0xff] }
 0x220   : > { %4473 = vmatprep.subr.bf16.mxu0 %v4472_v6  ;;  %v6893_v3 = vld [vmem:[%s7566_s0 + $0x8] sm:$0xff]  ;;  %v4110_v17 = vpack.c.bf16 %v1986_v5, %v1984_v2  ;;  %v2007_v2 = vld [vmem:[%s6575_s18 + $0x4d8] sm:$0xff]  ;;  %v4126_v5 = vpack.c.bf16 %v2002_v61, %v2000_v60 }
 0x221   : > { %v2368_v6 = vld [vmem:[%s6575_s18 + $0x1020] sm:$0xff]  ;;  %v6899_v7 = vrot.slane %v6893_v3, %v6673_v28 }
 0x222   : > { %4091 = vmatpush1.bf16.msra.mxu1 %v4090_v11  ;;  %v1991_v11 = vld [vmem:[%s6575_s18 + $0x458] sm:$0xff]  ;;  %v2016_v49 = vld [vmem:[%s6575_s18 + $0x520] sm:$0xff] }
 0x223   : > { %4475 = vmatpush1.bf16.msra.mxu0 %v4474_v12  ;;  %4093 = vmatprep.subr.bf16.mxu1 %v4092_v13  ;;  %v6911_v12 = vrot.slane %v6904_v8, %v6673_v28  ;;  %v2373_v13 = vld [vmem:[%s6575_s18 + $0x1048] sm:$0xff]  ;;  %v2687_v16 = vcombine.high %v6899_v7, %v6899_v7  ;;  %v4112_v19 = vpack.c.bf16 %v1991_v11, %v1989_v10  ;;  %v2006_v10 = vld [vmem:[%s6575_s18 + $0x4d0] sm:$0xff]  ;;  %v2388_v11 = vld [vmem:[%s6575_s18 + $0x10c0] sm:$0xff] }
 0x224   : > { %4477 = vmatprep.subr.bf16.mxu0 %v4476_v18  ;;  %v4496_v23 = vpack.c.bf16 %v2375_v15, %v2373_v13  ;;  %v2390_v15 = vld [vmem:[%s6575_s18 + $0x10d0] sm:$0xff]  ;;  %v2400_v52 = vld [vmem:[%s6575_s18 + $0x1120] sm:$0xff] }
 0x225   : > { %v2738_v18 = vcombine.high %v6911_v12, %v6911_v12  ;;  %v4514_v20 = vpack.c.bf16 %v2390_v15, %v2388_v11  ;;  %v2024_v11 = vld [vmem:[%s6575_s18 + $0x560] sm:$0xff] }
 0x226   : > { %4095 = vmatpush1.bf16.msra.mxu1 %v4094_v24  ;;  %v2374_v24 = vld [vmem:[%s6575_s18 + $0x1050] sm:$0xff]  ;;  %v2408_v15 = vld [vmem:[%s6575_s18 + $0x1160] sm:$0xff] }
 0x227   : > { %4479 = vmatpush1.bf16.msra.mxu0 %v4478_v25  ;;  %4097 = vmatprep.subr.bf16.mxu1 %v4096_v26  ;;  %v1995_v25 = vld [vmem:[%s6575_s18 + $0x478] sm:$0xff]  ;;  %v2377_v26 = vld [vmem:[%s6575_s18 + $0x1068] sm:$0xff]  ;;  %v4498_v30 = vpack.c.bf16 %v2374_v24, %v2372_v22  ;;  %v2008_v22 = vld [vmem:[%s6575_s18 + $0x4e0] sm:$0xff] }
 0x228   : > { %4481 = vmatprep.subr.bf16.mxu0 %v4480_v31  ;;  %v4500_v35 = vpack.c.bf16 %v2379_v27, %v2377_v26  ;;  %v2392_v24 = vld [vmem:[%s6575_s18 + $0x10e0] sm:$0xff]  ;;  %v2013_v26 = vld [vmem:[%s6575_s18 + $0x508] sm:$0xff]  ;;  %v2015_v27 = vld [vmem:[%s6575_s18 + $0x518] sm:$0xff] }
 0x229   : > { %v4136_v33 = vpack.c.bf16 %v2015_v27, %v2013_v26  ;;  %v2414_v27 = vld [vmem:[%s6575_s18 + $0x1190] sm:$0xff] }
 0x22a   : > { %4099 = vmatpush1.bf16.msra.mxu1 %v4098_v37  ;;  %v1997_v37 = vld [vmem:[%s6575_s18 + $0x488] sm:$0xff] }
 0x22b   : > { %4483 = vmatpush1.bf16.msra.mxu0 %v4482_v38  ;;  %4101 = vmatprep.subr.bf16.mxu1 %v4100_v39  ;;  %v1999_v38 = vld [vmem:[%s6575_s18 + $0x498] sm:$0xff]  ;;  %v2381_v39 = vld [vmem:[%s6575_s18 + $0x1088] sm:$0xff] }
 0x22c   : > { %4485 = vmatprep.subr.bf16.mxu0 %v4484_v44  ;;  %v4120_v44 = vpack.c.bf16 %v1999_v38, %v1997_v37  ;;  %v4504_v51 = vpack.c.bf16 %v2383_v40, %v2381_v39  ;;  %v2398_v38 = vld [vmem:[%s6575_s18 + $0x1110] sm:$0xff]  ;;  %v2017_v39 = vld [vmem:[%s6575_s18 + $0x528] sm:$0xff]  ;;  %v2019_v40 = vld [vmem:[%s6575_s18 + $0x538] sm:$0xff] }
 0x22d   : > { %v4522_v46 = vpack.c.bf16 %v2398_v38, %v2396_v36  ;;  %v4140_v48 = vpack.c.bf16 %v2019_v40, %v2017_v39  ;;  %v2032_v36 = vld [vmem:[%s6575_s18 + $0x5a0] sm:$0xff]  ;;  %v2418_v40 = vld [vmem:[%s6575_s18 + $0x11b0] sm:$0xff] }
 0x22e   : > { %4103 = vmatpush1.bf16.msra.mxu1 %v4102_v53  ;;  %v2001_v53 = vld [vmem:[%s6575_s18 + $0x4a8] sm:$0xff]  ;;  %v2416_v38 = vld [vmem:[%s6575_s18 + $0x11a0] sm:$0xff] }
 0x22f   : > { %4487 = vmatpush1.bf16.msra.mxu0 %v4486_v54  ;;  %4105 = vmatprep.subr.bf16.mxu1 %v4104_v55  ;;  %v2003_v54 = vld [vmem:[%s6575_s18 + $0x4b8] sm:$0xff]  ;;  %v2385_v55 = vld [vmem:[%s6575_s18 + $0x10a8] sm:$0xff] }
 0x230   : > { %4489 = vmatprep.subr.bf16.mxu0 %v4488_v59  ;;  %v4124_v59 = vpack.c.bf16 %v2003_v54, %v2001_v53  ;;  %v4508_v63 = vpack.c.bf16 %v2387_v56, %v2385_v55  ;;  %v2402_v54 = vld [vmem:[%s6575_s18 + $0x1130] sm:$0xff]  ;;  %v2021_v55 = vld [vmem:[%s6575_s18 + $0x548] sm:$0xff]  ;;  %v2023_v56 = vld [vmem:[%s6575_s18 + $0x558] sm:$0xff] }
 0x231   : > { %2927 = vmatmul.mubr.f32.vlgmr.msra.gmra.mrb[0].mxu1 %v6748_v47  ;;  %v4494_v47 = vpack.c.bf16 %v2370_v45, %v2368_v6  ;;  %v4510_v6 = vpack.c.bf16 %v2386_v0, %v2384_v62  ;;  %v2004_v45 = vld [vmem:[%s6575_s18 + $0x4c0] sm:$0xff]  ;;  %v4526_v60 = vpack.c.bf16 %v2402_v54, %v2400_v52  ;;  %v4144_v61 = vpack.c.bf16 %v2023_v56, %v2021_v55  ;;  %v2422_v56 = vld [vmem:[%s6575_s18 + $0x11d0] sm:$0xff] }
 0x232   : > { %4107 = vmatpush1.bf16.msra.mxu1 %v4106_v1  ;;  %3353 = vmatmul.mubr.f32.vlgmr.msra.gmra.mrb[0].mxu0 %v6753_v50  ;;  %v1993_v50 = vld [vmem:[%s6575_s18 + $0x468] sm:$0xff]  ;;  %v2020_v62 = vld [vmem:[%s6575_s18 + $0x540] sm:$0xff] }
 0x233   : > { %4491 = vmatpush1.bf16.msra.mxu0 %v4490_v4  ;;  %4109 = vmatprep.subr.bf16.mxu1 %v4108_v42  ;;  %v4116_v31 = vpack.c.bf16 %v1995_v25, %v1993_v50  ;;  %v2005_v1 = vld [vmem:[%s6575_s18 + $0x4c8] sm:$0xff]  ;;  %v2391_v42 = vld [vmem:[%s6575_s18 + $0x10d8] sm:$0xff]  ;;  %v2394_v25 = vld [vmem:[%s6575_s18 + $0x10f0] sm:$0xff] }
 0x234   : > { %4493 = vmatprep.subr.bf16.mxu0 %v4492_v9  ;;  %2997 = vmatprep.mubr.f32.mxu1 %v2687_v16  ;;  %v2389_v4 = vld [vmem:[%s6575_s18 + $0x10c8] sm:$0xff]  ;;  %v4128_v9 = vpack.c.bf16 %v2007_v2, %v2005_v1  ;;  %v4518_v32 = vpack.c.bf16 %v2394_v25, %v2392_v24  ;;  %v2404_v0 = vld [vmem:[%s6575_s18 + $0x1140] sm:$0xff]  ;;  %v2406_v2 = vld [vmem:[%s6575_s18 + $0x1150] sm:$0xff] }
 0x235   : > { %3423 = vmatprep.mubr.f32.mxu0 %v2738_v18  ;;  %v4512_v13 = vpack.c.bf16 %v2391_v42, %v2389_v4  ;;  %v2009_v16 = vld [vmem:[%s6575_s18 + $0x4e8] sm:$0xff]  ;;  %v2027_v42 = vld [vmem:[%s6575_s18 + $0x578] sm:$0xff]  ;;  %v2028_v24 = vld [vmem:[%s6575_s18 + $0x580] sm:$0xff] }
 0x236   : > { %4111 = vmatpush1.bf16.msra.mxu1 %v4110_v17  ;;  %v2011_v17 = vld [vmem:[%s6575_s18 + $0x4f8] sm:$0xff]  ;;  %v2393_v18 = vld [vmem:[%s6575_s18 + $0x10e8] sm:$0xff]  ;;  %v2412_v25 = vld [vmem:[%s6575_s18 + $0x1180] sm:$0xff] }
 0x237   : > { %4495 = vmatpush1.bf16.msra.mxu0 %v4494_v47  ;;  %4113 = vmatprep.subr.bf16.mxu1 %v4112_v19  ;;  %v2395_v47 = vld [vmem:[%s6575_s18 + $0x10f8] sm:$0xff]  ;;  %v4130_v19 = vpack.c.bf16 %v2006_v10, %v2004_v45  ;;  %v4132_v21 = vpack.c.bf16 %v2011_v17, %v2009_v16  ;;  %v2025_v4 = vld [vmem:[%s6575_s18 + $0x568] sm:$0xff]  ;;  %v4530_v45 = vpack.c.bf16 %v2406_v2, %v2404_v0  ;;  %v2410_v17 = vld [vmem:[%s6575_s18 + $0x1170] sm:$0xff] }
 0x238   : > { %4497 = vmatprep.subr.bf16.mxu0 %v4496_v23  ;;  %v2010_v23 = vld [vmem:[%s6575_s18 + $0x4f0] sm:$0xff]  ;;  %v4516_v50 = vpack.c.bf16 %v2395_v47, %v2393_v18  ;;  %v4148_v10 = vpack.c.bf16 %v2027_v42, %v2025_v4  ;;  %v2029_v18 = vld [vmem:[%s6575_s18 + $0x588] sm:$0xff]  ;;  %v2031_v47 = vld [vmem:[%s6575_s18 + $0x598] sm:$0xff] }
 0x239   : > { %v2036_v52 = vld [vmem:[%s6575_s18 + $0x5c0] sm:$0xff]  ;;  %v2426_v42 = vld [vmem:[%s6575_s18 + $0x11f0] sm:$0xff] }
 0x23a   : > { %4115 = vmatpush1.bf16.msra.mxu1 %v4114_v29  ;;  %v2397_v29 = vld [vmem:[%s6575_s18 + $0x1108] sm:$0xff]  ;;  %v2420_v54 = vld [vmem:[%s6575_s18 + $0x11c0] sm:$0xff] }
 0x23b   : > { %4499 = vmatpush1.bf16.msra.mxu0 %v4498_v30  ;;  %4117 = vmatprep.subr.bf16.mxu1 %v4116_v31  ;;  %v2399_v30 = vld [vmem:[%s6575_s18 + $0x1118] sm:$0xff]  ;;  %v4134_v31 = vpack.c.bf16 %v2010_v23, %v2008_v22  ;;  %v4534_v22 = vpack.c.bf16 %v2410_v17, %v2408_v15  ;;  %v4152_v23 = vpack.c.bf16 %v2031_v47, %v2029_v18  ;;  %v2040_v0 = vld [vmem:[%s6575_s18 + $0x5e0] sm:$0xff]  ;;  %v2046_v18 = vld [vmem:[%s6575_s18 + $0x610] sm:$0xff] }
 0x23c   : > { %4501 = vmatprep.subr.bf16.mxu0 %v4500_v35  ;;  %v2014_v35 = vld [vmem:[%s6575_s18 + $0x510] sm:$0xff]  ;;  %v4520_v37 = vpack.c.bf16 %v2399_v30, %v2397_v29  ;;  %v2033_v29 = vld [vmem:[%s6575_s18 + $0x5a8] sm:$0xff]  ;;  %v2035_v30 = vld [vmem:[%s6575_s18 + $0x5b8] sm:$0xff] }
 0x23d   : > { %v2424_v2 = vld [vmem:[%s6575_s18 + $0x11e0] sm:$0xff] }
 0x23e   : > { %4119 = vmatpush1.bf16.msra.mxu1 %v4118_v41  ;;  %v2401_v41 = vld [vmem:[%s6575_s18 + $0x1128] sm:$0xff]  ;;  %v4550_v15 = vpack.c.bf16 %v2426_v42, %v2424_v2  ;;  %v2044_v17 = vld [vmem:[%s6575_s18 + $0x600] sm:$0xff] }
 0x23f   : > { %4503 = vmatpush1.bf16.msra.mxu0 %v4502_v43  ;;  %4121 = vmatprep.subr.bf16.mxu1 %v4120_v44  ;;  %v2403_v43 = vld [vmem:[%s6575_s18 + $0x1138] sm:$0xff]  ;;  %v4138_v44 = vpack.c.bf16 %v2014_v35, %v2012_v34  ;;  %v4538_v34 = vpack.c.bf16 %v2414_v27, %v2412_v25  ;;  %v4156_v35 = vpack.c.bf16 %v2035_v30, %v2033_v29  ;;  %v2428_v47 = vld [vmem:[%s6575_s18 + $0x1200] sm:$0xff]  ;;  %v2050_v29 = vld [vmem:[%s6575_s18 + $0x630] sm:$0xff] }
 0x240   : > { %4505 = vmatprep.subr.bf16.mxu0 %v4504_v51  ;;  %v2018_v51 = vld [vmem:[%s6575_s18 + $0x530] sm:$0xff]  ;;  %v4524_v53 = vpack.c.bf16 %v2403_v43, %v2401_v41  ;;  %v2037_v41 = vld [vmem:[%s6575_s18 + $0x5c8] sm:$0xff]  ;;  %v2039_v43 = vld [vmem:[%s6575_s18 + $0x5d8] sm:$0xff] }
 0x241   : > { %v2048_v27 = vld [vmem:[%s6575_s18 + $0x620] sm:$0xff] }
 0x242   : > { %4123 = vmatpush1.bf16.msra.mxu1 %v4122_v57  ;;  %v2405_v57 = vld [vmem:[%s6575_s18 + $0x1148] sm:$0xff]  ;;  %v2432_v30 = vld [vmem:[%s6575_s18 + $0x1220] sm:$0xff] }
 0x243   : > { %4507 = vmatpush1.bf16.msra.mxu0 %v4506_v58  ;;  %4125 = vmatprep.subr.bf16.mxu1 %v4124_v59  ;;  %v2407_v58 = vld [vmem:[%s6575_s18 + $0x1158] sm:$0xff]  ;;  %v4142_v59 = vpack.c.bf16 %v2018_v51, %v2016_v49  ;;  %v4542_v49 = vpack.c.bf16 %v2418_v40, %v2416_v38  ;;  %v4160_v51 = vpack.c.bf16 %v2039_v43, %v2037_v41  ;;  %v2052_v43 = vld [vmem:[%s6575_s18 + $0x640] sm:$0xff] }
 0x244   : > { %4509 = vmatprep.subr.bf16.mxu0 %v4508_v63  ;;  %v2022_v63 = vld [vmem:[%s6575_s18 + $0x550] sm:$0xff]  ;;  %v4528_v1 = vpack.c.bf16 %v2407_v58, %v2405_v57  ;;  %v2041_v57 = vld [vmem:[%s6575_s18 + $0x5e8] sm:$0xff]  ;;  %v2043_v58 = vld [vmem:[%s6575_s18 + $0x5f8] sm:$0xff] }
 0x245   : > { %v2060_v42 = vld [vmem:[%s6575_s18 + $0x680] sm:$0xff] }
 0x246   : > { %4127 = vmatpush1.bf16.msra.mxu1 %v4126_v5  ;;  %v2409_v5 = vld [vmem:[%s6575_s18 + $0x1168] sm:$0xff] }
 0x247   : > { %4511 = vmatpush1.bf16.msra.mxu0 %v4510_v6  ;;  %4129 = vmatprep.subr.bf16.mxu1 %v4128_v9  ;;  %v2411_v6 = vld [vmem:[%s6575_s18 + $0x1178] sm:$0xff]  ;;  %v4146_v9 = vpack.c.bf16 %v2022_v63, %v2020_v62  ;;  %v4546_v62 = vpack.c.bf16 %v2422_v56, %v2420_v54  ;;  %v4164_v63 = vpack.c.bf16 %v2043_v58, %v2041_v57  ;;  %v2056_v56 = vld [vmem:[%s6575_s18 + $0x660] sm:$0xff]  ;;  %v2058_v57 = vld [vmem:[%s6575_s18 + $0x670] sm:$0xff] }
 0x248   : > { %4513 = vmatprep.subr.bf16.mxu0 %v4512_v13  ;;  %v2026_v13 = vld [vmem:[%s6575_s18 + $0x570] sm:$0xff]  ;;  %v4532_v16 = vpack.c.bf16 %v2411_v6, %v2409_v5  ;;  %v2045_v5 = vld [vmem:[%s6575_s18 + $0x608] sm:$0xff]  ;;  %v2047_v6 = vld [vmem:[%s6575_s18 + $0x618] sm:$0xff] }
 0x249   : > { %v2440_v58 = vld [vmem:[%s6575_s18 + $0x1260] sm:$0xff] }
 0x24a   : > { %4131 = vmatpush1.bf16.msra.mxu1 %v4130_v19  ;;  %v2413_v19 = vld [vmem:[%s6575_s18 + $0x1188] sm:$0xff] }
 0x24b   : > { %4515 = vmatpush1.bf16.msra.mxu0 %v4514_v20  ;;  %4133 = vmatprep.subr.bf16.mxu1 %v4132_v21  ;;  %v2415_v20 = vld [vmem:[%s6575_s18 + $0x1198] sm:$0xff]  ;;  %v4150_v21 = vpack.c.bf16 %v2026_v13, %v2024_v11  ;;  %v2723_v11 = vcombine.high %v6904_v8, %v6904_v8 }
 0x24c   : > { %4517 = vmatprep.subr.bf16.mxu0 %v4516_v50  ;;  %v2030_v50 = vld [vmem:[%s6575_s18 + $0x590] sm:$0xff]  ;;  %v4536_v26 = vpack.c.bf16 %v2415_v20, %v2413_v19  ;;  %v2049_v20 = vld [vmem:[%s6575_s18 + $0x628] sm:$0xff] }
 0x24d   : > { %v2430_v19 = vld [vmem:[%s6575_s18 + $0x1210] sm:$0xff] }
 0x24e   : > { %4135 = vmatpush1.bf16.msra.mxu1 %v4134_v31  ;;  %v2417_v31 = vld [vmem:[%s6575_s18 + $0x11a8] sm:$0xff]  ;;  %v4554_v25 = vpack.c.bf16 %v2430_v19, %v2428_v47  ;;  %v2064_v47 = vld [vmem:[%s6575_s18 + $0x6a0] sm:$0xff] }
 0x24f   : > { %4519 = vmatpush1.bf16.msra.mxu0 %v4518_v32  ;;  %4137 = vmatprep.subr.bf16.mxu1 %v4136_v33  ;;  %v2419_v32 = vld [vmem:[%s6575_s18 + $0x11b8] sm:$0xff]  ;;  %v4154_v33 = vpack.c.bf16 %v2030_v50, %v2028_v24  ;;  %v7049_v24 = vrot.slane %v2723_v11, %v6673_v28  ;;  %v4170_v50 = vpack.c.bf16 %v2046_v18, %v2044_v17  ;;  %v2448_v19 = vld [vmem:[%s6575_s18 + $0x12a0] sm:$0xff] }
 0x250   : > { %4521 = vmatprep.subr.bf16.mxu0 %v4520_v37  ;;  %v2034_v37 = vld [vmem:[%s6575_s18 + $0x5b0] sm:$0xff]  ;;  %v4540_v39 = vpack.c.bf16 %v2419_v32, %v2417_v31  ;;  %v2067_v11 = vld [vmem:[%s6575_s18 + $0x6b8] sm:$0xff] }
 0x251   : > { %v2434_v32 = vld [vmem:[%s6575_s18 + $0x1230] sm:$0xff]  ;;  %v2739_v38 = vcombine.high %v7049_v24, %v7049_v24 }
 0x252   : > { %4139 = vmatpush1.bf16.msra.mxu1 %v4138_v44  ;;  %v2421_v44 = vld [vmem:[%s6575_s18 + $0x11c8] sm:$0xff]  ;;  %v4558_v40 = vpack.c.bf16 %v2434_v32, %v2432_v30  ;;  %v2068_v30 = vld [vmem:[%s6575_s18 + $0x6c0] sm:$0xff] }
 0x253   : > { %4523 = vmatpush1.bf16.msra.mxu0 %v4522_v46  ;;  %4141 = vmatprep.subr.bf16.mxu1 %v4140_v48  ;;  %v2423_v46 = vld [vmem:[%s6575_s18 + $0x11d8] sm:$0xff]  ;;  %v4158_v48 = vpack.c.bf16 %v2034_v37, %v2032_v36  ;;  %v2437_v36 = vld [vmem:[%s6575_s18 + $0x1248] sm:$0xff]  ;;  %v2452_v32 = vld [vmem:[%s6575_s18 + $0x12c0] sm:$0xff] }
 0x254   : > { %4525 = vmatprep.subr.bf16.mxu0 %v4524_v53  ;;  %v2038_v53 = vld [vmem:[%s6575_s18 + $0x5d0] sm:$0xff]  ;;  %v4544_v55 = vpack.c.bf16 %v2423_v46, %v2421_v44  ;;  %v2439_v37 = vld [vmem:[%s6575_s18 + $0x1258] sm:$0xff]  ;;  %v2436_v44 = vld [vmem:[%s6575_s18 + $0x1240] sm:$0xff] }
 0x255   : > { %v4560_v46 = vpack.c.bf16 %v2439_v37, %v2437_v36  ;;  %v2075_v36 = vld [vmem:[%s6575_s18 + $0x6f8] sm:$0xff]  ;;  %v2457_v37 = vld [vmem:[%s6575_s18 + $0x12e8] sm:$0xff] }
 0x256   : > { %4143 = vmatpush1.bf16.msra.mxu1 %v4142_v59  ;;  %v2425_v59 = vld [vmem:[%s6575_s18 + $0x11e8] sm:$0xff] }
 0x257   : > { %4527 = vmatpush1.bf16.msra.mxu0 %v4526_v60  ;;  %4145 = vmatprep.subr.bf16.mxu1 %v4144_v61  ;;  %v2427_v60 = vld [vmem:[%s6575_s18 + $0x11f8] sm:$0xff]  ;;  %v4162_v61 = vpack.c.bf16 %v2038_v53, %v2036_v52 }
 0x258   : > { %4529 = vmatprep.subr.bf16.mxu0 %v4528_v1  ;;  %v2042_v1 = vld [vmem:[%s6575_s18 + $0x5f0] sm:$0xff]  ;;  %v4548_v4 = vpack.c.bf16 %v2427_v60, %v2425_v59  ;;  %v2443_v52 = vld [vmem:[%s6575_s18 + $0x1278] sm:$0xff] }
 0x259   : > { %v4166_v13 = vpack.c.bf16 %v2042_v1, %v2040_v0  ;;  %v2442_v60 = vld [vmem:[%s6575_s18 + $0x1270] sm:$0xff]  ;;  %v2447_v0 = vld [vmem:[%s6575_s18 + $0x1298] sm:$0xff]  ;;  %v4182_v1 = vpack.c.bf16 %v2058_v57, %v2056_v56  ;;  %v2076_v56 = vld [vmem:[%s6575_s18 + $0x700] sm:$0xff] }
 0x25a   : > { %4147 = vmatpush1.bf16.msra.mxu1 %v4146_v9  ;;  %v2672_v9 = vcombine.high %v6893_v3, %v6893_v3  ;;  %v4566_v2 = vpack.c.bf16 %v2442_v60, %v2440_v58  ;;  %v2078_v57 = vld [vmem:[%s6575_s18 + $0x710] sm:$0xff]  ;;  %v2460_v58 = vld [vmem:[%s6575_s18 + $0x1300] sm:$0xff] }
 0x25b   : > { %4531 = vmatpush1.bf16.msra.mxu0 %v4530_v45  ;;  %4149 = vmatprep.subr.bf16.mxu1 %v4148_v10  ;;  %v2429_v45 = vld [vmem:[%s6575_s18 + $0x1208] sm:$0xff]  ;;  %v2431_v10 = vld [vmem:[%s6575_s18 + $0x1218] sm:$0xff]  ;;  %v2462_v60 = vld [vmem:[%s6575_s18 + $0x1310] sm:$0xff] }
 0x25c   : > { %4533 = vmatprep.subr.bf16.mxu0 %v4532_v16  ;;  %v4168_v16 = vpack.c.bf16 %v2047_v6, %v2045_v5  ;;  %v4552_v3 = vpack.c.bf16 %v2431_v10, %v2429_v45  ;;  %v7044_v8 = vrot.slane %v2672_v9, %v6673_v28  ;;  %v2062_v5 = vld [vmem:[%s6575_s18 + $0x690] sm:$0xff]  ;;  %v2444_v6 = vld [vmem:[%s6575_s18 + $0x1280] sm:$0xff]  ;;  %v2065_v10 = vld [vmem:[%s6575_s18 + $0x6a8] sm:$0xff] }
 0x25d   : > { %v2446_v45 = vld [vmem:[%s6575_s18 + $0x1290] sm:$0xff]  ;;  %v4188_v18 = vpack.c.bf16 %v2067_v11, %v2065_v10  ;;  %v2085_v10 = vld [vmem:[%s6575_s18 + $0x748] sm:$0xff]  ;;  %v2087_v11 = vld [vmem:[%s6575_s18 + $0x758] sm:$0xff] }
 0x25e   : > { %4151 = vmatpush1.bf16.msra.mxu1 %v4150_v21  ;;  %v2051_v21 = vld [vmem:[%s6575_s18 + $0x638] sm:$0xff]  ;;  %v4570_v17 = vpack.c.bf16 %v2446_v45, %v2444_v6  ;;  %v2464_v6 = vld [vmem:[%s6575_s18 + $0x1320] sm:$0xff]  ;;  %v2466_v45 = vld [vmem:[%s6575_s18 + $0x1330] sm:$0xff] }
 0x25f   : > { %4535 = vmatpush1.bf16.msra.mxu0 %v4534_v22  ;;  %4153 = vmatprep.subr.bf16.mxu1 %v4152_v23  ;;  %v2433_v22 = vld [vmem:[%s6575_s18 + $0x1228] sm:$0xff]  ;;  %v2435_v23 = vld [vmem:[%s6575_s18 + $0x1238] sm:$0xff] }
 0x260   : > { %4537 = vmatprep.subr.bf16.mxu0 %v4536_v26  ;;  %v4172_v26 = vpack.c.bf16 %v2051_v21, %v2049_v20  ;;  %v4556_v31 = vpack.c.bf16 %v2435_v23, %v2433_v22  ;;  %v2450_v21 = vld [vmem:[%s6575_s18 + $0x12b0] sm:$0xff]  ;;  %v2069_v22 = vld [vmem:[%s6575_s18 + $0x6c8] sm:$0xff]  ;;  %v2071_v23 = vld [vmem:[%s6575_s18 + $0x6d8] sm:$0xff] }
 0x262   : > { %4155 = vmatpush1.bf16.msra.mxu1 %v4154_v33  ;;  %v2053_v33 = vld [vmem:[%s6575_s18 + $0x648] sm:$0xff] }
 0x263   : > { %4539 = vmatpush1.bf16.msra.mxu0 %v4538_v34  ;;  %4157 = vmatprep.subr.bf16.mxu1 %v4156_v35  ;;  %v2055_v34 = vld [vmem:[%s6575_s18 + $0x658] sm:$0xff]  ;;  %v2688_v35 = vcombine.high %v7044_v8, %v7044_v8 }
 0x264   : > { %4541 = vmatprep.subr.bf16.mxu0 %v4540_v39  ;;  %v4174_v39 = vpack.c.bf16 %v2050_v29, %v2048_v27  ;;  %v4176_v41 = vpack.c.bf16 %v2055_v34, %v2053_v33  ;;  %v4574_v27 = vpack.c.bf16 %v2450_v21, %v2448_v19  ;;  %v4192_v29 = vpack.c.bf16 %v2071_v23, %v2069_v22  ;;  %v2454_v34 = vld [vmem:[%s6575_s18 + $0x12d0] sm:$0xff]  ;;  %v2468_v19 = vld [vmem:[%s6575_s18 + $0x1340] sm:$0xff]  ;;  %v2089_v22 = vld [vmem:[%s6575_s18 + $0x768] sm:$0xff] }
 0x265   : > { %v2470_v21 = vld [vmem:[%s6575_s18 + $0x1350] sm:$0xff]  ;;  %v2091_v23 = vld [vmem:[%s6575_s18 + $0x778] sm:$0xff] }
 0x266   : > { %4159 = vmatpush1.bf16.msra.mxu1 %v4158_v48  ;;  %v2438_v48 = vld [vmem:[%s6575_s18 + $0x1250] sm:$0xff] }
 0x267   : > { %4543 = vmatpush1.bf16.msra.mxu0 %v4542_v49  ;;  %4161 = vmatprep.subr.bf16.mxu1 %v4160_v51  ;;  %v2057_v49 = vld [vmem:[%s6575_s18 + $0x668] sm:$0xff]  ;;  %v2059_v51 = vld [vmem:[%s6575_s18 + $0x678] sm:$0xff]  ;;  %v4562_v54 = vpack.c.bf16 %v2438_v48, %v2436_v44  ;;  %v2456_v44 = vld [vmem:[%s6575_s18 + $0x12e0] sm:$0xff] }
 0x268   : > { %4545 = vmatprep.subr.bf16.mxu0 %v4544_v55  ;;  %v4180_v55 = vpack.c.bf16 %v2059_v51, %v2057_v49  ;;  %v2458_v48 = vld [vmem:[%s6575_s18 + $0x12f0] sm:$0xff]  ;;  %v2077_v49 = vld [vmem:[%s6575_s18 + $0x708] sm:$0xff]  ;;  %v2079_v51 = vld [vmem:[%s6575_s18 + $0x718] sm:$0xff] }
 0x26a   : > { %4163 = vmatpush1.bf16.msra.mxu1 %v4162_v61  ;;  %v2061_v61 = vld [vmem:[%s6575_s18 + $0x688] sm:$0xff] }
 0x26b   : > { %4547 = vmatpush1.bf16.msra.mxu0 %v4546_v62  ;;  %4165 = vmatprep.subr.bf16.mxu1 %v4164_v63  ;;  %v2063_v62 = vld [vmem:[%s6575_s18 + $0x698] sm:$0xff]  ;;  %v2445_v63 = vld [vmem:[%s6575_s18 + $0x1288] sm:$0xff] }
 0x26c   : > { %4549 = vmatprep.subr.bf16.mxu0 %v4548_v4  ;;  %v4184_v4 = vpack.c.bf16 %v2063_v62, %v2061_v61  ;;  %v4568_v9 = vpack.c.bf16 %v2447_v0, %v2445_v63  ;;  %v2081_v61 = vld [vmem:[%s6575_s18 + $0x728] sm:$0xff]  ;;  %v2083_v62 = vld [vmem:[%s6575_s18 + $0x738] sm:$0xff] }
 0x26d   : > { %v2465_v63 = vld [vmem:[%s6575_s18 + $0x1328] sm:$0xff]  ;;  %v2467_v0 = vld [vmem:[%s6575_s18 + $0x1338] sm:$0xff] }
 0x26e   : > { %4167 = vmatpush1.bf16.msra.mxu1 %v4166_v13  ;;  %v2449_v13 = vld [vmem:[%s6575_s18 + $0x12a8] sm:$0xff] }
 0x26f   : > { %4551 = vmatpush1.bf16.msra.mxu0 %v4550_v15  ;;  %4169 = vmatprep.subr.bf16.mxu1 %v4168_v16  ;;  %v2451_v15 = vld [vmem:[%s6575_s18 + $0x12b8] sm:$0xff]  ;;  %v4186_v16 = vpack.c.bf16 %v2062_v5, %v2060_v42  ;;  %v2080_v42 = vld [vmem:[%s6575_s18 + $0x720] sm:$0xff]  ;;  %v2082_v5 = vld [vmem:[%s6575_s18 + $0x730] sm:$0xff] }
 0x270   : > { %4553 = vmatprep.subr.bf16.mxu0 %v4552_v3  ;;  %v2066_v3 = vld [vmem:[%s6575_s18 + $0x6b0] sm:$0xff]  ;;  %v4572_v20 = vpack.c.bf16 %v2451_v15, %v2449_v13  ;;  %v2469_v13 = vld [vmem:[%s6575_s18 + $0x1348] sm:$0xff]  ;;  %v2471_v15 = vld [vmem:[%s6575_s18 + $0x1358] sm:$0xff] }
 0x271   : > { %2998 = vmatmul.mubr.f32.vlgmr.msra.gmra.mrb[0].mxu1 %v6899_v7  ;;  %v2054_v7 = vld [vmem:[%s6575_s18 + $0x650] sm:$0xff] }
 0x272   : > { %4171 = vmatpush1.bf16.msra.mxu1 %v4170_v50  ;;  %3424 = vmatmul.mubr.f32.vlgmr.msra.gmra.mrb[0].mxu0 %v6911_v12  ;;  %v2441_v12 = vld [vmem:[%s6575_s18 + $0x1268] sm:$0xff]  ;;  %v4178_v53 = vpack.c.bf16 %v2054_v7, %v2052_v43  ;;  %v2072_v43 = vld [vmem:[%s6575_s18 + $0x6e0] sm:$0xff]  ;;  %v2074_v7 = vld [vmem:[%s6575_s18 + $0x6f0] sm:$0xff] }
 0x273   : > { %4555 = vmatpush1.bf16.msra.mxu0 %v4554_v25  ;;  %4173 = vmatprep.subr.bf16.mxu1 %v4172_v26  ;;  %v4564_v59 = vpack.c.bf16 %v2443_v52, %v2441_v12  ;;  %v2453_v50 = vld [vmem:[%s6575_s18 + $0x12c8] sm:$0xff]  ;;  %v2455_v25 = vld [vmem:[%s6575_s18 + $0x12d8] sm:$0xff]  ;;  %v4190_v26 = vpack.c.bf16 %v2066_v3, %v2064_v47  ;;  %v2084_v47 = vld [vmem:[%s6575_s18 + $0x740] sm:$0xff] }
 0x274   : > { %4557 = vmatprep.subr.bf16.mxu0 %v4556_v31  ;;  %3068 = vmatprep.mubr.f32.mxu1 %v2688_v35  ;;  %v2070_v31 = vld [vmem:[%s6575_s18 + $0x6d0] sm:$0xff]  ;;  %v4576_v33 = vpack.c.bf16 %v2455_v25, %v2453_v50  ;;  %v2073_v35 = vld [vmem:[%s6575_s18 + $0x6e8] sm:$0xff]  ;;  %v2463_v52 = vld [vmem:[%s6575_s18 + $0x1318] sm:$0xff] }
 0x275   : > { %3494 = vmatprep.mubr.f32.mxu0 %v2739_v38  ;;  %v2459_v38 = vld [vmem:[%s6575_s18 + $0x12f8] sm:$0xff]  ;;  %v2461_v12 = vld [vmem:[%s6575_s18 + $0x1308] sm:$0xff]  ;;  %v2086_v3 = vld [vmem:[%s6575_s18 + $0x750] sm:$0xff] }
 0x276   : > { %4175 = vmatpush1.bf16.msra.mxu1 %v4174_v39  ;;  %v4194_v39 = vpack.c.bf16 %v2070_v31, %v2068_v30  ;;  %v2473_v50 = vld [vmem:[%s6575_s18 + $0x1368] sm:$0xff]  ;;  %v2475_v25 = vld [vmem:[%s6575_s18 + $0x1378] sm:$0xff]  ;;  %v2088_v30 = vld [vmem:[%s6575_s18 + $0x760] sm:$0xff] }
 0x277   : > { %4559 = vmatpush1.bf16.msra.mxu0 %v4558_v40  ;;  %4177 = vmatprep.subr.bf16.mxu1 %v4176_v41  ;;  %v4578_v40 = vpack.c.bf16 %v2454_v34, %v2452_v32  ;;  %v4196_v41 = vpack.c.bf16 %v2075_v36, %v2073_v35  ;;  %v2090_v31 = vld [vmem:[%s6575_s18 + $0x770] sm:$0xff]  ;;  %v2472_v32 = vld [vmem:[%s6575_s18 + $0x1360] sm:$0xff]  ;;  %v2093_v35 = vld [vmem:[%s6575_s18 + $0x788] sm:$0xff] }
 0x278   : > { %4561 = vmatprep.subr.bf16.mxu0 %v4560_v46  ;;  %v4580_v46 = vpack.c.bf16 %v2459_v38, %v2457_v37  ;;  %v2474_v34 = vld [vmem:[%s6575_s18 + $0x1370] sm:$0xff]  ;;  %v2095_v36 = vld [vmem:[%s6575_s18 + $0x798] sm:$0xff]  ;;  %v2477_v37 = vld [vmem:[%s6575_s18 + $0x1388] sm:$0xff] }
 0x279   : > { %v2479_v38 = vld [vmem:[%s6575_s18 + $0x1398] sm:$0xff] }
 0x27a   : > { %4179 = vmatpush1.bf16.msra.mxu1 %v4178_v53  ;;  %v4198_v53 = vpack.c.bf16 %v2074_v7, %v2072_v43  ;;  %v2092_v43 = vld [vmem:[%s6575_s18 + $0x780] sm:$0xff]  ;;  %v2094_v7 = vld [vmem:[%s6575_s18 + $0x790] sm:$0xff] }
 0x27b   : > { %4563 = vmatpush1.bf16.msra.mxu0 %v4562_v54  ;;  %4181 = vmatprep.subr.bf16.mxu1 %v4180_v55  ;;  %v4582_v54 = vpack.c.bf16 %v2458_v48, %v2456_v44  ;;  %v4200_v55 = vpack.c.bf16 %v2079_v51, %v2077_v49  ;;  %v2476_v44 = vld [vmem:[%s6575_s18 + $0x1380] sm:$0xff]  ;;  %v2478_v48 = vld [vmem:[%s6575_s18 + $0x1390] sm:$0xff]  ;;  %v2097_v49 = vld [vmem:[%s6575_s18 + $0x7a8] sm:$0xff] }
 0x27c   : > { %4565 = vmatprep.subr.bf16.mxu0 %v4564_v59  ;;  %v4584_v59 = vpack.c.bf16 %v2463_v52, %v2461_v12  ;;  %v2099_v51 = vld [vmem:[%s6575_s18 + $0x7b8] sm:$0xff]  ;;  %v2481_v12 = vld [vmem:[%s6575_s18 + $0x13a8] sm:$0xff] }
 0x27d   : > { %v2483_v52 = vld [vmem:[%s6575_s18 + $0x13b8] sm:$0xff] }
 0x27e   : > { %4183 = vmatpush1.bf16.msra.mxu1 %v4182_v1  ;;  %v4202_v1 = vpack.c.bf16 %v2078_v57, %v2076_v56  ;;  %v2096_v56 = vld [vmem:[%s6575_s18 + $0x7a0] sm:$0xff]  ;;  %v2098_v57 = vld [vmem:[%s6575_s18 + $0x7b0] sm:$0xff] }
 0x27f   : > { %4567 = vmatpush1.bf16.msra.mxu0 %v4566_v2  ;;  %4185 = vmatprep.subr.bf16.mxu1 %v4184_v4  ;;  %v4586_v2 = vpack.c.bf16 %v2462_v60, %v2460_v58  ;;  %v4204_v4 = vpack.c.bf16 %v2083_v62, %v2081_v61  ;;  %v2480_v58 = vld [vmem:[%s6575_s18 + $0x13a0] sm:$0xff]  ;;  %v2482_v60 = vld [vmem:[%s6575_s18 + $0x13b0] sm:$0xff]  ;;  %v2101_v61 = vld [vmem:[%s6575_s18 + $0x7c8] sm:$0xff] }
 0x280   : > { %4569 = vmatprep.subr.bf16.mxu0 %v4568_v9  ;;  %v4588_v9 = vpack.c.bf16 %v2467_v0, %v2465_v63  ;;  %v2103_v62 = vld [vmem:[%s6575_s18 + $0x7d8] sm:$0xff]  ;;  %v2485_v63 = vld [vmem:[%s6575_s18 + $0x13c8] sm:$0xff] }
 0x281   : > { %v2487_v0 = vld [vmem:[%s6575_s18 + $0x13d8] sm:$0xff] }
 0x282   : > { %4187 = vmatpush1.bf16.msra.mxu1 %v4186_v16  ;;  %v4206_v16 = vpack.c.bf16 %v2082_v5, %v2080_v42  ;;  %v2100_v42 = vld [vmem:[%s6575_s18 + $0x7c0] sm:$0xff]  ;;  %v2102_v5 = vld [vmem:[%s6575_s18 + $0x7d0] sm:$0xff] }
 0x283   : > { %4571 = vmatpush1.bf16.msra.mxu0 %v4570_v17  ;;  %4189 = vmatprep.subr.bf16.mxu1 %v4188_v18  ;;  %v4590_v17 = vpack.c.bf16 %v2466_v45, %v2464_v6  ;;  %v4208_v18 = vpack.c.bf16 %v2087_v11, %v2085_v10  ;;  %v2484_v6 = vld [vmem:[%s6575_s18 + $0x13c0] sm:$0xff]  ;;  %v2486_v45 = vld [vmem:[%s6575_s18 + $0x13d0] sm:$0xff]  ;;  %v2105_v10 = vld [vmem:[%s6575_s18 + $0x7e8] sm:$0xff] }
 0x284   : > { %4573 = vmatprep.subr.bf16.mxu0 %v4572_v20  ;;  %v4592_v20 = vpack.c.bf16 %v2471_v15, %v2469_v13  ;;  %v2107_v11 = vld [vmem:[%s6575_s18 + $0x7f8] sm:$0xff]  ;;  %v2489_v13 = vld [vmem:[%s6575_s18 + $0x13e8] sm:$0xff] }
 0x285   : > { %v2491_v15 = vld [vmem:[%s6575_s18 + $0x13f8] sm:$0xff] }
 0x286   : > { %4191 = vmatpush1.bf16.msra.mxu1 %v4190_v26  ;;  %v4210_v26 = vpack.c.bf16 %v2086_v3, %v2084_v47  ;;  %v2104_v47 = vld [vmem:[%s6575_s18 + $0x7e0] sm:$0xff]  ;;  %v2106_v3 = vld [vmem:[%s6575_s18 + $0x7f0] sm:$0xff] }
 0x287   : > { %4575 = vmatpush1.bf16.msra.mxu0 %v4574_v27  ;;  %4193 = vmatprep.subr.bf16.mxu1 %v4192_v29  ;;  %v4594_v27 = vpack.c.bf16 %v2470_v21, %v2468_v19  ;;  %v4212_v29 = vpack.c.bf16 %v2091_v23, %v2089_v22  ;;  %v2488_v19 = vld [vmem:[%s6575_s18 + $0x13e0] sm:$0xff]  ;;  %v2490_v21 = vld [vmem:[%s6575_s18 + $0x13f0] sm:$0xff]  ;;  %v2109_v22 = vld [vmem:[%s6575_s18 + $0x808] sm:$0xff] }
 0x288   : > { %4577 = vmatprep.subr.bf16.mxu0 %v4576_v33  ;;  %v4596_v33 = vpack.c.bf16 %v2475_v25, %v2473_v50  ;;  %v2111_v23 = vld [vmem:[%s6575_s18 + $0x818] sm:$0xff]  ;;  %v2493_v50 = vld [vmem:[%s6575_s18 + $0x1408] sm:$0xff] }
 0x289   : > { %v2495_v25 = vld [vmem:[%s6575_s18 + $0x1418] sm:$0xff] }
 0x28a   : > { %4195 = vmatpush1.bf16.msra.mxu1 %v4194_v39  ;;  %v4214_v39 = vpack.c.bf16 %v2090_v31, %v2088_v30  ;;  %v4614_v30 = vpack.c.bf16 %v2490_v21, %v2488_v19  ;;  %v4232_v31 = vpack.c.bf16 %v2111_v23, %v2109_v22  ;;  %v2124_v21 = vld [vmem:[%s6575_s18 + $0x880] sm:$0xff]  ;;  %v2126_v22 = vld [vmem:[%s6575_s18 + $0x890] sm:$0xff] }
 0x28b   : > { %4579 = vmatpush1.bf16.msra.mxu0 %v4578_v40  ;;  %4197 = vmatprep.subr.bf16.mxu1 %v4196_v41  ;;  %v4598_v40 = vpack.c.bf16 %v2474_v34, %v2472_v32  ;;  %v4216_v41 = vpack.c.bf16 %v2095_v36, %v2093_v35  ;;  %v2108_v32 = vld [vmem:[%s6575_s18 + $0x800] sm:$0xff]  ;;  %v4616_v35 = vpack.c.bf16 %v2495_v25, %v2493_v50  ;;  %v2494_v36 = vld [vmem:[%s6575_s18 + $0x1410] sm:$0xff] }
 0x28c   : > { %4581 = vmatprep.subr.bf16.mxu0 %v4580_v46  ;;  %v4600_v46 = vpack.c.bf16 %v2479_v38, %v2477_v37  ;;  %v2492_v34 = vld [vmem:[%s6575_s18 + $0x1400] sm:$0xff]  ;;  %v2113_v37 = vld [vmem:[%s6575_s18 + $0x828] sm:$0xff]  ;;  %v2115_v38 = vld [vmem:[%s6575_s18 + $0x838] sm:$0xff] }
 0x28d   : > { %v2508_v23 = vld [vmem:[%s6575_s18 + $0x1480] sm:$0xff]  ;;  %v2510_v25 = vld [vmem:[%s6575_s18 + $0x1490] sm:$0xff] }
 0x28e   : > { %4199 = vmatpush1.bf16.msra.mxu1 %v4198_v53  ;;  %v4218_v53 = vpack.c.bf16 %v2094_v7, %v2092_v43 }
 0x28f   : > { %4583 = vmatpush1.bf16.msra.mxu0 %v4582_v54  ;;  %4201 = vmatprep.subr.bf16.mxu1 %v4200_v55  ;;  %v4602_v54 = vpack.c.bf16 %v2478_v48, %v2476_v44  ;;  %v4220_v55 = vpack.c.bf16 %v2099_v51, %v2097_v49  ;;  %v4618_v44 = vpack.c.bf16 %v2494_v36, %v2492_v34  ;;  %v2112_v48 = vld [vmem:[%s6575_s18 + $0x820] sm:$0xff]  ;;  %v2114_v49 = vld [vmem:[%s6575_s18 + $0x830] sm:$0xff] }
 0x290   : > { %4585 = vmatprep.subr.bf16.mxu0 %v4584_v59  ;;  %v4604_v59 = vpack.c.bf16 %v2483_v52, %v2481_v12  ;;  %v2496_v51 = vld [vmem:[%s6575_s18 + $0x1420] sm:$0xff]  ;;  %v2498_v52 = vld [vmem:[%s6575_s18 + $0x1430] sm:$0xff]  ;;  %v4634_v34 = vpack.c.bf16 %v2510_v25, %v2508_v23 }
 0x291   : > { %v2128_v36 = vld [vmem:[%s6575_s18 + $0x8a0] sm:$0xff] }
 0x292   : > { %4203 = vmatpush1.bf16.msra.mxu1 %v4202_v1  ;;  %v4222_v1 = vpack.c.bf16 %v2098_v57, %v2096_v56  ;;  %v2501_v56 = vld [vmem:[%s6575_s18 + $0x1448] sm:$0xff]  ;;  %v2503_v57 = vld [vmem:[%s6575_s18 + $0x1458] sm:$0xff]  ;;  %v2144_v23 = vld [vmem:[%s6575_s18 + $0x920] sm:$0xff] }
 0x293   : > { %4587 = vmatpush1.bf16.msra.mxu0 %v4586_v2  ;;  %4205 = vmatprep.subr.bf16.mxu1 %v4204_v4  ;;  %v4606_v2 = vpack.c.bf16 %v2482_v60, %v2480_v58  ;;  %v4224_v4 = vpack.c.bf16 %v2103_v62, %v2101_v61  ;;  %v4622_v60 = vpack.c.bf16 %v2498_v52, %v2496_v51  ;;  %v2116_v62 = vld [vmem:[%s6575_s18 + $0x840] sm:$0xff] }
 0x294   : > { %4589 = vmatprep.subr.bf16.mxu0 %v4588_v9  ;;  %v4608_v9 = vpack.c.bf16 %v2487_v0, %v2485_v63  ;;  %v2500_v63 = vld [vmem:[%s6575_s18 + $0x1440] sm:$0xff]  ;;  %v4624_v0 = vpack.c.bf16 %v2503_v57, %v2501_v56  ;;  %v2518_v56 = vld [vmem:[%s6575_s18 + $0x14d0] sm:$0xff]  ;;  %v2137_v57 = vld [vmem:[%s6575_s18 + $0x8e8] sm:$0xff] }
 0x295   : > { %v2132_v52 = vld [vmem:[%s6575_s18 + $0x8c0] sm:$0xff] }
 0x296   : > { %4207 = vmatpush1.bf16.msra.mxu1 %v4206_v16  ;;  %v4226_v16 = vpack.c.bf16 %v2102_v5, %v2100_v42  ;;  %v2507_v42 = vld [vmem:[%s6575_s18 + $0x1478] sm:$0xff]  ;;  %v2528_v25 = vld [vmem:[%s6575_s18 + $0x1520] sm:$0xff] }
 0x297   : > { %4591 = vmatpush1.bf16.msra.mxu0 %v4590_v17  ;;  %4209 = vmatprep.subr.bf16.mxu1 %v4208_v18  ;;  %v4610_v17 = vpack.c.bf16 %v2486_v45, %v2484_v6  ;;  %v4228_v18 = vpack.c.bf16 %v2107_v11, %v2105_v10  ;;  %v2120_v45 = vld [vmem:[%s6575_s18 + $0x860] sm:$0xff]  ;;  %v2122_v10 = vld [vmem:[%s6575_s18 + $0x870] sm:$0xff] }
 0x298   : > { %4593 = vmatprep.subr.bf16.mxu0 %v4592_v20  ;;  %v4612_v20 = vpack.c.bf16 %v2491_v15, %v2489_v13  ;;  %v2504_v11 = vld [vmem:[%s6575_s18 + $0x1460] sm:$0xff]  ;;  %v2506_v15 = vld [vmem:[%s6575_s18 + $0x1470] sm:$0xff] }
 0x299   : > { %v4630_v19 = vpack.c.bf16 %v2506_v15, %v2504_v11  ;;  %v2140_v11 = vld [vmem:[%s6575_s18 + $0x900] sm:$0xff] }
 0x29a   : > { %4211 = vmatpush1.bf16.msra.mxu1 %v4210_v26  ;;  %v7180_v26 = vld [vmem:[%s7566_s0 + $0x10] sm:$0xff]  ;;  %v2524_v15 = vld [vmem:[%s6575_s18 + $0x1500] sm:$0xff] }
 0x29b   : > { %4595 = vmatpush1.bf16.msra.mxu0 %v4594_v27  ;;  %4213 = vmatprep.subr.bf16.mxu1 %v4212_v29  ;;  %v4230_v27 = vpack.c.bf16 %v2106_v3, %v2104_v47  ;;  %v7185_v29 = vld [vmem:[%s7566_s0 + $0x28] sm:$0xff]  ;;  %v2511_v47 = vld [vmem:[%s6575_s18 + $0x1498] sm:$0xff]  ;;  %v4246_v3 = vpack.c.bf16 %v2122_v10, %v2120_v45 }
 0x29c   : > { %4597 = vmatprep.subr.bf16.mxu0 %v4596_v33  ;;  %v2110_v33 = vld [vmem:[%s6575_s18 + $0x810] sm:$0xff]  ;;  %v7201_v43 = vrot.slane %v7185_v29, %v6673_v28 }
 0x29d   : > { %v4234_v7 = vpack.c.bf16 %v2110_v33, %v2108_v32  ;;  %v2515_v32 = vld [vmem:[%s6575_s18 + $0x14b8] sm:$0xff]  ;;  %v4250_v33 = vpack.c.bf16 %v2126_v22, %v2124_v21 }
 0x29e   : > { %4215 = vmatpush1.bf16.msra.mxu1 %v4214_v39  ;;  %v7195_v39 = vrot.slane %v7180_v26, %v6673_v28  ;;  %v2755_v58 = vcombine.high %v7201_v43, %v7201_v43 }
 0x29f   : > { %4599 = vmatpush1.bf16.msra.mxu0 %v4598_v40  ;;  %4217 = vmatprep.subr.bf16.mxu1 %v4216_v41  ;;  %v2497_v40 = vld [vmem:[%s6575_s18 + $0x1428] sm:$0xff]  ;;  %v2499_v41 = vld [vmem:[%s6575_s18 + $0x1438] sm:$0xff] }
 0x2a0   : > { %4601 = vmatprep.subr.bf16.mxu0 %v4600_v46  ;;  %v4236_v46 = vpack.c.bf16 %v2115_v38, %v2113_v37  ;;  %v4620_v12 = vpack.c.bf16 %v2499_v41, %v2497_v40  ;;  %v2130_v37 = vld [vmem:[%s6575_s18 + $0x8b0] sm:$0xff]  ;;  %v2512_v38 = vld [vmem:[%s6575_s18 + $0x14a0] sm:$0xff] }
 0x2a1   : > { %v2514_v41 = vld [vmem:[%s6575_s18 + $0x14b0] sm:$0xff] }
 0x2a2   : > { %4219 = vmatpush1.bf16.msra.mxu1 %v4218_v53  ;;  %v2117_v53 = vld [vmem:[%s6575_s18 + $0x848] sm:$0xff]  ;;  %v4638_v51 = vpack.c.bf16 %v2514_v41, %v2512_v38  ;;  %v2148_v38 = vld [vmem:[%s6575_s18 + $0x940] sm:$0xff] }
 0x2a3   : > { %4603 = vmatpush1.bf16.msra.mxu0 %v4602_v54  ;;  %4221 = vmatprep.subr.bf16.mxu1 %v4220_v55  ;;  %v2119_v54 = vld [vmem:[%s6575_s18 + $0x858] sm:$0xff]  ;;  %v2704_v55 = vcombine.high %v7195_v39, %v7195_v39  ;;  %v2532_v41 = vld [vmem:[%s6575_s18 + $0x1540] sm:$0xff] }
 0x2a4   : > { %4605 = vmatprep.subr.bf16.mxu0 %v4604_v59  ;;  %v4238_v59 = vpack.c.bf16 %v2114_v49, %v2112_v48  ;;  %v4240_v61 = vpack.c.bf16 %v2119_v54, %v2117_v53  ;;  %v2519_v48 = vld [vmem:[%s6575_s18 + $0x14d8] sm:$0xff]  ;;  %v4254_v49 = vpack.c.bf16 %v2130_v37, %v2128_v36  ;;  %v2134_v53 = vld [vmem:[%s6575_s18 + $0x8d0] sm:$0xff]  ;;  %v2516_v54 = vld [vmem:[%s6575_s18 + $0x14c0] sm:$0xff] }
 0x2a6   : > { %4223 = vmatpush1.bf16.msra.mxu1 %v4222_v1  ;;  %v2502_v1 = vld [vmem:[%s6575_s18 + $0x1450] sm:$0xff] }
 0x2a7   : > { %4607 = vmatpush1.bf16.msra.mxu0 %v4606_v2  ;;  %4225 = vmatprep.subr.bf16.mxu1 %v4224_v4  ;;  %v2121_v2 = vld [vmem:[%s6575_s18 + $0x868] sm:$0xff]  ;;  %v2123_v4 = vld [vmem:[%s6575_s18 + $0x878] sm:$0xff]  ;;  %v4626_v6 = vpack.c.bf16 %v2502_v1, %v2500_v63  ;;  %v2136_v63 = vld [vmem:[%s6575_s18 + $0x8e0] sm:$0xff] }
 0x2a8   : > { %4609 = vmatprep.subr.bf16.mxu0 %v4608_v9  ;;  %v4244_v9 = vpack.c.bf16 %v2123_v4, %v2121_v2  ;;  %v2520_v1 = vld [vmem:[%s6575_s18 + $0x14e0] sm:$0xff]  ;;  %v2522_v4 = vld [vmem:[%s6575_s18 + $0x14f0] sm:$0xff] }
 0x2a9   : > { %v4646_v45 = vpack.c.bf16 %v2522_v4, %v2520_v1  ;;  %v2156_v1 = vld [vmem:[%s6575_s18 + $0x980] sm:$0xff] }
 0x2aa   : > { %4227 = vmatpush1.bf16.msra.mxu1 %v4226_v16  ;;  %v2125_v16 = vld [vmem:[%s6575_s18 + $0x888] sm:$0xff]  ;;  %v2540_v4 = vld [vmem:[%s6575_s18 + $0x1580] sm:$0xff] }
 0x2ab   : > { %4611 = vmatpush1.bf16.msra.mxu0 %v4610_v17  ;;  %4229 = vmatprep.subr.bf16.mxu1 %v4228_v18  ;;  %v2127_v17 = vld [vmem:[%s6575_s18 + $0x898] sm:$0xff]  ;;  %v2509_v18 = vld [vmem:[%s6575_s18 + $0x1488] sm:$0xff] }
 0x2ac   : > { %4613 = vmatprep.subr.bf16.mxu0 %v4612_v20  ;;  %v4248_v20 = vpack.c.bf16 %v2127_v17, %v2125_v16  ;;  %v4632_v50 = vpack.c.bf16 %v2511_v47, %v2509_v18  ;;  %v2526_v17 = vld [vmem:[%s6575_s18 + $0x1510] sm:$0xff]  ;;  %v2145_v18 = vld [vmem:[%s6575_s18 + $0x928] sm:$0xff]  ;;  %v2147_v47 = vld [vmem:[%s6575_s18 + $0x938] sm:$0xff] }
 0x2ad   : > { %v4650_v21 = vpack.c.bf16 %v2526_v17, %v2524_v15  ;;  %v4268_v22 = vpack.c.bf16 %v2147_v47, %v2145_v18  ;;  %v2160_v15 = vld [vmem:[%s6575_s18 + $0x9a0] sm:$0xff]  ;;  %v2546_v47 = vld [vmem:[%s6575_s18 + $0x15b0] sm:$0xff] }
 0x2ae   : > { %4231 = vmatpush1.bf16.msra.mxu1 %v4230_v27  ;;  %v2129_v27 = vld [vmem:[%s6575_s18 + $0x8a8] sm:$0xff]  ;;  %v2544_v17 = vld [vmem:[%s6575_s18 + $0x15a0] sm:$0xff] }
 0x2af   : > { %4615 = vmatpush1.bf16.msra.mxu0 %v4614_v30  ;;  %4233 = vmatprep.subr.bf16.mxu1 %v4232_v31  ;;  %v2131_v30 = vld [vmem:[%s6575_s18 + $0x8b8] sm:$0xff]  ;;  %v2513_v31 = vld [vmem:[%s6575_s18 + $0x14a8] sm:$0xff] }
 0x2b0   : > { %4617 = vmatprep.subr.bf16.mxu0 %v4616_v35  ;;  %v4252_v35 = vpack.c.bf16 %v2131_v30, %v2129_v27  ;;  %v4636_v40 = vpack.c.bf16 %v2515_v32, %v2513_v31  ;;  %v2530_v30 = vld [vmem:[%s6575_s18 + $0x1530] sm:$0xff]  ;;  %v2149_v31 = vld [vmem:[%s6575_s18 + $0x948] sm:$0xff]  ;;  %v2151_v32 = vld [vmem:[%s6575_s18 + $0x958] sm:$0xff] }
 0x2b1   : > { %3069 = vmatmul.mubr.f32.vlgmr.msra.gmra.mrb[0].mxu1 %v7044_v8  ;;  %v2118_v8 = vld [vmem:[%s6575_s18 + $0x850] sm:$0xff]  ;;  %v4654_v36 = vpack.c.bf16 %v2530_v30, %v2528_v25  ;;  %v4272_v37 = vpack.c.bf16 %v2151_v32, %v2149_v31  ;;  %v2164_v25 = vld [vmem:[%s6575_s18 + $0x9c0] sm:$0xff] }
 0x2b2   : > { %4235 = vmatpush1.bf16.msra.mxu1 %v4234_v7  ;;  %3495 = vmatmul.mubr.f32.vlgmr.msra.gmra.mrb[0].mxu0 %v7049_v24  ;;  %v2505_v24 = vld [vmem:[%s6575_s18 + $0x1468] sm:$0xff]  ;;  %v4242_v5 = vpack.c.bf16 %v2118_v8, %v2116_v62  ;;  %v4642_v62 = vpack.c.bf16 %v2518_v56, %v2516_v54  ;;  %v2152_v54 = vld [vmem:[%s6575_s18 + $0x960] sm:$0xff]  ;;  %v2550_v32 = vld [vmem:[%s6575_s18 + $0x15d0] sm:$0xff] }
 0x2b3   : > { %4619 = vmatpush1.bf16.msra.mxu0 %v4618_v44  ;;  %4237 = vmatprep.subr.bf16.mxu1 %v4236_v46  ;;  %v4628_v13 = vpack.c.bf16 %v2507_v42, %v2505_v24  ;;  %v2133_v7 = vld [vmem:[%s6575_s18 + $0x8c8] sm:$0xff]  ;;  %v2135_v44 = vld [vmem:[%s6575_s18 + $0x8d8] sm:$0xff]  ;;  %v2536_v56 = vld [vmem:[%s6575_s18 + $0x1560] sm:$0xff] }
 0x2b4   : > { %4621 = vmatprep.subr.bf16.mxu0 %v4620_v12  ;;  %3139 = vmatprep.mubr.f32.mxu1 %v2704_v55  ;;  %v2517_v46 = vld [vmem:[%s6575_s18 + $0x14c8] sm:$0xff]  ;;  %v4256_v12 = vpack.c.bf16 %v2135_v44, %v2133_v7  ;;  %v2143_v42 = vld [vmem:[%s6575_s18 + $0x918] sm:$0xff]  ;;  %v2534_v44 = vld [vmem:[%s6575_s18 + $0x1550] sm:$0xff] }
 0x2b5   : > { %3565 = vmatprep.mubr.f32.mxu0 %v2755_v58  ;;  %v4640_v55 = vpack.c.bf16 %v2519_v48, %v2517_v46  ;;  %v2139_v58 = vld [vmem:[%s6575_s18 + $0x8f8] sm:$0xff]  ;;  %v2141_v24 = vld [vmem:[%s6575_s18 + $0x908] sm:$0xff]  ;;  %v2548_v30 = vld [vmem:[%s6575_s18 + $0x15c0] sm:$0xff] }
 0x2b6   : > { %4239 = vmatpush1.bf16.msra.mxu1 %v4238_v59  ;;  %v2521_v59 = vld [vmem:[%s6575_s18 + $0x14e8] sm:$0xff]  ;;  %v4260_v8 = vpack.c.bf16 %v2139_v58, %v2137_v57  ;;  %v4264_v10 = vpack.c.bf16 %v2143_v42, %v2141_v24  ;;  %v2155_v48 = vld [vmem:[%s6575_s18 + $0x978] sm:$0xff]  ;;  %v2538_v58 = vld [vmem:[%s6575_s18 + $0x1570] sm:$0xff] }
 0x2b7   : > { %4623 = vmatpush1.bf16.msra.mxu0 %v4622_v60  ;;  %4241 = vmatprep.subr.bf16.mxu1 %v4240_v61  ;;  %v2523_v60 = vld [vmem:[%s6575_s18 + $0x14f8] sm:$0xff]  ;;  %v4258_v61 = vpack.c.bf16 %v2134_v53, %v2132_v52  ;;  %v2153_v46 = vld [vmem:[%s6575_s18 + $0x968] sm:$0xff]  ;;  %v4658_v52 = vpack.c.bf16 %v2534_v44, %v2532_v41  ;;  %v2542_v42 = vld [vmem:[%s6575_s18 + $0x1590] sm:$0xff] }
 0x2b8   : > { %4625 = vmatprep.subr.bf16.mxu0 %v4624_v0  ;;  %v2138_v0 = vld [vmem:[%s6575_s18 + $0x8f0] sm:$0xff]  ;;  %v4644_v2 = vpack.c.bf16 %v2523_v60, %v2521_v59  ;;  %v4276_v53 = vpack.c.bf16 %v2155_v48, %v2153_v46  ;;  %v2157_v59 = vld [vmem:[%s6575_s18 + $0x988] sm:$0xff]  ;;  %v2159_v60 = vld [vmem:[%s6575_s18 + $0x998] sm:$0xff] }
 0x2b9   : > { %v2168_v41 = vld [vmem:[%s6575_s18 + $0x9e0] sm:$0xff]  ;;  %v2554_v48 = vld [vmem:[%s6575_s18 + $0x15f0] sm:$0xff] }
 0x2ba   : > { %4243 = vmatpush1.bf16.msra.mxu1 %v4242_v5  ;;  %v2525_v5 = vld [vmem:[%s6575_s18 + $0x1508] sm:$0xff]  ;;  %v2552_v44 = vld [vmem:[%s6575_s18 + $0x15e0] sm:$0xff] }
 0x2bb   : > { %4627 = vmatpush1.bf16.msra.mxu0 %v4626_v6  ;;  %4245 = vmatprep.subr.bf16.mxu1 %v4244_v9  ;;  %v2527_v6 = vld [vmem:[%s6575_s18 + $0x1518] sm:$0xff]  ;;  %v4262_v9 = vpack.c.bf16 %v2138_v0, %v2136_v63  ;;  %v4662_v63 = vpack.c.bf16 %v2538_v58, %v2536_v56  ;;  %v4280_v0 = vpack.c.bf16 %v2159_v60, %v2157_v59  ;;  %v2172_v58 = vld [vmem:[%s6575_s18 + $0xa00] sm:$0xff]  ;;  %v2174_v59 = vld [vmem:[%s6575_s18 + $0xa10] sm:$0xff] }
 0x2bc   : > { %4629 = vmatprep.subr.bf16.mxu0 %v4628_v13  ;;  %v2142_v13 = vld [vmem:[%s6575_s18 + $0x910] sm:$0xff]  ;;  %v4648_v16 = vpack.c.bf16 %v2527_v6, %v2525_v5  ;;  %v2161_v5 = vld [vmem:[%s6575_s18 + $0x9a8] sm:$0xff]  ;;  %v2163_v6 = vld [vmem:[%s6575_s18 + $0x9b8] sm:$0xff]  ;;  %v4678_v56 = vpack.c.bf16 %v2554_v48, %v2552_v44 }
 0x2bd   : > { %v2556_v60 = vld [vmem:[%s6575_s18 + $0x1600] sm:$0xff]  ;;  %v2190_v48 = vld [vmem:[%s6575_s18 + $0xa90] sm:$0xff] }
 0x2be   : > { %4247 = vmatpush1.bf16.msra.mxu1 %v4246_v3  ;;  %v2529_v3 = vld [vmem:[%s6575_s18 + $0x1528] sm:$0xff] }
 0x2bf   : > { %4631 = vmatpush1.bf16.msra.mxu0 %v4630_v19  ;;  %4249 = vmatprep.subr.bf16.mxu1 %v4248_v20  ;;  %v2531_v19 = vld [vmem:[%s6575_s18 + $0x1538] sm:$0xff]  ;;  %v4266_v20 = vpack.c.bf16 %v2142_v13, %v2140_v11  ;;  %v4666_v11 = vpack.c.bf16 %v2542_v42, %v2540_v4  ;;  %v4284_v13 = vpack.c.bf16 %v2163_v6, %v2161_v5  ;;  %v2176_v42 = vld [vmem:[%s6575_s18 + $0xa20] sm:$0xff]  ;;  %v2178_v5 = vld [vmem:[%s6575_s18 + $0xa30] sm:$0xff] }
 0x2c0   : > { %4633 = vmatprep.subr.bf16.mxu0 %v4632_v50  ;;  %v2146_v50 = vld [vmem:[%s6575_s18 + $0x930] sm:$0xff]  ;;  %v4652_v27 = vpack.c.bf16 %v2531_v19, %v2529_v3  ;;  %v2165_v3 = vld [vmem:[%s6575_s18 + $0x9c8] sm:$0xff]  ;;  %v2167_v19 = vld [vmem:[%s6575_s18 + $0x9d8] sm:$0xff] }
 0x2c1   : > { %v2560_v6 = vld [vmem:[%s6575_s18 + $0x1620] sm:$0xff] }
 0x2c2   : > { %4251 = vmatpush1.bf16.msra.mxu1 %v4250_v33  ;;  %v2533_v33 = vld [vmem:[%s6575_s18 + $0x1548] sm:$0xff] }
 0x2c3   : > { %4635 = vmatpush1.bf16.msra.mxu0 %v4634_v34  ;;  %4253 = vmatprep.subr.bf16.mxu1 %v4252_v35  ;;  %v2535_v34 = vld [vmem:[%s6575_s18 + $0x1558] sm:$0xff]  ;;  %v4270_v35 = vpack.c.bf16 %v2146_v50, %v2144_v23  ;;  %v4670_v23 = vpack.c.bf16 %v2546_v47, %v2544_v17  ;;  %v4288_v50 = vpack.c.bf16 %v2167_v19, %v2165_v3  ;;  %v2180_v3 = vld [vmem:[%s6575_s18 + $0xa40] sm:$0xff] }
 0x2c4   : > { %4637 = vmatprep.subr.bf16.mxu0 %v4636_v40  ;;  %v2150_v40 = vld [vmem:[%s6575_s18 + $0x950] sm:$0xff]  ;;  %v4656_v7 = vpack.c.bf16 %v2535_v34, %v2533_v33  ;;  %v2169_v33 = vld [vmem:[%s6575_s18 + $0x9e8] sm:$0xff]  ;;  %v2171_v34 = vld [vmem:[%s6575_s18 + $0x9f8] sm:$0xff]  ;;  %v4302_v17 = vpack.c.bf16 %v2178_v5, %v2176_v42 }
 0x2c5   : > { %v2564_v19 = vld [vmem:[%s6575_s18 + $0x1640] sm:$0xff] }
 0x2c6   : > { %4255 = vmatpush1.bf16.msra.mxu1 %v4254_v49  ;;  %v2537_v49 = vld [vmem:[%s6575_s18 + $0x1568] sm:$0xff]  ;;  %v2196_v5 = vld [vmem:[%s6575_s18 + $0xac0] sm:$0xff] }
 0x2c7   : > { %4639 = vmatpush1.bf16.msra.mxu0 %v4638_v51  ;;  %4257 = vmatprep.subr.bf16.mxu1 %v4256_v12  ;;  %v2539_v51 = vld [vmem:[%s6575_s18 + $0x1578] sm:$0xff]  ;;  %v4274_v12 = vpack.c.bf16 %v2150_v40, %v2148_v38  ;;  %v4674_v38 = vpack.c.bf16 %v2550_v32, %v2548_v30  ;;  %v4292_v40 = vpack.c.bf16 %v2171_v34, %v2169_v33  ;;  %v2186_v32 = vld [vmem:[%s6575_s18 + $0xa70] sm:$0xff]  ;;  %v2568_v33 = vld [vmem:[%s6575_s18 + $0x1660] sm:$0xff] }
 0x2c8   : > { %4641 = vmatprep.subr.bf16.mxu0 %v4640_v55  ;;  %v2154_v55 = vld [vmem:[%s6575_s18 + $0x970] sm:$0xff]  ;;  %v4660_v57 = vpack.c.bf16 %v2539_v51, %v2537_v49  ;;  %v2173_v49 = vld [vmem:[%s6575_s18 + $0xa08] sm:$0xff]  ;;  %v2175_v51 = vld [vmem:[%s6575_s18 + $0xa18] sm:$0xff] }
 0x2ca   : > { %4259 = vmatpush1.bf16.msra.mxu1 %v4258_v61  ;;  %v2541_v61 = vld [vmem:[%s6575_s18 + $0x1588] sm:$0xff] }
 0x2cb   : > { %4643 = vmatpush1.bf16.msra.mxu0 %v4642_v62  ;;  %4261 = vmatprep.subr.bf16.mxu1 %v4260_v8  ;;  %v2543_v62 = vld [vmem:[%s6575_s18 + $0x1598] sm:$0xff]  ;;  %v4278_v8 = vpack.c.bf16 %v2154_v55, %v2152_v54  ;;  %v2740_v54 = vcombine.high %v7185_v29, %v7185_v29 }
 0x2cc   : > { %4645 = vmatprep.subr.bf16.mxu0 %v4644_v2  ;;  %v2158_v2 = vld [vmem:[%s6575_s18 + $0x990] sm:$0xff]  ;;  %v4664_v24 = vpack.c.bf16 %v2543_v62, %v2541_v61  ;;  %v2177_v62 = vld [vmem:[%s6575_s18 + $0xa28] sm:$0xff] }
 0x2cd   : > { %v2558_v61 = vld [vmem:[%s6575_s18 + $0x1610] sm:$0xff] }
 0x2ce   : > { %4263 = vmatpush1.bf16.msra.mxu1 %v4262_v9  ;;  %v2545_v9 = vld [vmem:[%s6575_s18 + $0x15a8] sm:$0xff]  ;;  %v4682_v4 = vpack.c.bf16 %v2558_v61, %v2556_v60  ;;  %v2194_v60 = vld [vmem:[%s6575_s18 + $0xab0] sm:$0xff] }
 0x2cf   : > { %4647 = vmatpush1.bf16.msra.mxu0 %v4646_v45  ;;  %4265 = vmatprep.subr.bf16.mxu1 %v4264_v10  ;;  %v2547_v45 = vld [vmem:[%s6575_s18 + $0x15b8] sm:$0xff]  ;;  %v4282_v10 = vpack.c.bf16 %v2158_v2, %v2156_v1  ;;  %v7345_v1 = vrot.slane %v2740_v54, %v6673_v28  ;;  %v4298_v2 = vpack.c.bf16 %v2174_v59, %v2172_v58  ;;  %v2577_v54 = vld [vmem:[%s6575_s18 + $0x16a8] sm:$0xff]  ;;  %v2192_v59 = vld [vmem:[%s6575_s18 + $0xaa0] sm:$0xff] }
 0x2d0   : > { %4649 = vmatprep.subr.bf16.mxu0 %v4648_v16  ;;  %v2162_v16 = vld [vmem:[%s6575_s18 + $0x9b0] sm:$0xff]  ;;  %v4668_v18 = vpack.c.bf16 %v2547_v45, %v2545_v9 }
 0x2d1   : > { %v2562_v45 = vld [vmem:[%s6575_s18 + $0x1630] sm:$0xff] }
 0x2d2   : > { %4267 = vmatpush1.bf16.msra.mxu1 %v4266_v20  ;;  %v2549_v20 = vld [vmem:[%s6575_s18 + $0x15c8] sm:$0xff] }
 0x2d3   : > { %4651 = vmatpush1.bf16.msra.mxu0 %v4650_v21  ;;  %4269 = vmatprep.subr.bf16.mxu1 %v4268_v22  ;;  %v2551_v21 = vld [vmem:[%s6575_s18 + $0x15d8] sm:$0xff]  ;;  %v4286_v22 = vpack.c.bf16 %v2162_v16, %v2160_v15  ;;  %v2756_v16 = vcombine.high %v7345_v1, %v7345_v1 }
 0x2d4   : > { %4653 = vmatprep.subr.bf16.mxu0 %v4652_v27  ;;  %v2166_v27 = vld [vmem:[%s6575_s18 + $0x9d0] sm:$0xff]  ;;  %v4672_v31 = vpack.c.bf16 %v2551_v21, %v2549_v20  ;;  %v2567_v15 = vld [vmem:[%s6575_s18 + $0x1658] sm:$0xff] }
 0x2d5   : > { %v2566_v21 = vld [vmem:[%s6575_s18 + $0x1650] sm:$0xff] }
 0x2d6   : > { %4271 = vmatpush1.bf16.msra.mxu1 %v4270_v35  ;;  %v2553_v35 = vld [vmem:[%s6575_s18 + $0x15e8] sm:$0xff] }
 0x2d7   : > { %4655 = vmatpush1.bf16.msra.mxu0 %v4654_v36  ;;  %4273 = vmatprep.subr.bf16.mxu1 %v4272_v37  ;;  %v2555_v36 = vld [vmem:[%s6575_s18 + $0x15f8] sm:$0xff]  ;;  %v4290_v37 = vpack.c.bf16 %v2166_v27, %v2164_v25  ;;  %v4690_v27 = vpack.c.bf16 %v2566_v21, %v2564_v19  ;;  %v2205_v21 = vld [vmem:[%s6575_s18 + $0xb08] sm:$0xff] }
 0x2d8   : > { %4657 = vmatprep.subr.bf16.mxu0 %v4656_v7  ;;  %v2170_v7 = vld [vmem:[%s6575_s18 + $0x9f0] sm:$0xff]  ;;  %v4676_v46 = vpack.c.bf16 %v2555_v36, %v2553_v35  ;;  %v2189_v36 = vld [vmem:[%s6575_s18 + $0xa88] sm:$0xff] }
 0x2d9   : > { %v4294_v55 = vpack.c.bf16 %v2170_v7, %v2168_v41  ;;  %v2570_v35 = vld [vmem:[%s6575_s18 + $0x1670] sm:$0xff] }
 0x2da   : > { %4275 = vmatpush1.bf16.msra.mxu1 %v4274_v12  ;;  %v2689_v12 = vcombine.high %v7180_v26, %v7180_v26  ;;  %v4694_v7 = vpack.c.bf16 %v2570_v35, %v2568_v33  ;;  %v2209_v35 = vld [vmem:[%s6575_s18 + $0xb28] sm:$0xff] }
 0x2db   : > { %4659 = vmatpush1.bf16.msra.mxu0 %v4658_v52  ;;  %4277 = vmatprep.subr.bf16.mxu1 %v4276_v53  ;;  %v2557_v52 = vld [vmem:[%s6575_s18 + $0x1608] sm:$0xff]  ;;  %v2559_v53 = vld [vmem:[%s6575_s18 + $0x1618] sm:$0xff] }
 0x2dc   : > { %4661 = vmatprep.subr.bf16.mxu0 %v4660_v57  ;;  %v4296_v57 = vpack.c.bf16 %v2175_v51, %v2173_v49  ;;  %v4680_v26 = vpack.c.bf16 %v2559_v53, %v2557_v52  ;;  %v7340_v29 = vrot.slane %v2689_v12, %v6673_v28  ;;  %v2183_v28 = vld [vmem:[%s6575_s18 + $0xa58] sm:$0xff]  ;;  %v2572_v49 = vld [vmem:[%s6575_s18 + $0x1680] sm:$0xff]  ;;  %v2574_v12 = vld [vmem:[%s6575_s18 + $0x1690] sm:$0xff] }
 0x2dd   : > { %v2193_v52 = vld [vmem:[%s6575_s18 + $0xaa8] sm:$0xff]  ;;  %v2195_v53 = vld [vmem:[%s6575_s18 + $0xab8] sm:$0xff] }
 0x2de   : > { %4279 = vmatpush1.bf16.msra.mxu1 %v4278_v8  ;;  %v2179_v8 = vld [vmem:[%s6575_s18 + $0xa38] sm:$0xff]  ;;  %v4316_v58 = vpack.c.bf16 %v2195_v53, %v2193_v52  ;;  %v2597_v53 = vld [vmem:[%s6575_s18 + $0x1748] sm:$0xff] }
 0x2df   : > { %4663 = vmatpush1.bf16.msra.mxu0 %v4662_v63  ;;  %4281 = vmatprep.subr.bf16.mxu1 %v4280_v0  ;;  %v2561_v63 = vld [vmem:[%s6575_s18 + $0x1628] sm:$0xff]  ;;  %v2563_v0 = vld [vmem:[%s6575_s18 + $0x1638] sm:$0xff] }
 0x2e0   : > { %4665 = vmatprep.subr.bf16.mxu0 %v4664_v24  ;;  %v4300_v24 = vpack.c.bf16 %v2179_v8, %v2177_v62  ;;  %v4684_v9 = vpack.c.bf16 %v2563_v0, %v2561_v63  ;;  %v2578_v62 = vld [vmem:[%s6575_s18 + $0x16b0] sm:$0xff]  ;;  %v2197_v8 = vld [vmem:[%s6575_s18 + $0xac8] sm:$0xff]  ;;  %v2199_v63 = vld [vmem:[%s6575_s18 + $0xad8] sm:$0xff] }
 0x2e1   : > { %v2581_v0 = vld [vmem:[%s6575_s18 + $0x16c8] sm:$0xff]  ;;  %v4320_v42 = vpack.c.bf16 %v2199_v63, %v2197_v8  ;;  %v2215_v52 = vld [vmem:[%s6575_s18 + $0xb58] sm:$0xff] }
 0x2e2   : > { %4283 = vmatpush1.bf16.msra.mxu1 %v4282_v10  ;;  %v2181_v10 = vld [vmem:[%s6575_s18 + $0xa48] sm:$0xff]  ;;  %v2219_v8 = vld [vmem:[%s6575_s18 + $0xb78] sm:$0xff] }
 0x2e3   : > { %4667 = vmatpush1.bf16.msra.mxu0 %v4666_v11  ;;  %4285 = vmatprep.subr.bf16.mxu1 %v4284_v13  ;;  %v2705_v11 = vcombine.high %v7340_v29, %v7340_v29  ;;  %v2565_v13 = vld [vmem:[%s6575_s18 + $0x1648] sm:$0xff]  ;;  %v4304_v47 = vpack.c.bf16 %v2183_v28, %v2181_v10  ;;  %v2582_v10 = vld [vmem:[%s6575_s18 + $0x16d0] sm:$0xff] }
 0x2e4   : > { %4669 = vmatprep.subr.bf16.mxu0 %v4668_v18  ;;  %v4686_v18 = vpack.c.bf16 %v2562_v45, %v2560_v6  ;;  %v4688_v20 = vpack.c.bf16 %v2567_v15, %v2565_v13  ;;  %v2198_v6 = vld [vmem:[%s6575_s18 + $0xad0] sm:$0xff]  ;;  %v2201_v28 = vld [vmem:[%s6575_s18 + $0xae8] sm:$0xff]  ;;  %v2587_v15 = vld [vmem:[%s6575_s18 + $0x16f8] sm:$0xff] }
 0x2e5   : > { %v2585_v13 = vld [vmem:[%s6575_s18 + $0x16e8] sm:$0xff] }
 0x2e6   : > { %4287 = vmatpush1.bf16.msra.mxu1 %v4286_v22  ;;  %v2185_v22 = vld [vmem:[%s6575_s18 + $0xa68] sm:$0xff]  ;;  %v4708_v19 = vpack.c.bf16 %v2587_v15, %v2585_v13  ;;  %v2607_v13 = vld [vmem:[%s6575_s18 + $0x1798] sm:$0xff] }
 0x2e7   : > { %4671 = vmatpush1.bf16.msra.mxu0 %v4670_v23  ;;  %4289 = vmatprep.subr.bf16.mxu1 %v4288_v50  ;;  %v2187_v23 = vld [vmem:[%s6575_s18 + $0xa78] sm:$0xff]  ;;  %v2601_v63 = vld [vmem:[%s6575_s18 + $0x1768] sm:$0xff] }
 0x2e8   : > { %4673 = vmatprep.subr.bf16.mxu0 %v4672_v31  ;;  %v2571_v50 = vld [vmem:[%s6575_s18 + $0x1678] sm:$0xff]  ;;  %v4308_v30 = vpack.c.bf16 %v2187_v23, %v2185_v22  ;;  %v2184_v31 = vld [vmem:[%s6575_s18 + $0xa60] sm:$0xff]  ;;  %v2589_v23 = vld [vmem:[%s6575_s18 + $0x1708] sm:$0xff] }
 0x2e9   : > { %v4310_v41 = vpack.c.bf16 %v2186_v32, %v2184_v31  ;;  %v2207_v22 = vld [vmem:[%s6575_s18 + $0xb18] sm:$0xff]  ;;  %v2206_v31 = vld [vmem:[%s6575_s18 + $0xb10] sm:$0xff]  ;;  %v2588_v32 = vld [vmem:[%s6575_s18 + $0x1700] sm:$0xff] }
 0x2ea   : > { %4291 = vmatpush1.bf16.msra.mxu1 %v4290_v37  ;;  %v2191_v37 = vld [vmem:[%s6575_s18 + $0xa98] sm:$0xff] }
 0x2eb   : > { %4675 = vmatpush1.bf16.msra.mxu0 %v4674_v38  ;;  %4293 = vmatprep.subr.bf16.mxu1 %v4292_v40  ;;  %v2573_v38 = vld [vmem:[%s6575_s18 + $0x1688] sm:$0xff]  ;;  %v2575_v40 = vld [vmem:[%s6575_s18 + $0x1698] sm:$0xff]  ;;  %v4312_v44 = vpack.c.bf16 %v2191_v37, %v2189_v36 }
 0x2ec   : > { %4677 = vmatprep.subr.bf16.mxu0 %v4676_v46  ;;  %v2188_v46 = vld [vmem:[%s6575_s18 + $0xa80] sm:$0xff]  ;;  %v4696_v51 = vpack.c.bf16 %v2575_v40, %v2573_v38  ;;  %v2211_v36 = vld [vmem:[%s6575_s18 + $0xb38] sm:$0xff]  ;;  %v2593_v37 = vld [vmem:[%s6575_s18 + $0x1728] sm:$0xff] }
 0x2ed   : > { %v2595_v38 = vld [vmem:[%s6575_s18 + $0x1738] sm:$0xff] }
 0x2ee   : > { %4295 = vmatpush1.bf16.msra.mxu1 %v4294_v55  ;;  %v2579_v55 = vld [vmem:[%s6575_s18 + $0x16b8] sm:$0xff] }
 0x2ef   : > { %4679 = vmatpush1.bf16.msra.mxu0 %v4678_v56  ;;  %4297 = vmatprep.subr.bf16.mxu1 %v4296_v57  ;;  %v4314_v56 = vpack.c.bf16 %v2190_v48, %v2188_v46  ;;  %v4698_v57 = vpack.c.bf16 %v2574_v12, %v2572_v49  ;;  %v4700_v61 = vpack.c.bf16 %v2579_v55, %v2577_v54  ;;  %v2210_v46 = vld [vmem:[%s6575_s18 + $0xb30] sm:$0xff]  ;;  %v2592_v48 = vld [vmem:[%s6575_s18 + $0x1720] sm:$0xff]  ;;  %v2213_v12 = vld [vmem:[%s6575_s18 + $0xb48] sm:$0xff] }
 0x2f0   : > { %4681 = vmatprep.subr.bf16.mxu0 %v4680_v26  ;;  %v2576_v26 = vld [vmem:[%s6575_s18 + $0x16a0] sm:$0xff]  ;;  %v4716_v49 = vpack.c.bf16 %v2595_v38, %v2593_v37  ;;  %v2599_v54 = vld [vmem:[%s6575_s18 + $0x1758] sm:$0xff] }
 0x2f1   : > { %3140 = vmatmul.mubr.f32.vlgmr.msra.gmra.mrb[0].mxu1 %v7195_v39  ;;  %v2182_v39 = vld [vmem:[%s6575_s18 + $0xa50] sm:$0xff]  ;;  %v2615_v37 = vld [vmem:[%s6575_s18 + $0x17d8] sm:$0xff] }
 0x2f2   : > { %4299 = vmatpush1.bf16.msra.mxu1 %v4298_v2  ;;  %3566 = vmatmul.mubr.f32.vlgmr.msra.gmra.mrb[0].mxu0 %v7201_v43  ;;  %v2569_v43 = vld [vmem:[%s6575_s18 + $0x1668] sm:$0xff]  ;;  %v4306_v25 = vpack.c.bf16 %v2182_v39, %v2180_v3  ;;  %v2583_v2 = vld [vmem:[%s6575_s18 + $0x16d8] sm:$0xff]  ;;  %v2202_v3 = vld [vmem:[%s6575_s18 + $0xaf0] sm:$0xff] }
 0x2f3   : > { %4683 = vmatpush1.bf16.msra.mxu0 %v4682_v4  ;;  %4301 = vmatprep.subr.bf16.mxu1 %v4300_v24  ;;  %v4692_v34 = vpack.c.bf16 %v2571_v50, %v2569_v43  ;;  %v4318_v4 = vpack.c.bf16 %v2194_v60, %v2192_v59  ;;  %v4702_v24 = vpack.c.bf16 %v2578_v62, %v2576_v26  ;;  %v2584_v39 = vld [vmem:[%s6575_s18 + $0x16e0] sm:$0xff]  ;;  %v2591_v43 = vld [vmem:[%s6575_s18 + $0x1718] sm:$0xff]  ;;  %v2214_v59 = vld [vmem:[%s6575_s18 + $0xb50] sm:$0xff] }
 0x2f4   : > { %4685 = vmatprep.subr.bf16.mxu0 %v4684_v9  ;;  %3210 = vmatprep.mubr.f32.mxu1 %v2705_v11  ;;  %v2580_v9 = vld [vmem:[%s6575_s18 + $0x16c0] sm:$0xff]  ;;  %v4704_v45 = vpack.c.bf16 %v2583_v2, %v2581_v0  ;;  %v2203_v11 = vld [vmem:[%s6575_s18 + $0xaf8] sm:$0xff]  ;;  %v4712_v33 = vpack.c.bf16 %v2591_v43, %v2589_v23  ;;  %v4720_v26 = vpack.c.bf16 %v2599_v54, %v2597_v53  ;;  %v2217_v62 = vld [vmem:[%s6575_s18 + $0xb68] sm:$0xff] }
 0x2f5   : > { %3636 = vmatprep.mubr.f32.mxu0 %v2756_v16  ;;  %v4322_v16 = vpack.c.bf16 %v2198_v6, %v2196_v5  ;;  %v2596_v60 = vld [vmem:[%s6575_s18 + $0x1740] sm:$0xff]  ;;  %v2603_v0 = vld [vmem:[%s6575_s18 + $0x1778] sm:$0xff]  ;;  %v2218_v5 = vld [vmem:[%s6575_s18 + $0xb70] sm:$0xff] }
 0x2f6   : > { %4303 = vmatpush1.bf16.msra.mxu1 %v4302_v17  ;;  %v4706_v17 = vpack.c.bf16 %v2582_v10, %v2580_v9  ;;  %v2600_v6 = vld [vmem:[%s6575_s18 + $0x1760] sm:$0xff]  ;;  %v4724_v9 = vpack.c.bf16 %v2603_v0, %v2601_v63  ;;  %v2221_v10 = vld [vmem:[%s6575_s18 + $0xb88] sm:$0xff]  ;;  %v2611_v23 = vld [vmem:[%s6575_s18 + $0x17b8] sm:$0xff] }
 0x2f7   : > { %4687 = vmatpush1.bf16.msra.mxu0 %v4686_v18  ;;  %4305 = vmatprep.subr.bf16.mxu1 %v4304_v47  ;;  %v4324_v18 = vpack.c.bf16 %v2203_v11, %v2201_v28  ;;  %v2200_v47 = vld [vmem:[%s6575_s18 + $0xae0] sm:$0xff]  ;;  %v2223_v28 = vld [vmem:[%s6575_s18 + $0xb98] sm:$0xff]  ;;  %v2605_v11 = vld [vmem:[%s6575_s18 + $0x1788] sm:$0xff] }
 0x2f8   : > { %4689 = vmatprep.subr.bf16.mxu0 %v4688_v20  ;;  %v2586_v20 = vld [vmem:[%s6575_s18 + $0x16f0] sm:$0xff]  ;;  %v4326_v50 = vpack.c.bf16 %v2202_v3, %v2200_v47  ;;  %v2604_v3 = vld [vmem:[%s6575_s18 + $0x1780] sm:$0xff]  ;;  %v2619_v53 = vld [vmem:[%s6575_s18 + $0x17f8] sm:$0xff] }
 0x2f9   : > { %v2222_v47 = vld [vmem:[%s6575_s18 + $0xb90] sm:$0xff]  ;;  %v2623_v63 = vld [vmem:[%s6575_s18 + $0x1818] sm:$0xff] }
 0x2fa   : > { %4307 = vmatpush1.bf16.msra.mxu1 %v4306_v25  ;;  %v4710_v25 = vpack.c.bf16 %v2586_v20, %v2584_v39  ;;  %v4728_v39 = vpack.c.bf16 %v2607_v13, %v2605_v11  ;;  %v2225_v20 = vld [vmem:[%s6575_s18 + $0xba8] sm:$0xff]  ;;  %v3736_v11 = vld [vmem:[%s6573_s20 + $0x98] sm:$0xff] }
 0x2fb   : > { %4691 = vmatpush1.bf16.msra.mxu0 %v4690_v27  ;;  %4309 = vmatprep.subr.bf16.mxu1 %v4308_v30  ;;  %v4328_v27 = vpack.c.bf16 %v2207_v22, %v2205_v21  ;;  %v2204_v30 = vld [vmem:[%s6575_s18 + $0xb00] sm:$0xff]  ;;  %v2227_v21 = vld [vmem:[%s6575_s18 + $0xbb8] sm:$0xff]  ;;  %v2609_v22 = vld [vmem:[%s6575_s18 + $0x17a8] sm:$0xff] }
 0x2fc   : > { %4693 = vmatprep.subr.bf16.mxu0 %v4692_v34  ;;  %v2590_v34 = vld [vmem:[%s6575_s18 + $0x1710] sm:$0xff]  ;;  %v4330_v40 = vpack.c.bf16 %v2206_v31, %v2204_v30  ;;  %v2608_v31 = vld [vmem:[%s6575_s18 + $0x17a0] sm:$0xff] }
 0x2fd   : > { %v2226_v30 = vld [vmem:[%s6575_s18 + $0xbb0] sm:$0xff] }
 0x2fe   : > { %4311 = vmatpush1.bf16.msra.mxu1 %v4310_v41  ;;  %v4714_v41 = vpack.c.bf16 %v2590_v34, %v2588_v32  ;;  %v4732_v32 = vpack.c.bf16 %v2611_v23, %v2609_v22  ;;  %v2229_v34 = vld [vmem:[%s6575_s18 + $0xbc8] sm:$0xff]  ;;  %v2631_v22 = vld [vmem:[%s6575_s18 + $0x1858] sm:$0xff] }
 0x2ff   : > { %4695 = vmatpush1.bf16.msra.mxu0 %v4694_v7  ;;  %4313 = vmatprep.subr.bf16.mxu1 %v4312_v44  ;;  %v4332_v7 = vpack.c.bf16 %v2211_v36, %v2209_v35  ;;  %v2208_v44 = vld [vmem:[%s6575_s18 + $0xb20] sm:$0xff]  ;;  %v2231_v35 = vld [vmem:[%s6575_s18 + $0xbd8] sm:$0xff]  ;;  %v2613_v36 = vld [vmem:[%s6575_s18 + $0x17c8] sm:$0xff] }
 0x300   : > { %4697 = vmatprep.subr.bf16.mxu0 %v4696_v51  ;;  %v2594_v51 = vld [vmem:[%s6575_s18 + $0x1730] sm:$0xff]  ;;  %v4334_v55 = vpack.c.bf16 %v2210_v46, %v2208_v44  ;;  %v2612_v46 = vld [vmem:[%s6575_s18 + $0x17c0] sm:$0xff] }
 0x301   : > { %v2230_v44 = vld [vmem:[%s6575_s18 + $0xbd0] sm:$0xff] }
 0x302   : > { %4315 = vmatpush1.bf16.msra.mxu1 %v4314_v56  ;;  %v4718_v56 = vpack.c.bf16 %v2594_v51, %v2592_v48  ;;  %v4736_v48 = vpack.c.bf16 %v2615_v37, %v2613_v36  ;;  %v2233_v51 = vld [vmem:[%s6575_s18 + $0xbe8] sm:$0xff] }
 0x303   : > { %4699 = vmatpush1.bf16.msra.mxu0 %v4698_v57  ;;  %4317 = vmatprep.subr.bf16.mxu1 %v4316_v58  ;;  %v4336_v57 = vpack.c.bf16 %v2215_v52, %v2213_v12  ;;  %v2212_v58 = vld [vmem:[%s6575_s18 + $0xb40] sm:$0xff]  ;;  %v2235_v12 = vld [vmem:[%s6575_s18 + $0xbf8] sm:$0xff]  ;;  %v2617_v52 = vld [vmem:[%s6575_s18 + $0x17e8] sm:$0xff] }
 0x304   : > { %4701 = vmatprep.subr.bf16.mxu0 %v4700_v61  ;;  %v2598_v61 = vld [vmem:[%s6575_s18 + $0x1750] sm:$0xff]  ;;  %v4338_v2 = vpack.c.bf16 %v2214_v59, %v2212_v58  ;;  %v2616_v59 = vld [vmem:[%s6575_s18 + $0x17e0] sm:$0xff]  ;;  %v3932_v37 = vld.sshfl [vmem:[%s7566_s0 + $0x30] sm:$0x3 pattern:$0x76325410] }
 0x305   : > { %v2234_v58 = vld [vmem:[%s6575_s18 + $0xbf0] sm:$0xff] }
 0x306   : > { %4319 = vmatpush1.bf16.msra.mxu1 %v4318_v4  ;;  %v4722_v4 = vpack.c.bf16 %v2598_v61, %v2596_v60  ;;  %v4740_v60 = vpack.c.bf16 %v2619_v53, %v2617_v52  ;;  %v3733_v61 = vld [vmem:[%s6573_s20 + $0x80] sm:$0xff]  ;;  %v3742_v52 = vld [vmem:[%s6573_s20 + $0xc8] sm:$0xff] }
 0x307   : > { %4703 = vmatpush1.bf16.msra.mxu0 %v4702_v24  ;;  %4321 = vmatprep.subr.bf16.mxu1 %v4320_v42  ;;  %v4340_v24 = vpack.c.bf16 %v2219_v8, %v2217_v62  ;;  %v2216_v42 = vld [vmem:[%s6575_s18 + $0xb60] sm:$0xff]  ;;  %v2621_v8 = vld [vmem:[%s6575_s18 + $0x1808] sm:$0xff] }
 0x308   : > { %4705 = vmatprep.subr.bf16.mxu0 %v4704_v45  ;;  %v2602_v45 = vld [vmem:[%s6575_s18 + $0x1770] sm:$0xff]  ;;  %v4342_v15 = vpack.c.bf16 %v2218_v5, %v2216_v42  ;;  %v3734_v62 = vld [vmem:[%s6573_s20 + $0x88] sm:$0xff]  ;;  %v4744_v5 = vpack.c.bf16 %v2623_v63, %v2621_v8  ;;  %v3725_v53 = vld [vmem:[%s6573_s20 + $0x40] sm:$0xff] }
 0x309   : > { %v3718_v42 = vld [vmem:[%s6573_s20 + $0x8] sm:$0xff] }
 0x30a   : > { %4323 = vmatpush1.bf16.msra.mxu1 %v4322_v16  ;;  %v4726_v16 = vpack.c.bf16 %v2602_v45, %v2600_v6  ;;  %v2620_v6 = vld [vmem:[%s6575_s18 + $0x1800] sm:$0xff]  ;;  %v2625_v45 = vld [vmem:[%s6575_s18 + $0x1828] sm:$0xff] }
 0x30b   : > { %4707 = vmatpush1.bf16.msra.mxu0 %v4706_v17  ;;  %4325 = vmatprep.subr.bf16.mxu1 %v4324_v18  ;;  %v4344_v17 = vpack.c.bf16 %v2223_v28, %v2221_v10  ;;  %v2220_v18 = vld [vmem:[%s6575_s18 + $0xb80] sm:$0xff]  ;;  %v2627_v10 = vld [vmem:[%s6575_s18 + $0x1838] sm:$0xff]  ;;  %v3735_v28 = vld [vmem:[%s6573_s20 + $0x90] sm:$0xff] }
 0x30c   : > { %4709 = vmatprep.subr.bf16.mxu0 %v4708_v19  ;;  %v2606_v19 = vld [vmem:[%s6575_s18 + $0x1790] sm:$0xff]  ;;  %v4346_v43 = vpack.c.bf16 %v2222_v47, %v2220_v18  ;;  %v4748_v47 = vpack.c.bf16 %v2627_v10, %v2625_v45 }
 0x30d   : > { %v3720_v18 = vld [vmem:[%s6573_s20 + $0x18] sm:$0xff] }
 0x30e   : > { %4327 = vmatpush1.bf16.msra.mxu1 %v4326_v50  ;;  %v4730_v50 = vpack.c.bf16 %v2606_v19, %v2604_v3  ;;  %v2626_v3 = vld [vmem:[%s6575_s18 + $0x1830] sm:$0xff]  ;;  %v3737_v19 = vld [vmem:[%s6573_s20 + $0xa0] sm:$0xff] }
 0x30f   : > { %4711 = vmatpush1.bf16.msra.mxu0 %v4710_v25  ;;  %4329 = vmatprep.subr.bf16.mxu1 %v4328_v27  ;;  %v4348_v25 = vpack.c.bf16 %v2227_v21, %v2225_v20  ;;  %v2224_v27 = vld [vmem:[%s6575_s18 + $0xba0] sm:$0xff]  ;;  %v2629_v21 = vld [vmem:[%s6575_s18 + $0x1848] sm:$0xff] }
 0x310   : > { %4713 = vmatprep.subr.bf16.mxu0 %v4712_v33  ;;  %v2610_v33 = vld [vmem:[%s6575_s18 + $0x17b0] sm:$0xff]  ;;  %v4350_v38 = vpack.c.bf16 %v2226_v30, %v2224_v27  ;;  %v3738_v20 = vld [vmem:[%s6573_s20 + $0xa8] sm:$0xff]  ;;  %v4752_v27 = vpack.c.bf16 %v2631_v22, %v2629_v21 }
 0x311   : > { %v2628_v30 = vld [vmem:[%s6575_s18 + $0x1840] sm:$0xff] }
 0x312   : > { %4331 = vmatpush1.bf16.msra.mxu1 %v4330_v40  ;;  %v4734_v40 = vpack.c.bf16 %v2610_v33, %v2608_v31  ;;  %v2630_v31 = vld [vmem:[%s6575_s18 + $0x1850] sm:$0xff] }
 0x313   : > { %4715 = vmatpush1.bf16.msra.mxu0 %v4714_v41  ;;  %4333 = vmatprep.subr.bf16.mxu1 %v4332_v7  ;;  %v4352_v41 = vpack.c.bf16 %v2231_v35, %v2229_v34  ;;  %v2228_v7 = vld [vmem:[%s6575_s18 + $0xbc0] sm:$0xff]  ;;  %v2634_v35 = vld [vmem:[%s6575_s18 + $0x1870] sm:$0xff] }
 0x314   : > { %4717 = vmatprep.subr.bf16.mxu0 %v4716_v49  ;;  %v2614_v49 = vld [vmem:[%s6575_s18 + $0x17d0] sm:$0xff]  ;;  %v4354_v54 = vpack.c.bf16 %v2230_v44, %v2228_v7  ;;  %v2632_v34 = vld [vmem:[%s6575_s18 + $0x1860] sm:$0xff] }
 0x315   : > { %v4758_v36 = vpack.c.bf16 %v2634_v35, %v2632_v34  ;;  %v3739_v7 = vld [vmem:[%s6573_s20 + $0xb0] sm:$0xff]  ;;  %v3740_v44 = vld [vmem:[%s6573_s20 + $0xb8] sm:$0xff] }
 0x316   : > { %4335 = vmatpush1.bf16.msra.mxu1 %v4334_v55  ;;  %v4738_v55 = vpack.c.bf16 %v2614_v49, %v2612_v46  ;;  %v4772_v46 = vpack.c.bf16 %v3740_v44, %v3739_v7  ;;  %v3724_v49 = vld [vmem:[%s6573_s20 + $0x38] sm:$0xff] }
 0x317   : > { %4719 = vmatpush1.bf16.msra.mxu0 %v4718_v56  ;;  %4337 = vmatprep.subr.bf16.mxu1 %v4336_v57  ;;  %v4356_v56 = vpack.c.bf16 %v2235_v12, %v2233_v51  ;;  %v2232_v57 = vld [vmem:[%s6575_s18 + $0xbe0] sm:$0xff] }
 0x318   : > { %4721 = vmatprep.subr.bf16.mxu0 %v4720_v26  ;;  %v2618_v26 = vld [vmem:[%s6575_s18 + $0x17f0] sm:$0xff]  ;;  %v4358_v0 = vpack.c.bf16 %v2234_v58, %v2232_v57  ;;  %v3741_v51 = vld [vmem:[%s6573_s20 + $0xc0] sm:$0xff] }
 0x319   : > { %v3744_v57 = vld [vmem:[%s6573_s20 + $0xd8] sm:$0xff] }
 0x31a   : > { %4339 = vmatpush1.bf16.msra.mxu1 %v4338_v2  ;;  %v4742_v2 = vpack.c.bf16 %v2618_v26, %v2616_v59  ;;  %v3728_v26 = vld [vmem:[%s6573_s20 + $0x58] sm:$0xff] }
 0x31b   : > { %4723 = vmatpush1.bf16.msra.mxu0 %v4722_v4  ;;  %4341 = vmatprep.subr.bf16.mxu1 %v4340_v24  ;;  %v4760_v4 = vpack.c.bf16 %v3734_v62, %v3733_v61  ;;  %v3717_v24 = vld [vmem:[%s6573_s20] sm:$0xff]  ;;  %v3746_v62 = vld [vmem:[%s6573_s20 + $0xe8] sm:$0xff] }
 0x31c   : > { %4725 = vmatprep.subr.bf16.mxu0 %v4724_v9  ;;  %v2622_v9 = vld [vmem:[%s6575_s18 + $0x1810] sm:$0xff]  ;;  %v4762_v13 = vpack.c.bf16 %v3718_v42, %v3717_v24  ;;  %v3745_v61 = vld [vmem:[%s6573_s20 + $0xe0] sm:$0xff] }
 0x31d   : > { %v4784_v63 = vpack.c.bf16 %v3746_v62, %v3745_v61  ;;  %v3747_v24 = vld [vmem:[%s6573_s20 + $0xf0] sm:$0xff]  ;;  %v3748_v42 = vld [vmem:[%s6573_s20 + $0xf8] sm:$0xff] }
 0x31e   : > { %4343 = vmatpush1.bf16.msra.mxu1 %v4342_v15  ;;  %v4746_v15 = vpack.c.bf16 %v2622_v9, %v2620_v6  ;;  %v3731_v6 = vld [vmem:[%s6573_s20 + $0x70] sm:$0xff]  ;;  %v3732_v9 = vld [vmem:[%s6573_s20 + $0x78] sm:$0xff] }
 0x31f   : > { %4727 = vmatpush1.bf16.msra.mxu0 %v4726_v16  ;;  %4345 = vmatprep.subr.bf16.mxu1 %v4344_v17  ;;  %v2624_v16 = vld [vmem:[%s6575_s18 + $0x1820] sm:$0xff]  ;;  %v3719_v17 = vld [vmem:[%s6573_s20 + $0x10] sm:$0xff]  ;;  %v4790_v45 = vpack.c.bf16 %v3732_v9, %v3731_v6 }
 0x320   : > { %4729 = vmatprep.subr.bf16.mxu0 %v4728_v39  ;;  %v4764_v39 = vpack.c.bf16 %v3736_v11, %v3735_v28  ;;  %v4766_v23 = vpack.c.bf16 %v3720_v18, %v3719_v17  ;;  %v2640_v11 = vsub.s32 0, %v6662_v14 }
 0x322   : > { %4347 = vmatpush1.bf16.msra.mxu1 %v4346_v43  ;;  %v4750_v43 = vpack.c.bf16 %v2626_v3, %v2624_v16 }
 0x323   : > { %4731 = vmatpush1.bf16.msra.mxu0 %v4730_v50  ;;  %4349 = vmatprep.subr.bf16.mxu1 %v4348_v25  ;;  %v4918_v50 = vmov 0.0   ;;  %v4768_v25 = vpack.c.bf16 %v3738_v20, %v3737_v19 }
 0x324   : > { %4733 = vmatprep.subr.bf16.mxu0 %v4732_v32  ;;  %v2635_v32 = vld [vmem:[%s6575_s18 + $0x1878] sm:$0xff] }
 0x326   : > { %4351 = vmatpush1.bf16.msra.mxu1 %v4350_v38  ;;  %v3721_v38 = vld [vmem:[%s6573_s20 + $0x20] sm:$0xff] }
 0x327   : > { %4735 = vmatpush1.bf16.msra.mxu0 %v4734_v40  ;;  %4353 = vmatprep.subr.bf16.mxu1 %v4352_v41  ;;  %v3722_v40 = vld [vmem:[%s6573_s20 + $0x28] sm:$0xff] }
 0x328   : > { %4737 = vmatprep.subr.bf16.mxu0 %v4736_v48  ;;  %v4770_v41 = vpack.c.bf16 %v3722_v40, %v3721_v38  ;;  %v3723_v48 = vld [vmem:[%s6573_s20 + $0x30] sm:$0xff] }
 0x329   : > { %v4774_v12 = vpack.c.bf16 %v3724_v49, %v3723_v48 }
 0x32a   : > { %4355 = vmatpush1.bf16.msra.mxu1 %v4354_v54  ;;  %v3726_v54 = vld [vmem:[%s6573_s20 + $0x48] sm:$0xff] }
 0x32b   : > { %4739 = vmatpush1.bf16.msra.mxu0 %v4738_v55  ;;  %4357 = vmatprep.subr.bf16.mxu1 %v4356_v56  ;;  %v4776_v55 = vpack.c.bf16 %v3742_v52, %v3741_v51  ;;  %v3743_v56 = vld [vmem:[%s6573_s20 + $0xd0] sm:$0xff]  ;;  %v4778_v58 = vpack.c.bf16 %v3726_v54, %v3725_v53 }
 0x32c   : > { %4741 = vmatprep.subr.bf16.mxu0 %v4740_v60  ;;  %v4780_v59 = vpack.c.bf16 %v3744_v57, %v3743_v56  ;;  %v3727_v60 = vld [vmem:[%s6573_s20 + $0x50] sm:$0xff] }
 0x32d   : > { %v4782_v8 = vpack.c.bf16 %v3728_v26, %v3727_v60 }
 0x32e   : > { %4359 = vmatpush1.bf16.msra.mxu1 %v4358_v0  ;;  %v3729_v0 = vld [vmem:[%s6573_s20 + $0x60] sm:$0xff] }
 0x32f   : > { %4743 = vmatpush1.bf16.msra.mxu0 %v4742_v2  ;;  %4761 = vmatprep.subr.bf16.mxu1 %v4760_v4  ;;  %v3730_v2 = vld [vmem:[%s6573_s20 + $0x68] sm:$0xff] }
 0x330   : > { %4745 = vmatprep.subr.bf16.mxu0 %v4744_v5  ;;  %v4786_v4 = vpack.c.bf16 %v3730_v2, %v3729_v0  ;;  %v4788_v5 = vpack.c.bf16 %v3748_v42, %v3747_v24 }
 0x331   : > { %3211 = vmatmul.mubr.f32.vlgmr.msra.gmra.mrb[0].mxu1 %v7340_v29  ;;  %v2633_v29 = vld [vmem:[%s6575_s18 + $0x1868] sm:$0xff] }
 0x332   : > { %3637 = vmatmul.mubr.f32.vlgmr.msra.gmra.mrb[0].mxu0 %v7345_v1  ;;  %4763 = vmatpush3.bf16.msra.mxu1 %v4762_v13  ;;  %v4754_v1 = vpack.c.bf16 %v2630_v31, %v2628_v30  ;;  %v4756_v33 = vpack.c.bf16 %v2635_v32, %v2633_v29  ;;  %v2636_v13 = vld [vmem:[%s1831_s14] sm:$0x3]  ;;  %v4919_v29 = vmov (!%p3934_p11), 6  }
 0x333   : > { %4747 = vmatpush1.bf16.msra.mxu0 %v4746_v15  ;;  %3707 = vmatprep.mubr.f32.mxu0 %v4918_v50  ;;  %v2644_v15 = vsub.s32 1, %v6662_v14  ;;  %v2641_v16 = vrot.slane %v2636_v13, %v2640_v11  ;;  %v3935_v30 = vld [vmem:[%s7570_s4] ss:$0 sm:$0xff] (!%p3934_p11) }
 0x334   : > { %4749 = vmatprep.subr.bf16.mxu0 %v4748_v47  ;;  %4765 = vmatprep.subr.bf16.mxu1 %v4764_v39 }
 0x335   : > { %v2645_v17 = vrot.slane %v2636_v13, %v2644_v15  ;;  %4861 = vset.pattern.permute.xlu0 (!%p3934_p11), %v4919_v29 }
 0x336   : > { %4767 = vmatpush3.bf16.msra.mxu1 %v4766_v23 }
 0x337   : > { %4751 = vmatpush1.bf16.msra.mxu0 %v4750_v43  ;;  %4769 = vmatprep.subr.bf16.mxu1 %v4768_v25  ;;  %v3716_v43 = vld [vmem:[#allocation2] sm:$0x3] }
 0x338   : > { %4753 = vmatprep.subr.bf16.mxu0 %v4752_v27 }
 0x33a   : > { %4771 = vmatpush3.bf16.msra.mxu1 %v4770_v41 }
 0x33b   : > { %4755 = vmatpush1.bf16.msra.mxu0 %v4754_v1  ;;  %4773 = vmatprep.subr.bf16.mxu1 %v4772_v46 }
 0x33c   : > { %4757 = vmatprep.subr.bf16.mxu0 %v4756_v33 }
 0x33e   : > { %4775 = vmatpush3.bf16.msra.mxu1 %v4774_v12 }
 0x33f   : > { %4759 = vmatpush1.bf16.msra.mxu0 %v4758_v36  ;;  %4777 = vmatprep.subr.bf16.mxu1 %v4776_v55 }
 0x342   : > { %3933 = vmatmul.mubr.msk.f32.vlgmr.msra.gmra.mrb[0].mxu0 %vm2788_vm1, %v3932_v37  ;;  %4779 = vmatpush3.bf16.msra.mxu1 %v4778_v58 }
 0x343   : > { %4781 = vmatprep.subr.bf16.mxu1 %v4780_v59 }
 0x346   : > { %4783 = vmatpush3.bf16.msra.mxu1 %v4782_v8 }
 0x347   : > { %4785 = vmatprep.subr.bf16.mxu1 %v4784_v63 }
 0x34a   : > { %4787 = vmatpush3.bf16.msra.mxu1 %v4786_v4 }
 0x34b   : > { %4789 = vmatprep.subr.bf16.mxu1 %v4788_v5 }
 0x34e   : > { %4791 = vmatpush3.bf16.msra.mxu1 %v4790_v45 }
 0x404   : > { %v3212_v10 = vpop.f32.mrb[0].mxu1 }
 0x405   : > { %v3214_v28 = vpop.f32.mrb[1].mxu1  ;;  %v4792_v18 = vadd.f32 %v3212_v10, %v2641_v16 }
 0x406   : > { %v4794_v47 = vadd.f32 %v3214_v28, %v2645_v17 }
 0x415   : > { %v3709_v3 = vpop.f32.mrb[0].mxu0 }
 0x416   : > { %v4793_v39 = vadd.f32 %v4792_v18, %v3709_v3  ;;  %v3711_v19 = vpop.f32.mrb[1].mxu0 }
 0x417   : > { %v4795_v20 = vadd.f32 %v4794_v47, %v3711_v19 }
 0x418   : > { %v3714_v22 = vmax.f32 %v4793_v39, 0.0 }
 0x419   : > { %v3715_v21 = vmax.f32 %v4795_v20, 0.0 }
 0x41b   : > { %3813 = vmatprep.mubr.f32.mxu1 %v3715_v21 }
 0x41c   : > { %3814 = vmatmul.mubr.f32.vlgmr.msra.gmra.mrb[2].mxu1 %v3714_v22 }
 0x4ef   : > { %v3973_v23 = vpop.f32.mrb[2].mxu1  ;;  %3825 = sbr.rel (%p3934_p11) target bundleno = 1435 (0x59b), region = 71 }
 0x4f0   : > { %v3974_v50 = vpop.f32.mrb[3].mxu1 }
 0x4f1   : > { %v3975_v25 = vadd.f32 %v3974_v50, %v3973_v23 }
 0x4f3   : > { %v3819_v27 = vadd.f32 %v3975_v25, %v3716_v43 }
 0x4f5   : > { %3821 = vst.msk [vmem:[#allocation2] sm:$0x3] %vm3820_vm2, %v3819_v27 }
 0x4fc   : > { %v3826_v14 = vld [vmem:[#allocation2] sm:$0x3] }
 0x4fd   : > { %v3834_v31 = vadd.f32 %v3935_v30, %v3826_v14 }
 0x4ff   : > { %v3842_v32 = vsel %vm3841_vm3, %v3834_v31, 0.0 }
 0x500   : > { %3843 = vadd.xlane.f32.xlu0 %v3842_v32 }
 0x516   : > { %3837 = vperm.xlu0 %4861, %v3834_v31  }
 0x58d   : > { %v3844_v1 = vpop.xlane.xlu0 %3843 }
 0x58e   : > { %v3846_v34 = vmul.f32 0.16666667, %v3844_v1 }
 0x595   : > { %v3838_v33 = vpop.permute.xlu0 %3837 }
 0x596   : > { %v3840_v35 = vadd.f32 %v3838_v33, %v3834_v31 }
 0x598   : > { %v3847_v36 = vsub.f32 %v3840_v35, %v3846_v34 }
 0x59a   : > { %3848 = vst.msk [vmem:[#allocation4] sm:$0x3] %vm3841_vm3, %v3847_v36 }
 0x59b PF: > { %p4824_p12 = scmp.eq.s32.totalorder %s4967_s21, 3  ;;  %s4920_s17 = smov [#allocation4]  }
 0x59c   : > { %s3856_s20 = sshll.u32 %s4920_s17, 4  ;;  %s3857_s20 = int_to_ptr.vmem [resolvable:$true] %s3856_s20 }
 0x59d   : > { %s4862_s18 = scalar_lea.vmem %s3857_s20, 32  ;;  %p4869_p2 = scmp.lt.s32.totalorder %s3857_s20, %s3857_s20 }
 0x59e   : > { %p4863_p13 = scmp.ne.s32.totalorder %s3857_s20, %s4862_s18  ;;  %p4870_p3 = scmp.lt.s32.totalorder %s4862_s18, %s4862_s18 }
 0x5a0   : > { %p4864_p0 = pnand %p4863_p13, %p4824_p12  ;;  %p4871_p4 = por %p4870_p3, %p4869_p2 }
 0x5a2   : > { %p4865_p1 = pneg %p4864_p0 }
 0x5a4   : > { %p4872_p5 = pnand %p4871_p4, %p4865_p1 }
 0x5a6   : > { %4875 = shalt.err (!%p4872_p5)
}
 0x5a7   : > { %s4876_s26 = scalar_lea.hbm %s7571_s5, 32 }
 0x5a8   : > { %p4877_p6 = scmp.ne.s32.totalorder %s7571_s5, %s4876_s26  ;;  %p4882_p9 = scmp.lt.u32.totalorder %s4876_s26, %s7571_s5 }
 0x5aa   : > { %p4878_p7 = pnand %p4877_p6, %p4824_p12 }
 0x5ac   : > { %p4879_p8 = pneg %p4878_p7 }
 0x5ae   : > { %p4884_p10 = pnand %p4882_p9, %p4879_p8 }
 0x5b0   : > { %4887 = shalt.err (!%p4884_p10)
}
 0x5b1   : > { %4821 = dma.vmem_to_hbm [thread:$0]  (%p4824_p12), %s3857_s20, 32, %s7571_s5, [#allocation5]  }
 0x5b2   : > { %4901 = dma.done.wait (%p4824_p12), [#allocation5], 32  }
 0x5b3   : > { %4903 = vsyncadd (%p4824_p12), [#allocation5], 4294967264 }
 0x5b4 PF: > { %p13_p11 = scmp.ge.s32.totalorder %s4970_s22, 6   ;;  %s7572_s18 = smov %s4910_s19 }
 0x5b5   : > { %s7573_s19 = smov %s4979_s25  ;;  %s7574_s20 = smov %s4970_s22 }
 0x5b6   :  { %15 = sbr.rel (!%p13_p11) target bundleno = 2 (0x2), region = 109 }
 0x5bd   :  { %3869 = vsyncpa [#allocation5], 1 }
 0x5be   :  { %3871 = vsyncpa [#allocation5 + $0x1], 1 }

</bundles_post_ra>
